<compile_context>
chip_gen: v7x
topology: tpu7x:2x2x1
jax: 0.10.0
libtpu: 0.0.40
codegen_flags: <defaults>
</compile_context>

<pallas_src>
import functools

import jax
import jax.numpy as jnp
from jax.experimental import pallas as pl
from jax.experimental.pallas import tpu as pltpu

INPUT_SIZE = 64
HIDDEN = 128
NUM_LAYERS = 5
NUM_CLASSES = 40
SUBLANE = 8  # f32 sublane height


# ----------------------------- Pallas kernel ------------------------------

def fused_lstm_fc_kernel(x_ref, wih0_ref, wih_rest_ref, whh_ref, b_ref,
                         wfc_ref, bfc_ref, out_ref, seq_ref, xproj_ref,
                         *, seq_len, batch):
    """Fused 5-layer LSTM + final Linear.

    x_ref:        (T*Bp, INPUT_SIZE)  time-major flattened input, batch padded
    wih0_ref:     (INPUT_SIZE, 4H)    layer-0 W_ih^T
    wih_rest_ref: (L-1, H, 4H)        layers 1..L-1 W_ih^T
    whh_ref:      (L, H, 4H)          W_hh^T, all layers
    b_ref:        (L, 1, 4H)          b_ih + b_hh, all layers
    wfc_ref:      (H, C)              fc weight^T
    bfc_ref:      (1, C)              fc bias
    out_ref:      (Bp, C)             logits for the padded batch
    seq_ref:      (T*Bp, H)  scratch  inter-layer hidden-state sequence
    xproj_ref:    (T*Bp, 4H) scratch  hoisted input projection
    """
    T, Bp = seq_len, batch
    L, H, _ = whh_ref.shape

    cur = x_ref[...]                              # (T*Bp, D_in) for layer 0
    h_last = None

    for l in range(L):                            # static -> fully unrolled
        wih = wih0_ref[...] if l == 0 else wih_rest_ref[l - 1]
        whh = whh_ref[l]                          # (H, 4H)
        bias = b_ref[l]                           # (1, 4H)

        # Hoisted input projection: one MXU matmul over all T timesteps,
        # bias folded in here; the serial loop below only does h @ whh.
        xproj_ref[...] = (
            jnp.dot(cur, wih, preferred_element_type=jnp.float32) + bias)

        h = jnp.zeros((Bp, H), jnp.float32)
        c = jnp.zeros((Bp, H), jnp.float32)
        is_last = (l == L - 1)

        for t in range(T):                        # static -> fully unrolled
            gates = (xproj_ref[pl.ds(t * Bp, Bp), :]
                     + jnp.dot(h, whh, preferred_element_type=jnp.float32))
            i_g = jax.nn.sigmoid(gates[:, 0 * H:1 * H])
            f_g = jax.nn.sigmoid(gates[:, 1 * H:2 * H])
            g_g = jnp.tanh(gates[:, 2 * H:3 * H])
            o_g = jax.nn.sigmoid(gates[:, 3 * H:4 * H])
            c = f_g * c + i_g * g_g
            h = o_g * jnp.tanh(c)
            if not is_last:
                seq_ref[pl.ds(t * Bp, Bp), :] = h  # direct store, no carry

        if is_last:
            h_last = h                            # only final h is needed
        else:
            cur = seq_ref[...]                    # next layer's input seq

    # Final linear layer on the last timestep's hidden state.
    out_ref[...] = (jnp.dot(h_last, wfc_ref[...],
                            preferred_element_type=jnp.float32)
                    + bfc_ref[...])


# ------------------------------- wrapper -----------------------------------

_VMEM_SPEC = pl.BlockSpec(memory_space=pltpu.MemorySpace.VMEM)


def rnn_classifier_forward(x, lstm_params, fc_params):
    """Equivalent of RNN_Classifier('LSTM').forward(x).  x: (B, T, 64)."""
    B, T, D = x.shape
    Bp = ((B + SUBLANE - 1) // SUBLANE) * SUBLANE     # pad batch to sublane

    # Pad batch, go time-major, flatten to (T*Bp, D) rows (glue, trace time).
    x_p = jnp.pad(x, ((0, Bp - B), (0, 0), (0, 0)))
    x_tm = jnp.transpose(x_p, (1, 0, 2)).reshape(T * Bp, D)

    # Stack per-layer weights (already transposed / bias-summed).
    wih0_t = lstm_params[0][0]                               # (64, 4H)
    wih_rest_t = jnp.stack([p[0] for p in lstm_params[1:]])  # (L-1, H, 4H)
    whh_all_t = jnp.stack([p[1] for p in lstm_params])       # (L, H, 4H)
    b_all = jnp.stack([p[2] for p in lstm_params])           # (L, 1, 4H)
    wfc_t, bfc = fc_params                                   # (H, C), (1, C)
    C = wfc_t.shape[1]

    out_p = pl.pallas_call(
        functools.partial(fused_lstm_fc_kernel, seq_len=T, batch=Bp),
        out_shape=jax.ShapeDtypeStruct((Bp, C), jnp.float32),
        in_specs=[_VMEM_SPEC] * 7,
        out_specs=_VMEM_SPEC,
        scratch_shapes=[
            pltpu.VMEM((T * Bp, HIDDEN), jnp.float32),       # seq buffer
            pltpu.VMEM((T * Bp, 4 * HIDDEN), jnp.float32),   # x-projection
        ],
    )(x_tm, wih0_t, wih_rest_t, whh_all_t, b_all, wfc_t, bfc)

    return out_p[:B]                                          # drop padding


# ------------------------------- params ------------------------------------

def init_params(key):
    """Deterministic synthetic params, PyTorch-style U(-1/sqrt(H), 1/sqrt(H))."""
    k = 1.0 / jnp.sqrt(jnp.float32(HIDDEN))
    params = []
    for layer in range(NUM_LAYERS):
        d_in = INPUT_SIZE if layer == 0 else HIDDEN
        key, k1, k2, k3, k4 = jax.random.split(key, 5)
        w_ih = jax.random.uniform(k1, (4 * HIDDEN, d_in), jnp.float32, -k, k)
        w_hh = jax.random.uniform(k2, (4 * HIDDEN, HIDDEN), jnp.float32, -k, k)
        b_ih = jax.random.uniform(k3, (4 * HIDDEN,), jnp.float32, -k, k)
        b_hh = jax.random.uniform(k4, (4 * HIDDEN,), jnp.float32, -k, k)
        params.append((w_ih.T, w_hh.T, (b_ih + b_hh)[None, :]))
    key, k1, k2 = jax.random.split(key, 3)
    w_fc = jax.random.uniform(k1, (NUM_CLASSES, HIDDEN), jnp.float32, -k, k)
    b_fc = jax.random.uniform(k2, (NUM_CLASSES,), jnp.float32, -k, k)
    return params, (w_fc.T, b_fc[None, :])


# ----------------------------- pure-JAX reference ---------------------------

def reference_forward(x, lstm_params, fc_params):
    h_seq = x
    H = HIDDEN
    for (wih_t, whh_t, b) in lstm_params:
        B, T, _ = h_seq.shape
        h = jnp.zeros((B, H), jnp.float32)
        c = jnp.zeros((B, H), jnp.float32)
        outs = []
        for t in range(T):
            gates = h_seq[:, t, :] @ wih_t + h @ whh_t + b
            i = jax.nn.sigmoid(gates[:, 0 * H:1 * H])
            f = jax.nn.sigmoid(gates[:, 1 * H:2 * H])
            g = jnp.tanh(gates[:, 2 * H:3 * H])
            o = jax.nn.sigmoid(gates[:, 3 * H:4 * H])
            c = f * c + i * g
            h = o * jnp.tanh(c)
            outs.append(h)
        h_seq = jnp.stack(outs, axis=1)
    w_fc_t, b_fc = fc_params
    return h_seq[:, -1, :] @ w_fc_t + b_fc


# --------------------------------- main -------------------------------------

if __name__ == "__main__":
    key = jax.random.PRNGKey(0)
    key, pkey, xkey = jax.random.split(key, 3)
    lstm_params, fc_params = init_params(pkey)

    B, T = 2, 8
    x = jax.random.normal(xkey, (B, T, INPUT_SIZE), jnp.float32)

    fwd = jax.jit(rnn_classifier_forward)
    out = fwd(x, lstm_params, fc_params)
    out = jax.block_until_ready(out)
    assert out.shape == (B, NUM_CLASSES)

    ref = reference_forward(x, lstm_params, fc_params)
    assert jnp.allclose(out, ref, atol=1e-3, rtol=1e-3), "mismatch vs reference"

    print("KERNEL_OK")
</pallas_src>

<mosaic_0001>
module attributes {stable_mosaic.version = 11 : i64} {
  func.func @fused_lstm_fc_kernel(%arg0: memref<64x64xf32, #tpu.memory_space<vmem>>, %arg1: memref<64x512xf32, #tpu.memory_space<vmem>>, %arg2: memref<4x128x512xf32, #tpu.memory_space<vmem>>, %arg3: memref<5x128x512xf32, #tpu.memory_space<vmem>>, %arg4: memref<5x1x512xf32, #tpu.memory_space<vmem>>, %arg5: memref<128x40xf32, #tpu.memory_space<vmem>>, %arg6: memref<1x40xf32, #tpu.memory_space<vmem>>, %arg7: memref<8x40xf32, #tpu.memory_space<vmem>>, %arg8: memref<64x128xf32, #tpu.memory_space<vmem>>, %arg9: memref<64x512xf32, #tpu.memory_space<vmem>>) attributes {dimension_semantics = [], scalar_prefetch = 0 : i64, scratch_operands = 2 : i64, tpu.core_type = #tpu.core_type<tc>} {
    %c0 = arith.constant 0 : index
    %c0_0 = arith.constant 0 : index
    %0 = vector.load %arg0[%c0, %c0_0] : memref<64x64xf32, #tpu.memory_space<vmem>>, vector<64x64xf32>
    %c0_1 = arith.constant 0 : index
    %c0_2 = arith.constant 0 : index
    %1 = vector.load %arg1[%c0_1, %c0_2] : memref<64x512xf32, #tpu.memory_space<vmem>>, vector<64x512xf32>
    %c0_3 = arith.constant 0 : index
    %c0_4 = arith.constant 0 : index
    %c0_5 = arith.constant 0 : index
    %2 = vector.load %arg3[%c0_3, %c0_4, %c0_5] : memref<5x128x512xf32, #tpu.memory_space<vmem>>, vector<1x128x512xf32>
    %3 = vector.shape_cast %2 : vector<1x128x512xf32> to vector<128x512xf32>
    %c0_6 = arith.constant 0 : index
    %c0_7 = arith.constant 0 : index
    %c0_8 = arith.constant 0 : index
    %4 = vector.load %arg4[%c0_6, %c0_7, %c0_8] : memref<5x1x512xf32, #tpu.memory_space<vmem>>, vector<1x1x512xf32>
    %5 = vector.shape_cast %4 : vector<1x1x512xf32> to vector<1x512xf32>
    %cst = arith.constant dense<0.000000e+00> : vector<64x512xf32>
    %6 = tpu.matmul %0, %1, %cst {dimension_numbers = #tpu.dot_dimension_numbers<[1], [0], [0], [1], [0, 0, 1, 1], [], []>} : vector<64x64xf32>, vector<64x512xf32>, vector<64x512xf32> -> vector<64x512xf32>
    %7 = vector.broadcast %5 : vector<1x512xf32> to vector<64x512xf32>
    %8 = arith.addf %6, %7 : vector<64x512xf32>
    %c0_9 = arith.constant 0 : index
    %c0_10 = arith.constant 0 : index
    %9 = vector.load %arg9[%c0_9, %c0_10] : memref<64x512xf32, #tpu.memory_space<vmem>>, vector<64x512xf32>
    tpu.vector_store %arg9[%c0_9, %c0_10], %8 {strides = array<i32>} : memref<64x512xf32, #tpu.memory_space<vmem>>, vector<64x512xf32>,
    %cst_11 = arith.constant 0.000000e+00 : f32
    %10 = vector.broadcast %cst_11 : f32 to vector<8x128xf32>
    %cst_12 = arith.constant 0.000000e+00 : f32
    %11 = vector.broadcast %cst_12 : f32 to vector<8x128xf32>
    %c0_13 = arith.constant 0 : index
    %c0_14 = arith.constant 0 : index
    %12 = vector.load %arg9[%c0_13, %c0_14] : memref<64x512xf32, #tpu.memory_space<vmem>>, vector<8x512xf32>
    %cst_15 = arith.constant dense<0.000000e+00> : vector<8x512xf32>
    %13 = tpu.matmul %10, %3, %cst_15 {dimension_numbers = #tpu.dot_dimension_numbers<[1], [0], [0], [1], [0, 0, 1, 1], [], []>} : vector<8x128xf32>, vector<128x512xf32>, vector<8x512xf32> -> vector<8x512xf32>
    %14 = arith.addf %12, %13 : vector<8x512xf32>
    %15 = vector.extract_strided_slice %14 {offsets = [0, 0], sizes = [8, 128], strides = [1, 1]} : vector<8x512xf32> to vector<8x128xf32>
    %16 = arith.negf %15 : vector<8x128xf32>
    %17 = math.exp %16 : vector<8x128xf32>
    %cst_16 = arith.constant 1.000000e+00 : f32
    %18 = vector.broadcast %cst_16 : f32 to vector<8x128xf32>
    %19 = arith.addf %18, %17 : vector<8x128xf32>
    %20 = arith.divf %18, %19 : vector<8x128xf32>
    %21 = vector.extract_strided_slice %14 {offsets = [0, 128], sizes = [8, 128], strides = [1, 1]} : vector<8x512xf32> to vector<8x128xf32>
    %22 = arith.negf %21 : vector<8x128xf32>
    %23 = math.exp %22 : vector<8x128xf32>
    %cst_17 = arith.constant 1.000000e+00 : f32
    %24 = vector.broadcast %cst_17 : f32 to vector<8x128xf32>
    %25 = arith.addf %24, %23 : vector<8x128xf32>
    %26 = arith.divf %24, %25 : vector<8x128xf32>
    %27 = vector.extract_strided_slice %14 {offsets = [0, 256], sizes = [8, 128], strides = [1, 1]} : vector<8x512xf32> to vector<8x128xf32>
    %28 = math.tanh %27 : vector<8x128xf32>
    %29 = vector.extract_strided_slice %14 {offsets = [0, 384], sizes = [8, 128], strides = [1, 1]} : vector<8x512xf32> to vector<8x128xf32>
    %30 = arith.negf %29 : vector<8x128xf32>
    %31 = math.exp %30 : vector<8x128xf32>
    %cst_18 = arith.constant 1.000000e+00 : f32
    %32 = vector.broadcast %cst_18 : f32 to vector<8x128xf32>
    %33 = arith.addf %32, %31 : vector<8x128xf32>
    %34 = arith.divf %32, %33 : vector<8x128xf32>
    %35 = arith.mulf %26, %11 : vector<8x128xf32>
    %36 = arith.mulf %20, %28 : vector<8x128xf32>
    %37 = arith.addf %35, %36 : vector<8x128xf32>
    %38 = math.tanh %37 : vector<8x128xf32>
    %39 = arith.mulf %34, %38 : vector<8x128xf32>
    %c0_19 = arith.constant 0 : index
    %c0_20 = arith.constant 0 : index
    %40 = vector.load %arg8[%c0_19, %c0_20] : memref<64x128xf32, #tpu.memory_space<vmem>>, vector<8x128xf32>
    tpu.vector_store %arg8[%c0_19, %c0_20], %39 {strides = array<i32>} : memref<64x128xf32, #tpu.memory_space<vmem>>, vector<8x128xf32>,
    %c8 = arith.constant 8 : index
    %c0_21 = arith.constant 0 : index
    %41 = vector.load %arg9[%c8, %c0_21] : memref<64x512xf32, #tpu.memory_space<vmem>>, vector<8x512xf32>
    %cst_22 = arith.constant dense<0.000000e+00> : vector<8x512xf32>
    %42 = tpu.matmul %39, %3, %cst_22 {dimension_numbers = #tpu.dot_dimension_numbers<[1], [0], [0], [1], [0, 0, 1, 1], [], []>} : vector<8x128xf32>, vector<128x512xf32>, vector<8x512xf32> -> vector<8x512xf32>
    %43 = arith.addf %41, %42 : vector<8x512xf32>
    %44 = vector.extract_strided_slice %43 {offsets = [0, 0], sizes = [8, 128], strides = [1, 1]} : vector<8x512xf32> to vector<8x128xf32>
    %45 = arith.negf %44 : vector<8x128xf32>
    %46 = math.exp %45 : vector<8x128xf32>
    %cst_23 = arith.constant 1.000000e+00 : f32
    %47 = vector.broadcast %cst_23 : f32 to vector<8x128xf32>
    %48 = arith.addf %47, %46 : vector<8x128xf32>
    %49 = arith.divf %47, %48 : vector<8x128xf32>
    %50 = vector.extract_strided_slice %43 {offsets = [0, 128], sizes = [8, 128], strides = [1, 1]} : vector<8x512xf32> to vector<8x128xf32>
    %51 = arith.negf %50 : vector<8x128xf32>
    %52 = math.exp %51 : vector<8x128xf32>
    %cst_24 = arith.constant 1.000000e+00 : f32
    %53 = vector.broadcast %cst_24 : f32 to vector<8x128xf32>
    %54 = arith.addf %53, %52 : vector<8x128xf32>
    %55 = arith.divf %53, %54 : vector<8x128xf32>
    %56 = vector.extract_strided_slice %43 {offsets = [0, 256], sizes = [8, 128], strides = [1, 1]} : vector<8x512xf32> to vector<8x128xf32>
    %57 = math.tanh %56 : vector<8x128xf32>
    %58 = vector.extract_strided_slice %43 {offsets = [0, 384], sizes = [8, 128], strides = [1, 1]} : vector<8x512xf32> to vector<8x128xf32>
    %59 = arith.negf %58 : vector<8x128xf32>
    %60 = math.exp %59 : vector<8x128xf32>
    %cst_25 = arith.constant 1.000000e+00 : f32
    %61 = vector.broadcast %cst_25 : f32 to vector<8x128xf32>
    %62 = arith.addf %61, %60 : vector<8x128xf32>
    %63 = arith.divf %61, %62 : vector<8x128xf32>
    %64 = arith.mulf %55, %37 : vector<8x128xf32>
    %65 = arith.mulf %49, %57 : vector<8x128xf32>
    %66 = arith.addf %64, %65 : vector<8x128xf32>
    %67 = math.tanh %66 : vector<8x128xf32>
    %68 = arith.mulf %63, %67 : vector<8x128xf32>
    %c8_26 = arith.constant 8 : index
    %c0_27 = arith.constant 0 : index
    %69 = vector.load %arg8[%c8_26, %c0_27] : memref<64x128xf32, #tpu.memory_space<vmem>>, vector<8x128xf32>
    tpu.vector_store %arg8[%c8_26, %c0_27], %68 {strides = array<i32>} : memref<64x128xf32, #tpu.memory_space<vmem>>, vector<8x128xf32>,
    %c16 = arith.constant 16 : index
    %c0_28 = arith.constant 0 : index
    %70 = vector.load %arg9[%c16, %c0_28] : memref<64x512xf32, #tpu.memory_space<vmem>>, vector<8x512xf32>
    %cst_29 = arith.constant dense<0.000000e+00> : vector<8x512xf32>
    %71 = tpu.matmul %68, %3, %cst_29 {dimension_numbers = #tpu.dot_dimension_numbers<[1], [0], [0], [1], [0, 0, 1, 1], [], []>} : vector<8x128xf32>, vector<128x512xf32>, vector<8x512xf32> -> vector<8x512xf32>
    %72 = arith.addf %70, %71 : vector<8x512xf32>
    %73 = vector.extract_strided_slice %72 {offsets = [0, 0], sizes = [8, 128], strides = [1, 1]} : vector<8x512xf32> to vector<8x128xf32>
    %74 = arith.negf %73 : vector<8x128xf32>
    %75 = math.exp %74 : vector<8x128xf32>
    %cst_30 = arith.constant 1.000000e+00 : f32
    %76 = vector.broadcast %cst_30 : f32 to vector<8x128xf32>
    %77 = arith.addf %76, %75 : vector<8x128xf32>
    %78 = arith.divf %76, %77 : vector<8x128xf32>
    %79 = vector.extract_strided_slice %72 {offsets = [0, 128], sizes = [8, 128], strides = [1, 1]} : vector<8x512xf32> to vector<8x128xf32>
    %80 = arith.negf %79 : vector<8x128xf32>
    %81 = math.exp %80 : vector<8x128xf32>
    %cst_31 = arith.constant 1.000000e+00 : f32
    %82 = vector.broadcast %cst_31 : f32 to vector<8x128xf32>
    %83 = arith.addf %82, %81 : vector<8x128xf32>
    %84 = arith.divf %82, %83 : vector<8x128xf32>
    %85 = vector.extract_strided_slice %72 {offsets = [0, 256], sizes = [8, 128], strides = [1, 1]} : vector<8x512xf32> to vector<8x128xf32>
    %86 = math.tanh %85 : vector<8x128xf32>
    %87 = vector.extract_strided_slice %72 {offsets = [0, 384], sizes = [8, 128], strides = [1, 1]} : vector<8x512xf32> to vector<8x128xf32>
    %88 = arith.negf %87 : vector<8x128xf32>
    %89 = math.exp %88 : vector<8x128xf32>
    %cst_32 = arith.constant 1.000000e+00 : f32
    %90 = vector.broadcast %cst_32 : f32 to vector<8x128xf32>
    %91 = arith.addf %90, %89 : vector<8x128xf32>
    %92 = arith.divf %90, %91 : vector<8x128xf32>
    %93 = arith.mulf %84, %66 : vector<8x128xf32>
    %94 = arith.mulf %78, %86 : vector<8x128xf32>
    %95 = arith.addf %93, %94 : vector<8x128xf32>
    %96 = math.tanh %95 : vector<8x128xf32>
    %97 = arith.mulf %92, %96 : vector<8x128xf32>
    %c16_33 = arith.constant 16 : index
    %c0_34 = arith.constant 0 : index
    %98 = vector.load %arg8[%c16_33, %c0_34] : memref<64x128xf32, #tpu.memory_space<vmem>>, vector<8x128xf32>
    tpu.vector_store %arg8[%c16_33, %c0_34], %97 {strides = array<i32>} : memref<64x128xf32, #tpu.memory_space<vmem>>, vector<8x128xf32>,
    %c24 = arith.constant 24 : index
    %c0_35 = arith.constant 0 : index
    %99 = vector.load %arg9[%c24, %c0_35] : memref<64x512xf32, #tpu.memory_space<vmem>>, vector<8x512xf32>
    %cst_36 = arith.constant dense<0.000000e+00> : vector<8x512xf32>
    %100 = tpu.matmul %97, %3, %cst_36 {dimension_numbers = #tpu.dot_dimension_numbers<[1], [0], [0], [1], [0, 0, 1, 1], [], []>} : vector<8x128xf32>, vector<128x512xf32>, vector<8x512xf32> -> vector<8x512xf32>
    %101 = arith.addf %99, %100 : vector<8x512xf32>
    %102 = vector.extract_strided_slice %101 {offsets = [0, 0], sizes = [8, 128], strides = [1, 1]} : vector<8x512xf32> to vector<8x128xf32>
    %103 = arith.negf %102 : vector<8x128xf32>
    %104 = math.exp %103 : vector<8x128xf32>
    %cst_37 = arith.constant 1.000000e+00 : f32
    %105 = vector.broadcast %cst_37 : f32 to vector<8x128xf32>
    %106 = arith.addf %105, %104 : vector<8x128xf32>
    %107 = arith.divf %105, %106 : vector<8x128xf32>
    %108 = vector.extract_strided_slice %101 {offsets = [0, 128], sizes = [8, 128], strides = [1, 1]} : vector<8x512xf32> to vector<8x128xf32>
    %109 = arith.negf %108 : vector<8x128xf32>
    %110 = math.exp %109 : vector<8x128xf32>
    %cst_38 = arith.constant 1.000000e+00 : f32
    %111 = vector.broadcast %cst_38 : f32 to vector<8x128xf32>
    %112 = arith.addf %111, %110 : vector<8x128xf32>
    %113 = arith.divf %111, %112 : vector<8x128xf32>
    %114 = vector.extract_strided_slice %101 {offsets = [0, 256], sizes = [8, 128], strides = [1, 1]} : vector<8x512xf32> to vector<8x128xf32>
    %115 = math.tanh %114 : vector<8x128xf32>
    %116 = vector.extract_strided_slice %101 {offsets = [0, 384], sizes = [8, 128], strides = [1, 1]} : vector<8x512xf32> to vector<8x128xf32>
    %117 = arith.negf %116 : vector<8x128xf32>
    %118 = math.exp %117 : vector<8x128xf32>
    %cst_39 = arith.constant 1.000000e+00 : f32
    %119 = vector.broadcast %cst_39 : f32 to vector<8x128xf32>
    %120 = arith.addf %119, %118 : vector<8x128xf32>
    %121 = arith.divf %119, %120 : vector<8x128xf32>
    %122 = arith.mulf %113, %95 : vector<8x128xf32>
    %123 = arith.mulf %107, %115 : vector<8x128xf32>
    %124 = arith.addf %122, %123 : vector<8x128xf32>
    %125 = math.tanh %124 : vector<8x128xf32>
    %126 = arith.mulf %121, %125 : vector<8x128xf32>
    %c24_40 = arith.constant 24 : index
    %c0_41 = arith.constant 0 : index
    %127 = vector.load %arg8[%c24_40, %c0_41] : memref<64x128xf32, #tpu.memory_space<vmem>>, vector<8x128xf32>
    tpu.vector_store %arg8[%c24_40, %c0_41], %126 {strides = array<i32>} : memref<64x128xf32, #tpu.memory_space<vmem>>, vector<8x128xf32>,
    %c32 = arith.constant 32 : index
    %c0_42 = arith.constant 0 : index
    %128 = vector.load %arg9[%c32, %c0_42] : memref<64x512xf32, #tpu.memory_space<vmem>>, vector<8x512xf32>
    %cst_43 = arith.constant dense<0.000000e+00> : vector<8x512xf32>
    %129 = tpu.matmul %126, %3, %cst_43 {dimension_numbers = #tpu.dot_dimension_numbers<[1], [0], [0], [1], [0, 0, 1, 1], [], []>} : vector<8x128xf32>, vector<128x512xf32>, vector<8x512xf32> -> vector<8x512xf32>
    %130 = arith.addf %128, %129 : vector<8x512xf32>
    %131 = vector.extract_strided_slice %130 {offsets = [0, 0], sizes = [8, 128], strides = [1, 1]} : vector<8x512xf32> to vector<8x128xf32>
    %132 = arith.negf %131 : vector<8x128xf32>
    %133 = math.exp %132 : vector<8x128xf32>
    %cst_44 = arith.constant 1.000000e+00 : f32
    %134 = vector.broadcast %cst_44 : f32 to vector<8x128xf32>
    %135 = arith.addf %134, %133 : vector<8x128xf32>
    %136 = arith.divf %134, %135 : vector<8x128xf32>
    %137 = vector.extract_strided_slice %130 {offsets = [0, 128], sizes = [8, 128], strides = [1, 1]} : vector<8x512xf32> to vector<8x128xf32>
    %138 = arith.negf %137 : vector<8x128xf32>
    %139 = math.exp %138 : vector<8x128xf32>
    %cst_45 = arith.constant 1.000000e+00 : f32
    %140 = vector.broadcast %cst_45 : f32 to vector<8x128xf32>
    %141 = arith.addf %140, %139 : vector<8x128xf32>
    %142 = arith.divf %140, %141 : vector<8x128xf32>
    %143 = vector.extract_strided_slice %130 {offsets = [0, 256], sizes = [8, 128], strides = [1, 1]} : vector<8x512xf32> to vector<8x128xf32>
    %144 = math.tanh %143 : vector<8x128xf32>
    %145 = vector.extract_strided_slice %130 {offsets = [0, 384], sizes = [8, 128], strides = [1, 1]} : vector<8x512xf32> to vector<8x128xf32>
    %146 = arith.negf %145 : vector<8x128xf32>
    %147 = math.exp %146 : vector<8x128xf32>
    %cst_46 = arith.constant 1.000000e+00 : f32
    %148 = vector.broadcast %cst_46 : f32 to vector<8x128xf32>
    %149 = arith.addf %148, %147 : vector<8x128xf32>
    %150 = arith.divf %148, %149 : vector<8x128xf32>
    %151 = arith.mulf %142, %124 : vector<8x128xf32>
    %152 = arith.mulf %136, %144 : vector<8x128xf32>
    %153 = arith.addf %151, %152 : vector<8x128xf32>
    %154 = math.tanh %153 : vector<8x128xf32>
    %155 = arith.mulf %150, %154 : vector<8x128xf32>
    %c32_47 = arith.constant 32 : index
    %c0_48 = arith.constant 0 : index
    %156 = vector.load %arg8[%c32_47, %c0_48] : memref<64x128xf32, #tpu.memory_space<vmem>>, vector<8x128xf32>
    tpu.vector_store %arg8[%c32_47, %c0_48], %155 {strides = array<i32>} : memref<64x128xf32, #tpu.memory_space<vmem>>, vector<8x128xf32>,
    %c40 = arith.constant 40 : index
    %c0_49 = arith.constant 0 : index
    %157 = vector.load %arg9[%c40, %c0_49] : memref<64x512xf32, #tpu.memory_space<vmem>>, vector<8x512xf32>
    %cst_50 = arith.constant dense<0.000000e+00> : vector<8x512xf32>
    %158 = tpu.matmul %155, %3, %cst_50 {dimension_numbers = #tpu.dot_dimension_numbers<[1], [0], [0], [1], [0, 0, 1, 1], [], []>} : vector<8x128xf32>, vector<128x512xf32>, vector<8x512xf32> -> vector<8x512xf32>
    %159 = arith.addf %157, %158 : vector<8x512xf32>
    %160 = vector.extract_strided_slice %159 {offsets = [0, 0], sizes = [8, 128], strides = [1, 1]} : vector<8x512xf32> to vector<8x128xf32>
    %161 = arith.negf %160 : vector<8x128xf32>
    %162 = math.exp %161 : vector<8x128xf32>
    %cst_51 = arith.constant 1.000000e+00 : f32
    %163 = vector.broadcast %cst_51 : f32 to vector<8x128xf32>
    %164 = arith.addf %163, %162 : vector<8x128xf32>
    %165 = arith.divf %163, %164 : vector<8x128xf32>
    %166 = vector.extract_strided_slice %159 {offsets = [0, 128], sizes = [8, 128], strides = [1, 1]} : vector<8x512xf32> to vector<8x128xf32>
    %167 = arith.negf %166 : vector<8x128xf32>
    %168 = math.exp %167 : vector<8x128xf32>
    %cst_52 = arith.constant 1.000000e+00 : f32
    %169 = vector.broadcast %cst_52 : f32 to vector<8x128xf32>
    %170 = arith.addf %169, %168 : vector<8x128xf32>
    %171 = arith.divf %169, %170 : vector<8x128xf32>
    %172 = vector.extract_strided_slice %159 {offsets = [0, 256], sizes = [8, 128], strides = [1, 1]} : vector<8x512xf32> to vector<8x128xf32>
    %173 = math.tanh %172 : vector<8x128xf32>
    %174 = vector.extract_strided_slice %159 {offsets = [0, 384], sizes = [8, 128], strides = [1, 1]} : vector<8x512xf32> to vector<8x128xf32>
    %175 = arith.negf %174 : vector<8x128xf32>
    %176 = math.exp %175 : vector<8x128xf32>
    %cst_53 = arith.constant 1.000000e+00 : f32
    %177 = vector.broadcast %cst_53 : f32 to vector<8x128xf32>
    %178 = arith.addf %177, %176 : vector<8x128xf32>
    %179 = arith.divf %177, %178 : vector<8x128xf32>
    %180 = arith.mulf %171, %153 : vector<8x128xf32>
    %181 = arith.mulf %165, %173 : vector<8x128xf32>
    %182 = arith.addf %180, %181 : vector<8x128xf32>
    %183 = math.tanh %182 : vector<8x128xf32>
    %184 = arith.mulf %179, %183 : vector<8x128xf32>
    %c40_54 = arith.constant 40 : index
    %c0_55 = arith.constant 0 : index
    %185 = vector.load %arg8[%c40_54, %c0_55] : memref<64x128xf32, #tpu.memory_space<vmem>>, vector<8x128xf32>
    tpu.vector_store %arg8[%c40_54, %c0_55], %184 {strides = array<i32>} : memref<64x128xf32, #tpu.memory_space<vmem>>, vector<8x128xf32>,
    %c48 = arith.constant 48 : index
    %c0_56 = arith.constant 0 : index
    %186 = vector.load %arg9[%c48, %c0_56] : memref<64x512xf32, #tpu.memory_space<vmem>>, vector<8x512xf32>
    %cst_57 = arith.constant dense<0.000000e+00> : vector<8x512xf32>
    %187 = tpu.matmul %184, %3, %cst_57 {dimension_numbers = #tpu.dot_dimension_numbers<[1], [0], [0], [1], [0, 0, 1, 1], [], []>} : vector<8x128xf32>, vector<128x512xf32>, vector<8x512xf32> -> vector<8x512xf32>
    %188 = arith.addf %186, %187 : vector<8x512xf32>
    %189 = vector.extract_strided_slice %188 {offsets = [0, 0], sizes = [8, 128], strides = [1, 1]} : vector<8x512xf32> to vector<8x128xf32>
    %190 = arith.negf %189 : vector<8x128xf32>
    %191 = math.exp %190 : vector<8x128xf32>
    %cst_58 = arith.constant 1.000000e+00 : f32
    %192 = vector.broadcast %cst_58 : f32 to vector<8x128xf32>
    %193 = arith.addf %192, %191 : vector<8x128xf32>
    %194 = arith.divf %192, %193 : vector<8x128xf32>
    %195 = vector.extract_strided_slice %188 {offsets = [0, 128], sizes = [8, 128], strides = [1, 1]} : vector<8x512xf32> to vector<8x128xf32>
    %196 = arith.negf %195 : vector<8x128xf32>
    %197 = math.exp %196 : vector<8x128xf32>
    %cst_59 = arith.constant 1.000000e+00 : f32
    %198 = vector.broadcast %cst_59 : f32 to vector<8x128xf32>
    %199 = arith.addf %198, %197 : vector<8x128xf32>
    %200 = arith.divf %198, %199 : vector<8x128xf32>
    %201 = vector.extract_strided_slice %188 {offsets = [0, 256], sizes = [8, 128], strides = [1, 1]} : vector<8x512xf32> to vector<8x128xf32>
    %202 = math.tanh %201 : vector<8x128xf32>
    %203 = vector.extract_strided_slice %188 {offsets = [0, 384], sizes = [8, 128], strides = [1, 1]} : vector<8x512xf32> to vector<8x128xf32>
    %204 = arith.negf %203 : vector<8x128xf32>
    %205 = math.exp %204 : vector<8x128xf32>
    %cst_60 = arith.constant 1.000000e+00 : f32
    %206 = vector.broadcast %cst_60 : f32 to vector<8x128xf32>
    %207 = arith.addf %206, %205 : vector<8x128xf32>
    %208 = arith.divf %206, %207 : vector<8x128xf32>
    %209 = arith.mulf %200, %182 : vector<8x128xf32>
    %210 = arith.mulf %194, %202 : vector<8x128xf32>
    %211 = arith.addf %209, %210 : vector<8x128xf32>
    %212 = math.tanh %211 : vector<8x128xf32>
    %213 = arith.mulf %208, %212 : vector<8x128xf32>
    %c48_61 = arith.constant 48 : index
    %c0_62 = arith.constant 0 : index
    %214 = vector.load %arg8[%c48_61, %c0_62] : memref<64x128xf32, #tpu.memory_space<vmem>>, vector<8x128xf32>
    tpu.vector_store %arg8[%c48_61, %c0_62], %213 {strides = array<i32>} : memref<64x128xf32, #tpu.memory_space<vmem>>, vector<8x128xf32>,
    %c56 = arith.constant 56 : index
    %c0_63 = arith.constant 0 : index
    %215 = vector.load %arg9[%c56, %c0_63] : memref<64x512xf32, #tpu.memory_space<vmem>>, vector<8x512xf32>
    %cst_64 = arith.constant dense<0.000000e+00> : vector<8x512xf32>
    %216 = tpu.matmul %213, %3, %cst_64 {dimension_numbers = #tpu.dot_dimension_numbers<[1], [0], [0], [1], [0, 0, 1, 1], [], []>} : vector<8x128xf32>, vector<128x512xf32>, vector<8x512xf32> -> vector<8x512xf32>
    %217 = arith.addf %215, %216 : vector<8x512xf32>
    %218 = vector.extract_strided_slice %217 {offsets = [0, 0], sizes = [8, 128], strides = [1, 1]} : vector<8x512xf32> to vector<8x128xf32>
    %219 = arith.negf %218 : vector<8x128xf32>
    %220 = math.exp %219 : vector<8x128xf32>
    %cst_65 = arith.constant 1.000000e+00 : f32
    %221 = vector.broadcast %cst_65 : f32 to vector<8x128xf32>
    %222 = arith.addf %221, %220 : vector<8x128xf32>
    %223 = arith.divf %221, %222 : vector<8x128xf32>
    %224 = vector.extract_strided_slice %217 {offsets = [0, 128], sizes = [8, 128], strides = [1, 1]} : vector<8x512xf32> to vector<8x128xf32>
    %225 = arith.negf %224 : vector<8x128xf32>
    %226 = math.exp %225 : vector<8x128xf32>
    %cst_66 = arith.constant 1.000000e+00 : f32
    %227 = vector.broadcast %cst_66 : f32 to vector<8x128xf32>
    %228 = arith.addf %227, %226 : vector<8x128xf32>
    %229 = arith.divf %227, %228 : vector<8x128xf32>
    %230 = vector.extract_strided_slice %217 {offsets = [0, 256], sizes = [8, 128], strides = [1, 1]} : vector<8x512xf32> to vector<8x128xf32>
    %231 = math.tanh %230 : vector<8x128xf32>
    %232 = vector.extract_strided_slice %217 {offsets = [0, 384], sizes = [8, 128], strides = [1, 1]} : vector<8x512xf32> to vector<8x128xf32>
    %233 = arith.negf %232 : vector<8x128xf32>
    %234 = math.exp %233 : vector<8x128xf32>
    %cst_67 = arith.constant 1.000000e+00 : f32
    %235 = vector.broadcast %cst_67 : f32 to vector<8x128xf32>
    %236 = arith.addf %235, %234 : vector<8x128xf32>
    %237 = arith.divf %235, %236 : vector<8x128xf32>
    %238 = arith.mulf %229, %211 : vector<8x128xf32>
    %239 = arith.mulf %223, %231 : vector<8x128xf32>
    %240 = arith.addf %238, %239 : vector<8x128xf32>
    %241 = math.tanh %240 : vector<8x128xf32>
    %242 = arith.mulf %237, %241 : vector<8x128xf32>
    %c56_68 = arith.constant 56 : index
    %c0_69 = arith.constant 0 : index
    %243 = vector.load %arg8[%c56_68, %c0_69] : memref<64x128xf32, #tpu.memory_space<vmem>>, vector<8x128xf32>
    tpu.vector_store %arg8[%c56_68, %c0_69], %242 {strides = array<i32>} : memref<64x128xf32, #tpu.memory_space<vmem>>, vector<8x128xf32>,
    %c0_70 = arith.constant 0 : index
    %c0_71 = arith.constant 0 : index
    %244 = vector.load %arg8[%c0_70, %c0_71] : memref<64x128xf32, #tpu.memory_space<vmem>>, vector<64x128xf32>
    %c0_72 = arith.constant 0 : index
    %c0_73 = arith.constant 0 : index
    %c0_74 = arith.constant 0 : index
    %245 = vector.load %arg2[%c0_72, %c0_73, %c0_74] : memref<4x128x512xf32, #tpu.memory_space<vmem>>, vector<1x128x512xf32>
    %246 = vector.shape_cast %245 : vector<1x128x512xf32> to vector<128x512xf32>
    %c1 = arith.constant 1 : index
    %c0_75 = arith.constant 0 : index
    %c0_76 = arith.constant 0 : index
    %247 = vector.load %arg3[%c1, %c0_75, %c0_76] : memref<5x128x512xf32, #tpu.memory_space<vmem>>, vector<1x128x512xf32>
    %248 = vector.shape_cast %247 : vector<1x128x512xf32> to vector<128x512xf32>
    %c1_77 = arith.constant 1 : index
    %c0_78 = arith.constant 0 : index
    %c0_79 = arith.constant 0 : index
    %249 = vector.load %arg4[%c1_77, %c0_78, %c0_79] : memref<5x1x512xf32, #tpu.memory_space<vmem>>, vector<1x1x512xf32>
    %250 = vector.shape_cast %249 : vector<1x1x512xf32> to vector<1x512xf32>
    %cst_80 = arith.constant dense<0.000000e+00> : vector<64x512xf32>
    %251 = tpu.matmul %244, %246, %cst_80 {dimension_numbers = #tpu.dot_dimension_numbers<[1], [0], [0], [1], [0, 0, 1, 1], [], []>} : vector<64x128xf32>, vector<128x512xf32>, vector<64x512xf32> -> vector<64x512xf32>
    %252 = vector.broadcast %250 : vector<1x512xf32> to vector<64x512xf32>
    %253 = arith.addf %251, %252 : vector<64x512xf32>
    %c0_81 = arith.constant 0 : index
    %c0_82 = arith.constant 0 : index
    %254 = vector.load %arg9[%c0_81, %c0_82] : memref<64x512xf32, #tpu.memory_space<vmem>>, vector<64x512xf32>
    tpu.vector_store %arg9[%c0_81, %c0_82], %253 {strides = array<i32>} : memref<64x512xf32, #tpu.memory_space<vmem>>, vector<64x512xf32>,
    %cst_83 = arith.constant 0.000000e+00 : f32
    %255 = vector.broadcast %cst_83 : f32 to vector<8x128xf32>
    %cst_84 = arith.constant 0.000000e+00 : f32
    %256 = vector.broadcast %cst_84 : f32 to vector<8x128xf32>
    %c0_85 = arith.constant 0 : index
    %c0_86 = arith.constant 0 : index
    %257 = vector.load %arg9[%c0_85, %c0_86] : memref<64x512xf32, #tpu.memory_space<vmem>>, vector<8x512xf32>
    %cst_87 = arith.constant dense<0.000000e+00> : vector<8x512xf32>
    %258 = tpu.matmul %255, %248, %cst_87 {dimension_numbers = #tpu.dot_dimension_numbers<[1], [0], [0], [1], [0, 0, 1, 1], [], []>} : vector<8x128xf32>, vector<128x512xf32>, vector<8x512xf32> -> vector<8x512xf32>
    %259 = arith.addf %257, %258 : vector<8x512xf32>
    %260 = vector.extract_strided_slice %259 {offsets = [0, 0], sizes = [8, 128], strides = [1, 1]} : vector<8x512xf32> to vector<8x128xf32>
    %261 = arith.negf %260 : vector<8x128xf32>
    %262 = math.exp %261 : vector<8x128xf32>
    %cst_88 = arith.constant 1.000000e+00 : f32
    %263 = vector.broadcast %cst_88 : f32 to vector<8x128xf32>
    %264 = arith.addf %263, %262 : vector<8x128xf32>
    %265 = arith.divf %263, %264 : vector<8x128xf32>
    %266 = vector.extract_strided_slice %259 {offsets = [0, 128], sizes = [8, 128], strides = [1, 1]} : vector<8x512xf32> to vector<8x128xf32>
    %267 = arith.negf %266 : vector<8x128xf32>
    %268 = math.exp %267 : vector<8x128xf32>
    %cst_89 = arith.constant 1.000000e+00 : f32
    %269 = vector.broadcast %cst_89 : f32 to vector<8x128xf32>
    %270 = arith.addf %269, %268 : vector<8x128xf32>
    %271 = arith.divf %269, %270 : vector<8x128xf32>
    %272 = vector.extract_strided_slice %259 {offsets = [0, 256], sizes = [8, 128], strides = [1, 1]} : vector<8x512xf32> to vector<8x128xf32>
    %273 = math.tanh %272 : vector<8x128xf32>
    %274 = vector.extract_strided_slice %259 {offsets = [0, 384], sizes = [8, 128], strides = [1, 1]} : vector<8x512xf32> to vector<8x128xf32>
    %275 = arith.negf %274 : vector<8x128xf32>
    %276 = math.exp %275 : vector<8x128xf32>
    %cst_90 = arith.constant 1.000000e+00 : f32
    %277 = vector.broadcast %cst_90 : f32 to vector<8x128xf32>
    %278 = arith.addf %277, %276 : vector<8x128xf32>
    %279 = arith.divf %277, %278 : vector<8x128xf32>
    %280 = arith.mulf %271, %256 : vector<8x128xf32>
    %281 = arith.mulf %265, %273 : vector<8x128xf32>
    %282 = arith.addf %280, %281 : vector<8x128xf32>
    %283 = math.tanh %282 : vector<8x128xf32>
    %284 = arith.mulf %279, %283 : vector<8x128xf32>
    %c0_91 = arith.constant 0 : index
    %c0_92 = arith.constant 0 : index
    %285 = vector.load %arg8[%c0_91, %c0_92] : memref<64x128xf32, #tpu.memory_space<vmem>>, vector<8x128xf32>
    tpu.vector_store %arg8[%c0_91, %c0_92], %284 {strides = array<i32>} : memref<64x128xf32, #tpu.memory_space<vmem>>, vector<8x128xf32>,
    %c8_93 = arith.constant 8 : index
    %c0_94 = arith.constant 0 : index
    %286 = vector.load %arg9[%c8_93, %c0_94] : memref<64x512xf32, #tpu.memory_space<vmem>>, vector<8x512xf32>
    %cst_95 = arith.constant dense<0.000000e+00> : vector<8x512xf32>
    %287 = tpu.matmul %284, %248, %cst_95 {dimension_numbers = #tpu.dot_dimension_numbers<[1], [0], [0], [1], [0, 0, 1, 1], [], []>} : vector<8x128xf32>, vector<128x512xf32>, vector<8x512xf32> -> vector<8x512xf32>
    %288 = arith.addf %286, %287 : vector<8x512xf32>
    %289 = vector.extract_strided_slice %288 {offsets = [0, 0], sizes = [8, 128], strides = [1, 1]} : vector<8x512xf32> to vector<8x128xf32>
    %290 = arith.negf %289 : vector<8x128xf32>
    %291 = math.exp %290 : vector<8x128xf32>
    %cst_96 = arith.constant 1.000000e+00 : f32
    %292 = vector.broadcast %cst_96 : f32 to vector<8x128xf32>
    %293 = arith.addf %292, %291 : vector<8x128xf32>
    %294 = arith.divf %292, %293 : vector<8x128xf32>
    %295 = vector.extract_strided_slice %288 {offsets = [0, 128], sizes = [8, 128], strides = [1, 1]} : vector<8x512xf32> to vector<8x128xf32>
    %296 = arith.negf %295 : vector<8x128xf32>
    %297 = math.exp %296 : vector<8x128xf32>
    %cst_97 = arith.constant 1.000000e+00 : f32
    %298 = vector.broadcast %cst_97 : f32 to vector<8x128xf32>
    %299 = arith.addf %298, %297 : vector<8x128xf32>
    %300 = arith.divf %298, %299 : vector<8x128xf32>
    %301 = vector.extract_strided_slice %288 {offsets = [0, 256], sizes = [8, 128], strides = [1, 1]} : vector<8x512xf32> to vector<8x128xf32>
    %302 = math.tanh %301 : vector<8x128xf32>
    %303 = vector.extract_strided_slice %288 {offsets = [0, 384], sizes = [8, 128], strides = [1, 1]} : vector<8x512xf32> to vector<8x128xf32>
    %304 = arith.negf %303 : vector<8x128xf32>
    %305 = math.exp %304 : vector<8x128xf32>
    %cst_98 = arith.constant 1.000000e+00 : f32
    %306 = vector.broadcast %cst_98 : f32 to vector<8x128xf32>
    %307 = arith.addf %306, %305 : vector<8x128xf32>
    %308 = arith.divf %306, %307 : vector<8x128xf32>
    %309 = arith.mulf %300, %282 : vector<8x128xf32>
    %310 = arith.mulf %294, %302 : vector<8x128xf32>
    %311 = arith.addf %309, %310 : vector<8x128xf32>
    %312 = math.tanh %311 : vector<8x128xf32>
    %313 = arith.mulf %308, %312 : vector<8x128xf32>
    %c8_99 = arith.constant 8 : index
    %c0_100 = arith.constant 0 : index
    %314 = vector.load %arg8[%c8_99, %c0_100] : memref<64x128xf32, #tpu.memory_space<vmem>>, vector<8x128xf32>
    tpu.vector_store %arg8[%c8_99, %c0_100], %313 {strides = array<i32>} : memref<64x128xf32, #tpu.memory_space<vmem>>, vector<8x128xf32>,
    %c16_101 = arith.constant 16 : index
    %c0_102 = arith.constant 0 : index
    %315 = vector.load %arg9[%c16_101, %c0_102] : memref<64x512xf32, #tpu.memory_space<vmem>>, vector<8x512xf32>
    %cst_103 = arith.constant dense<0.000000e+00> : vector<8x512xf32>
    %316 = tpu.matmul %313, %248, %cst_103 {dimension_numbers = #tpu.dot_dimension_numbers<[1], [0], [0], [1], [0, 0, 1, 1], [], []>} : vector<8x128xf32>, vector<128x512xf32>, vector<8x512xf32> -> vector<8x512xf32>
    %317 = arith.addf %315, %316 : vector<8x512xf32>
    %318 = vector.extract_strided_slice %317 {offsets = [0, 0], sizes = [8, 128], strides = [1, 1]} : vector<8x512xf32> to vector<8x128xf32>
    %319 = arith.negf %318 : vector<8x128xf32>
    %320 = math.exp %319 : vector<8x128xf32>
    %cst_104 = arith.constant 1.000000e+00 : f32
    %321 = vector.broadcast %cst_104 : f32 to vector<8x128xf32>
    %322 = arith.addf %321, %320 : vector<8x128xf32>
    %323 = arith.divf %321, %322 : vector<8x128xf32>
    %324 = vector.extract_strided_slice %317 {offsets = [0, 128], sizes = [8, 128], strides = [1, 1]} : vector<8x512xf32> to vector<8x128xf32>
    %325 = arith.negf %324 : vector<8x128xf32>
    %326 = math.exp %325 : vector<8x128xf32>
    %cst_105 = arith.constant 1.000000e+00 : f32
    %327 = vector.broadcast %cst_105 : f32 to vector<8x128xf32>
    %328 = arith.addf %327, %326 : vector<8x128xf32>
    %329 = arith.divf %327, %328 : vector<8x128xf32>
    %330 = vector.extract_strided_slice %317 {offsets = [0, 256], sizes = [8, 128], strides = [1, 1]} : vector<8x512xf32> to vector<8x128xf32>
    %331 = math.tanh %330 : vector<8x128xf32>
    %332 = vector.extract_strided_slice %317 {offsets = [0, 384], sizes = [8, 128], strides = [1, 1]} : vector<8x512xf32> to vector<8x128xf32>
    %333 = arith.negf %332 : vector<8x128xf32>
    %334 = math.exp %333 : vector<8x128xf32>
    %cst_106 = arith.constant 1.000000e+00 : f32
    %335 = vector.broadcast %cst_106 : f32 to vector<8x128xf32>
    %336 = arith.addf %335, %334 : vector<8x128xf32>
    %337 = arith.divf %335, %336 : vector<8x128xf32>
    %338 = arith.mulf %329, %311 : vector<8x128xf32>
    %339 = arith.mulf %323, %331 : vector<8x128xf32>
    %340 = arith.addf %338, %339 : vector<8x128xf32>
    %341 = math.tanh %340 : vector<8x128xf32>
    %342 = arith.mulf %337, %341 : vector<8x128xf32>
    %c16_107 = arith.constant 16 : index
    %c0_108 = arith.constant 0 : index
    %343 = vector.load %arg8[%c16_107, %c0_108] : memref<64x128xf32, #tpu.memory_space<vmem>>, vector<8x128xf32>
    tpu.vector_store %arg8[%c16_107, %c0_108], %342 {strides = array<i32>} : memref<64x128xf32, #tpu.memory_space<vmem>>, vector<8x128xf32>,
    %c24_109 = arith.constant 24 : index
    %c0_110 = arith.constant 0 : index
    %344 = vector.load %arg9[%c24_109, %c0_110] : memref<64x512xf32, #tpu.memory_space<vmem>>, vector<8x512xf32>
    %cst_111 = arith.constant dense<0.000000e+00> : vector<8x512xf32>
    %345 = tpu.matmul %342, %248, %cst_111 {dimension_numbers = #tpu.dot_dimension_numbers<[1], [0], [0], [1], [0, 0, 1, 1], [], []>} : vector<8x128xf32>, vector<128x512xf32>, vector<8x512xf32> -> vector<8x512xf32>
    %346 = arith.addf %344, %345 : vector<8x512xf32>
    %347 = vector.extract_strided_slice %346 {offsets = [0, 0], sizes = [8, 128], strides = [1, 1]} : vector<8x512xf32> to vector<8x128xf32>
    %348 = arith.negf %347 : vector<8x128xf32>
    %349 = math.exp %348 : vector<8x128xf32>
    %cst_112 = arith.constant 1.000000e+00 : f32
    %350 = vector.broadcast %cst_112 : f32 to vector<8x128xf32>
    %351 = arith.addf %350, %349 : vector<8x128xf32>
    %352 = arith.divf %350, %351 : vector<8x128xf32>
    %353 = vector.extract_strided_slice %346 {offsets = [0, 128], sizes = [8, 128], strides = [1, 1]} : vector<8x512xf32> to vector<8x128xf32>
    %354 = arith.negf %353 : vector<8x128xf32>
    %355 = math.exp %354 : vector<8x128xf32>
    %cst_113 = arith.constant 1.000000e+00 : f32
    %356 = vector.broadcast %cst_113 : f32 to vector<8x128xf32>
    %357 = arith.addf %356, %355 : vector<8x128xf32>
    %358 = arith.divf %356, %357 : vector<8x128xf32>
    %359 = vector.extract_strided_slice %346 {offsets = [0, 256], sizes = [8, 128], strides = [1, 1]} : vector<8x512xf32> to vector<8x128xf32>
    %360 = math.tanh %359 : vector<8x128xf32>
    %361 = vector.extract_strided_slice %346 {offsets = [0, 384], sizes = [8, 128], strides = [1, 1]} : vector<8x512xf32> to vector<8x128xf32>
    %362 = arith.negf %361 : vector<8x128xf32>
    %363 = math.exp %362 : vector<8x128xf32>
    %cst_114 = arith.constant 1.000000e+00 : f32
    %364 = vector.broadcast %cst_114 : f32 to vector<8x128xf32>
    %365 = arith.addf %364, %363 : vector<8x128xf32>
    %366 = arith.divf %364, %365 : vector<8x128xf32>
    %367 = arith.mulf %358, %340 : vector<8x128xf32>
    %368 = arith.mulf %352, %360 : vector<8x128xf32>
    %369 = arith.addf %367, %368 : vector<8x128xf32>
    %370 = math.tanh %369 : vector<8x128xf32>
    %371 = arith.mulf %366, %370 : vector<8x128xf32>
    %c24_115 = arith.constant 24 : index
    %c0_116 = arith.constant 0 : index
    %372 = vector.load %arg8[%c24_115, %c0_116] : memref<64x128xf32, #tpu.memory_space<vmem>>, vector<8x128xf32>
    tpu.vector_store %arg8[%c24_115, %c0_116], %371 {strides = array<i32>} : memref<64x128xf32, #tpu.memory_space<vmem>>, vector<8x128xf32>,
    %c32_117 = arith.constant 32 : index
    %c0_118 = arith.constant 0 : index
    %373 = vector.load %arg9[%c32_117, %c0_118] : memref<64x512xf32, #tpu.memory_space<vmem>>, vector<8x512xf32>
    %cst_119 = arith.constant dense<0.000000e+00> : vector<8x512xf32>
    %374 = tpu.matmul %371, %248, %cst_119 {dimension_numbers = #tpu.dot_dimension_numbers<[1], [0], [0], [1], [0, 0, 1, 1], [], []>} : vector<8x128xf32>, vector<128x512xf32>, vector<8x512xf32> -> vector<8x512xf32>
    %375 = arith.addf %373, %374 : vector<8x512xf32>
    %376 = vector.extract_strided_slice %375 {offsets = [0, 0], sizes = [8, 128], strides = [1, 1]} : vector<8x512xf32> to vector<8x128xf32>
    %377 = arith.negf %376 : vector<8x128xf32>
    %378 = math.exp %377 : vector<8x128xf32>
    %cst_120 = arith.constant 1.000000e+00 : f32
    %379 = vector.broadcast %cst_120 : f32 to vector<8x128xf32>
    %380 = arith.addf %379, %378 : vector<8x128xf32>
    %381 = arith.divf %379, %380 : vector<8x128xf32>
    %382 = vector.extract_strided_slice %375 {offsets = [0, 128], sizes = [8, 128], strides = [1, 1]} : vector<8x512xf32> to vector<8x128xf32>
    %383 = arith.negf %382 : vector<8x128xf32>
    %384 = math.exp %383 : vector<8x128xf32>
    %cst_121 = arith.constant 1.000000e+00 : f32
    %385 = vector.broadcast %cst_121 : f32 to vector<8x128xf32>
    %386 = arith.addf %385, %384 : vector<8x128xf32>
    %387 = arith.divf %385, %386 : vector<8x128xf32>
    %388 = vector.extract_strided_slice %375 {offsets = [0, 256], sizes = [8, 128], strides = [1, 1]} : vector<8x512xf32> to vector<8x128xf32>
    %389 = math.tanh %388 : vector<8x128xf32>
    %390 = vector.extract_strided_slice %375 {offsets = [0, 384], sizes = [8, 128], strides = [1, 1]} : vector<8x512xf32> to vector<8x128xf32>
    %391 = arith.negf %390 : vector<8x128xf32>
    %392 = math.exp %391 : vector<8x128xf32>
    %cst_122 = arith.constant 1.000000e+00 : f32
    %393 = vector.broadcast %cst_122 : f32 to vector<8x128xf32>
    %394 = arith.addf %393, %392 : vector<8x128xf32>
    %395 = arith.divf %393, %394 : vector<8x128xf32>
    %396 = arith.mulf %387, %369 : vector<8x128xf32>
    %397 = arith.mulf %381, %389 : vector<8x128xf32>
    %398 = arith.addf %396, %397 : vector<8x128xf32>
    %399 = math.tanh %398 : vector<8x128xf32>
    %400 = arith.mulf %395, %399 : vector<8x128xf32>
    %c32_123 = arith.constant 32 : index
    %c0_124 = arith.constant 0 : index
    %401 = vector.load %arg8[%c32_123, %c0_124] : memref<64x128xf32, #tpu.memory_space<vmem>>, vector<8x128xf32>
    tpu.vector_store %arg8[%c32_123, %c0_124], %400 {strides = array<i32>} : memref<64x128xf32, #tpu.memory_space<vmem>>, vector<8x128xf32>,
    %c40_125 = arith.constant 40 : index
    %c0_126 = arith.constant 0 : index
    %402 = vector.load %arg9[%c40_125, %c0_126] : memref<64x512xf32, #tpu.memory_space<vmem>>, vector<8x512xf32>
    %cst_127 = arith.constant dense<0.000000e+00> : vector<8x512xf32>
    %403 = tpu.matmul %400, %248, %cst_127 {dimension_numbers = #tpu.dot_dimension_numbers<[1], [0], [0], [1], [0, 0, 1, 1], [], []>} : vector<8x128xf32>, vector<128x512xf32>, vector<8x512xf32> -> vector<8x512xf32>
    %404 = arith.addf %402, %403 : vector<8x512xf32>
    %405 = vector.extract_strided_slice %404 {offsets = [0, 0], sizes = [8, 128], strides = [1, 1]} : vector<8x512xf32> to vector<8x128xf32>
    %406 = arith.negf %405 : vector<8x128xf32>
    %407 = math.exp %406 : vector<8x128xf32>
    %cst_128 = arith.constant 1.000000e+00 : f32
    %408 = vector.broadcast %cst_128 : f32 to vector<8x128xf32>
    %409 = arith.addf %408, %407 : vector<8x128xf32>
    %410 = arith.divf %408, %409 : vector<8x128xf32>
    %411 = vector.extract_strided_slice %404 {offsets = [0, 128], sizes = [8, 128], strides = [1, 1]} : vector<8x512xf32> to vector<8x128xf32>
    %412 = arith.negf %411 : vector<8x128xf32>
    %413 = math.exp %412 : vector<8x128xf32>
    %cst_129 = arith.constant 1.000000e+00 : f32
    %414 = vector.broadcast %cst_129 : f32 to vector<8x128xf32>
    %415 = arith.addf %414, %413 : vector<8x128xf32>
    %416 = arith.divf %414, %415 : vector<8x128xf32>
    %417 = vector.extract_strided_slice %404 {offsets = [0, 256], sizes = [8, 128], strides = [1, 1]} : vector<8x512xf32> to vector<8x128xf32>
    %418 = math.tanh %417 : vector<8x128xf32>
    %419 = vector.extract_strided_slice %404 {offsets = [0, 384], sizes = [8, 128], strides = [1, 1]} : vector<8x512xf32> to vector<8x128xf32>
    %420 = arith.negf %419 : vector<8x128xf32>
    %421 = math.exp %420 : vector<8x128xf32>
    %cst_130 = arith.constant 1.000000e+00 : f32
    %422 = vector.broadcast %cst_130 : f32 to vector<8x128xf32>
    %423 = arith.addf %422, %421 : vector<8x128xf32>
    %424 = arith.divf %422, %423 : vector<8x128xf32>
    %425 = arith.mulf %416, %398 : vector<8x128xf32>
    %426 = arith.mulf %410, %418 : vector<8x128xf32>
    %427 = arith.addf %425, %426 : vector<8x128xf32>
    %428 = math.tanh %427 : vector<8x128xf32>
    %429 = arith.mulf %424, %428 : vector<8x128xf32>
    %c40_131 = arith.constant 40 : index
    %c0_132 = arith.constant 0 : index
    %430 = vector.load %arg8[%c40_131, %c0_132] : memref<64x128xf32, #tpu.memory_space<vmem>>, vector<8x128xf32>
    tpu.vector_store %arg8[%c40_131, %c0_132], %429 {strides = array<i32>} : memref<64x128xf32, #tpu.memory_space<vmem>>, vector<8x128xf32>,
    %c48_133 = arith.constant 48 : index
    %c0_134 = arith.constant 0 : index
    %431 = vector.load %arg9[%c48_133, %c0_134] : memref<64x512xf32, #tpu.memory_space<vmem>>, vector<8x512xf32>
    %cst_135 = arith.constant dense<0.000000e+00> : vector<8x512xf32>
    %432 = tpu.matmul %429, %248, %cst_135 {dimension_numbers = #tpu.dot_dimension_numbers<[1], [0], [0], [1], [0, 0, 1, 1], [], []>} : vector<8x128xf32>, vector<128x512xf32>, vector<8x512xf32> -> vector<8x512xf32>
    %433 = arith.addf %431, %432 : vector<8x512xf32>
    %434 = vector.extract_strided_slice %433 {offsets = [0, 0], sizes = [8, 128], strides = [1, 1]} : vector<8x512xf32> to vector<8x128xf32>
    %435 = arith.negf %434 : vector<8x128xf32>
    %436 = math.exp %435 : vector<8x128xf32>
    %cst_136 = arith.constant 1.000000e+00 : f32
    %437 = vector.broadcast %cst_136 : f32 to vector<8x128xf32>
    %438 = arith.addf %437, %436 : vector<8x128xf32>
    %439 = arith.divf %437, %438 : vector<8x128xf32>
    %440 = vector.extract_strided_slice %433 {offsets = [0, 128], sizes = [8, 128], strides = [1, 1]} : vector<8x512xf32> to vector<8x128xf32>
    %441 = arith.negf %440 : vector<8x128xf32>
    %442 = math.exp %441 : vector<8x128xf32>
    %cst_137 = arith.constant 1.000000e+00 : f32
    %443 = vector.broadcast %cst_137 : f32 to vector<8x128xf32>
    %444 = arith.addf %443, %442 : vector<8x128xf32>
    %445 = arith.divf %443, %444 : vector<8x128xf32>
    %446 = vector.extract_strided_slice %433 {offsets = [0, 256], sizes = [8, 128], strides = [1, 1]} : vector<8x512xf32> to vector<8x128xf32>
    %447 = math.tanh %446 : vector<8x128xf32>
    %448 = vector.extract_strided_slice %433 {offsets = [0, 384], sizes = [8, 128], strides = [1, 1]} : vector<8x512xf32> to vector<8x128xf32>
    %449 = arith.negf %448 : vector<8x128xf32>
    %450 = math.exp %449 : vector<8x128xf32>
    %cst_138 = arith.constant 1.000000e+00 : f32
    %451 = vector.broadcast %cst_138 : f32 to vector<8x128xf32>
    %452 = arith.addf %451, %450 : vector<8x128xf32>
    %453 = arith.divf %451, %452 : vector<8x128xf32>
    %454 = arith.mulf %445, %427 : vector<8x128xf32>
    %455 = arith.mulf %439, %447 : vector<8x128xf32>
    %456 = arith.addf %454, %455 : vector<8x128xf32>
    %457 = math.tanh %456 : vector<8x128xf32>
    %458 = arith.mulf %453, %457 : vector<8x128xf32>
    %c48_139 = arith.constant 48 : index
    %c0_140 = arith.constant 0 : index
    %459 = vector.load %arg8[%c48_139, %c0_140] : memref<64x128xf32, #tpu.memory_space<vmem>>, vector<8x128xf32>
    tpu.vector_store %arg8[%c48_139, %c0_140], %458 {strides = array<i32>} : memref<64x128xf32, #tpu.memory_space<vmem>>, vector<8x128xf32>,
    %c56_141 = arith.constant 56 : index
    %c0_142 = arith.constant 0 : index
    %460 = vector.load %arg9[%c56_141, %c0_142] : memref<64x512xf32, #tpu.memory_space<vmem>>, vector<8x512xf32>
    %cst_143 = arith.constant dense<0.000000e+00> : vector<8x512xf32>
    %461 = tpu.matmul %458, %248, %cst_143 {dimension_numbers = #tpu.dot_dimension_numbers<[1], [0], [0], [1], [0, 0, 1, 1], [], []>} : vector<8x128xf32>, vector<128x512xf32>, vector<8x512xf32> -> vector<8x512xf32>
    %462 = arith.addf %460, %461 : vector<8x512xf32>
    %463 = vector.extract_strided_slice %462 {offsets = [0, 0], sizes = [8, 128], strides = [1, 1]} : vector<8x512xf32> to vector<8x128xf32>
    %464 = arith.negf %463 : vector<8x128xf32>
    %465 = math.exp %464 : vector<8x128xf32>
    %cst_144 = arith.constant 1.000000e+00 : f32
    %466 = vector.broadcast %cst_144 : f32 to vector<8x128xf32>
    %467 = arith.addf %466, %465 : vector<8x128xf32>
    %468 = arith.divf %466, %467 : vector<8x128xf32>
    %469 = vector.extract_strided_slice %462 {offsets = [0, 128], sizes = [8, 128], strides = [1, 1]} : vector<8x512xf32> to vector<8x128xf32>
    %470 = arith.negf %469 : vector<8x128xf32>
    %471 = math.exp %470 : vector<8x128xf32>
    %cst_145 = arith.constant 1.000000e+00 : f32
    %472 = vector.broadcast %cst_145 : f32 to vector<8x128xf32>
    %473 = arith.addf %472, %471 : vector<8x128xf32>
    %474 = arith.divf %472, %473 : vector<8x128xf32>
    %475 = vector.extract_strided_slice %462 {offsets = [0, 256], sizes = [8, 128], strides = [1, 1]} : vector<8x512xf32> to vector<8x128xf32>
    %476 = math.tanh %475 : vector<8x128xf32>
    %477 = vector.extract_strided_slice %462 {offsets = [0, 384], sizes = [8, 128], strides = [1, 1]} : vector<8x512xf32> to vector<8x128xf32>
    %478 = arith.negf %477 : vector<8x128xf32>
    %479 = math.exp %478 : vector<8x128xf32>
    %cst_146 = arith.constant 1.000000e+00 : f32
    %480 = vector.broadcast %cst_146 : f32 to vector<8x128xf32>
    %481 = arith.addf %480, %479 : vector<8x128xf32>
    %482 = arith.divf %480, %481 : vector<8x128xf32>
    %483 = arith.mulf %474, %456 : vector<8x128xf32>
    %484 = arith.mulf %468, %476 : vector<8x128xf32>
    %485 = arith.addf %483, %484 : vector<8x128xf32>
    %486 = math.tanh %485 : vector<8x128xf32>
    %487 = arith.mulf %482, %486 : vector<8x128xf32>
    %c56_147 = arith.constant 56 : index
    %c0_148 = arith.constant 0 : index
    %488 = vector.load %arg8[%c56_147, %c0_148] : memref<64x128xf32, #tpu.memory_space<vmem>>, vector<8x128xf32>
    tpu.vector_store %arg8[%c56_147, %c0_148], %487 {strides = array<i32>} : memref<64x128xf32, #tpu.memory_space<vmem>>, vector<8x128xf32>,
    %c0_149 = arith.constant 0 : index
    %c0_150 = arith.constant 0 : index
    %489 = vector.load %arg8[%c0_149, %c0_150] : memref<64x128xf32, #tpu.memory_space<vmem>>, vector<64x128xf32>
    %c1_151 = arith.constant 1 : index
    %c0_152 = arith.constant 0 : index
    %c0_153 = arith.constant 0 : index
    %490 = vector.load %arg2[%c1_151, %c0_152, %c0_153] : memref<4x128x512xf32, #tpu.memory_space<vmem>>, vector<1x128x512xf32>
    %491 = vector.shape_cast %490 : vector<1x128x512xf32> to vector<128x512xf32>
    %c2 = arith.constant 2 : index
    %c0_154 = arith.constant 0 : index
    %c0_155 = arith.constant 0 : index
    %492 = vector.load %arg3[%c2, %c0_154, %c0_155] : memref<5x128x512xf32, #tpu.memory_space<vmem>>, vector<1x128x512xf32>
    %493 = vector.shape_cast %492 : vector<1x128x512xf32> to vector<128x512xf32>
    %c2_156 = arith.constant 2 : index
    %c0_157 = arith.constant 0 : index
    %c0_158 = arith.constant 0 : index
    %494 = vector.load %arg4[%c2_156, %c0_157, %c0_158] : memref<5x1x512xf32, #tpu.memory_space<vmem>>, vector<1x1x512xf32>
    %495 = vector.shape_cast %494 : vector<1x1x512xf32> to vector<1x512xf32>
    %cst_159 = arith.constant dense<0.000000e+00> : vector<64x512xf32>
    %496 = tpu.matmul %489, %491, %cst_159 {dimension_numbers = #tpu.dot_dimension_numbers<[1], [0], [0], [1], [0, 0, 1, 1], [], []>} : vector<64x128xf32>, vector<128x512xf32>, vector<64x512xf32> -> vector<64x512xf32>
    %497 = vector.broadcast %495 : vector<1x512xf32> to vector<64x512xf32>
    %498 = arith.addf %496, %497 : vector<64x512xf32>
    %c0_160 = arith.constant 0 : index
    %c0_161 = arith.constant 0 : index
    %499 = vector.load %arg9[%c0_160, %c0_161] : memref<64x512xf32, #tpu.memory_space<vmem>>, vector<64x512xf32>
    tpu.vector_store %arg9[%c0_160, %c0_161], %498 {strides = array<i32>} : memref<64x512xf32, #tpu.memory_space<vmem>>, vector<64x512xf32>,
    %cst_162 = arith.constant 0.000000e+00 : f32
    %500 = vector.broadcast %cst_162 : f32 to vector<8x128xf32>
    %cst_163 = arith.constant 0.000000e+00 : f32
    %501 = vector.broadcast %cst_163 : f32 to vector<8x128xf32>
    %c0_164 = arith.constant 0 : index
    %c0_165 = arith.constant 0 : index
    %502 = vector.load %arg9[%c0_164, %c0_165] : memref<64x512xf32, #tpu.memory_space<vmem>>, vector<8x512xf32>
    %cst_166 = arith.constant dense<0.000000e+00> : vector<8x512xf32>
    %503 = tpu.matmul %500, %493, %cst_166 {dimension_numbers = #tpu.dot_dimension_numbers<[1], [0], [0], [1], [0, 0, 1, 1], [], []>} : vector<8x128xf32>, vector<128x512xf32>, vector<8x512xf32> -> vector<8x512xf32>
    %504 = arith.addf %502, %503 : vector<8x512xf32>
    %505 = vector.extract_strided_slice %504 {offsets = [0, 0], sizes = [8, 128], strides = [1, 1]} : vector<8x512xf32> to vector<8x128xf32>
    %506 = arith.negf %505 : vector<8x128xf32>
    %507 = math.exp %506 : vector<8x128xf32>
    %cst_167 = arith.constant 1.000000e+00 : f32
    %508 = vector.broadcast %cst_167 : f32 to vector<8x128xf32>
    %509 = arith.addf %508, %507 : vector<8x128xf32>
    %510 = arith.divf %508, %509 : vector<8x128xf32>
    %511 = vector.extract_strided_slice %504 {offsets = [0, 128], sizes = [8, 128], strides = [1, 1]} : vector<8x512xf32> to vector<8x128xf32>
    %512 = arith.negf %511 : vector<8x128xf32>
    %513 = math.exp %512 : vector<8x128xf32>
    %cst_168 = arith.constant 1.000000e+00 : f32
    %514 = vector.broadcast %cst_168 : f32 to vector<8x128xf32>
    %515 = arith.addf %514, %513 : vector<8x128xf32>
    %516 = arith.divf %514, %515 : vector<8x128xf32>
    %517 = vector.extract_strided_slice %504 {offsets = [0, 256], sizes = [8, 128], strides = [1, 1]} : vector<8x512xf32> to vector<8x128xf32>
    %518 = math.tanh %517 : vector<8x128xf32>
    %519 = vector.extract_strided_slice %504 {offsets = [0, 384], sizes = [8, 128], strides = [1, 1]} : vector<8x512xf32> to vector<8x128xf32>
    %520 = arith.negf %519 : vector<8x128xf32>
    %521 = math.exp %520 : vector<8x128xf32>
    %cst_169 = arith.constant 1.000000e+00 : f32
    %522 = vector.broadcast %cst_169 : f32 to vector<8x128xf32>
    %523 = arith.addf %522, %521 : vector<8x128xf32>
    %524 = arith.divf %522, %523 : vector<8x128xf32>
    %525 = arith.mulf %516, %501 : vector<8x128xf32>
    %526 = arith.mulf %510, %518 : vector<8x128xf32>
    %527 = arith.addf %525, %526 : vector<8x128xf32>
    %528 = math.tanh %527 : vector<8x128xf32>
    %529 = arith.mulf %524, %528 : vector<8x128xf32>
    %c0_170 = arith.constant 0 : index
    %c0_171 = arith.constant 0 : index
    %530 = vector.load %arg8[%c0_170, %c0_171] : memref<64x128xf32, #tpu.memory_space<vmem>>, vector<8x128xf32>
    tpu.vector_store %arg8[%c0_170, %c0_171], %529 {strides = array<i32>} : memref<64x128xf32, #tpu.memory_space<vmem>>, vector<8x128xf32>,
    %c8_172 = arith.constant 8 : index
    %c0_173 = arith.constant 0 : index
    %531 = vector.load %arg9[%c8_172, %c0_173] : memref<64x512xf32, #tpu.memory_space<vmem>>, vector<8x512xf32>
    %cst_174 = arith.constant dense<0.000000e+00> : vector<8x512xf32>
    %532 = tpu.matmul %529, %493, %cst_174 {dimension_numbers = #tpu.dot_dimension_numbers<[1], [0], [0], [1], [0, 0, 1, 1], [], []>} : vector<8x128xf32>, vector<128x512xf32>, vector<8x512xf32> -> vector<8x512xf32>
    %533 = arith.addf %531, %532 : vector<8x512xf32>
    %534 = vector.extract_strided_slice %533 {offsets = [0, 0], sizes = [8, 128], strides = [1, 1]} : vector<8x512xf32> to vector<8x128xf32>
    %535 = arith.negf %534 : vector<8x128xf32>
    %536 = math.exp %535 : vector<8x128xf32>
    %cst_175 = arith.constant 1.000000e+00 : f32
    %537 = vector.broadcast %cst_175 : f32 to vector<8x128xf32>
    %538 = arith.addf %537, %536 : vector<8x128xf32>
    %539 = arith.divf %537, %538 : vector<8x128xf32>
    %540 = vector.extract_strided_slice %533 {offsets = [0, 128], sizes = [8, 128], strides = [1, 1]} : vector<8x512xf32> to vector<8x128xf32>
    %541 = arith.negf %540 : vector<8x128xf32>
    %542 = math.exp %541 : vector<8x128xf32>
    %cst_176 = arith.constant 1.000000e+00 : f32
    %543 = vector.broadcast %cst_176 : f32 to vector<8x128xf32>
    %544 = arith.addf %543, %542 : vector<8x128xf32>
    %545 = arith.divf %543, %544 : vector<8x128xf32>
    %546 = vector.extract_strided_slice %533 {offsets = [0, 256], sizes = [8, 128], strides = [1, 1]} : vector<8x512xf32> to vector<8x128xf32>
    %547 = math.tanh %546 : vector<8x128xf32>
    %548 = vector.extract_strided_slice %533 {offsets = [0, 384], sizes = [8, 128], strides = [1, 1]} : vector<8x512xf32> to vector<8x128xf32>
    %549 = arith.negf %548 : vector<8x128xf32>
    %550 = math.exp %549 : vector<8x128xf32>
    %cst_177 = arith.constant 1.000000e+00 : f32
    %551 = vector.broadcast %cst_177 : f32 to vector<8x128xf32>
    %552 = arith.addf %551, %550 : vector<8x128xf32>
    %553 = arith.divf %551, %552 : vector<8x128xf32>
    %554 = arith.mulf %545, %527 : vector<8x128xf32>
    %555 = arith.mulf %539, %547 : vector<8x128xf32>
    %556 = arith.addf %554, %555 : vector<8x128xf32>
    %557 = math.tanh %556 : vector<8x128xf32>
    %558 = arith.mulf %553, %557 : vector<8x128xf32>
    %c8_178 = arith.constant 8 : index
    %c0_179 = arith.constant 0 : index
    %559 = vector.load %arg8[%c8_178, %c0_179] : memref<64x128xf32, #tpu.memory_space<vmem>>, vector<8x128xf32>
    tpu.vector_store %arg8[%c8_178, %c0_179], %558 {strides = array<i32>} : memref<64x128xf32, #tpu.memory_space<vmem>>, vector<8x128xf32>,
    %c16_180 = arith.constant 16 : index
    %c0_181 = arith.constant 0 : index
    %560 = vector.load %arg9[%c16_180, %c0_181] : memref<64x512xf32, #tpu.memory_space<vmem>>, vector<8x512xf32>
    %cst_182 = arith.constant dense<0.000000e+00> : vector<8x512xf32>
    %561 = tpu.matmul %558, %493, %cst_182 {dimension_numbers = #tpu.dot_dimension_numbers<[1], [0], [0], [1], [0, 0, 1, 1], [], []>} : vector<8x128xf32>, vector<128x512xf32>, vector<8x512xf32> -> vector<8x512xf32>
    %562 = arith.addf %560, %561 : vector<8x512xf32>
    %563 = vector.extract_strided_slice %562 {offsets = [0, 0], sizes = [8, 128], strides = [1, 1]} : vector<8x512xf32> to vector<8x128xf32>
    %564 = arith.negf %563 : vector<8x128xf32>
    %565 = math.exp %564 : vector<8x128xf32>
    %cst_183 = arith.constant 1.000000e+00 : f32
    %566 = vector.broadcast %cst_183 : f32 to vector<8x128xf32>
    %567 = arith.addf %566, %565 : vector<8x128xf32>
    %568 = arith.divf %566, %567 : vector<8x128xf32>
    %569 = vector.extract_strided_slice %562 {offsets = [0, 128], sizes = [8, 128], strides = [1, 1]} : vector<8x512xf32> to vector<8x128xf32>
    %570 = arith.negf %569 : vector<8x128xf32>
    %571 = math.exp %570 : vector<8x128xf32>
    %cst_184 = arith.constant 1.000000e+00 : f32
    %572 = vector.broadcast %cst_184 : f32 to vector<8x128xf32>
    %573 = arith.addf %572, %571 : vector<8x128xf32>
    %574 = arith.divf %572, %573 : vector<8x128xf32>
    %575 = vector.extract_strided_slice %562 {offsets = [0, 256], sizes = [8, 128], strides = [1, 1]} : vector<8x512xf32> to vector<8x128xf32>
    %576 = math.tanh %575 : vector<8x128xf32>
    %577 = vector.extract_strided_slice %562 {offsets = [0, 384], sizes = [8, 128], strides = [1, 1]} : vector<8x512xf32> to vector<8x128xf32>
    %578 = arith.negf %577 : vector<8x128xf32>
    %579 = math.exp %578 : vector<8x128xf32>
    %cst_185 = arith.constant 1.000000e+00 : f32
    %580 = vector.broadcast %cst_185 : f32 to vector<8x128xf32>
    %581 = arith.addf %580, %579 : vector<8x128xf32>
    %582 = arith.divf %580, %581 : vector<8x128xf32>
    %583 = arith.mulf %574, %556 : vector<8x128xf32>
    %584 = arith.mulf %568, %576 : vector<8x128xf32>
    %585 = arith.addf %583, %584 : vector<8x128xf32>
    %586 = math.tanh %585 : vector<8x128xf32>
    %587 = arith.mulf %582, %586 : vector<8x128xf32>
    %c16_186 = arith.constant 16 : index
    %c0_187 = arith.constant 0 : index
    %588 = vector.load %arg8[%c16_186, %c0_187] : memref<64x128xf32, #tpu.memory_space<vmem>>, vector<8x128xf32>
    tpu.vector_store %arg8[%c16_186, %c0_187], %587 {strides = array<i32>} : memref<64x128xf32, #tpu.memory_space<vmem>>, vector<8x128xf32>,
    %c24_188 = arith.constant 24 : index
    %c0_189 = arith.constant 0 : index
    %589 = vector.load %arg9[%c24_188, %c0_189] : memref<64x512xf32, #tpu.memory_space<vmem>>, vector<8x512xf32>
    %cst_190 = arith.constant dense<0.000000e+00> : vector<8x512xf32>
    %590 = tpu.matmul %587, %493, %cst_190 {dimension_numbers = #tpu.dot_dimension_numbers<[1], [0], [0], [1], [0, 0, 1, 1], [], []>} : vector<8x128xf32>, vector<128x512xf32>, vector<8x512xf32> -> vector<8x512xf32>
    %591 = arith.addf %589, %590 : vector<8x512xf32>
    %592 = vector.extract_strided_slice %591 {offsets = [0, 0], sizes = [8, 128], strides = [1, 1]} : vector<8x512xf32> to vector<8x128xf32>
    %593 = arith.negf %592 : vector<8x128xf32>
    %594 = math.exp %593 : vector<8x128xf32>
    %cst_191 = arith.constant 1.000000e+00 : f32
    %595 = vector.broadcast %cst_191 : f32 to vector<8x128xf32>
    %596 = arith.addf %595, %594 : vector<8x128xf32>
    %597 = arith.divf %595, %596 : vector<8x128xf32>
    %598 = vector.extract_strided_slice %591 {offsets = [0, 128], sizes = [8, 128], strides = [1, 1]} : vector<8x512xf32> to vector<8x128xf32>
    %599 = arith.negf %598 : vector<8x128xf32>
    %600 = math.exp %599 : vector<8x128xf32>
    %cst_192 = arith.constant 1.000000e+00 : f32
    %601 = vector.broadcast %cst_192 : f32 to vector<8x128xf32>
    %602 = arith.addf %601, %600 : vector<8x128xf32>
    %603 = arith.divf %601, %602 : vector<8x128xf32>
    %604 = vector.extract_strided_slice %591 {offsets = [0, 256], sizes = [8, 128], strides = [1, 1]} : vector<8x512xf32> to vector<8x128xf32>
    %605 = math.tanh %604 : vector<8x128xf32>
    %606 = vector.extract_strided_slice %591 {offsets = [0, 384], sizes = [8, 128], strides = [1, 1]} : vector<8x512xf32> to vector<8x128xf32>
    %607 = arith.negf %606 : vector<8x128xf32>
    %608 = math.exp %607 : vector<8x128xf32>
    %cst_193 = arith.constant 1.000000e+00 : f32
    %609 = vector.broadcast %cst_193 : f32 to vector<8x128xf32>
    %610 = arith.addf %609, %608 : vector<8x128xf32>
    %611 = arith.divf %609, %610 : vector<8x128xf32>
    %612 = arith.mulf %603, %585 : vector<8x128xf32>
    %613 = arith.mulf %597, %605 : vector<8x128xf32>
    %614 = arith.addf %612, %613 : vector<8x128xf32>
    %615 = math.tanh %614 : vector<8x128xf32>
    %616 = arith.mulf %611, %615 : vector<8x128xf32>
    %c24_194 = arith.constant 24 : index
    %c0_195 = arith.constant 0 : index
    %617 = vector.load %arg8[%c24_194, %c0_195] : memref<64x128xf32, #tpu.memory_space<vmem>>, vector<8x128xf32>
    tpu.vector_store %arg8[%c24_194, %c0_195], %616 {strides = array<i32>} : memref<64x128xf32, #tpu.memory_space<vmem>>, vector<8x128xf32>,
    %c32_196 = arith.constant 32 : index
    %c0_197 = arith.constant 0 : index
    %618 = vector.load %arg9[%c32_196, %c0_197] : memref<64x512xf32, #tpu.memory_space<vmem>>, vector<8x512xf32>
    %cst_198 = arith.constant dense<0.000000e+00> : vector<8x512xf32>
    %619 = tpu.matmul %616, %493, %cst_198 {dimension_numbers = #tpu.dot_dimension_numbers<[1], [0], [0], [1], [0, 0, 1, 1], [], []>} : vector<8x128xf32>, vector<128x512xf32>, vector<8x512xf32> -> vector<8x512xf32>
    %620 = arith.addf %618, %619 : vector<8x512xf32>
    %621 = vector.extract_strided_slice %620 {offsets = [0, 0], sizes = [8, 128], strides = [1, 1]} : vector<8x512xf32> to vector<8x128xf32>
    %622 = arith.negf %621 : vector<8x128xf32>
    %623 = math.exp %622 : vector<8x128xf32>
    %cst_199 = arith.constant 1.000000e+00 : f32
    %624 = vector.broadcast %cst_199 : f32 to vector<8x128xf32>
    %625 = arith.addf %624, %623 : vector<8x128xf32>
    %626 = arith.divf %624, %625 : vector<8x128xf32>
    %627 = vector.extract_strided_slice %620 {offsets = [0, 128], sizes = [8, 128], strides = [1, 1]} : vector<8x512xf32> to vector<8x128xf32>
    %628 = arith.negf %627 : vector<8x128xf32>
    %629 = math.exp %628 : vector<8x128xf32>
    %cst_200 = arith.constant 1.000000e+00 : f32
    %630 = vector.broadcast %cst_200 : f32 to vector<8x128xf32>
    %631 = arith.addf %630, %629 : vector<8x128xf32>
    %632 = arith.divf %630, %631 : vector<8x128xf32>
    %633 = vector.extract_strided_slice %620 {offsets = [0, 256], sizes = [8, 128], strides = [1, 1]} : vector<8x512xf32> to vector<8x128xf32>
    %634 = math.tanh %633 : vector<8x128xf32>
    %635 = vector.extract_strided_slice %620 {offsets = [0, 384], sizes = [8, 128], strides = [1, 1]} : vector<8x512xf32> to vector<8x128xf32>
    %636 = arith.negf %635 : vector<8x128xf32>
    %637 = math.exp %636 : vector<8x128xf32>
    %cst_201 = arith.constant 1.000000e+00 : f32
    %638 = vector.broadcast %cst_201 : f32 to vector<8x128xf32>
    %639 = arith.addf %638, %637 : vector<8x128xf32>
    %640 = arith.divf %638, %639 : vector<8x128xf32>
    %641 = arith.mulf %632, %614 : vector<8x128xf32>
    %642 = arith.mulf %626, %634 : vector<8x128xf32>
    %643 = arith.addf %641, %642 : vector<8x128xf32>
    %644 = math.tanh %643 : vector<8x128xf32>
    %645 = arith.mulf %640, %644 : vector<8x128xf32>
    %c32_202 = arith.constant 32 : index
    %c0_203 = arith.constant 0 : index
    %646 = vector.load %arg8[%c32_202, %c0_203] : memref<64x128xf32, #tpu.memory_space<vmem>>, vector<8x128xf32>
    tpu.vector_store %arg8[%c32_202, %c0_203], %645 {strides = array<i32>} : memref<64x128xf32, #tpu.memory_space<vmem>>, vector<8x128xf32>,
    %c40_204 = arith.constant 40 : index
    %c0_205 = arith.constant 0 : index
    %647 = vector.load %arg9[%c40_204, %c0_205] : memref<64x512xf32, #tpu.memory_space<vmem>>, vector<8x512xf32>
    %cst_206 = arith.constant dense<0.000000e+00> : vector<8x512xf32>
    %648 = tpu.matmul %645, %493, %cst_206 {dimension_numbers = #tpu.dot_dimension_numbers<[1], [0], [0], [1], [0, 0, 1, 1], [], []>} : vector<8x128xf32>, vector<128x512xf32>, vector<8x512xf32> -> vector<8x512xf32>
    %649 = arith.addf %647, %648 : vector<8x512xf32>
    %650 = vector.extract_strided_slice %649 {offsets = [0, 0], sizes = [8, 128], strides = [1, 1]} : vector<8x512xf32> to vector<8x128xf32>
    %651 = arith.negf %650 : vector<8x128xf32>
    %652 = math.exp %651 : vector<8x128xf32>
    %cst_207 = arith.constant 1.000000e+00 : f32
    %653 = vector.broadcast %cst_207 : f32 to vector<8x128xf32>
    %654 = arith.addf %653, %652 : vector<8x128xf32>
    %655 = arith.divf %653, %654 : vector<8x128xf32>
    %656 = vector.extract_strided_slice %649 {offsets = [0, 128], sizes = [8, 128], strides = [1, 1]} : vector<8x512xf32> to vector<8x128xf32>
    %657 = arith.negf %656 : vector<8x128xf32>
    %658 = math.exp %657 : vector<8x128xf32>
    %cst_208 = arith.constant 1.000000e+00 : f32
    %659 = vector.broadcast %cst_208 : f32 to vector<8x128xf32>
    %660 = arith.addf %659, %658 : vector<8x128xf32>
    %661 = arith.divf %659, %660 : vector<8x128xf32>
    %662 = vector.extract_strided_slice %649 {offsets = [0, 256], sizes = [8, 128], strides = [1, 1]} : vector<8x512xf32> to vector<8x128xf32>
    %663 = math.tanh %662 : vector<8x128xf32>
    %664 = vector.extract_strided_slice %649 {offsets = [0, 384], sizes = [8, 128], strides = [1, 1]} : vector<8x512xf32> to vector<8x128xf32>
    %665 = arith.negf %664 : vector<8x128xf32>
    %666 = math.exp %665 : vector<8x128xf32>
    %cst_209 = arith.constant 1.000000e+00 : f32
    %667 = vector.broadcast %cst_209 : f32 to vector<8x128xf32>
    %668 = arith.addf %667, %666 : vector<8x128xf32>
    %669 = arith.divf %667, %668 : vector<8x128xf32>
    %670 = arith.mulf %661, %643 : vector<8x128xf32>
    %671 = arith.mulf %655, %663 : vector<8x128xf32>
    %672 = arith.addf %670, %671 : vector<8x128xf32>
    %673 = math.tanh %672 : vector<8x128xf32>
    %674 = arith.mulf %669, %673 : vector<8x128xf32>
    %c40_210 = arith.constant 40 : index
    %c0_211 = arith.constant 0 : index
    %675 = vector.load %arg8[%c40_210, %c0_211] : memref<64x128xf32, #tpu.memory_space<vmem>>, vector<8x128xf32>
    tpu.vector_store %arg8[%c40_210, %c0_211], %674 {strides = array<i32>} : memref<64x128xf32, #tpu.memory_space<vmem>>, vector<8x128xf32>,
    %c48_212 = arith.constant 48 : index
    %c0_213 = arith.constant 0 : index
    %676 = vector.load %arg9[%c48_212, %c0_213] : memref<64x512xf32, #tpu.memory_space<vmem>>, vector<8x512xf32>
    %cst_214 = arith.constant dense<0.000000e+00> : vector<8x512xf32>
    %677 = tpu.matmul %674, %493, %cst_214 {dimension_numbers = #tpu.dot_dimension_numbers<[1], [0], [0], [1], [0, 0, 1, 1], [], []>} : vector<8x128xf32>, vector<128x512xf32>, vector<8x512xf32> -> vector<8x512xf32>
    %678 = arith.addf %676, %677 : vector<8x512xf32>
    %679 = vector.extract_strided_slice %678 {offsets = [0, 0], sizes = [8, 128], strides = [1, 1]} : vector<8x512xf32> to vector<8x128xf32>
    %680 = arith.negf %679 : vector<8x128xf32>
    %681 = math.exp %680 : vector<8x128xf32>
    %cst_215 = arith.constant 1.000000e+00 : f32
    %682 = vector.broadcast %cst_215 : f32 to vector<8x128xf32>
    %683 = arith.addf %682, %681 : vector<8x128xf32>
    %684 = arith.divf %682, %683 : vector<8x128xf32>
    %685 = vector.extract_strided_slice %678 {offsets = [0, 128], sizes = [8, 128], strides = [1, 1]} : vector<8x512xf32> to vector<8x128xf32>
    %686 = arith.negf %685 : vector<8x128xf32>
    %687 = math.exp %686 : vector<8x128xf32>
    %cst_216 = arith.constant 1.000000e+00 : f32
    %688 = vector.broadcast %cst_216 : f32 to vector<8x128xf32>
    %689 = arith.addf %688, %687 : vector<8x128xf32>
    %690 = arith.divf %688, %689 : vector<8x128xf32>
    %691 = vector.extract_strided_slice %678 {offsets = [0, 256], sizes = [8, 128], strides = [1, 1]} : vector<8x512xf32> to vector<8x128xf32>
    %692 = math.tanh %691 : vector<8x128xf32>
    %693 = vector.extract_strided_slice %678 {offsets = [0, 384], sizes = [8, 128], strides = [1, 1]} : vector<8x512xf32> to vector<8x128xf32>
    %694 = arith.negf %693 : vector<8x128xf32>
    %695 = math.exp %694 : vector<8x128xf32>
    %cst_217 = arith.constant 1.000000e+00 : f32
    %696 = vector.broadcast %cst_217 : f32 to vector<8x128xf32>
    %697 = arith.addf %696, %695 : vector<8x128xf32>
    %698 = arith.divf %696, %697 : vector<8x128xf32>
    %699 = arith.mulf %690, %672 : vector<8x128xf32>
    %700 = arith.mulf %684, %692 : vector<8x128xf32>
    %701 = arith.addf %699, %700 : vector<8x128xf32>
    %702 = math.tanh %701 : vector<8x128xf32>
    %703 = arith.mulf %698, %702 : vector<8x128xf32>
    %c48_218 = arith.constant 48 : index
    %c0_219 = arith.constant 0 : index
    %704 = vector.load %arg8[%c48_218, %c0_219] : memref<64x128xf32, #tpu.memory_space<vmem>>, vector<8x128xf32>
    tpu.vector_store %arg8[%c48_218, %c0_219], %703 {strides = array<i32>} : memref<64x128xf32, #tpu.memory_space<vmem>>, vector<8x128xf32>,
    %c56_220 = arith.constant 56 : index
    %c0_221 = arith.constant 0 : index
    %705 = vector.load %arg9[%c56_220, %c0_221] : memref<64x512xf32, #tpu.memory_space<vmem>>, vector<8x512xf32>
    %cst_222 = arith.constant dense<0.000000e+00> : vector<8x512xf32>
    %706 = tpu.matmul %703, %493, %cst_222 {dimension_numbers = #tpu.dot_dimension_numbers<[1], [0], [0], [1], [0, 0, 1, 1], [], []>} : vector<8x128xf32>, vector<128x512xf32>, vector<8x512xf32> -> vector<8x512xf32>
    %707 = arith.addf %705, %706 : vector<8x512xf32>
    %708 = vector.extract_strided_slice %707 {offsets = [0, 0], sizes = [8, 128], strides = [1, 1]} : vector<8x512xf32> to vector<8x128xf32>
    %709 = arith.negf %708 : vector<8x128xf32>
    %710 = math.exp %709 : vector<8x128xf32>
    %cst_223 = arith.constant 1.000000e+00 : f32
    %711 = vector.broadcast %cst_223 : f32 to vector<8x128xf32>
    %712 = arith.addf %711, %710 : vector<8x128xf32>
    %713 = arith.divf %711, %712 : vector<8x128xf32>
    %714 = vector.extract_strided_slice %707 {offsets = [0, 128], sizes = [8, 128], strides = [1, 1]} : vector<8x512xf32> to vector<8x128xf32>
    %715 = arith.negf %714 : vector<8x128xf32>
    %716 = math.exp %715 : vector<8x128xf32>
    %cst_224 = arith.constant 1.000000e+00 : f32
    %717 = vector.broadcast %cst_224 : f32 to vector<8x128xf32>
    %718 = arith.addf %717, %716 : vector<8x128xf32>
    %719 = arith.divf %717, %718 : vector<8x128xf32>
    %720 = vector.extract_strided_slice %707 {offsets = [0, 256], sizes = [8, 128], strides = [1, 1]} : vector<8x512xf32> to vector<8x128xf32>
    %721 = math.tanh %720 : vector<8x128xf32>
    %722 = vector.extract_strided_slice %707 {offsets = [0, 384], sizes = [8, 128], strides = [1, 1]} : vector<8x512xf32> to vector<8x128xf32>
    %723 = arith.negf %722 : vector<8x128xf32>
    %724 = math.exp %723 : vector<8x128xf32>
    %cst_225 = arith.constant 1.000000e+00 : f32
    %725 = vector.broadcast %cst_225 : f32 to vector<8x128xf32>
    %726 = arith.addf %725, %724 : vector<8x128xf32>
    %727 = arith.divf %725, %726 : vector<8x128xf32>
    %728 = arith.mulf %719, %701 : vector<8x128xf32>
    %729 = arith.mulf %713, %721 : vector<8x128xf32>
    %730 = arith.addf %728, %729 : vector<8x128xf32>
    %731 = math.tanh %730 : vector<8x128xf32>
    %732 = arith.mulf %727, %731 : vector<8x128xf32>
    %c56_226 = arith.constant 56 : index
    %c0_227 = arith.constant 0 : index
    %733 = vector.load %arg8[%c56_226, %c0_227] : memref<64x128xf32, #tpu.memory_space<vmem>>, vector<8x128xf32>
    tpu.vector_store %arg8[%c56_226, %c0_227], %732 {strides = array<i32>} : memref<64x128xf32, #tpu.memory_space<vmem>>, vector<8x128xf32>,
    %c0_228 = arith.constant 0 : index
    %c0_229 = arith.constant 0 : index
    %734 = vector.load %arg8[%c0_228, %c0_229] : memref<64x128xf32, #tpu.memory_space<vmem>>, vector<64x128xf32>
    %c2_230 = arith.constant 2 : index
    %c0_231 = arith.constant 0 : index
    %c0_232 = arith.constant 0 : index
    %735 = vector.load %arg2[%c2_230, %c0_231, %c0_232] : memref<4x128x512xf32, #tpu.memory_space<vmem>>, vector<1x128x512xf32>
    %736 = vector.shape_cast %735 : vector<1x128x512xf32> to vector<128x512xf32>
    %c3 = arith.constant 3 : index
    %c0_233 = arith.constant 0 : index
    %c0_234 = arith.constant 0 : index
    %737 = vector.load %arg3[%c3, %c0_233, %c0_234] : memref<5x128x512xf32, #tpu.memory_space<vmem>>, vector<1x128x512xf32>
    %738 = vector.shape_cast %737 : vector<1x128x512xf32> to vector<128x512xf32>
    %c3_235 = arith.constant 3 : index
    %c0_236 = arith.constant 0 : index
    %c0_237 = arith.constant 0 : index
    %739 = vector.load %arg4[%c3_235, %c0_236, %c0_237] : memref<5x1x512xf32, #tpu.memory_space<vmem>>, vector<1x1x512xf32>
    %740 = vector.shape_cast %739 : vector<1x1x512xf32> to vector<1x512xf32>
    %cst_238 = arith.constant dense<0.000000e+00> : vector<64x512xf32>
    %741 = tpu.matmul %734, %736, %cst_238 {dimension_numbers = #tpu.dot_dimension_numbers<[1], [0], [0], [1], [0, 0, 1, 1], [], []>} : vector<64x128xf32>, vector<128x512xf32>, vector<64x512xf32> -> vector<64x512xf32>
    %742 = vector.broadcast %740 : vector<1x512xf32> to vector<64x512xf32>
    %743 = arith.addf %741, %742 : vector<64x512xf32>
    %c0_239 = arith.constant 0 : index
    %c0_240 = arith.constant 0 : index
    %744 = vector.load %arg9[%c0_239, %c0_240] : memref<64x512xf32, #tpu.memory_space<vmem>>, vector<64x512xf32>
    tpu.vector_store %arg9[%c0_239, %c0_240], %743 {strides = array<i32>} : memref<64x512xf32, #tpu.memory_space<vmem>>, vector<64x512xf32>,
    %cst_241 = arith.constant 0.000000e+00 : f32
    %745 = vector.broadcast %cst_241 : f32 to vector<8x128xf32>
    %cst_242 = arith.constant 0.000000e+00 : f32
    %746 = vector.broadcast %cst_242 : f32 to vector<8x128xf32>
    %c0_243 = arith.constant 0 : index
    %c0_244 = arith.constant 0 : index
    %747 = vector.load %arg9[%c0_243, %c0_244] : memref<64x512xf32, #tpu.memory_space<vmem>>, vector<8x512xf32>
    %cst_245 = arith.constant dense<0.000000e+00> : vector<8x512xf32>
    %748 = tpu.matmul %745, %738, %cst_245 {dimension_numbers = #tpu.dot_dimension_numbers<[1], [0], [0], [1], [0, 0, 1, 1], [], []>} : vector<8x128xf32>, vector<128x512xf32>, vector<8x512xf32> -> vector<8x512xf32>
    %749 = arith.addf %747, %748 : vector<8x512xf32>
    %750 = vector.extract_strided_slice %749 {offsets = [0, 0], sizes = [8, 128], strides = [1, 1]} : vector<8x512xf32> to vector<8x128xf32>
    %751 = arith.negf %750 : vector<8x128xf32>
    %752 = math.exp %751 : vector<8x128xf32>
    %cst_246 = arith.constant 1.000000e+00 : f32
    %753 = vector.broadcast %cst_246 : f32 to vector<8x128xf32>
    %754 = arith.addf %753, %752 : vector<8x128xf32>
    %755 = arith.divf %753, %754 : vector<8x128xf32>
    %756 = vector.extract_strided_slice %749 {offsets = [0, 128], sizes = [8, 128], strides = [1, 1]} : vector<8x512xf32> to vector<8x128xf32>
    %757 = arith.negf %756 : vector<8x128xf32>
    %758 = math.exp %757 : vector<8x128xf32>
    %cst_247 = arith.constant 1.000000e+00 : f32
    %759 = vector.broadcast %cst_247 : f32 to vector<8x128xf32>
    %760 = arith.addf %759, %758 : vector<8x128xf32>
    %761 = arith.divf %759, %760 : vector<8x128xf32>
    %762 = vector.extract_strided_slice %749 {offsets = [0, 256], sizes = [8, 128], strides = [1, 1]} : vector<8x512xf32> to vector<8x128xf32>
    %763 = math.tanh %762 : vector<8x128xf32>
    %764 = vector.extract_strided_slice %749 {offsets = [0, 384], sizes = [8, 128], strides = [1, 1]} : vector<8x512xf32> to vector<8x128xf32>
    %765 = arith.negf %764 : vector<8x128xf32>
    %766 = math.exp %765 : vector<8x128xf32>
    %cst_248 = arith.constant 1.000000e+00 : f32
    %767 = vector.broadcast %cst_248 : f32 to vector<8x128xf32>
    %768 = arith.addf %767, %766 : vector<8x128xf32>
    %769 = arith.divf %767, %768 : vector<8x128xf32>
    %770 = arith.mulf %761, %746 : vector<8x128xf32>
    %771 = arith.mulf %755, %763 : vector<8x128xf32>
    %772 = arith.addf %770, %771 : vector<8x128xf32>
    %773 = math.tanh %772 : vector<8x128xf32>
    %774 = arith.mulf %769, %773 : vector<8x128xf32>
    %c0_249 = arith.constant 0 : index
    %c0_250 = arith.constant 0 : index
    %775 = vector.load %arg8[%c0_249, %c0_250] : memref<64x128xf32, #tpu.memory_space<vmem>>, vector<8x128xf32>
    tpu.vector_store %arg8[%c0_249, %c0_250], %774 {strides = array<i32>} : memref<64x128xf32, #tpu.memory_space<vmem>>, vector<8x128xf32>,
    %c8_251 = arith.constant 8 : index
    %c0_252 = arith.constant 0 : index
    %776 = vector.load %arg9[%c8_251, %c0_252] : memref<64x512xf32, #tpu.memory_space<vmem>>, vector<8x512xf32>
    %cst_253 = arith.constant dense<0.000000e+00> : vector<8x512xf32>
    %777 = tpu.matmul %774, %738, %cst_253 {dimension_numbers = #tpu.dot_dimension_numbers<[1], [0], [0], [1], [0, 0, 1, 1], [], []>} : vector<8x128xf32>, vector<128x512xf32>, vector<8x512xf32> -> vector<8x512xf32>
    %778 = arith.addf %776, %777 : vector<8x512xf32>
    %779 = vector.extract_strided_slice %778 {offsets = [0, 0], sizes = [8, 128], strides = [1, 1]} : vector<8x512xf32> to vector<8x128xf32>
    %780 = arith.negf %779 : vector<8x128xf32>
    %781 = math.exp %780 : vector<8x128xf32>
    %cst_254 = arith.constant 1.000000e+00 : f32
    %782 = vector.broadcast %cst_254 : f32 to vector<8x128xf32>
    %783 = arith.addf %782, %781 : vector<8x128xf32>
    %784 = arith.divf %782, %783 : vector<8x128xf32>
    %785 = vector.extract_strided_slice %778 {offsets = [0, 128], sizes = [8, 128], strides = [1, 1]} : vector<8x512xf32> to vector<8x128xf32>
    %786 = arith.negf %785 : vector<8x128xf32>
    %787 = math.exp %786 : vector<8x128xf32>
    %cst_255 = arith.constant 1.000000e+00 : f32
    %788 = vector.broadcast %cst_255 : f32 to vector<8x128xf32>
    %789 = arith.addf %788, %787 : vector<8x128xf32>
    %790 = arith.divf %788, %789 : vector<8x128xf32>
    %791 = vector.extract_strided_slice %778 {offsets = [0, 256], sizes = [8, 128], strides = [1, 1]} : vector<8x512xf32> to vector<8x128xf32>
    %792 = math.tanh %791 : vector<8x128xf32>
    %793 = vector.extract_strided_slice %778 {offsets = [0, 384], sizes = [8, 128], strides = [1, 1]} : vector<8x512xf32> to vector<8x128xf32>
    %794 = arith.negf %793 : vector<8x128xf32>
    %795 = math.exp %794 : vector<8x128xf32>
    %cst_256 = arith.constant 1.000000e+00 : f32
    %796 = vector.broadcast %cst_256 : f32 to vector<8x128xf32>
    %797 = arith.addf %796, %795 : vector<8x128xf32>
    %798 = arith.divf %796, %797 : vector<8x128xf32>
    %799 = arith.mulf %790, %772 : vector<8x128xf32>
    %800 = arith.mulf %784, %792 : vector<8x128xf32>
    %801 = arith.addf %799, %800 : vector<8x128xf32>
    %802 = math.tanh %801 : vector<8x128xf32>
    %803 = arith.mulf %798, %802 : vector<8x128xf32>
    %c8_257 = arith.constant 8 : index
    %c0_258 = arith.constant 0 : index
    %804 = vector.load %arg8[%c8_257, %c0_258] : memref<64x128xf32, #tpu.memory_space<vmem>>, vector<8x128xf32>
    tpu.vector_store %arg8[%c8_257, %c0_258], %803 {strides = array<i32>} : memref<64x128xf32, #tpu.memory_space<vmem>>, vector<8x128xf32>,
    %c16_259 = arith.constant 16 : index
    %c0_260 = arith.constant 0 : index
    %805 = vector.load %arg9[%c16_259, %c0_260] : memref<64x512xf32, #tpu.memory_space<vmem>>, vector<8x512xf32>
    %cst_261 = arith.constant dense<0.000000e+00> : vector<8x512xf32>
    %806 = tpu.matmul %803, %738, %cst_261 {dimension_numbers = #tpu.dot_dimension_numbers<[1], [0], [0], [1], [0, 0, 1, 1], [], []>} : vector<8x128xf32>, vector<128x512xf32>, vector<8x512xf32> -> vector<8x512xf32>
    %807 = arith.addf %805, %806 : vector<8x512xf32>
    %808 = vector.extract_strided_slice %807 {offsets = [0, 0], sizes = [8, 128], strides = [1, 1]} : vector<8x512xf32> to vector<8x128xf32>
    %809 = arith.negf %808 : vector<8x128xf32>
    %810 = math.exp %809 : vector<8x128xf32>
    %cst_262 = arith.constant 1.000000e+00 : f32
    %811 = vector.broadcast %cst_262 : f32 to vector<8x128xf32>
    %812 = arith.addf %811, %810 : vector<8x128xf32>
    %813 = arith.divf %811, %812 : vector<8x128xf32>
    %814 = vector.extract_strided_slice %807 {offsets = [0, 128], sizes = [8, 128], strides = [1, 1]} : vector<8x512xf32> to vector<8x128xf32>
    %815 = arith.negf %814 : vector<8x128xf32>
    %816 = math.exp %815 : vector<8x128xf32>
    %cst_263 = arith.constant 1.000000e+00 : f32
    %817 = vector.broadcast %cst_263 : f32 to vector<8x128xf32>
    %818 = arith.addf %817, %816 : vector<8x128xf32>
    %819 = arith.divf %817, %818 : vector<8x128xf32>
    %820 = vector.extract_strided_slice %807 {offsets = [0, 256], sizes = [8, 128], strides = [1, 1]} : vector<8x512xf32> to vector<8x128xf32>
    %821 = math.tanh %820 : vector<8x128xf32>
    %822 = vector.extract_strided_slice %807 {offsets = [0, 384], sizes = [8, 128], strides = [1, 1]} : vector<8x512xf32> to vector<8x128xf32>
    %823 = arith.negf %822 : vector<8x128xf32>
    %824 = math.exp %823 : vector<8x128xf32>
    %cst_264 = arith.constant 1.000000e+00 : f32
    %825 = vector.broadcast %cst_264 : f32 to vector<8x128xf32>
    %826 = arith.addf %825, %824 : vector<8x128xf32>
    %827 = arith.divf %825, %826 : vector<8x128xf32>
    %828 = arith.mulf %819, %801 : vector<8x128xf32>
    %829 = arith.mulf %813, %821 : vector<8x128xf32>
    %830 = arith.addf %828, %829 : vector<8x128xf32>
    %831 = math.tanh %830 : vector<8x128xf32>
    %832 = arith.mulf %827, %831 : vector<8x128xf32>
    %c16_265 = arith.constant 16 : index
    %c0_266 = arith.constant 0 : index
    %833 = vector.load %arg8[%c16_265, %c0_266] : memref<64x128xf32, #tpu.memory_space<vmem>>, vector<8x128xf32>
    tpu.vector_store %arg8[%c16_265, %c0_266], %832 {strides = array<i32>} : memref<64x128xf32, #tpu.memory_space<vmem>>, vector<8x128xf32>,
    %c24_267 = arith.constant 24 : index
    %c0_268 = arith.constant 0 : index
    %834 = vector.load %arg9[%c24_267, %c0_268] : memref<64x512xf32, #tpu.memory_space<vmem>>, vector<8x512xf32>
    %cst_269 = arith.constant dense<0.000000e+00> : vector<8x512xf32>
    %835 = tpu.matmul %832, %738, %cst_269 {dimension_numbers = #tpu.dot_dimension_numbers<[1], [0], [0], [1], [0, 0, 1, 1], [], []>} : vector<8x128xf32>, vector<128x512xf32>, vector<8x512xf32> -> vector<8x512xf32>
    %836 = arith.addf %834, %835 : vector<8x512xf32>
    %837 = vector.extract_strided_slice %836 {offsets = [0, 0], sizes = [8, 128], strides = [1, 1]} : vector<8x512xf32> to vector<8x128xf32>
    %838 = arith.negf %837 : vector<8x128xf32>
    %839 = math.exp %838 : vector<8x128xf32>
    %cst_270 = arith.constant 1.000000e+00 : f32
    %840 = vector.broadcast %cst_270 : f32 to vector<8x128xf32>
    %841 = arith.addf %840, %839 : vector<8x128xf32>
    %842 = arith.divf %840, %841 : vector<8x128xf32>
    %843 = vector.extract_strided_slice %836 {offsets = [0, 128], sizes = [8, 128], strides = [1, 1]} : vector<8x512xf32> to vector<8x128xf32>
    %844 = arith.negf %843 : vector<8x128xf32>
    %845 = math.exp %844 : vector<8x128xf32>
    %cst_271 = arith.constant 1.000000e+00 : f32
    %846 = vector.broadcast %cst_271 : f32 to vector<8x128xf32>
    %847 = arith.addf %846, %845 : vector<8x128xf32>
    %848 = arith.divf %846, %847 : vector<8x128xf32>
    %849 = vector.extract_strided_slice %836 {offsets = [0, 256], sizes = [8, 128], strides = [1, 1]} : vector<8x512xf32> to vector<8x128xf32>
    %850 = math.tanh %849 : vector<8x128xf32>
    %851 = vector.extract_strided_slice %836 {offsets = [0, 384], sizes = [8, 128], strides = [1, 1]} : vector<8x512xf32> to vector<8x128xf32>
    %852 = arith.negf %851 : vector<8x128xf32>
    %853 = math.exp %852 : vector<8x128xf32>
    %cst_272 = arith.constant 1.000000e+00 : f32
    %854 = vector.broadcast %cst_272 : f32 to vector<8x128xf32>
    %855 = arith.addf %854, %853 : vector<8x128xf32>
    %856 = arith.divf %854, %855 : vector<8x128xf32>
    %857 = arith.mulf %848, %830 : vector<8x128xf32>
    %858 = arith.mulf %842, %850 : vector<8x128xf32>
    %859 = arith.addf %857, %858 : vector<8x128xf32>
    %860 = math.tanh %859 : vector<8x128xf32>
    %861 = arith.mulf %856, %860 : vector<8x128xf32>
    %c24_273 = arith.constant 24 : index
    %c0_274 = arith.constant 0 : index
    %862 = vector.load %arg8[%c24_273, %c0_274] : memref<64x128xf32, #tpu.memory_space<vmem>>, vector<8x128xf32>
    tpu.vector_store %arg8[%c24_273, %c0_274], %861 {strides = array<i32>} : memref<64x128xf32, #tpu.memory_space<vmem>>, vector<8x128xf32>,
    %c32_275 = arith.constant 32 : index
    %c0_276 = arith.constant 0 : index
    %863 = vector.load %arg9[%c32_275, %c0_276] : memref<64x512xf32, #tpu.memory_space<vmem>>, vector<8x512xf32>
    %cst_277 = arith.constant dense<0.000000e+00> : vector<8x512xf32>
    %864 = tpu.matmul %861, %738, %cst_277 {dimension_numbers = #tpu.dot_dimension_numbers<[1], [0], [0], [1], [0, 0, 1, 1], [], []>} : vector<8x128xf32>, vector<128x512xf32>, vector<8x512xf32> -> vector<8x512xf32>
    %865 = arith.addf %863, %864 : vector<8x512xf32>
    %866 = vector.extract_strided_slice %865 {offsets = [0, 0], sizes = [8, 128], strides = [1, 1]} : vector<8x512xf32> to vector<8x128xf32>
    %867 = arith.negf %866 : vector<8x128xf32>
    %868 = math.exp %867 : vector<8x128xf32>
    %cst_278 = arith.constant 1.000000e+00 : f32
    %869 = vector.broadcast %cst_278 : f32 to vector<8x128xf32>
    %870 = arith.addf %869, %868 : vector<8x128xf32>
    %871 = arith.divf %869, %870 : vector<8x128xf32>
    %872 = vector.extract_strided_slice %865 {offsets = [0, 128], sizes = [8, 128], strides = [1, 1]} : vector<8x512xf32> to vector<8x128xf32>
    %873 = arith.negf %872 : vector<8x128xf32>
    %874 = math.exp %873 : vector<8x128xf32>
    %cst_279 = arith.constant 1.000000e+00 : f32
    %875 = vector.broadcast %cst_279 : f32 to vector<8x128xf32>
    %876 = arith.addf %875, %874 : vector<8x128xf32>
    %877 = arith.divf %875, %876 : vector<8x128xf32>
    %878 = vector.extract_strided_slice %865 {offsets = [0, 256], sizes = [8, 128], strides = [1, 1]} : vector<8x512xf32> to vector<8x128xf32>
    %879 = math.tanh %878 : vector<8x128xf32>
    %880 = vector.extract_strided_slice %865 {offsets = [0, 384], sizes = [8, 128], strides = [1, 1]} : vector<8x512xf32> to vector<8x128xf32>
    %881 = arith.negf %880 : vector<8x128xf32>
    %882 = math.exp %881 : vector<8x128xf32>
    %cst_280 = arith.constant 1.000000e+00 : f32
    %883 = vector.broadcast %cst_280 : f32 to vector<8x128xf32>
    %884 = arith.addf %883, %882 : vector<8x128xf32>
    %885 = arith.divf %883, %884 : vector<8x128xf32>
    %886 = arith.mulf %877, %859 : vector<8x128xf32>
    %887 = arith.mulf %871, %879 : vector<8x128xf32>
    %888 = arith.addf %886, %887 : vector<8x128xf32>
    %889 = math.tanh %888 : vector<8x128xf32>
    %890 = arith.mulf %885, %889 : vector<8x128xf32>
    %c32_281 = arith.constant 32 : index
    %c0_282 = arith.constant 0 : index
    %891 = vector.load %arg8[%c32_281, %c0_282] : memref<64x128xf32, #tpu.memory_space<vmem>>, vector<8x128xf32>
    tpu.vector_store %arg8[%c32_281, %c0_282], %890 {strides = array<i32>} : memref<64x128xf32, #tpu.memory_space<vmem>>, vector<8x128xf32>,
    %c40_283 = arith.constant 40 : index
    %c0_284 = arith.constant 0 : index
    %892 = vector.load %arg9[%c40_283, %c0_284] : memref<64x512xf32, #tpu.memory_space<vmem>>, vector<8x512xf32>
    %cst_285 = arith.constant dense<0.000000e+00> : vector<8x512xf32>
    %893 = tpu.matmul %890, %738, %cst_285 {dimension_numbers = #tpu.dot_dimension_numbers<[1], [0], [0], [1], [0, 0, 1, 1], [], []>} : vector<8x128xf32>, vector<128x512xf32>, vector<8x512xf32> -> vector<8x512xf32>
    %894 = arith.addf %892, %893 : vector<8x512xf32>
    %895 = vector.extract_strided_slice %894 {offsets = [0, 0], sizes = [8, 128], strides = [1, 1]} : vector<8x512xf32> to vector<8x128xf32>
    %896 = arith.negf %895 : vector<8x128xf32>
    %897 = math.exp %896 : vector<8x128xf32>
    %cst_286 = arith.constant 1.000000e+00 : f32
    %898 = vector.broadcast %cst_286 : f32 to vector<8x128xf32>
    %899 = arith.addf %898, %897 : vector<8x128xf32>
    %900 = arith.divf %898, %899 : vector<8x128xf32>
    %901 = vector.extract_strided_slice %894 {offsets = [0, 128], sizes = [8, 128], strides = [1, 1]} : vector<8x512xf32> to vector<8x128xf32>
    %902 = arith.negf %901 : vector<8x128xf32>
    %903 = math.exp %902 : vector<8x128xf32>
    %cst_287 = arith.constant 1.000000e+00 : f32
    %904 = vector.broadcast %cst_287 : f32 to vector<8x128xf32>
    %905 = arith.addf %904, %903 : vector<8x128xf32>
    %906 = arith.divf %904, %905 : vector<8x128xf32>
    %907 = vector.extract_strided_slice %894 {offsets = [0, 256], sizes = [8, 128], strides = [1, 1]} : vector<8x512xf32> to vector<8x128xf32>
    %908 = math.tanh %907 : vector<8x128xf32>
    %909 = vector.extract_strided_slice %894 {offsets = [0, 384], sizes = [8, 128], strides = [1, 1]} : vector<8x512xf32> to vector<8x128xf32>
    %910 = arith.negf %909 : vector<8x128xf32>
    %911 = math.exp %910 : vector<8x128xf32>
    %cst_288 = arith.constant 1.000000e+00 : f32
    %912 = vector.broadcast %cst_288 : f32 to vector<8x128xf32>
    %913 = arith.addf %912, %911 : vector<8x128xf32>
    %914 = arith.divf %912, %913 : vector<8x128xf32>
    %915 = arith.mulf %906, %888 : vector<8x128xf32>
    %916 = arith.mulf %900, %908 : vector<8x128xf32>
    %917 = arith.addf %915, %916 : vector<8x128xf32>
    %918 = math.tanh %917 : vector<8x128xf32>
    %919 = arith.mulf %914, %918 : vector<8x128xf32>
    %c40_289 = arith.constant 40 : index
    %c0_290 = arith.constant 0 : index
    %920 = vector.load %arg8[%c40_289, %c0_290] : memref<64x128xf32, #tpu.memory_space<vmem>>, vector<8x128xf32>
    tpu.vector_store %arg8[%c40_289, %c0_290], %919 {strides = array<i32>} : memref<64x128xf32, #tpu.memory_space<vmem>>, vector<8x128xf32>,
    %c48_291 = arith.constant 48 : index
    %c0_292 = arith.constant 0 : index
    %921 = vector.load %arg9[%c48_291, %c0_292] : memref<64x512xf32, #tpu.memory_space<vmem>>, vector<8x512xf32>
    %cst_293 = arith.constant dense<0.000000e+00> : vector<8x512xf32>
    %922 = tpu.matmul %919, %738, %cst_293 {dimension_numbers = #tpu.dot_dimension_numbers<[1], [0], [0], [1], [0, 0, 1, 1], [], []>} : vector<8x128xf32>, vector<128x512xf32>, vector<8x512xf32> -> vector<8x512xf32>
    %923 = arith.addf %921, %922 : vector<8x512xf32>
    %924 = vector.extract_strided_slice %923 {offsets = [0, 0], sizes = [8, 128], strides = [1, 1]} : vector<8x512xf32> to vector<8x128xf32>
    %925 = arith.negf %924 : vector<8x128xf32>
    %926 = math.exp %925 : vector<8x128xf32>
    %cst_294 = arith.constant 1.000000e+00 : f32
    %927 = vector.broadcast %cst_294 : f32 to vector<8x128xf32>
    %928 = arith.addf %927, %926 : vector<8x128xf32>
    %929 = arith.divf %927, %928 : vector<8x128xf32>
    %930 = vector.extract_strided_slice %923 {offsets = [0, 128], sizes = [8, 128], strides = [1, 1]} : vector<8x512xf32> to vector<8x128xf32>
    %931 = arith.negf %930 : vector<8x128xf32>
    %932 = math.exp %931 : vector<8x128xf32>
    %cst_295 = arith.constant 1.000000e+00 : f32
    %933 = vector.broadcast %cst_295 : f32 to vector<8x128xf32>
    %934 = arith.addf %933, %932 : vector<8x128xf32>
    %935 = arith.divf %933, %934 : vector<8x128xf32>
    %936 = vector.extract_strided_slice %923 {offsets = [0, 256], sizes = [8, 128], strides = [1, 1]} : vector<8x512xf32> to vector<8x128xf32>
    %937 = math.tanh %936 : vector<8x128xf32>
    %938 = vector.extract_strided_slice %923 {offsets = [0, 384], sizes = [8, 128], strides = [1, 1]} : vector<8x512xf32> to vector<8x128xf32>
    %939 = arith.negf %938 : vector<8x128xf32>
    %940 = math.exp %939 : vector<8x128xf32>
    %cst_296 = arith.constant 1.000000e+00 : f32
    %941 = vector.broadcast %cst_296 : f32 to vector<8x128xf32>
    %942 = arith.addf %941, %940 : vector<8x128xf32>
    %943 = arith.divf %941, %942 : vector<8x128xf32>
    %944 = arith.mulf %935, %917 : vector<8x128xf32>
    %945 = arith.mulf %929, %937 : vector<8x128xf32>
    %946 = arith.addf %944, %945 : vector<8x128xf32>
    %947 = math.tanh %946 : vector<8x128xf32>
    %948 = arith.mulf %943, %947 : vector<8x128xf32>
    %c48_297 = arith.constant 48 : index
    %c0_298 = arith.constant 0 : index
    %949 = vector.load %arg8[%c48_297, %c0_298] : memref<64x128xf32, #tpu.memory_space<vmem>>, vector<8x128xf32>
    tpu.vector_store %arg8[%c48_297, %c0_298], %948 {strides = array<i32>} : memref<64x128xf32, #tpu.memory_space<vmem>>, vector<8x128xf32>,
    %c56_299 = arith.constant 56 : index
    %c0_300 = arith.constant 0 : index
    %950 = vector.load %arg9[%c56_299, %c0_300] : memref<64x512xf32, #tpu.memory_space<vmem>>, vector<8x512xf32>
    %cst_301 = arith.constant dense<0.000000e+00> : vector<8x512xf32>
    %951 = tpu.matmul %948, %738, %cst_301 {dimension_numbers = #tpu.dot_dimension_numbers<[1], [0], [0], [1], [0, 0, 1, 1], [], []>} : vector<8x128xf32>, vector<128x512xf32>, vector<8x512xf32> -> vector<8x512xf32>
    %952 = arith.addf %950, %951 : vector<8x512xf32>
    %953 = vector.extract_strided_slice %952 {offsets = [0, 0], sizes = [8, 128], strides = [1, 1]} : vector<8x512xf32> to vector<8x128xf32>
    %954 = arith.negf %953 : vector<8x128xf32>
    %955 = math.exp %954 : vector<8x128xf32>
    %cst_302 = arith.constant 1.000000e+00 : f32
    %956 = vector.broadcast %cst_302 : f32 to vector<8x128xf32>
    %957 = arith.addf %956, %955 : vector<8x128xf32>
    %958 = arith.divf %956, %957 : vector<8x128xf32>
    %959 = vector.extract_strided_slice %952 {offsets = [0, 128], sizes = [8, 128], strides = [1, 1]} : vector<8x512xf32> to vector<8x128xf32>
    %960 = arith.negf %959 : vector<8x128xf32>
    %961 = math.exp %960 : vector<8x128xf32>
    %cst_303 = arith.constant 1.000000e+00 : f32
    %962 = vector.broadcast %cst_303 : f32 to vector<8x128xf32>
    %963 = arith.addf %962, %961 : vector<8x128xf32>
    %964 = arith.divf %962, %963 : vector<8x128xf32>
    %965 = vector.extract_strided_slice %952 {offsets = [0, 256], sizes = [8, 128], strides = [1, 1]} : vector<8x512xf32> to vector<8x128xf32>
    %966 = math.tanh %965 : vector<8x128xf32>
    %967 = vector.extract_strided_slice %952 {offsets = [0, 384], sizes = [8, 128], strides = [1, 1]} : vector<8x512xf32> to vector<8x128xf32>
    %968 = arith.negf %967 : vector<8x128xf32>
    %969 = math.exp %968 : vector<8x128xf32>
    %cst_304 = arith.constant 1.000000e+00 : f32
    %970 = vector.broadcast %cst_304 : f32 to vector<8x128xf32>
    %971 = arith.addf %970, %969 : vector<8x128xf32>
    %972 = arith.divf %970, %971 : vector<8x128xf32>
    %973 = arith.mulf %964, %946 : vector<8x128xf32>
    %974 = arith.mulf %958, %966 : vector<8x128xf32>
    %975 = arith.addf %973, %974 : vector<8x128xf32>
    %976 = math.tanh %975 : vector<8x128xf32>
    %977 = arith.mulf %972, %976 : vector<8x128xf32>
    %c56_305 = arith.constant 56 : index
    %c0_306 = arith.constant 0 : index
    %978 = vector.load %arg8[%c56_305, %c0_306] : memref<64x128xf32, #tpu.memory_space<vmem>>, vector<8x128xf32>
    tpu.vector_store %arg8[%c56_305, %c0_306], %977 {strides = array<i32>} : memref<64x128xf32, #tpu.memory_space<vmem>>, vector<8x128xf32>,
    %c0_307 = arith.constant 0 : index
    %c0_308 = arith.constant 0 : index
    %979 = vector.load %arg8[%c0_307, %c0_308] : memref<64x128xf32, #tpu.memory_space<vmem>>, vector<64x128xf32>
    %c3_309 = arith.constant 3 : index
    %c0_310 = arith.constant 0 : index
    %c0_311 = arith.constant 0 : index
    %980 = vector.load %arg2[%c3_309, %c0_310, %c0_311] : memref<4x128x512xf32, #tpu.memory_space<vmem>>, vector<1x128x512xf32>
    %981 = vector.shape_cast %980 : vector<1x128x512xf32> to vector<128x512xf32>
    %c4 = arith.constant 4 : index
    %c0_312 = arith.constant 0 : index
    %c0_313 = arith.constant 0 : index
    %982 = vector.load %arg3[%c4, %c0_312, %c0_313] : memref<5x128x512xf32, #tpu.memory_space<vmem>>, vector<1x128x512xf32>
    %983 = vector.shape_cast %982 : vector<1x128x512xf32> to vector<128x512xf32>
    %c4_314 = arith.constant 4 : index
    %c0_315 = arith.constant 0 : index
    %c0_316 = arith.constant 0 : index
    %984 = vector.load %arg4[%c4_314, %c0_315, %c0_316] : memref<5x1x512xf32, #tpu.memory_space<vmem>>, vector<1x1x512xf32>
    %985 = vector.shape_cast %984 : vector<1x1x512xf32> to vector<1x512xf32>
    %cst_317 = arith.constant dense<0.000000e+00> : vector<64x512xf32>
    %986 = tpu.matmul %979, %981, %cst_317 {dimension_numbers = #tpu.dot_dimension_numbers<[1], [0], [0], [1], [0, 0, 1, 1], [], []>} : vector<64x128xf32>, vector<128x512xf32>, vector<64x512xf32> -> vector<64x512xf32>
    %987 = vector.broadcast %985 : vector<1x512xf32> to vector<64x512xf32>
    %988 = arith.addf %986, %987 : vector<64x512xf32>
    %c0_318 = arith.constant 0 : index
    %c0_319 = arith.constant 0 : index
    %989 = vector.load %arg9[%c0_318, %c0_319] : memref<64x512xf32, #tpu.memory_space<vmem>>, vector<64x512xf32>
    tpu.vector_store %arg9[%c0_318, %c0_319], %988 {strides = array<i32>} : memref<64x512xf32, #tpu.memory_space<vmem>>, vector<64x512xf32>,
    %cst_320 = arith.constant 0.000000e+00 : f32
    %990 = vector.broadcast %cst_320 : f32 to vector<8x128xf32>
    %cst_321 = arith.constant 0.000000e+00 : f32
    %991 = vector.broadcast %cst_321 : f32 to vector<8x128xf32>
    %c0_322 = arith.constant 0 : index
    %c0_323 = arith.constant 0 : index
    %992 = vector.load %arg9[%c0_322, %c0_323] : memref<64x512xf32, #tpu.memory_space<vmem>>, vector<8x512xf32>
    %cst_324 = arith.constant dense<0.000000e+00> : vector<8x512xf32>
    %993 = tpu.matmul %990, %983, %cst_324 {dimension_numbers = #tpu.dot_dimension_numbers<[1], [0], [0], [1], [0, 0, 1, 1], [], []>} : vector<8x128xf32>, vector<128x512xf32>, vector<8x512xf32> -> vector<8x512xf32>
    %994 = arith.addf %992, %993 : vector<8x512xf32>
    %995 = vector.extract_strided_slice %994 {offsets = [0, 0], sizes = [8, 128], strides = [1, 1]} : vector<8x512xf32> to vector<8x128xf32>
    %996 = arith.negf %995 : vector<8x128xf32>
    %997 = math.exp %996 : vector<8x128xf32>
    %cst_325 = arith.constant 1.000000e+00 : f32
    %998 = vector.broadcast %cst_325 : f32 to vector<8x128xf32>
    %999 = arith.addf %998, %997 : vector<8x128xf32>
    %1000 = arith.divf %998, %999 : vector<8x128xf32>
    %1001 = vector.extract_strided_slice %994 {offsets = [0, 128], sizes = [8, 128], strides = [1, 1]} : vector<8x512xf32> to vector<8x128xf32>
    %1002 = arith.negf %1001 : vector<8x128xf32>
    %1003 = math.exp %1002 : vector<8x128xf32>
    %cst_326 = arith.constant 1.000000e+00 : f32
    %1004 = vector.broadcast %cst_326 : f32 to vector<8x128xf32>
    %1005 = arith.addf %1004, %1003 : vector<8x128xf32>
    %1006 = arith.divf %1004, %1005 : vector<8x128xf32>
    %1007 = vector.extract_strided_slice %994 {offsets = [0, 256], sizes = [8, 128], strides = [1, 1]} : vector<8x512xf32> to vector<8x128xf32>
    %1008 = math.tanh %1007 : vector<8x128xf32>
    %1009 = vector.extract_strided_slice %994 {offsets = [0, 384], sizes = [8, 128], strides = [1, 1]} : vector<8x512xf32> to vector<8x128xf32>
    %1010 = arith.negf %1009 : vector<8x128xf32>
    %1011 = math.exp %1010 : vector<8x128xf32>
    %cst_327 = arith.constant 1.000000e+00 : f32
    %1012 = vector.broadcast %cst_327 : f32 to vector<8x128xf32>
    %1013 = arith.addf %1012, %1011 : vector<8x128xf32>
    %1014 = arith.divf %1012, %1013 : vector<8x128xf32>
    %1015 = arith.mulf %1006, %991 : vector<8x128xf32>
    %1016 = arith.mulf %1000, %1008 : vector<8x128xf32>
    %1017 = arith.addf %1015, %1016 : vector<8x128xf32>
    %1018 = math.tanh %1017 : vector<8x128xf32>
    %1019 = arith.mulf %1014, %1018 : vector<8x128xf32>
    %c8_328 = arith.constant 8 : index
    %c0_329 = arith.constant 0 : index
    %1020 = vector.load %arg9[%c8_328, %c0_329] : memref<64x512xf32, #tpu.memory_space<vmem>>, vector<8x512xf32>
    %cst_330 = arith.constant dense<0.000000e+00> : vector<8x512xf32>
    %1021 = tpu.matmul %1019, %983, %cst_330 {dimension_numbers = #tpu.dot_dimension_numbers<[1], [0], [0], [1], [0, 0, 1, 1], [], []>} : vector<8x128xf32>, vector<128x512xf32>, vector<8x512xf32> -> vector<8x512xf32>
    %1022 = arith.addf %1020, %1021 : vector<8x512xf32>
    %1023 = vector.extract_strided_slice %1022 {offsets = [0, 0], sizes = [8, 128], strides = [1, 1]} : vector<8x512xf32> to vector<8x128xf32>
    %1024 = arith.negf %1023 : vector<8x128xf32>
    %1025 = math.exp %1024 : vector<8x128xf32>
    %cst_331 = arith.constant 1.000000e+00 : f32
    %1026 = vector.broadcast %cst_331 : f32 to vector<8x128xf32>
    %1027 = arith.addf %1026, %1025 : vector<8x128xf32>
    %1028 = arith.divf %1026, %1027 : vector<8x128xf32>
    %1029 = vector.extract_strided_slice %1022 {offsets = [0, 128], sizes = [8, 128], strides = [1, 1]} : vector<8x512xf32> to vector<8x128xf32>
    %1030 = arith.negf %1029 : vector<8x128xf32>
    %1031 = math.exp %1030 : vector<8x128xf32>
    %cst_332 = arith.constant 1.000000e+00 : f32
    %1032 = vector.broadcast %cst_332 : f32 to vector<8x128xf32>
    %1033 = arith.addf %1032, %1031 : vector<8x128xf32>
    %1034 = arith.divf %1032, %1033 : vector<8x128xf32>
    %1035 = vector.extract_strided_slice %1022 {offsets = [0, 256], sizes = [8, 128], strides = [1, 1]} : vector<8x512xf32> to vector<8x128xf32>
    %1036 = math.tanh %1035 : vector<8x128xf32>
    %1037 = vector.extract_strided_slice %1022 {offsets = [0, 384], sizes = [8, 128], strides = [1, 1]} : vector<8x512xf32> to vector<8x128xf32>
    %1038 = arith.negf %1037 : vector<8x128xf32>
    %1039 = math.exp %1038 : vector<8x128xf32>
    %cst_333 = arith.constant 1.000000e+00 : f32
    %1040 = vector.broadcast %cst_333 : f32 to vector<8x128xf32>
    %1041 = arith.addf %1040, %1039 : vector<8x128xf32>
    %1042 = arith.divf %1040, %1041 : vector<8x128xf32>
    %1043 = arith.mulf %1034, %1017 : vector<8x128xf32>
    %1044 = arith.mulf %1028, %1036 : vector<8x128xf32>
    %1045 = arith.addf %1043, %1044 : vector<8x128xf32>
    %1046 = math.tanh %1045 : vector<8x128xf32>
    %1047 = arith.mulf %1042, %1046 : vector<8x128xf32>
    %c16_334 = arith.constant 16 : index
    %c0_335 = arith.constant 0 : index
    %1048 = vector.load %arg9[%c16_334, %c0_335] : memref<64x512xf32, #tpu.memory_space<vmem>>, vector<8x512xf32>
    %cst_336 = arith.constant dense<0.000000e+00> : vector<8x512xf32>
    %1049 = tpu.matmul %1047, %983, %cst_336 {dimension_numbers = #tpu.dot_dimension_numbers<[1], [0], [0], [1], [0, 0, 1, 1], [], []>} : vector<8x128xf32>, vector<128x512xf32>, vector<8x512xf32> -> vector<8x512xf32>
    %1050 = arith.addf %1048, %1049 : vector<8x512xf32>
    %1051 = vector.extract_strided_slice %1050 {offsets = [0, 0], sizes = [8, 128], strides = [1, 1]} : vector<8x512xf32> to vector<8x128xf32>
    %1052 = arith.negf %1051 : vector<8x128xf32>
    %1053 = math.exp %1052 : vector<8x128xf32>
    %cst_337 = arith.constant 1.000000e+00 : f32
    %1054 = vector.broadcast %cst_337 : f32 to vector<8x128xf32>
    %1055 = arith.addf %1054, %1053 : vector<8x128xf32>
    %1056 = arith.divf %1054, %1055 : vector<8x128xf32>
    %1057 = vector.extract_strided_slice %1050 {offsets = [0, 128], sizes = [8, 128], strides = [1, 1]} : vector<8x512xf32> to vector<8x128xf32>
    %1058 = arith.negf %1057 : vector<8x128xf32>
    %1059 = math.exp %1058 : vector<8x128xf32>
    %cst_338 = arith.constant 1.000000e+00 : f32
    %1060 = vector.broadcast %cst_338 : f32 to vector<8x128xf32>
    %1061 = arith.addf %1060, %1059 : vector<8x128xf32>
    %1062 = arith.divf %1060, %1061 : vector<8x128xf32>
    %1063 = vector.extract_strided_slice %1050 {offsets = [0, 256], sizes = [8, 128], strides = [1, 1]} : vector<8x512xf32> to vector<8x128xf32>
    %1064 = math.tanh %1063 : vector<8x128xf32>
    %1065 = vector.extract_strided_slice %1050 {offsets = [0, 384], sizes = [8, 128], strides = [1, 1]} : vector<8x512xf32> to vector<8x128xf32>
    %1066 = arith.negf %1065 : vector<8x128xf32>
    %1067 = math.exp %1066 : vector<8x128xf32>
    %cst_339 = arith.constant 1.000000e+00 : f32
    %1068 = vector.broadcast %cst_339 : f32 to vector<8x128xf32>
    %1069 = arith.addf %1068, %1067 : vector<8x128xf32>
    %1070 = arith.divf %1068, %1069 : vector<8x128xf32>
    %1071 = arith.mulf %1062, %1045 : vector<8x128xf32>
    %1072 = arith.mulf %1056, %1064 : vector<8x128xf32>
    %1073 = arith.addf %1071, %1072 : vector<8x128xf32>
    %1074 = math.tanh %1073 : vector<8x128xf32>
    %1075 = arith.mulf %1070, %1074 : vector<8x128xf32>
    %c24_340 = arith.constant 24 : index
    %c0_341 = arith.constant 0 : index
    %1076 = vector.load %arg9[%c24_340, %c0_341] : memref<64x512xf32, #tpu.memory_space<vmem>>, vector<8x512xf32>
    %cst_342 = arith.constant dense<0.000000e+00> : vector<8x512xf32>
    %1077 = tpu.matmul %1075, %983, %cst_342 {dimension_numbers = #tpu.dot_dimension_numbers<[1], [0], [0], [1], [0, 0, 1, 1], [], []>} : vector<8x128xf32>, vector<128x512xf32>, vector<8x512xf32> -> vector<8x512xf32>
    %1078 = arith.addf %1076, %1077 : vector<8x512xf32>
    %1079 = vector.extract_strided_slice %1078 {offsets = [0, 0], sizes = [8, 128], strides = [1, 1]} : vector<8x512xf32> to vector<8x128xf32>
    %1080 = arith.negf %1079 : vector<8x128xf32>
    %1081 = math.exp %1080 : vector<8x128xf32>
    %cst_343 = arith.constant 1.000000e+00 : f32
    %1082 = vector.broadcast %cst_343 : f32 to vector<8x128xf32>
    %1083 = arith.addf %1082, %1081 : vector<8x128xf32>
    %1084 = arith.divf %1082, %1083 : vector<8x128xf32>
    %1085 = vector.extract_strided_slice %1078 {offsets = [0, 128], sizes = [8, 128], strides = [1, 1]} : vector<8x512xf32> to vector<8x128xf32>
    %1086 = arith.negf %1085 : vector<8x128xf32>
    %1087 = math.exp %1086 : vector<8x128xf32>
    %cst_344 = arith.constant 1.000000e+00 : f32
    %1088 = vector.broadcast %cst_344 : f32 to vector<8x128xf32>
    %1089 = arith.addf %1088, %1087 : vector<8x128xf32>
    %1090 = arith.divf %1088, %1089 : vector<8x128xf32>
    %1091 = vector.extract_strided_slice %1078 {offsets = [0, 256], sizes = [8, 128], strides = [1, 1]} : vector<8x512xf32> to vector<8x128xf32>
    %1092 = math.tanh %1091 : vector<8x128xf32>
    %1093 = vector.extract_strided_slice %1078 {offsets = [0, 384], sizes = [8, 128], strides = [1, 1]} : vector<8x512xf32> to vector<8x128xf32>
    %1094 = arith.negf %1093 : vector<8x128xf32>
    %1095 = math.exp %1094 : vector<8x128xf32>
    %cst_345 = arith.constant 1.000000e+00 : f32
    %1096 = vector.broadcast %cst_345 : f32 to vector<8x128xf32>
    %1097 = arith.addf %1096, %1095 : vector<8x128xf32>
    %1098 = arith.divf %1096, %1097 : vector<8x128xf32>
    %1099 = arith.mulf %1090, %1073 : vector<8x128xf32>
    %1100 = arith.mulf %1084, %1092 : vector<8x128xf32>
    %1101 = arith.addf %1099, %1100 : vector<8x128xf32>
    %1102 = math.tanh %1101 : vector<8x128xf32>
    %1103 = arith.mulf %1098, %1102 : vector<8x128xf32>
    %c32_346 = arith.constant 32 : index
    %c0_347 = arith.constant 0 : index
    %1104 = vector.load %arg9[%c32_346, %c0_347] : memref<64x512xf32, #tpu.memory_space<vmem>>, vector<8x512xf32>
    %cst_348 = arith.constant dense<0.000000e+00> : vector<8x512xf32>
    %1105 = tpu.matmul %1103, %983, %cst_348 {dimension_numbers = #tpu.dot_dimension_numbers<[1], [0], [0], [1], [0, 0, 1, 1], [], []>} : vector<8x128xf32>, vector<128x512xf32>, vector<8x512xf32> -> vector<8x512xf32>
    %1106 = arith.addf %1104, %1105 : vector<8x512xf32>
    %1107 = vector.extract_strided_slice %1106 {offsets = [0, 0], sizes = [8, 128], strides = [1, 1]} : vector<8x512xf32> to vector<8x128xf32>
    %1108 = arith.negf %1107 : vector<8x128xf32>
    %1109 = math.exp %1108 : vector<8x128xf32>
    %cst_349 = arith.constant 1.000000e+00 : f32
    %1110 = vector.broadcast %cst_349 : f32 to vector<8x128xf32>
    %1111 = arith.addf %1110, %1109 : vector<8x128xf32>
    %1112 = arith.divf %1110, %1111 : vector<8x128xf32>
    %1113 = vector.extract_strided_slice %1106 {offsets = [0, 128], sizes = [8, 128], strides = [1, 1]} : vector<8x512xf32> to vector<8x128xf32>
    %1114 = arith.negf %1113 : vector<8x128xf32>
    %1115 = math.exp %1114 : vector<8x128xf32>
    %cst_350 = arith.constant 1.000000e+00 : f32
    %1116 = vector.broadcast %cst_350 : f32 to vector<8x128xf32>
    %1117 = arith.addf %1116, %1115 : vector<8x128xf32>
    %1118 = arith.divf %1116, %1117 : vector<8x128xf32>
    %1119 = vector.extract_strided_slice %1106 {offsets = [0, 256], sizes = [8, 128], strides = [1, 1]} : vector<8x512xf32> to vector<8x128xf32>
    %1120 = math.tanh %1119 : vector<8x128xf32>
    %1121 = vector.extract_strided_slice %1106 {offsets = [0, 384], sizes = [8, 128], strides = [1, 1]} : vector<8x512xf32> to vector<8x128xf32>
    %1122 = arith.negf %1121 : vector<8x128xf32>
    %1123 = math.exp %1122 : vector<8x128xf32>
    %cst_351 = arith.constant 1.000000e+00 : f32
    %1124 = vector.broadcast %cst_351 : f32 to vector<8x128xf32>
    %1125 = arith.addf %1124, %1123 : vector<8x128xf32>
    %1126 = arith.divf %1124, %1125 : vector<8x128xf32>
    %1127 = arith.mulf %1118, %1101 : vector<8x128xf32>
    %1128 = arith.mulf %1112, %1120 : vector<8x128xf32>
    %1129 = arith.addf %1127, %1128 : vector<8x128xf32>
    %1130 = math.tanh %1129 : vector<8x128xf32>
    %1131 = arith.mulf %1126, %1130 : vector<8x128xf32>
    %c40_352 = arith.constant 40 : index
    %c0_353 = arith.constant 0 : index
    %1132 = vector.load %arg9[%c40_352, %c0_353] : memref<64x512xf32, #tpu.memory_space<vmem>>, vector<8x512xf32>
    %cst_354 = arith.constant dense<0.000000e+00> : vector<8x512xf32>
    %1133 = tpu.matmul %1131, %983, %cst_354 {dimension_numbers = #tpu.dot_dimension_numbers<[1], [0], [0], [1], [0, 0, 1, 1], [], []>} : vector<8x128xf32>, vector<128x512xf32>, vector<8x512xf32> -> vector<8x512xf32>
    %1134 = arith.addf %1132, %1133 : vector<8x512xf32>
    %1135 = vector.extract_strided_slice %1134 {offsets = [0, 0], sizes = [8, 128], strides = [1, 1]} : vector<8x512xf32> to vector<8x128xf32>
    %1136 = arith.negf %1135 : vector<8x128xf32>
    %1137 = math.exp %1136 : vector<8x128xf32>
    %cst_355 = arith.constant 1.000000e+00 : f32
    %1138 = vector.broadcast %cst_355 : f32 to vector<8x128xf32>
    %1139 = arith.addf %1138, %1137 : vector<8x128xf32>
    %1140 = arith.divf %1138, %1139 : vector<8x128xf32>
    %1141 = vector.extract_strided_slice %1134 {offsets = [0, 128], sizes = [8, 128], strides = [1, 1]} : vector<8x512xf32> to vector<8x128xf32>
    %1142 = arith.negf %1141 : vector<8x128xf32>
    %1143 = math.exp %1142 : vector<8x128xf32>
    %cst_356 = arith.constant 1.000000e+00 : f32
    %1144 = vector.broadcast %cst_356 : f32 to vector<8x128xf32>
    %1145 = arith.addf %1144, %1143 : vector<8x128xf32>
    %1146 = arith.divf %1144, %1145 : vector<8x128xf32>
    %1147 = vector.extract_strided_slice %1134 {offsets = [0, 256], sizes = [8, 128], strides = [1, 1]} : vector<8x512xf32> to vector<8x128xf32>
    %1148 = math.tanh %1147 : vector<8x128xf32>
    %1149 = vector.extract_strided_slice %1134 {offsets = [0, 384], sizes = [8, 128], strides = [1, 1]} : vector<8x512xf32> to vector<8x128xf32>
    %1150 = arith.negf %1149 : vector<8x128xf32>
    %1151 = math.exp %1150 : vector<8x128xf32>
    %cst_357 = arith.constant 1.000000e+00 : f32
    %1152 = vector.broadcast %cst_357 : f32 to vector<8x128xf32>
    %1153 = arith.addf %1152, %1151 : vector<8x128xf32>
    %1154 = arith.divf %1152, %1153 : vector<8x128xf32>
    %1155 = arith.mulf %1146, %1129 : vector<8x128xf32>
    %1156 = arith.mulf %1140, %1148 : vector<8x128xf32>
    %1157 = arith.addf %1155, %1156 : vector<8x128xf32>
    %1158 = math.tanh %1157 : vector<8x128xf32>
    %1159 = arith.mulf %1154, %1158 : vector<8x128xf32>
    %c48_358 = arith.constant 48 : index
    %c0_359 = arith.constant 0 : index
    %1160 = vector.load %arg9[%c48_358, %c0_359] : memref<64x512xf32, #tpu.memory_space<vmem>>, vector<8x512xf32>
    %cst_360 = arith.constant dense<0.000000e+00> : vector<8x512xf32>
    %1161 = tpu.matmul %1159, %983, %cst_360 {dimension_numbers = #tpu.dot_dimension_numbers<[1], [0], [0], [1], [0, 0, 1, 1], [], []>} : vector<8x128xf32>, vector<128x512xf32>, vector<8x512xf32> -> vector<8x512xf32>
    %1162 = arith.addf %1160, %1161 : vector<8x512xf32>
    %1163 = vector.extract_strided_slice %1162 {offsets = [0, 0], sizes = [8, 128], strides = [1, 1]} : vector<8x512xf32> to vector<8x128xf32>
    %1164 = arith.negf %1163 : vector<8x128xf32>
    %1165 = math.exp %1164 : vector<8x128xf32>
    %cst_361 = arith.constant 1.000000e+00 : f32
    %1166 = vector.broadcast %cst_361 : f32 to vector<8x128xf32>
    %1167 = arith.addf %1166, %1165 : vector<8x128xf32>
    %1168 = arith.divf %1166, %1167 : vector<8x128xf32>
    %1169 = vector.extract_strided_slice %1162 {offsets = [0, 128], sizes = [8, 128], strides = [1, 1]} : vector<8x512xf32> to vector<8x128xf32>
    %1170 = arith.negf %1169 : vector<8x128xf32>
    %1171 = math.exp %1170 : vector<8x128xf32>
    %cst_362 = arith.constant 1.000000e+00 : f32
    %1172 = vector.broadcast %cst_362 : f32 to vector<8x128xf32>
    %1173 = arith.addf %1172, %1171 : vector<8x128xf32>
    %1174 = arith.divf %1172, %1173 : vector<8x128xf32>
    %1175 = vector.extract_strided_slice %1162 {offsets = [0, 256], sizes = [8, 128], strides = [1, 1]} : vector<8x512xf32> to vector<8x128xf32>
    %1176 = math.tanh %1175 : vector<8x128xf32>
    %1177 = vector.extract_strided_slice %1162 {offsets = [0, 384], sizes = [8, 128], strides = [1, 1]} : vector<8x512xf32> to vector<8x128xf32>
    %1178 = arith.negf %1177 : vector<8x128xf32>
    %1179 = math.exp %1178 : vector<8x128xf32>
    %cst_363 = arith.constant 1.000000e+00 : f32
    %1180 = vector.broadcast %cst_363 : f32 to vector<8x128xf32>
    %1181 = arith.addf %1180, %1179 : vector<8x128xf32>
    %1182 = arith.divf %1180, %1181 : vector<8x128xf32>
    %1183 = arith.mulf %1174, %1157 : vector<8x128xf32>
    %1184 = arith.mulf %1168, %1176 : vector<8x128xf32>
    %1185 = arith.addf %1183, %1184 : vector<8x128xf32>
    %1186 = math.tanh %1185 : vector<8x128xf32>
    %1187 = arith.mulf %1182, %1186 : vector<8x128xf32>
    %c56_364 = arith.constant 56 : index
    %c0_365 = arith.constant 0 : index
    %1188 = vector.load %arg9[%c56_364, %c0_365] : memref<64x512xf32, #tpu.memory_space<vmem>>, vector<8x512xf32>
    %cst_366 = arith.constant dense<0.000000e+00> : vector<8x512xf32>
    %1189 = tpu.matmul %1187, %983, %cst_366 {dimension_numbers = #tpu.dot_dimension_numbers<[1], [0], [0], [1], [0, 0, 1, 1], [], []>} : vector<8x128xf32>, vector<128x512xf32>, vector<8x512xf32> -> vector<8x512xf32>
    %1190 = arith.addf %1188, %1189 : vector<8x512xf32>
    %1191 = vector.extract_strided_slice %1190 {offsets = [0, 0], sizes = [8, 128], strides = [1, 1]} : vector<8x512xf32> to vector<8x128xf32>
    %1192 = arith.negf %1191 : vector<8x128xf32>
    %1193 = math.exp %1192 : vector<8x128xf32>
    %cst_367 = arith.constant 1.000000e+00 : f32
    %1194 = vector.broadcast %cst_367 : f32 to vector<8x128xf32>
    %1195 = arith.addf %1194, %1193 : vector<8x128xf32>
    %1196 = arith.divf %1194, %1195 : vector<8x128xf32>
    %1197 = vector.extract_strided_slice %1190 {offsets = [0, 128], sizes = [8, 128], strides = [1, 1]} : vector<8x512xf32> to vector<8x128xf32>
    %1198 = arith.negf %1197 : vector<8x128xf32>
    %1199 = math.exp %1198 : vector<8x128xf32>
    %cst_368 = arith.constant 1.000000e+00 : f32
    %1200 = vector.broadcast %cst_368 : f32 to vector<8x128xf32>
    %1201 = arith.addf %1200, %1199 : vector<8x128xf32>
    %1202 = arith.divf %1200, %1201 : vector<8x128xf32>
    %1203 = vector.extract_strided_slice %1190 {offsets = [0, 256], sizes = [8, 128], strides = [1, 1]} : vector<8x512xf32> to vector<8x128xf32>
    %1204 = math.tanh %1203 : vector<8x128xf32>
    %1205 = vector.extract_strided_slice %1190 {offsets = [0, 384], sizes = [8, 128], strides = [1, 1]} : vector<8x512xf32> to vector<8x128xf32>
    %1206 = arith.negf %1205 : vector<8x128xf32>
    %1207 = math.exp %1206 : vector<8x128xf32>
    %cst_369 = arith.constant 1.000000e+00 : f32
    %1208 = vector.broadcast %cst_369 : f32 to vector<8x128xf32>
    %1209 = arith.addf %1208, %1207 : vector<8x128xf32>
    %1210 = arith.divf %1208, %1209 : vector<8x128xf32>
    %1211 = arith.mulf %1202, %1185 : vector<8x128xf32>
    %1212 = arith.mulf %1196, %1204 : vector<8x128xf32>
    %1213 = arith.addf %1211, %1212 : vector<8x128xf32>
    %1214 = math.tanh %1213 : vector<8x128xf32>
    %1215 = arith.mulf %1210, %1214 : vector<8x128xf32>
    %c0_370 = arith.constant 0 : index
    %c0_371 = arith.constant 0 : index
    %1216 = vector.load %arg5[%c0_370, %c0_371] : memref<128x40xf32, #tpu.memory_space<vmem>>, vector<128x40xf32>
    %cst_372 = arith.constant dense<0.000000e+00> : vector<8x40xf32>
    %1217 = tpu.matmul %1215, %1216, %cst_372 {dimension_numbers = #tpu.dot_dimension_numbers<[1], [0], [0], [1], [0, 0, 1, 1], [], []>} : vector<8x128xf32>, vector<128x40xf32>, vector<8x40xf32> -> vector<8x40xf32>
    %c0_373 = arith.constant 0 : index
    %c0_374 = arith.constant 0 : index
    %1218 = vector.load %arg6[%c0_373, %c0_374] : memref<1x40xf32, #tpu.memory_space<vmem>>, vector<1x40xf32>
    %1219 = vector.broadcast %1218 : vector<1x40xf32> to vector<8x40xf32>
    %1220 = arith.addf %1217, %1219 : vector<8x40xf32>
    %c0_375 = arith.constant 0 : index
    %c0_376 = arith.constant 0 : index
    %1221 = vector.load %arg7[%c0_375, %c0_376] : memref<8x40xf32, #tpu.memory_space<vmem>>, vector<8x40xf32>
    tpu.vector_store %arg7[%c0_375, %c0_376], %1220 {strides = array<i32>} : memref<8x40xf32, #tpu.memory_space<vmem>>, vector<8x40xf32>,
    return
  }
}

</mosaic_0001>

<bundles_post_ra>
// kernel: rnn_classifier_forward.1
= control target key start
LH: loop header
LB: loop body
LE: loop exit
PB: predicated region body
PF: predicated region fallthrough
CT: control target
= control target key end

     0   :  { %v13677_v3 = vmov 0.0   ;;  %vm152_vm0 = vcmask 523264   ;;  %vm13679_vm1 = vmmov 0   ;;  %vm9195_vm2 = vcmask 326656   ;;  %s17960_s1 = inlined_call_operand.vmem [shape: f32[64,512], index: 1, kind: input, shape index: {}]   ;;  %s17961_s3 = inlined_call_operand.vmem [shape: f32[5,128,512], index: 3, kind: input, shape index: {}]   ;;  %s17962_s0 = inlined_call_operand.vmem [shape: f32[64,64], index: 0, kind: input, shape index: {}]   ;;  %s17963_s4 = inlined_call_operand.vmem [shape: f32[5,1,512], index: 4, kind: input, shape index: {}]   ;;  %s17964_s2 = inlined_call_operand.vmem [shape: f32[4,128,512], index: 2, kind: input, shape index: {}]   ;;  %s17965_s5 = inlined_call_operand.vmem [shape: f32[128,40], index: 5, kind: input, shape index: {}]   ;;  %s17966_s6 = inlined_call_operand.vmem [shape: f32[1,40], index: 6, kind: input, shape index: {}]   ;;  %s17967_s7 = inlined_call_operand.vmem [shape: f32[8,40], index: 7, kind: output, shape index: {}]  }
   0x1   :  { %v35_v0 = vld [vmem:[%s17960_s1 + $0x8] sm:$0xff]  ;;  %v37_v2 = vld [vmem:[%s17960_s1 + $0x18] sm:$0xff]  ;;  %241 = vmatprep.mubr.f32.mxu0 %v13677_v3  ;;  %354 = vmatprep.mubr.f32.mxu1 %v13677_v3  ;;  %v34_v6 = vld [vmem:[%s17960_s1] sm:$0xff] }
   0x2   :  { %v39_v1 = vld [vmem:[%s17960_s1 + $0x28] sm:$0xff]  ;;  %v41_v5 = vld [vmem:[%s17960_s1 + $0x38] sm:$0xff]  ;;  %v38_v7 = vld [vmem:[%s17960_s1 + $0x20] sm:$0xff] }
   0x3   :  { %v9842_v4 = vpack.c.bf16 %v39_v1, %v35_v0  ;;  %v9858_v8 = vpack.c.bf16 %v41_v5, %v37_v2  ;;  %v9844_v9 = vpack.c.bf16 %v38_v7, %v34_v6  ;;  %v36_v10 = vld [vmem:[%s17960_s1 + $0x10] sm:$0xff]  ;;  %v43_v12 = vld [vmem:[%s17960_s1 + $0x48] sm:$0xff]  ;;  %v45_v15 = vld [vmem:[%s17960_s1 + $0x58] sm:$0xff] }
   0x4   :  { %v40_v11 = vld [vmem:[%s17960_s1 + $0x30] sm:$0xff]  ;;  %v47_v14 = vld [vmem:[%s17960_s1 + $0x68] sm:$0xff]  ;;  %v49_v16 = vld [vmem:[%s17960_s1 + $0x78] sm:$0xff] }
   0x5   :  { %9843 = vmatprep.subr.bf16.mxu0 %v9842_v4  ;;  %v9860_v13 = vpack.c.bf16 %v40_v11, %v36_v10  ;;  %9859 = vmatprep.subr.bf16.mxu1 %v9858_v8  ;;  %v9846_v17 = vpack.c.bf16 %v47_v14, %v43_v12  ;;  %v9862_v18 = vpack.c.bf16 %v49_v16, %v45_v15  ;;  %v42_v19 = vld [vmem:[%s17960_s1 + $0x40] sm:$0xff]  ;;  %v44_v21 = vld [vmem:[%s17960_s1 + $0x50] sm:$0xff]  ;;  %v51_v24 = vld [vmem:[%s17960_s1 + $0x88] sm:$0xff] }
   0x6   :  { %9845 = vmatpush1.bf16.msra.mxu0 %v9844_v9  ;;  %v46_v20 = vld [vmem:[%s17960_s1 + $0x60] sm:$0xff]  ;;  %v48_v23 = vld [vmem:[%s17960_s1 + $0x70] sm:$0xff]  ;;  %v55_v25 = vld [vmem:[%s17960_s1 + $0xa8] sm:$0xff] }
   0x7   :  { %9861 = vmatpush1.bf16.msra.mxu1 %v9860_v13  ;;  %v9848_v22 = vpack.c.bf16 %v46_v20, %v42_v19  ;;  %9847 = vmatprep.subr.bf16.mxu0 %v9846_v17  ;;  %v9864_v26 = vpack.c.bf16 %v48_v23, %v44_v21  ;;  %v9850_v27 = vpack.c.bf16 %v55_v25, %v51_v24  ;;  %v53_v28 = vld [vmem:[%s17960_s1 + $0x98] sm:$0xff]  ;;  %v50_v30 = vld [vmem:[%s17960_s1 + $0x80] sm:$0xff]  ;;  %v52_v33 = vld [vmem:[%s17960_s1 + $0x90] sm:$0xff] }
   0x8   :  { %9863 = vmatprep.subr.bf16.mxu1 %v9862_v18  ;;  %v57_v29 = vld [vmem:[%s17960_s1 + $0xb8] sm:$0xff]  ;;  %v54_v32 = vld [vmem:[%s17960_s1 + $0xa0] sm:$0xff]  ;;  %v56_v34 = vld [vmem:[%s17960_s1 + $0xb0] sm:$0xff] }
   0x9   :  { %v9866_v31 = vpack.c.bf16 %v57_v29, %v53_v28  ;;  %v9852_v35 = vpack.c.bf16 %v54_v32, %v50_v30  ;;  %v59_v36 = vld [vmem:[%s17960_s1 + $0xc8] sm:$0xff]  ;;  %v61_v38 = vld [vmem:[%s17960_s1 + $0xd8] sm:$0xff]  ;;  %v9868_v39 = vpack.c.bf16 %v56_v34, %v52_v33  ;;  %v58_v42 = vld [vmem:[%s17960_s1 + $0xc0] sm:$0xff] }
   0xa   :  { %9849 = vmatpush1.bf16.msra.mxu0 %v9848_v22  ;;  %v63_v37 = vld [vmem:[%s17960_s1 + $0xe8] sm:$0xff]  ;;  %v65_v41 = vld [vmem:[%s17960_s1 + $0xf8] sm:$0xff]  ;;  %v62_v43 = vld [vmem:[%s17960_s1 + $0xe0] sm:$0xff] }
   0xb   :  { %9865 = vmatpush1.bf16.msra.mxu1 %v9864_v26  ;;  %9851 = vmatprep.subr.bf16.mxu0 %v9850_v27  ;;  %v9854_v40 = vpack.c.bf16 %v63_v37, %v59_v36  ;;  %v9870_v44 = vpack.c.bf16 %v65_v41, %v61_v38  ;;  %v60_v45 = vld [vmem:[%s17960_s1 + $0xd0] sm:$0xff]  ;;  %v67_v47 = vld [vmem:[%s17961_s3 + $0x8] sm:$0xff]  ;;  %v69_v49 = vld [vmem:[%s17961_s3 + $0x18] sm:$0xff]  ;;  %v9856_v50 = vpack.c.bf16 %v62_v43, %v58_v42 }
   0xc   :  { %9867 = vmatprep.subr.bf16.mxu1 %v9866_v31  ;;  %v64_v46 = vld [vmem:[%s17960_s1 + $0xf0] sm:$0xff]  ;;  %v71_v48 = vld [vmem:[%s17961_s3 + $0x28] sm:$0xff]  ;;  %v73_v51 = vld [vmem:[%s17961_s3 + $0x38] sm:$0xff] }
   0xd   :  { %v9872_v52 = vpack.c.bf16 %v64_v46, %v60_v45  ;;  %v13830_v53 = vpack.c.bf16 %v71_v48, %v67_v47  ;;  %v66_v54 = vld [vmem:[%s17961_s3] sm:$0xff]  ;;  %v13838_v56 = vpack.c.bf16 %v73_v51, %v69_v49  ;;  %v68_v57 = vld [vmem:[%s17961_s3 + $0x10] sm:$0xff]  ;;  %v75_v59 = vld [vmem:[%s17961_s3 + $0x48] sm:$0xff] }
   0xe   :  { %9853 = vmatpush1.bf16.msra.mxu0 %v9852_v35  ;;  %v70_v55 = vld [vmem:[%s17961_s3 + $0x20] sm:$0xff]  ;;  %v72_v58 = vld [vmem:[%s17961_s3 + $0x30] sm:$0xff]  ;;  %v79_v60 = vld [vmem:[%s17961_s3 + $0x68] sm:$0xff] }
   0xf   :  { %9869 = vmatpush1.bf16.msra.mxu1 %v9868_v39  ;;  %9855 = vmatprep.subr.bf16.mxu0 %v9854_v40  ;;  %v26_v61 = vld [vmem:[%s17962_s0] sm:$0xff]  ;;  %v13855_v62 = vpack.c.bf16 %v70_v55, %v66_v54  ;;  %v77_v63 = vld [vmem:[%s17961_s3 + $0x58] sm:$0xff]  ;;  %v13864_v1 = vpack.c.bf16 %v72_v58, %v68_v57  ;;  %v13873_v5 = vpack.c.bf16 %v79_v60, %v75_v59  ;;  %v76_v6 = vld [vmem:[%s17961_s3 + $0x50] sm:$0xff] }
  0x10   :  { %9871 = vmatprep.subr.bf16.mxu1 %v9870_v44  ;;  %v81_v0 = vld [vmem:[%s17961_s3 + $0x78] sm:$0xff]  ;;  %v74_v2 = vld [vmem:[%s17961_s3 + $0x40] sm:$0xff]  ;;  %v80_v7 = vld [vmem:[%s17961_s3 + $0x70] sm:$0xff] }
  0x11   :  { %v78_v4 = vld [vmem:[%s17961_s3 + $0x60] sm:$0xff]  ;;  %v13882_v8 = vpack.c.bf16 %v81_v0, %v77_v63  ;;  %v83_v9 = vld [vmem:[%s17961_s3 + $0x88] sm:$0xff]  ;;  %v85_v13 = vld [vmem:[%s17961_s3 + $0x98] sm:$0xff]  ;;  %v13905_v15 = vpack.c.bf16 %v80_v7, %v76_v6 }
  0x12   :  { %9857 = vmatpush1.bf16.msra.mxu0 %v9856_v50  ;;  %v87_v10 = vld [vmem:[%s17961_s3 + $0xa8] sm:$0xff]  ;;  %v13895_v12 = vpack.c.bf16 %v78_v4, %v74_v2  ;;  %v89_v14 = vld [vmem:[%s17961_s3 + $0xb8] sm:$0xff]  ;;  %v82_v16 = vld [vmem:[%s17961_s3 + $0x80] sm:$0xff] }
  0x13   :  { %9873 = vmatpush1.bf16.msra.mxu1 %v9872_v52  ;;  %9875 = vmatprep.subr.bf16.mxu0 %v13830_v53  ;;  %v27_v11 = vld [vmem:[%s17962_s0 + $0x8] sm:$0xff]  ;;  %v86_v17 = vld [vmem:[%s17961_s3 + $0xa0] sm:$0xff]  ;;  %v13915_v18 = vpack.c.bf16 %v87_v10, %v83_v9  ;;  %v84_v19 = vld [vmem:[%s17961_s3 + $0x90] sm:$0xff]  ;;  %v13925_v21 = vpack.c.bf16 %v89_v14, %v85_v13 }
  0x14   :  { %9907 = vmatprep.subr.bf16.mxu1 %v13838_v56  ;;  %v88_v20 = vld [vmem:[%s17961_s3 + $0xb0] sm:$0xff]  ;;  %v91_v22 = vld [vmem:[%s17961_s3 + $0xc8] sm:$0xff]  ;;  %v13938_v25 = vpack.c.bf16 %v86_v17, %v82_v16  ;;  %v93_v26 = vld [vmem:[%s17961_s3 + $0xd8] sm:$0xff] }
  0x15   :  { %9201 = vmatmul.mubr.msk.f32.vlgmr.msra.gmra.mrb[0].mxu0 %vm152_vm0, %v26_v61  ;;  %v95_v23 = vld [vmem:[%s17961_s3 + $0xe8] sm:$0xff]  ;;  %v28_v24 = vld [vmem:[%s17962_s0 + $0x10] sm:$0xff]  ;;  %v97_v27 = vld [vmem:[%s17961_s3 + $0xf8] sm:$0xff]  ;;  %v13948_v28 = vpack.c.bf16 %v88_v20, %v84_v19 }
  0x16   :  { %9209 = vmatmul.mubr.msk.f32.vlgmr.msra.gmra.mrb[0].mxu1 %vm152_vm0, %v26_v61  ;;  %9877 = vmatpush1.bf16.msra.mxu0 %v13855_v62  ;;  %v90_v29 = vld [vmem:[%s17961_s3 + $0xc0] sm:$0xff]  ;;  %v13958_v31 = vpack.c.bf16 %v95_v23, %v91_v22  ;;  %v92_v32 = vld [vmem:[%s17961_s3 + $0xd0] sm:$0xff]  ;;  %v13968_v34 = vpack.c.bf16 %v97_v27, %v93_v26  ;;  %v99_v35 = vld [vmem:[%s17961_s3 + $0x108] sm:$0xff] }
  0x17   :  { %9909 = vmatpush1.bf16.msra.mxu1 %v13864_v1  ;;  %247 = vmatprep.mubr.f32.mxu0 %v13677_v3  ;;  %v94_v30 = vld [vmem:[%s17961_s3 + $0xe0] sm:$0xff]  ;;  %v96_v33 = vld [vmem:[%s17961_s3 + $0xf0] sm:$0xff]  ;;  %v103_v36 = vld [vmem:[%s17961_s3 + $0x128] sm:$0xff] }
  0x18   :  { %360 = vmatprep.mubr.f32.mxu1 %v13677_v3  ;;  %9879 = vmatprep.subr.bf16.mxu0 %v13873_v5  ;;  %v29_v37 = vld [vmem:[%s17962_s0 + $0x18] sm:$0xff]  ;;  %v13981_v38 = vpack.c.bf16 %v94_v30, %v90_v29  ;;  %v13991_v41 = vpack.c.bf16 %v96_v33, %v92_v32  ;;  %v98_v42 = vld [vmem:[%s17961_s3 + $0x100] sm:$0xff]  ;;  %v14001_v44 = vpack.c.bf16 %v103_v36, %v99_v35  ;;  %v100_v45 = vld [vmem:[%s17961_s3 + $0x110] sm:$0xff] }
  0x19   :  { %9202 = vmatmul.mubr.msk.f32.gmra.mrb[2].mxu0 %vm152_vm0, %v27_v11  ;;  %9911 = vmatprep.subr.bf16.mxu1 %v13882_v8  ;;  %v101_v39 = vld [vmem:[%s17961_s3 + $0x118] sm:$0xff]  ;;  %v102_v43 = vld [vmem:[%s17961_s3 + $0x120] sm:$0xff]  ;;  %v104_v46 = vld [vmem:[%s17961_s3 + $0x130] sm:$0xff] }
  0x1a   :  { %9210 = vmatmul.mubr.msk.f32.gmra.mrb[2].mxu1 %vm152_vm0, %v27_v11  ;;  %9881 = vmatpush1.bf16.msra.mxu0 %v13895_v12  ;;  %v105_v40 = vld [vmem:[%s17961_s3 + $0x138] sm:$0xff]  ;;  %v107_v48 = vld [vmem:[%s17961_s3 + $0x148] sm:$0xff]  ;;  %v30_v50 = vld [vmem:[%s17962_s0 + $0x20] sm:$0xff]  ;;  %v14024_v51 = vpack.c.bf16 %v102_v43, %v98_v42  ;;  %v14034_v55 = vpack.c.bf16 %v104_v46, %v100_v45  ;;  %v132_v43 = vlaneseq }
  0x1b   :  { %9913 = vmatpush1.bf16.msra.mxu1 %v13905_v15  ;;  %253 = vmatprep.mubr.f32.mxu0 %v13677_v3  ;;  %v14011_v47 = vpack.c.bf16 %v105_v40, %v101_v39  ;;  %v111_v49 = vld [vmem:[%s17961_s3 + $0x168] sm:$0xff]  ;;  %v109_v52 = vld [vmem:[%s17961_s3 + $0x158] sm:$0xff]  ;;  %v106_v57 = vld [vmem:[%s17961_s3 + $0x140] sm:$0xff] }
  0x1c   :  { %366 = vmatprep.mubr.f32.mxu1 %v13677_v3  ;;  %9883 = vmatprep.subr.bf16.mxu0 %v13915_v18  ;;  %v113_v54 = vld [vmem:[%s17961_s3 + $0x178] sm:$0xff]  ;;  %v110_v58 = vld [vmem:[%s17961_s3 + $0x160] sm:$0xff]  ;;  %v14044_v59 = vpack.c.bf16 %v111_v49, %v107_v48  ;;  %v108_v60 = vld [vmem:[%s17961_s3 + $0x150] sm:$0xff]  ;;  %v133_v45 = vshrl.u32 %v132_v43, 7 }
  0x1d   :  { %9203 = vmatmul.mubr.msk.f32.gmra.mrb[4].mxu0 %vm152_vm0, %v28_v24  ;;  %9915 = vmatprep.subr.bf16.mxu1 %v13925_v21  ;;  %v112_v61 = vld [vmem:[%s17961_s3 + $0x170] sm:$0xff]  ;;  %v14054_v63 = vpack.c.bf16 %v113_v54, %v109_v52  ;;  %v115_v0 = vld [vmem:[%s17961_s3 + $0x188] sm:$0xff]  ;;  %v14067_v6 = vpack.c.bf16 %v110_v58, %v106_v57  ;;  %v117_v7 = vld [vmem:[%s17961_s3 + $0x198] sm:$0xff] }
  0x1e   :  { %9211 = vmatmul.mubr.msk.f32.gmra.mrb[4].mxu1 %vm152_vm0, %v28_v24  ;;  %9885 = vmatpush1.bf16.msra.mxu0 %v13938_v25  ;;  %v119_v2 = vld [vmem:[%s17961_s3 + $0x1a8] sm:$0xff]  ;;  %v121_v9 = vld [vmem:[%s17961_s3 + $0x1b8] sm:$0xff]  ;;  %v14077_v10 = vpack.c.bf16 %v112_v61, %v108_v60  ;;  %v114_v11 = vld [vmem:[%s17961_s3 + $0x180] sm:$0xff]  ;;  %v14200_v46 = vsub.s32 0, %v133_v45  ;;  %v14205_v49 = vsub.s32 1, %v133_v45  ;;  %v14213_v57 = vsub.s32 3, %v133_v45 }
  0x1f   :  { %9917 = vmatpush1.bf16.msra.mxu1 %v13948_v28  ;;  %259 = vmatprep.mubr.f32.mxu0 %v13677_v3  ;;  %v31_v4 = vld [vmem:[%s17962_s0 + $0x28] sm:$0xff]  ;;  %v118_v13 = vld [vmem:[%s17961_s3 + $0x1a0] sm:$0xff]  ;;  %v14087_v14 = vpack.c.bf16 %v119_v2, %v115_v0  ;;  %v116_v16 = vld [vmem:[%s17961_s3 + $0x190] sm:$0xff]  ;;  %v14097_v19 = vpack.c.bf16 %v121_v9, %v117_v7 }
  0x20   :  { %372 = vmatprep.mubr.f32.mxu1 %v13677_v3  ;;  %9887 = vmatprep.subr.bf16.mxu0 %v13958_v31  ;;  %v120_v17 = vld [vmem:[%s17961_s3 + $0x1b0] sm:$0xff]  ;;  %v123_v20 = vld [vmem:[%s17961_s3 + $0x1c8] sm:$0xff]  ;;  %v14110_v24 = vpack.c.bf16 %v118_v13, %v114_v11  ;;  %v125_v26 = vld [vmem:[%s17961_s3 + $0x1d8] sm:$0xff]  ;;  %v14220_v11 = vsub.s32 2, %v133_v45 }
  0x21   :  { %9204 = vmatmul.mubr.msk.f32.gmra.mrb[6].mxu0 %vm152_vm0, %v29_v37  ;;  %9919 = vmatprep.subr.bf16.mxu1 %v13968_v34  ;;  %v127_v22 = vld [vmem:[%s17961_s3 + $0x1e8] sm:$0xff]  ;;  %v32_v23 = vld [vmem:[%s17962_s0 + $0x30] sm:$0xff]  ;;  %v129_v27 = vld [vmem:[%s17961_s3 + $0x1f8] sm:$0xff]  ;;  %v14120_v29 = vpack.c.bf16 %v120_v17, %v116_v16 }
  0x22   :  { %9212 = vmatmul.mubr.msk.f32.gmra.mrb[6].mxu1 %vm152_vm0, %v29_v37  ;;  %9889 = vmatpush1.bf16.msra.mxu0 %v13981_v38  ;;  %v122_v30 = vld [vmem:[%s17961_s3 + $0x1c0] sm:$0xff]  ;;  %v14130_v33 = vpack.c.bf16 %v127_v22, %v123_v20  ;;  %v124_v35 = vld [vmem:[%s17961_s3 + $0x1d0] sm:$0xff]  ;;  %v14140_v37 = vpack.c.bf16 %v129_v27, %v125_v26  ;;  %v33_v39 = vld [vmem:[%s17962_s0 + $0x38] sm:$0xff] }
  0x23   :  { %9921 = vmatpush1.bf16.msra.mxu1 %v13991_v41  ;;  %265 = vmatprep.mubr.f32.mxu0 %v13677_v3  ;;  %v126_v32 = vld [vmem:[%s17961_s3 + $0x1e0] sm:$0xff]  ;;  %v128_v36 = vld [vmem:[%s17961_s3 + $0x1f0] sm:$0xff] }
  0x24   :  { %378 = vmatprep.mubr.f32.mxu1 %v13677_v3  ;;  %9891 = vmatprep.subr.bf16.mxu0 %v14001_v44  ;;  %v14147_v40 = vpack.c.bf16 %v126_v32, %v122_v30  ;;  %v14151_v42 = vpack.c.bf16 %v128_v36, %v124_v35  ;;  %v130_v48 = vld [vmem:[%s17963_s4] sm:$0xf] }
  0x25   :  { %9205 = vmatmul.mubr.msk.f32.gmra.mrb[8].mxu0 %vm152_vm0, %v30_v50  ;;  %9923 = vmatprep.subr.bf16.mxu1 %v14011_v47  ;;  %v14211_v52 = vrot.slane %v130_v48, %v14205_v49  ;;  %v14218_v9 = vrot.slane %v130_v48, %v14213_v57  ;;  %v14224_v16 = vrot.slane %v130_v48, %v14220_v11 }
  0x26   :  { %9213 = vmatmul.mubr.msk.f32.gmra.mrb[8].mxu1 %vm152_vm0, %v30_v50  ;;  %9893 = vmatpush1.bf16.msra.mxu0 %v14024_v51  ;;  %v14208_v50 = vrot.slane %v130_v48, %v14200_v46 }
  0x27   :  { %9925 = vmatpush1.bf16.msra.mxu1 %v14034_v55  ;;  %271 = vmatprep.mubr.f32.mxu0 %v13677_v3 }
  0x28   :  { %384 = vmatprep.mubr.f32.mxu1 %v13677_v3  ;;  %9895 = vmatprep.subr.bf16.mxu0 %v14044_v59 }
  0x29   :  { %9206 = vmatmul.mubr.msk.f32.gmra.mrb[10].mxu0 %vm152_vm0, %v31_v4  ;;  %9927 = vmatprep.subr.bf16.mxu1 %v14054_v63 }
  0x2a   :  { %9214 = vmatmul.mubr.msk.f32.gmra.mrb[10].mxu1 %vm152_vm0, %v31_v4  ;;  %9897 = vmatpush1.bf16.msra.mxu0 %v14067_v6 }
  0x2b   :  { %9929 = vmatpush1.bf16.msra.mxu1 %v14077_v10  ;;  %277 = vmatprep.mubr.f32.mxu0 %v13677_v3 }
  0x2c   :  { %390 = vmatprep.mubr.f32.mxu1 %v13677_v3  ;;  %9899 = vmatprep.subr.bf16.mxu0 %v14087_v14 }
  0x2d   :  { %9207 = vmatmul.mubr.msk.f32.gmra.mrb[12].mxu0 %vm152_vm0, %v32_v23  ;;  %9931 = vmatprep.subr.bf16.mxu1 %v14097_v19 }
  0x2e   :  { %9215 = vmatmul.mubr.msk.f32.gmra.mrb[12].mxu1 %vm152_vm0, %v32_v23  ;;  %9901 = vmatpush1.bf16.msra.mxu0 %v14110_v24 }
  0x2f   :  { %9933 = vmatpush1.bf16.msra.mxu1 %v14120_v29  ;;  %283 = vmatprep.mubr.f32.mxu0 %v13677_v3 }
  0x30   :  { %396 = vmatprep.mubr.f32.mxu1 %v13677_v3  ;;  %9903 = vmatprep.subr.bf16.mxu0 %v14130_v33 }
  0x31   :  { %9208 = vmatmul.mubr.msk.f32.gmra.mrb[14].mxu0 %vm152_vm0, %v33_v39  ;;  %9935 = vmatprep.subr.bf16.mxu1 %v14140_v37 }
  0x32   :  { %9216 = vmatmul.mubr.msk.f32.gmra.mrb[14].mxu1 %vm152_vm0, %v33_v39  ;;  %9905 = vmatpush1.bf16.msra.mxu0 %v14147_v40 }
  0x33   :  { %9937 = vmatpush1.bf16.msra.mxu1 %v14151_v42  ;;  %503 = vmatprep.mubr.f32.mxu0 %v13677_v3 }
  0x34   :  { %574 = vmatprep.mubr.f32.mxu1 %v13677_v3  ;;  %9939 = vmatprep.subr.bf16.mxu0 %v13830_v53 }
  0x35   :  { %504 = vmatmul.mubr.f32.vlgmr.msra.gmra.mrb[0].mxu0 %v13677_v3  ;;  %9971 = vmatprep.subr.bf16.mxu1 %v13838_v56 }
  0x36   :  { %575 = vmatmul.mubr.f32.vlgmr.msra.gmra.mrb[0].mxu1 %v13677_v3  ;;  %9941 = vmatpush1.bf16.msra.mxu0 %v13855_v62 }
  0x37   :  { %9973 = vmatpush1.bf16.msra.mxu1 %v13864_v1  ;;  %9943 = vmatprep.subr.bf16.mxu0 %v13873_v5 }
  0x38   :  { %9975 = vmatprep.subr.bf16.mxu1 %v13882_v8  ;;  %678 = vmatprep.mubr.f32.mxu0 %v13677_v3 }
  0x39   :  { %749 = vmatprep.mubr.f32.mxu1 %v13677_v3 }
  0x3a   :  { %9945 = vmatpush1.bf16.msra.mxu0 %v13895_v12 }
  0x3b   :  { %9977 = vmatpush1.bf16.msra.mxu1 %v13905_v15  ;;  %9947 = vmatprep.subr.bf16.mxu0 %v13915_v18 }
  0x3c   :  { %9979 = vmatprep.subr.bf16.mxu1 %v13925_v21 }
  0x3e   :  { %9949 = vmatpush1.bf16.msra.mxu0 %v13938_v25 }
  0x3f   :  { %9981 = vmatpush1.bf16.msra.mxu1 %v13948_v28  ;;  %9951 = vmatprep.subr.bf16.mxu0 %v13958_v31 }
  0x40   :  { %9983 = vmatprep.subr.bf16.mxu1 %v13968_v34 }
  0x42   :  { %9953 = vmatpush1.bf16.msra.mxu0 %v13981_v38 }
  0x43   :  { %9985 = vmatpush1.bf16.msra.mxu1 %v13991_v41  ;;  %9955 = vmatprep.subr.bf16.mxu0 %v14001_v44 }
  0x44   :  { %9987 = vmatprep.subr.bf16.mxu1 %v14011_v47 }
  0x46   :  { %9957 = vmatpush1.bf16.msra.mxu0 %v14024_v51 }
  0x47   :  { %9989 = vmatpush1.bf16.msra.mxu1 %v14034_v55  ;;  %9959 = vmatprep.subr.bf16.mxu0 %v14044_v59 }
  0x48   :  { %9991 = vmatprep.subr.bf16.mxu1 %v14054_v63 }
  0x4a   :  { %9961 = vmatpush1.bf16.msra.mxu0 %v14067_v6 }
  0x4b   :  { %9993 = vmatpush1.bf16.msra.mxu1 %v14077_v10  ;;  %9963 = vmatprep.subr.bf16.mxu0 %v14087_v14 }
  0x4c   :  { %9995 = vmatprep.subr.bf16.mxu1 %v14097_v19 }
  0x4e   :  { %9965 = vmatpush1.bf16.msra.mxu0 %v14110_v24 }
  0x4f   :  { %9997 = vmatpush1.bf16.msra.mxu1 %v14120_v29  ;;  %9967 = vmatprep.subr.bf16.mxu0 %v14130_v33 }
  0x50   :  { %9999 = vmatprep.subr.bf16.mxu1 %v14140_v37 }
  0x52   :  { %9969 = vmatpush1.bf16.msra.mxu0 %v14147_v40 }
  0x53   :  { %10001 = vmatpush1.bf16.msra.mxu1 %v14151_v42  ;;  %10003 = vmatprep.subr.bf16.mxu0 %v13830_v53 }
  0x54   :  { %10035 = vmatprep.subr.bf16.mxu1 %v13838_v56 }
 0x108   :  { %v505_v54 = vpop.f32.mrb[0].mxu0 }
 0x109   :  { %v12714_v58 = vadd.f32 %v505_v54, %v14208_v50  ;;  %v576_v60 = vpop.f32.mrb[0].mxu1  ;;  %v507_v61 = vpop.f32.mrb[1].mxu0 }
 0x10a   :  { %v12715_v0 = vadd.f32 %v507_v61, %v14211_v52  ;;  %v578_v2 = vpop.f32.mrb[1].mxu1  ;;  %v12730_v20 = vadd.f32 %v576_v60, %v14224_v16 }
 0x10b   :  { %v9217_v4 = vmul.f32 -1.442695, %v12714_v58  ;;  %v12731_v13 = vadd.f32 %v578_v2, %v14218_v9 }
 0x10c   :  { %v9218_v7 = vmul.f32 -1.442695, %v12715_v0 }
 0x10d   :  { %13037 = vpow2.f32 %v9217_v4  ;;  %v9219_v17 = vmul.f32 -1.442695, %v12731_v13 }
 0x10e   :  { %13039 = vpow2.f32 %v9218_v7 }
 0x10f   :  { %13041 = vpow2.f32 %v9219_v17 }
 0x110   :  { %13043 = vtanh.f32 %v12730_v20 }
 0x117   :  { %v13038_v22 = vpop.eup %13037 }
 0x118   :  { %v13040_v23 = vpop.eup %13039  ;;  %v588_v26 = vadd.f32 1.0, %v13038_v22 }
 0x119   :  { %v594_v27 = vadd.f32 1.0, %v13040_v23  ;;  %v13042_v30 = vpop.eup %13041 }
 0x11a   :  { %13045 = vrcp.f32 %v588_v26  ;;  %v13044_v32 = vpop.eup %13043  ;;  %v601_v43 = vadd.f32 1.0, %v13042_v30 }
 0x11b   :  { %13047 = vrcp.f32 %v594_v27 }
 0x11c   :  { %13049 = vrcp.f32 %v601_v43 }
 0x124   :  { %v13046_v35 = vpop.eup %13045 }
 0x125   :  { %v13048_v36 = vpop.eup %13047  ;;  %v605_v39 = vmul.f32 %v13046_v35, %v13044_v32 }
 0x126   :  { %v604_v45 = vmul.f32 0.0, %v13048_v36  ;;  %v13050_v54 = vpop.eup %13049 }
 0x128   :  { %v14227_v48 = vadd.f32 %v605_v39, %v604_v45 }
 0x12a   :  { %13051 = vtanh.f32 %v14227_v48 }
 0x134   :  { %v13052_v58 = vpop.eup %13051 }
 0x135   :  { %v14230_v60 = vmul.f32 %v13052_v58, %v13050_v54 }
 0x137   :  { %679 = vmatmul.mubr.f32.vlgmr.msra.gmra.mrb[2].mxu0 %v14230_v60  ;;  %750 = vmatmul.mubr.f32.vlgmr.msra.gmra.mrb[2].mxu1 %v14230_v60 }
 0x138   :  { %10005 = vmatpush1.bf16.msra.mxu0 %v13855_v62  ;;  %10037 = vmatpush1.bf16.msra.mxu1 %v13864_v1 }
 0x139   :  { %10007 = vmatprep.subr.bf16.mxu0 %v13873_v5  ;;  %10039 = vmatprep.subr.bf16.mxu1 %v13882_v8 }
 0x13a   :  { %853 = vmatprep.mubr.f32.mxu0 %v13677_v3  ;;  %924 = vmatprep.mubr.f32.mxu1 %v13677_v3 }
 0x13c   :  { %10009 = vmatpush1.bf16.msra.mxu0 %v13895_v12  ;;  %10041 = vmatpush1.bf16.msra.mxu1 %v13905_v15 }
 0x13d   :  { %10011 = vmatprep.subr.bf16.mxu0 %v13915_v18  ;;  %10043 = vmatprep.subr.bf16.mxu1 %v13925_v21 }
 0x140   :  { %10013 = vmatpush1.bf16.msra.mxu0 %v13938_v25  ;;  %10045 = vmatpush1.bf16.msra.mxu1 %v13948_v28 }
 0x141   :  { %10015 = vmatprep.subr.bf16.mxu0 %v13958_v31  ;;  %10047 = vmatprep.subr.bf16.mxu1 %v13968_v34 }
 0x144   :  { %10017 = vmatpush1.bf16.msra.mxu0 %v13981_v38  ;;  %10049 = vmatpush1.bf16.msra.mxu1 %v13991_v41 }
 0x145   :  { %10019 = vmatprep.subr.bf16.mxu0 %v14001_v44  ;;  %10051 = vmatprep.subr.bf16.mxu1 %v14011_v47 }
 0x148   :  { %10021 = vmatpush1.bf16.msra.mxu0 %v14024_v51  ;;  %10053 = vmatpush1.bf16.msra.mxu1 %v14034_v55 }
 0x149   :  { %10023 = vmatprep.subr.bf16.mxu0 %v14044_v59  ;;  %10055 = vmatprep.subr.bf16.mxu1 %v14054_v63 }
 0x14c   :  { %10025 = vmatpush1.bf16.msra.mxu0 %v14067_v6  ;;  %10057 = vmatpush1.bf16.msra.mxu1 %v14077_v10 }
 0x14d   :  { %10027 = vmatprep.subr.bf16.mxu0 %v14087_v14  ;;  %10059 = vmatprep.subr.bf16.mxu1 %v14097_v19 }
 0x150   :  { %10029 = vmatpush1.bf16.msra.mxu0 %v14110_v24  ;;  %10061 = vmatpush1.bf16.msra.mxu1 %v14120_v29 }
 0x151   :  { %10031 = vmatprep.subr.bf16.mxu0 %v14130_v33  ;;  %10063 = vmatprep.subr.bf16.mxu1 %v14140_v37 }
 0x154   :  { %10033 = vmatpush1.bf16.msra.mxu0 %v14147_v40  ;;  %10065 = vmatpush1.bf16.msra.mxu1 %v14151_v42 }
 0x155   :  { %10067 = vmatprep.subr.bf16.mxu0 %v13830_v53  ;;  %10099 = vmatprep.subr.bf16.mxu1 %v13838_v56 }
 0x20a   :  { %v680_v61 = vpop.f32.mrb[2].mxu0  ;;  %v751_v0 = vpop.f32.mrb[2].mxu1 }
 0x20b   :  { %v12716_v2 = vadd.f32 %v680_v61, %v14208_v50  ;;  %v682_v4 = vpop.f32.mrb[3].mxu0  ;;  %v753_v7 = vpop.f32.mrb[3].mxu1  ;;  %v12732_v26 = vadd.f32 %v751_v0, %v14224_v16 }
 0x20c   :  { %v12717_v13 = vadd.f32 %v682_v4, %v14211_v52  ;;  %v12733_v22 = vadd.f32 %v753_v7, %v14218_v9 }
 0x20d   :  { %v9220_v17 = vmul.f32 -1.442695, %v12716_v2 }
 0x20e   :  { %v9221_v20 = vmul.f32 -1.442695, %v12717_v13  ;;  %v9222_v23 = vmul.f32 -1.442695, %v12733_v22 }
 0x20f   :  { %13053 = vpow2.f32 %v9220_v17 }
 0x210   :  { %13055 = vpow2.f32 %v9221_v20 }
 0x211   :  { %13057 = vpow2.f32 %v9222_v23 }
 0x212   :  { %13059 = vtanh.f32 %v12732_v26 }
 0x219   :  { %v13054_v27 = vpop.eup %13053 }
 0x21a   :  { %v13056_v30 = vpop.eup %13055  ;;  %v763_v32 = vadd.f32 1.0, %v13054_v27 }
 0x21b   :  { %v769_v35 = vadd.f32 1.0, %v13056_v30  ;;  %v13058_v36 = vpop.eup %13057 }
 0x21c   :  { %13061 = vrcp.f32 %v763_v32  ;;  %v13060_v39 = vpop.eup %13059  ;;  %v776_v58 = vadd.f32 1.0, %v13058_v36 }
 0x21d   :  { %13063 = vrcp.f32 %v769_v35 }
 0x21e   :  { %13065 = vrcp.f32 %v776_v58 }
 0x226   :  { %v13062_v43 = vpop.eup %13061 }
 0x227   :  { %v13064_v45 = vpop.eup %13063  ;;  %v780_v54 = vmul.f32 %v13062_v43, %v13060_v39 }
 0x228   :  { %v779_v61 = vmul.f32 %v13064_v45, %v14227_v48  ;;  %v13066_v0 = vpop.eup %13065 }
 0x22a   :  { %v14273_v2 = vadd.f32 %v780_v54, %v779_v61 }
 0x22c   :  { %13067 = vtanh.f32 %v14273_v2 }
 0x236   :  { %v13068_v4 = vpop.eup %13067 }
 0x237   :  { %v14276_v7 = vmul.f32 %v13068_v4, %v13066_v0 }
 0x239   :  { %854 = vmatmul.mubr.f32.vlgmr.msra.gmra.mrb[4].mxu0 %v14276_v7  ;;  %925 = vmatmul.mubr.f32.vlgmr.msra.gmra.mrb[4].mxu1 %v14276_v7 }
 0x23a   :  { %10069 = vmatpush1.bf16.msra.mxu0 %v13855_v62  ;;  %10101 = vmatpush1.bf16.msra.mxu1 %v13864_v1 }
 0x23b   :  { %10071 = vmatprep.subr.bf16.mxu0 %v13873_v5  ;;  %10103 = vmatprep.subr.bf16.mxu1 %v13882_v8 }
 0x23c   :  { %1028 = vmatprep.mubr.f32.mxu0 %v13677_v3  ;;  %1099 = vmatprep.mubr.f32.mxu1 %v13677_v3 }
 0x23e   :  { %10073 = vmatpush1.bf16.msra.mxu0 %v13895_v12  ;;  %10105 = vmatpush1.bf16.msra.mxu1 %v13905_v15 }
 0x23f   :  { %10075 = vmatprep.subr.bf16.mxu0 %v13915_v18  ;;  %10107 = vmatprep.subr.bf16.mxu1 %v13925_v21 }
 0x242   :  { %10077 = vmatpush1.bf16.msra.mxu0 %v13938_v25  ;;  %10109 = vmatpush1.bf16.msra.mxu1 %v13948_v28 }
 0x243   :  { %10079 = vmatprep.subr.bf16.mxu0 %v13958_v31  ;;  %10111 = vmatprep.subr.bf16.mxu1 %v13968_v34 }
 0x246   :  { %10081 = vmatpush1.bf16.msra.mxu0 %v13981_v38  ;;  %10113 = vmatpush1.bf16.msra.mxu1 %v13991_v41 }
 0x247   :  { %10083 = vmatprep.subr.bf16.mxu0 %v14001_v44  ;;  %10115 = vmatprep.subr.bf16.mxu1 %v14011_v47 }
 0x24a   :  { %10085 = vmatpush1.bf16.msra.mxu0 %v14024_v51  ;;  %10117 = vmatpush1.bf16.msra.mxu1 %v14034_v55 }
 0x24b   :  { %10087 = vmatprep.subr.bf16.mxu0 %v14044_v59  ;;  %10119 = vmatprep.subr.bf16.mxu1 %v14054_v63 }
 0x24e   :  { %10089 = vmatpush1.bf16.msra.mxu0 %v14067_v6  ;;  %10121 = vmatpush1.bf16.msra.mxu1 %v14077_v10 }
 0x24f   :  { %10091 = vmatprep.subr.bf16.mxu0 %v14087_v14  ;;  %10123 = vmatprep.subr.bf16.mxu1 %v14097_v19 }
 0x252   :  { %10093 = vmatpush1.bf16.msra.mxu0 %v14110_v24  ;;  %10125 = vmatpush1.bf16.msra.mxu1 %v14120_v29 }
 0x253   :  { %10095 = vmatprep.subr.bf16.mxu0 %v14130_v33  ;;  %10127 = vmatprep.subr.bf16.mxu1 %v14140_v37 }
 0x256   :  { %10097 = vmatpush1.bf16.msra.mxu0 %v14147_v40  ;;  %10129 = vmatpush1.bf16.msra.mxu1 %v14151_v42 }
 0x257   :  { %10131 = vmatprep.subr.bf16.mxu0 %v13830_v53  ;;  %10163 = vmatprep.subr.bf16.mxu1 %v13838_v56 }
 0x30c   :  { %v855_v48 = vpop.f32.mrb[4].mxu0  ;;  %v926_v13 = vpop.f32.mrb[4].mxu1 }
 0x30d   :  { %v12718_v17 = vadd.f32 %v855_v48, %v14208_v50  ;;  %v857_v20 = vpop.f32.mrb[5].mxu0  ;;  %v928_v22 = vpop.f32.mrb[5].mxu1  ;;  %v12734_v35 = vadd.f32 %v926_v13, %v14224_v16 }
 0x30e   :  { %v12719_v23 = vadd.f32 %v857_v20, %v14211_v52  ;;  %v12735_v30 = vadd.f32 %v928_v22, %v14218_v9 }
 0x30f   :  { %v9223_v26 = vmul.f32 -1.442695, %v12718_v17 }
 0x310   :  { %v9224_v27 = vmul.f32 -1.442695, %v12719_v23  ;;  %v9225_v32 = vmul.f32 -1.442695, %v12735_v30 }
 0x311   :  { %13069 = vpow2.f32 %v9223_v26 }
 0x312   :  { %13071 = vpow2.f32 %v9224_v27 }
 0x313   :  { %13073 = vpow2.f32 %v9225_v32 }
 0x314   :  { %13075 = vtanh.f32 %v12734_v35 }
 0x31b   :  { %v13070_v36 = vpop.eup %13069 }
 0x31c   :  { %v13072_v39 = vpop.eup %13071  ;;  %v938_v43 = vadd.f32 1.0, %v13070_v36 }
 0x31d   :  { %v944_v45 = vadd.f32 1.0, %v13072_v39  ;;  %v13074_v54 = vpop.eup %13073 }
 0x31e   :  { %13077 = vrcp.f32 %v938_v43  ;;  %v13076_v58 = vpop.eup %13075  ;;  %v951_v48 = vadd.f32 1.0, %v13074_v54 }
 0x31f   :  { %13079 = vrcp.f32 %v944_v45 }
 0x320   :  { %13081 = vrcp.f32 %v951_v48 }
 0x328   :  { %v13078_v61 = vpop.eup %13077 }
 0x329   :  { %v13080_v0 = vpop.eup %13079  ;;  %v955_v4 = vmul.f32 %v13078_v61, %v13076_v58 }
 0x32a   :  { %v954_v17 = vmul.f32 %v13080_v0, %v14273_v2  ;;  %v13082_v13 = vpop.eup %13081 }
 0x32c   :  { %v14319_v20 = vadd.f32 %v955_v4, %v954_v17 }
 0x32e   :  { %13083 = vtanh.f32 %v14319_v20 }
 0x338   :  { %v13084_v22 = vpop.eup %13083 }
 0x339   :  { %v14322_v23 = vmul.f32 %v13084_v22, %v13082_v13 }
 0x33b   :  { %1029 = vmatmul.mubr.f32.vlgmr.msra.gmra.mrb[6].mxu0 %v14322_v23  ;;  %1100 = vmatmul.mubr.f32.vlgmr.msra.gmra.mrb[6].mxu1 %v14322_v23 }
 0x33c   :  { %10133 = vmatpush1.bf16.msra.mxu0 %v13855_v62  ;;  %10165 = vmatpush1.bf16.msra.mxu1 %v13864_v1 }
 0x33d   :  { %10135 = vmatprep.subr.bf16.mxu0 %v13873_v5  ;;  %10167 = vmatprep.subr.bf16.mxu1 %v13882_v8 }
 0x33e   :  { %1203 = vmatprep.mubr.f32.mxu0 %v13677_v3  ;;  %1274 = vmatprep.mubr.f32.mxu1 %v13677_v3 }
 0x340   :  { %10137 = vmatpush1.bf16.msra.mxu0 %v13895_v12  ;;  %10169 = vmatpush1.bf16.msra.mxu1 %v13905_v15 }
 0x341   :  { %10139 = vmatprep.subr.bf16.mxu0 %v13915_v18  ;;  %10171 = vmatprep.subr.bf16.mxu1 %v13925_v21 }
 0x344   :  { %10141 = vmatpush1.bf16.msra.mxu0 %v13938_v25  ;;  %10173 = vmatpush1.bf16.msra.mxu1 %v13948_v28 }
 0x345   :  { %10143 = vmatprep.subr.bf16.mxu0 %v13958_v31  ;;  %10175 = vmatprep.subr.bf16.mxu1 %v13968_v34 }
 0x348   :  { %10145 = vmatpush1.bf16.msra.mxu0 %v13981_v38  ;;  %10177 = vmatpush1.bf16.msra.mxu1 %v13991_v41 }
 0x349   :  { %10147 = vmatprep.subr.bf16.mxu0 %v14001_v44  ;;  %10179 = vmatprep.subr.bf16.mxu1 %v14011_v47 }
 0x34c   :  { %10149 = vmatpush1.bf16.msra.mxu0 %v14024_v51  ;;  %10181 = vmatpush1.bf16.msra.mxu1 %v14034_v55 }
 0x34d   :  { %10151 = vmatprep.subr.bf16.mxu0 %v14044_v59  ;;  %10183 = vmatprep.subr.bf16.mxu1 %v14054_v63 }
 0x350   :  { %10153 = vmatpush1.bf16.msra.mxu0 %v14067_v6  ;;  %10185 = vmatpush1.bf16.msra.mxu1 %v14077_v10 }
 0x351   :  { %10155 = vmatprep.subr.bf16.mxu0 %v14087_v14  ;;  %10187 = vmatprep.subr.bf16.mxu1 %v14097_v19 }
 0x354   :  { %10157 = vmatpush1.bf16.msra.mxu0 %v14110_v24  ;;  %10189 = vmatpush1.bf16.msra.mxu1 %v14120_v29 }
 0x355   :  { %10159 = vmatprep.subr.bf16.mxu0 %v14130_v33  ;;  %10191 = vmatprep.subr.bf16.mxu1 %v14140_v37 }
 0x358   :  { %10161 = vmatpush1.bf16.msra.mxu0 %v14147_v40  ;;  %10193 = vmatpush1.bf16.msra.mxu1 %v14151_v42 }
 0x359   :  { %10195 = vmatprep.subr.bf16.mxu0 %v13830_v53  ;;  %10227 = vmatprep.subr.bf16.mxu1 %v13838_v56 }
 0x40e   :  { %v1030_v2 = vpop.f32.mrb[6].mxu0  ;;  %v1101_v26 = vpop.f32.mrb[6].mxu1 }
 0x40f   :  { %v12720_v27 = vadd.f32 %v1030_v2, %v14208_v50  ;;  %v1032_v30 = vpop.f32.mrb[7].mxu0  ;;  %v1103_v32 = vpop.f32.mrb[7].mxu1  ;;  %v12736_v54 = vadd.f32 %v1101_v26, %v14224_v16 }
 0x410   :  { %v12721_v35 = vadd.f32 %v1032_v30, %v14211_v52  ;;  %v12737_v43 = vadd.f32 %v1103_v32, %v14218_v9 }
 0x411   :  { %v9226_v36 = vmul.f32 -1.442695, %v12720_v27 }
 0x412   :  { %v9227_v39 = vmul.f32 -1.442695, %v12721_v35  ;;  %v9228_v45 = vmul.f32 -1.442695, %v12737_v43 }
 0x413   :  { %13085 = vpow2.f32 %v9226_v36 }
 0x414   :  { %13087 = vpow2.f32 %v9227_v39 }
 0x415   :  { %13089 = vpow2.f32 %v9228_v45 }
 0x416   :  { %13091 = vtanh.f32 %v12736_v54 }
 0x41d   :  { %v13086_v58 = vpop.eup %13085 }
 0x41e   :  { %v13088_v61 = vpop.eup %13087  ;;  %v1113_v0 = vadd.f32 1.0, %v13086_v58 }
 0x41f   :  { %v1119_v4 = vadd.f32 1.0, %v13088_v61  ;;  %v13090_v48 = vpop.eup %13089 }
 0x420   :  { %13093 = vrcp.f32 %v1113_v0  ;;  %v13092_v17 = vpop.eup %13091  ;;  %v1126_v27 = vadd.f32 1.0, %v13090_v48 }
 0x421   :  { %13095 = vrcp.f32 %v1119_v4 }
 0x422   :  { %13097 = vrcp.f32 %v1126_v27 }
 0x42a   :  { %v13094_v13 = vpop.eup %13093 }
 0x42b   :  { %v13096_v22 = vpop.eup %13095  ;;  %v1130_v2 = vmul.f32 %v13094_v13, %v13092_v17 }
 0x42c   :  { %v1129_v30 = vmul.f32 %v13096_v22, %v14319_v20  ;;  %v13098_v26 = vpop.eup %13097 }
 0x42e   :  { %v14365_v32 = vadd.f32 %v1130_v2, %v1129_v30 }
 0x430   :  { %13099 = vtanh.f32 %v14365_v32 }
 0x43a   :  { %v13100_v35 = vpop.eup %13099 }
 0x43b   :  { %v14368_v36 = vmul.f32 %v13100_v35, %v13098_v26 }
 0x43d   :  { %1204 = vmatmul.mubr.f32.vlgmr.msra.gmra.mrb[8].mxu0 %v14368_v36  ;;  %1275 = vmatmul.mubr.f32.vlgmr.msra.gmra.mrb[8].mxu1 %v14368_v36 }
 0x43e   :  { %10197 = vmatpush1.bf16.msra.mxu0 %v13855_v62  ;;  %10229 = vmatpush1.bf16.msra.mxu1 %v13864_v1 }
 0x43f   :  { %10199 = vmatprep.subr.bf16.mxu0 %v13873_v5  ;;  %10231 = vmatprep.subr.bf16.mxu1 %v13882_v8 }
 0x440   :  { %1378 = vmatprep.mubr.f32.mxu0 %v13677_v3  ;;  %1449 = vmatprep.mubr.f32.mxu1 %v13677_v3 }
 0x442   :  { %10201 = vmatpush1.bf16.msra.mxu0 %v13895_v12  ;;  %10233 = vmatpush1.bf16.msra.mxu1 %v13905_v15 }
 0x443   :  { %10203 = vmatprep.subr.bf16.mxu0 %v13915_v18  ;;  %10235 = vmatprep.subr.bf16.mxu1 %v13925_v21 }
 0x446   :  { %10205 = vmatpush1.bf16.msra.mxu0 %v13938_v25  ;;  %10237 = vmatpush1.bf16.msra.mxu1 %v13948_v28 }
 0x447   :  { %10207 = vmatprep.subr.bf16.mxu0 %v13958_v31  ;;  %10239 = vmatprep.subr.bf16.mxu1 %v13968_v34 }
 0x44a   :  { %10209 = vmatpush1.bf16.msra.mxu0 %v13981_v38  ;;  %10241 = vmatpush1.bf16.msra.mxu1 %v13991_v41 }
 0x44b   :  { %10211 = vmatprep.subr.bf16.mxu0 %v14001_v44  ;;  %10243 = vmatprep.subr.bf16.mxu1 %v14011_v47 }
 0x44e   :  { %10213 = vmatpush1.bf16.msra.mxu0 %v14024_v51  ;;  %10245 = vmatpush1.bf16.msra.mxu1 %v14034_v55 }
 0x44f   :  { %10215 = vmatprep.subr.bf16.mxu0 %v14044_v59  ;;  %10247 = vmatprep.subr.bf16.mxu1 %v14054_v63 }
 0x452   :  { %10217 = vmatpush1.bf16.msra.mxu0 %v14067_v6  ;;  %10249 = vmatpush1.bf16.msra.mxu1 %v14077_v10 }
 0x453   :  { %10219 = vmatprep.subr.bf16.mxu0 %v14087_v14  ;;  %10251 = vmatprep.subr.bf16.mxu1 %v14097_v19 }
 0x456   :  { %10221 = vmatpush1.bf16.msra.mxu0 %v14110_v24  ;;  %10253 = vmatpush1.bf16.msra.mxu1 %v14120_v29 }
 0x457   :  { %10223 = vmatprep.subr.bf16.mxu0 %v14130_v33  ;;  %10255 = vmatprep.subr.bf16.mxu1 %v14140_v37 }
 0x45a   :  { %10225 = vmatpush1.bf16.msra.mxu0 %v14147_v40  ;;  %10257 = vmatpush1.bf16.msra.mxu1 %v14151_v42 }
 0x45b   :  { %10259 = vmatprep.subr.bf16.mxu0 %v13830_v53  ;;  %10291 = vmatprep.subr.bf16.mxu1 %v13838_v56 }
 0x510   :  { %v1205_v20 = vpop.f32.mrb[8].mxu0  ;;  %v1276_v39 = vpop.f32.mrb[8].mxu1 }
 0x511   :  { %v12722_v43 = vadd.f32 %v1205_v20, %v14208_v50  ;;  %v1207_v45 = vpop.f32.mrb[9].mxu0  ;;  %v1278_v54 = vpop.f32.mrb[9].mxu1  ;;  %v12738_v17 = vadd.f32 %v1276_v39, %v14224_v16 }
 0x512   :  { %v12723_v58 = vadd.f32 %v1207_v45, %v14211_v52  ;;  %v12739_v4 = vadd.f32 %v1278_v54, %v14218_v9 }
 0x513   :  { %v9229_v61 = vmul.f32 -1.442695, %v12722_v43 }
 0x514   :  { %v9230_v0 = vmul.f32 -1.442695, %v12723_v58  ;;  %v9231_v48 = vmul.f32 -1.442695, %v12739_v4 }
 0x515   :  { %13101 = vpow2.f32 %v9229_v61 }
 0x516   :  { %13103 = vpow2.f32 %v9230_v0 }
 0x517   :  { %13105 = vpow2.f32 %v9231_v48 }
 0x518   :  { %13107 = vtanh.f32 %v12738_v17 }
 0x51f   :  { %v13102_v13 = vpop.eup %13101 }
 0x520   :  { %v13104_v22 = vpop.eup %13103  ;;  %v1288_v2 = vadd.f32 1.0, %v13102_v13 }
 0x521   :  { %v1294_v27 = vadd.f32 1.0, %v13104_v22  ;;  %v13106_v30 = vpop.eup %13105 }
 0x522   :  { %13109 = vrcp.f32 %v1288_v2  ;;  %v13108_v26 = vpop.eup %13107  ;;  %v1301_v45 = vadd.f32 1.0, %v13106_v30 }
 0x523   :  { %13111 = vrcp.f32 %v1294_v27 }
 0x524   :  { %13113 = vrcp.f32 %v1301_v45 }
 0x52c   :  { %v13110_v35 = vpop.eup %13109 }
 0x52d   :  { %v13112_v20 = vpop.eup %13111  ;;  %v1305_v43 = vmul.f32 %v13110_v35, %v13108_v26 }
 0x52e   :  { %v1304_v58 = vmul.f32 %v13112_v20, %v14365_v32  ;;  %v13114_v39 = vpop.eup %13113 }
 0x530   :  { %v14411_v54 = vadd.f32 %v1305_v43, %v1304_v58 }
 0x532   :  { %13115 = vtanh.f32 %v14411_v54 }
 0x53c   :  { %v13116_v61 = vpop.eup %13115 }
 0x53d   :  { %v14414_v0 = vmul.f32 %v13116_v61, %v13114_v39 }
 0x53f   :  { %1379 = vmatmul.mubr.f32.vlgmr.msra.gmra.mrb[10].mxu0 %v14414_v0  ;;  %1450 = vmatmul.mubr.f32.vlgmr.msra.gmra.mrb[10].mxu1 %v14414_v0 }
 0x540   :  { %10261 = vmatpush1.bf16.msra.mxu0 %v13855_v62  ;;  %10293 = vmatpush1.bf16.msra.mxu1 %v13864_v1 }
 0x541   :  { %10263 = vmatprep.subr.bf16.mxu0 %v13873_v5  ;;  %10295 = vmatprep.subr.bf16.mxu1 %v13882_v8 }
 0x542   :  { %1553 = vmatprep.mubr.f32.mxu0 %v13677_v3  ;;  %1624 = vmatprep.mubr.f32.mxu1 %v13677_v3 }
 0x544   :  { %10265 = vmatpush1.bf16.msra.mxu0 %v13895_v12  ;;  %10297 = vmatpush1.bf16.msra.mxu1 %v13905_v15 }
 0x545   :  { %10267 = vmatprep.subr.bf16.mxu0 %v13915_v18  ;;  %10299 = vmatprep.subr.bf16.mxu1 %v13925_v21 }
 0x548   :  { %10269 = vmatpush1.bf16.msra.mxu0 %v13938_v25  ;;  %10301 = vmatpush1.bf16.msra.mxu1 %v13948_v28 }
 0x549   :  { %10271 = vmatprep.subr.bf16.mxu0 %v13958_v31  ;;  %10303 = vmatprep.subr.bf16.mxu1 %v13968_v34 }
 0x54c   :  { %10273 = vmatpush1.bf16.msra.mxu0 %v13981_v38  ;;  %10305 = vmatpush1.bf16.msra.mxu1 %v13991_v41 }
 0x54d   :  { %10275 = vmatprep.subr.bf16.mxu0 %v14001_v44  ;;  %10307 = vmatprep.subr.bf16.mxu1 %v14011_v47 }
 0x550   :  { %10277 = vmatpush1.bf16.msra.mxu0 %v14024_v51  ;;  %10309 = vmatpush1.bf16.msra.mxu1 %v14034_v55 }
 0x551   :  { %10279 = vmatprep.subr.bf16.mxu0 %v14044_v59  ;;  %10311 = vmatprep.subr.bf16.mxu1 %v14054_v63 }
 0x554   :  { %10281 = vmatpush1.bf16.msra.mxu0 %v14067_v6  ;;  %10313 = vmatpush1.bf16.msra.mxu1 %v14077_v10 }
 0x555   :  { %10283 = vmatprep.subr.bf16.mxu0 %v14087_v14  ;;  %10315 = vmatprep.subr.bf16.mxu1 %v14097_v19 }
 0x558   :  { %10285 = vmatpush1.bf16.msra.mxu0 %v14110_v24  ;;  %10317 = vmatpush1.bf16.msra.mxu1 %v14120_v29 }
 0x559   :  { %10287 = vmatprep.subr.bf16.mxu0 %v14130_v33  ;;  %10319 = vmatprep.subr.bf16.mxu1 %v14140_v37 }
 0x55c   :  { %10289 = vmatpush1.bf16.msra.mxu0 %v14147_v40  ;;  %10321 = vmatpush1.bf16.msra.mxu1 %v14151_v42 }
 0x55d   :  { %10323 = vmatprep.subr.bf16.mxu0 %v13830_v53  ;;  %10355 = vmatprep.subr.bf16.mxu1 %v13838_v56 }
 0x612   :  { %v1380_v32 = vpop.f32.mrb[10].mxu0  ;;  %v1451_v4 = vpop.f32.mrb[10].mxu1 }
 0x613   :  { %v12724_v48 = vadd.f32 %v1380_v32, %v14208_v50  ;;  %v1382_v17 = vpop.f32.mrb[11].mxu0  ;;  %v1453_v13 = vpop.f32.mrb[11].mxu1  ;;  %v12740_v35 = vadd.f32 %v1451_v4, %v14224_v16 }
 0x614   :  { %v12725_v22 = vadd.f32 %v1382_v17, %v14211_v52  ;;  %v12741_v30 = vadd.f32 %v1453_v13, %v14218_v9 }
 0x615   :  { %v9232_v2 = vmul.f32 -1.442695, %v12724_v48 }
 0x616   :  { %v9233_v27 = vmul.f32 -1.442695, %v12725_v22  ;;  %v9234_v26 = vmul.f32 -1.442695, %v12741_v30  ;;  %v1849_v30 = vld [vmem:[%s17964_s2 + $0x30] sm:$0xff] }
 0x617   :  { %13117 = vpow2.f32 %v9232_v2 }
 0x618   :  { %13119 = vpow2.f32 %v9233_v27  ;;  %v1845_v27 = vld [vmem:[%s17964_s2 + $0x10] sm:$0xff] }
 0x619   :  { %13121 = vpow2.f32 %v9234_v26  ;;  %v1852_v26 = vld [vmem:[%s17964_s2 + $0x48] sm:$0xff] }
 0x61a   :  { %13123 = vtanh.f32 %v12740_v35  ;;  %v1856_v35 = vld [vmem:[%s17964_s2 + $0x68] sm:$0xff] }
 0x621   :  { %v13118_v53 = vpop.eup %13117 }
 0x622   :  { %v13120_v20 = vpop.eup %13119  ;;  %v1463_v56 = vadd.f32 1.0, %v13118_v53  ;;  %v1854_v53 = vld [vmem:[%s17964_s2 + $0x58] sm:$0xff] }
 0x623   :  { %v1469_v43 = vadd.f32 1.0, %v13120_v20  ;;  %v13122_v45 = vpop.eup %13121  ;;  %v1858_v20 = vld [vmem:[%s17964_s2 + $0x78] sm:$0xff] }
 0x624   :  { %13125 = vrcp.f32 %v1463_v56  ;;  %v13124_v58 = vpop.eup %13123  ;;  %v1476_v48 = vadd.f32 1.0, %v13122_v45 }
 0x625   :  { %13127 = vrcp.f32 %v1469_v43 }
 0x626   :  { %13129 = vrcp.f32 %v1476_v48  ;;  %v10390_v48 = vpack.c.bf16 %v1856_v35, %v1852_v26  ;;  %v1877_v35 = vld [vmem:[%s17964_s2 + $0x110] sm:$0xff] }
 0x62e   :  { %v13126_v39 = vpop.eup %13125 }
 0x62f   :  { %v13128_v61 = vpop.eup %13127  ;;  %v1480_v32 = vmul.f32 %v13126_v39, %v13124_v58  ;;  %v10420_v58 = vpack.c.bf16 %v1849_v30, %v1845_v27  ;;  %v1851_v39 = vld [vmem:[%s17964_s2 + $0x40] sm:$0xff] }
 0x630   :  { %v1479_v17 = vmul.f32 %v13128_v61, %v14411_v54  ;;  %v13130_v4 = vpop.eup %13129  ;;  %v1847_v54 = vld [vmem:[%s17964_s2 + $0x20] sm:$0xff] }
 0x631   :  { %v1855_v61 = vld [vmem:[%s17964_s2 + $0x60] sm:$0xff] }
 0x632   :  { %v14457_v13 = vadd.f32 %v1480_v32, %v1479_v17  ;;  %v10422_v17 = vpack.c.bf16 %v1858_v20, %v1854_v53  ;;  %v1879_v27 = vld [vmem:[%s17964_s2 + $0x120] sm:$0xff]  ;;  %v1881_v53 = vld [vmem:[%s17964_s2 + $0x130] sm:$0xff]  ;;  %v1884_v20 = vld [vmem:[%s17964_s2 + $0x148] sm:$0xff] }
 0x634   :  { %13131 = vtanh.f32 %v14457_v13 }
 0x63e   :  { %v13132_v22 = vpop.eup %13131 }
 0x63f   :  { %v14460_v2 = vmul.f32 %v13132_v22, %v13130_v4  ;;  %v1857_v4 = vld [vmem:[%s17964_s2 + $0x70] sm:$0xff]  ;;  %v1860_v22 = vld [vmem:[%s17964_s2 + $0x88] sm:$0xff] }
 0x641   :  { %1554 = vmatmul.mubr.f32.vlgmr.msra.gmra.mrb[12].mxu0 %v14460_v2  ;;  %1625 = vmatmul.mubr.f32.vlgmr.msra.gmra.mrb[12].mxu1 %v14460_v2 }
 0x642   :  { %10325 = vmatpush1.bf16.msra.mxu0 %v13855_v62  ;;  %10357 = vmatpush1.bf16.msra.mxu1 %v13864_v1  ;;  %v1844_v62 = vld [vmem:[%s17964_s2 + $0x8] sm:$0xff] }
 0x643   :  { %10327 = vmatprep.subr.bf16.mxu0 %v13873_v5  ;;  %10359 = vmatprep.subr.bf16.mxu1 %v13882_v8  ;;  %v1848_v1 = vld [vmem:[%s17964_s2 + $0x28] sm:$0xff]  ;;  %v1846_v5 = vld [vmem:[%s17964_s2 + $0x18] sm:$0xff] }
 0x644   :  { %1728 = vmatprep.mubr.f32.mxu0 %v13677_v3  ;;  %1799 = vmatprep.mubr.f32.mxu1 %v13677_v3  ;;  %v10386_v8 = vpack.c.bf16 %v1848_v1, %v1844_v62  ;;  %v1864_v62 = vld [vmem:[%s17964_s2 + $0xa8] sm:$0xff]  ;;  %v1862_v1 = vld [vmem:[%s17964_s2 + $0x98] sm:$0xff] }
 0x646   :  { %10329 = vmatpush1.bf16.msra.mxu0 %v13895_v12  ;;  %10361 = vmatpush1.bf16.msra.mxu1 %v13905_v15  ;;  %v1850_v12 = vld [vmem:[%s17964_s2 + $0x38] sm:$0xff] }
 0x647   :  { %10331 = vmatprep.subr.bf16.mxu0 %v13915_v18  ;;  %10363 = vmatprep.subr.bf16.mxu1 %v13925_v21  ;;  %v10418_v15 = vpack.c.bf16 %v1850_v12, %v1846_v5  ;;  %v1866_v5 = vld [vmem:[%s17964_s2 + $0xb8] sm:$0xff] }
 0x64a   :  { %10333 = vmatpush1.bf16.msra.mxu0 %v13938_v25  ;;  %10365 = vmatpush1.bf16.msra.mxu1 %v13948_v28 }
 0x64b   :  { %10335 = vmatprep.subr.bf16.mxu0 %v13958_v31  ;;  %10367 = vmatprep.subr.bf16.mxu1 %v13968_v34 }
 0x64e   :  { %10337 = vmatpush1.bf16.msra.mxu0 %v13981_v38  ;;  %10369 = vmatpush1.bf16.msra.mxu1 %v13991_v41 }
 0x64f   :  { %10339 = vmatprep.subr.bf16.mxu0 %v14001_v44  ;;  %10371 = vmatprep.subr.bf16.mxu1 %v14011_v47 }
 0x652   :  { %10341 = vmatpush1.bf16.msra.mxu0 %v14024_v51  ;;  %10373 = vmatpush1.bf16.msra.mxu1 %v14034_v55 }
 0x653   :  { %10343 = vmatprep.subr.bf16.mxu0 %v14044_v59  ;;  %10375 = vmatprep.subr.bf16.mxu1 %v14054_v63 }
 0x656   :  { %10345 = vmatpush1.bf16.msra.mxu0 %v14067_v6  ;;  %10377 = vmatpush1.bf16.msra.mxu1 %v14077_v10 }
 0x657   :  { %10347 = vmatprep.subr.bf16.mxu0 %v14087_v14  ;;  %10379 = vmatprep.subr.bf16.mxu1 %v14097_v19 }
 0x65a   :  { %10349 = vmatpush1.bf16.msra.mxu0 %v14110_v24  ;;  %10381 = vmatpush1.bf16.msra.mxu1 %v14120_v29 }
 0x65b   :  { %10351 = vmatprep.subr.bf16.mxu0 %v14130_v33  ;;  %10383 = vmatprep.subr.bf16.mxu1 %v14140_v37 }
 0x65e   :  { %10353 = vmatpush1.bf16.msra.mxu0 %v14147_v40  ;;  %10385 = vmatpush1.bf16.msra.mxu1 %v14151_v42  ;;  %v1843_v42 = vld [vmem:[%s17964_s2] sm:$0xff] }
 0x65f   :  { %10387 = vmatprep.subr.bf16.mxu0 %v10386_v8  ;;  %10419 = vmatprep.subr.bf16.mxu1 %v10418_v15  ;;  %v10388_v45 = vpack.c.bf16 %v1847_v54, %v1843_v42  ;;  %v10392_v8 = vpack.c.bf16 %v1855_v61, %v1851_v39  ;;  %v1859_v15 = vld [vmem:[%s17964_s2 + $0x80] sm:$0xff]  ;;  %v10436_v39 = vpack.c.bf16 %v1881_v53, %v1877_v35  ;;  %v9252_v35 = vld [vmem:[%s17961_s3 + $0x258] sm:$0xff] }
 0x660   :  { %v1875_v54 = vld [vmem:[%s17964_s2 + $0x100] sm:$0xff] }
 0x661   :  { %v1883_v61 = vld [vmem:[%s17964_s2 + $0x140] sm:$0xff] }
 0x714   :  { %v1555_v18 = vpop.f32.mrb[12].mxu0  ;;  %v1626_v21 = vpop.f32.mrb[12].mxu1 }
 0x715   :  { %v12726_v25 = vadd.f32 %v1555_v18, %v14208_v50  ;;  %v1557_v28 = vpop.f32.mrb[13].mxu0  ;;  %v1628_v31 = vpop.f32.mrb[13].mxu1  ;;  %v12742_v51 = vadd.f32 %v1626_v21, %v14224_v16  ;;  %v1863_v18 = vld [vmem:[%s17964_s2 + $0xa0] sm:$0xff]  ;;  %v10394_v21 = vpack.c.bf16 %v1864_v62, %v1860_v22  ;;  %v1889_v22 = vld [vmem:[%s17964_s2 + $0x170] sm:$0xff]  ;;  %v1892_v62 = vld [vmem:[%s17964_s2 + $0x188] sm:$0xff] }
 0x716   :  { %v12727_v34 = vadd.f32 %v1557_v28, %v14211_v52  ;;  %v12743_v44 = vadd.f32 %v1628_v31, %v14218_v9  ;;  %v1861_v28 = vld [vmem:[%s17964_s2 + $0x90] sm:$0xff] }
 0x717   :  { %v9235_v38 = vmul.f32 -1.442695, %v12726_v25  ;;  %v10426_v25 = vpack.c.bf16 %v1866_v5, %v1862_v1  ;;  %v1865_v31 = vld [vmem:[%s17964_s2 + $0xb0] sm:$0xff]  ;;  %v1896_v1 = vld [vmem:[%s17964_s2 + $0x1a8] sm:$0xff]  ;;  %v1894_v5 = vld [vmem:[%s17964_s2 + $0x198] sm:$0xff] }
 0x718   :  { %v9236_v41 = vmul.f32 -1.442695, %v12727_v34  ;;  %v9237_v47 = vmul.f32 -1.442695, %v12743_v44  ;;  %v1868_v34 = vld [vmem:[%s17964_s2 + $0xc8] sm:$0xff]  ;;  %v1874_v44 = vld [vmem:[%s17964_s2 + $0xf8] sm:$0xff] }
 0x719   :  { %13133 = vpow2.f32 %v9235_v38  ;;  %v1872_v38 = vld [vmem:[%s17964_s2 + $0xe8] sm:$0xff] }
 0x71a   :  { %13135 = vpow2.f32 %v9236_v41  ;;  %v1870_v41 = vld [vmem:[%s17964_s2 + $0xd8] sm:$0xff] }
 0x71b   :  { %13137 = vpow2.f32 %v9237_v47  ;;  %v10396_v47 = vpack.c.bf16 %v1863_v18, %v1859_v15  ;;  %v1891_v18 = vld [vmem:[%s17964_s2 + $0x180] sm:$0xff] }
 0x71c   :  { %13139 = vtanh.f32 %v12742_v51  ;;  %v10428_v51 = vpack.c.bf16 %v1865_v31, %v1861_v28  ;;  %v1893_v31 = vld [vmem:[%s17964_s2 + $0x190] sm:$0xff] }
 0x723   :  { %v13134_v55 = vpop.eup %13133 }
 0x724   :  { %v13136_v59 = vpop.eup %13135  ;;  %v1638_v63 = vadd.f32 1.0, %v13134_v55  ;;  %v1867_v55 = vld [vmem:[%s17964_s2 + $0xc0] sm:$0xff] }
 0x725   :  { %v1644_v6 = vadd.f32 1.0, %v13136_v59  ;;  %v13138_v10 = vpop.eup %13137  ;;  %v1871_v59 = vld [vmem:[%s17964_s2 + $0xe0] sm:$0xff] }
 0x726   :  { %13141 = vrcp.f32 %v1638_v63  ;;  %v13140_v14 = vpop.eup %13139  ;;  %v1651_v33 = vadd.f32 1.0, %v13138_v10  ;;  %v10398_v63 = vpack.c.bf16 %v1872_v38, %v1868_v34  ;;  %v1869_v10 = vld [vmem:[%s17964_s2 + $0xd0] sm:$0xff]  ;;  %v1900_v38 = vld [vmem:[%s17964_s2 + $0x1c8] sm:$0xff] }
 0x727   :  { %13143 = vrcp.f32 %v1644_v6  ;;  %v10430_v6 = vpack.c.bf16 %v1874_v44, %v1870_v41  ;;  %v1897_v34 = vld [vmem:[%s17964_s2 + $0x1b0] sm:$0xff]  ;;  %v1904_v41 = vld [vmem:[%s17964_s2 + $0x1e8] sm:$0xff]  ;;  %v1902_v44 = vld [vmem:[%s17964_s2 + $0x1d8] sm:$0xff] }
 0x728   :  { %13145 = vrcp.f32 %v1651_v33  ;;  %v1882_v33 = vld [vmem:[%s17964_s2 + $0x138] sm:$0xff] }
 0x730   :  { %v13142_v19 = vpop.eup %13141 }
 0x731   :  { %v13144_v24 = vpop.eup %13143  ;;  %v1655_v29 = vmul.f32 %v13142_v19, %v13140_v14  ;;  %v1873_v14 = vld [vmem:[%s17964_s2 + $0xf0] sm:$0xff]  ;;  %v1876_v19 = vld [vmem:[%s17964_s2 + $0x108] sm:$0xff] }
 0x732   :  { %v1654_v37 = vmul.f32 %v13144_v24, %v14457_v13  ;;  %v13146_v56 = vpop.eup %13145  ;;  %v1853_v13 = vld [vmem:[%s17964_s2 + $0x50] sm:$0xff]  ;;  %v1880_v24 = vld [vmem:[%s17964_s2 + $0x128] sm:$0xff]  ;;  %v10432_v42 = vpack.c.bf16 %v1873_v14, %v1869_v10  ;;  %v1903_v10 = vld [vmem:[%s17964_s2 + $0x1e0] sm:$0xff] }
 0x733   :  { %v10424_v12 = vpack.c.bf16 %v1857_v4, %v1853_v13  ;;  %v10402_v30 = vpack.c.bf16 %v1880_v24, %v1876_v19  ;;  %v1885_v4 = vld [vmem:[%s17964_s2 + $0x150] sm:$0xff] }
 0x734   :  { %v14513_v40 = vadd.f32 %v1655_v29, %v1654_v37  ;;  %v1878_v29 = vld [vmem:[%s17964_s2 + $0x118] sm:$0xff]  ;;  %v10400_v37 = vpack.c.bf16 %v1871_v59, %v1867_v55  ;;  %v10440_v15 = vpack.c.bf16 %v1889_v22, %v1885_v4  ;;  %v10444_v55 = vpack.c.bf16 %v1897_v34, %v1893_v31  ;;  %v1899_v59 = vld [vmem:[%s17964_s2 + $0x1c0] sm:$0xff]  ;;  %v1901_v14 = vld [vmem:[%s17964_s2 + $0x1d0] sm:$0xff] }
 0x735   :  { %v10434_v26 = vpack.c.bf16 %v1882_v33, %v1878_v29  ;;  %v1905_v19 = vld [vmem:[%s17964_s2 + $0x1f0] sm:$0xff]  ;;  %v10416_v24 = vpack.c.bf16 %v1903_v10, %v1899_v59  ;;  %v9260_v4 = vld [vmem:[%s17961_s3 + $0x298] sm:$0xff]  ;;  %v9278_v10 = vld [vmem:[%s17961_s3 + $0x328] sm:$0xff] }
 0x736   :  { %13147 = vtanh.f32 %v14513_v40  ;;  %v10448_v29 = vpack.c.bf16 %v1905_v19, %v1901_v14  ;;  %v9268_v31 = vld [vmem:[%s17961_s3 + $0x2d8] sm:$0xff]  ;;  %v9271_v59 = vld [vmem:[%s17961_s3 + $0x2f0] sm:$0xff] }
 0x737   :  { %v9276_v14 = vld [vmem:[%s17961_s3 + $0x318] sm:$0xff] }
 0x738   :  { %v9280_v19 = vld [vmem:[%s17961_s3 + $0x338] sm:$0xff] }
 0x740   :  { %v13148_v43 = vpop.eup %13147 }
 0x741   :  { %v14546_v32 = vmul.f32 %v13148_v43, %v13146_v56  ;;  %v1888_v56 = vld [vmem:[%s17964_s2 + $0x168] sm:$0xff]  ;;  %v1886_v43 = vld [vmem:[%s17964_s2 + $0x158] sm:$0xff] }
 0x743   :  { %1729 = vmatmul.mubr.f32.vlgmr.msra.gmra.mrb[14].mxu0 %v14546_v32  ;;  %1800 = vmatmul.mubr.f32.vlgmr.msra.gmra.mrb[14].mxu1 %v14546_v32 }
 0x744   :  { %10389 = vmatpush1.bf16.msra.mxu0 %v10388_v45  ;;  %10421 = vmatpush1.bf16.msra.mxu1 %v10420_v58  ;;  %v1890_v45 = vld [vmem:[%s17964_s2 + $0x178] sm:$0xff]  ;;  %v10404_v58 = vpack.c.bf16 %v1879_v27, %v1875_v54  ;;  %v9247_v54 = vld [vmem:[%s17961_s3 + $0x230] sm:$0xff] }
 0x745   :  { %10391 = vmatprep.subr.bf16.mxu0 %v10390_v48  ;;  %10423 = vmatprep.subr.bf16.mxu1 %v10422_v17  ;;  %v1887_v48 = vld [vmem:[%s17964_s2 + $0x160] sm:$0xff]  ;;  %v10406_v17 = vpack.c.bf16 %v1888_v56, %v1884_v20  ;;  %v10438_v13 = vpack.c.bf16 %v1890_v45, %v1886_v43  ;;  %v9256_v20 = vld [vmem:[%s17961_s3 + $0x278] sm:$0xff] }
 0x746   :  { %2059 = vmatprep.mubr.f32.mxu0 %v13677_v3  ;;  %2172 = vmatprep.mubr.f32.mxu1 %v13677_v3  ;;  %v9249_v56 = vld [vmem:[%s17961_s3 + $0x240] sm:$0xff]  ;;  %v14786_v45 = vpack.c.bf16 %v9256_v20, %v9252_v35  ;;  %v9288_v35 = vld [vmem:[%s17961_s3 + $0x378] sm:$0xff] }
 0x747   :  { %v9253_v43 = vld [vmem:[%s17961_s3 + $0x260] sm:$0xff] }
 0x748   :  { %10393 = vmatpush1.bf16.msra.mxu0 %v10392_v8  ;;  %10425 = vmatpush1.bf16.msra.mxu1 %v10424_v12  ;;  %v1898_v8 = vld [vmem:[%s17964_s2 + $0x1b8] sm:$0xff]  ;;  %v10408_v12 = vpack.c.bf16 %v1887_v48, %v1883_v61  ;;  %v9255_v61 = vld [vmem:[%s17961_s3 + $0x270] sm:$0xff]  ;;  %v9281_v20 = vld [vmem:[%s17961_s3 + $0x340] sm:$0xff] }
 0x749   :  { %10395 = vmatprep.subr.bf16.mxu0 %v10394_v21  ;;  %10427 = vmatprep.subr.bf16.mxu1 %v10426_v25  ;;  %v1895_v21 = vld [vmem:[%s17964_s2 + $0x1a0] sm:$0xff]  ;;  %v10410_v25 = vpack.c.bf16 %v1896_v1, %v1892_v62  ;;  %v10442_v28 = vpack.c.bf16 %v1898_v8, %v1894_v5  ;;  %v9264_v62 = vld [vmem:[%s17961_s3 + $0x2b8] sm:$0xff] }
 0x74a   :  { %v9257_v1 = vld [vmem:[%s17961_s3 + $0x280] sm:$0xff]  ;;  %v14822_v8 = vpack.c.bf16 %v9264_v62, %v9260_v4  ;;  %v9294_v4 = vld [vmem:[%s17961_s3 + $0x3a8] sm:$0xff]  ;;  %v9292_v62 = vld [vmem:[%s17961_s3 + $0x398] sm:$0xff] }
 0x74b   :  { %v9261_v5 = vld [vmem:[%s17961_s3 + $0x2a0] sm:$0xff] }
 0x74c   :  { %10397 = vmatpush1.bf16.msra.mxu0 %v10396_v47  ;;  %10429 = vmatpush1.bf16.msra.mxu1 %v10428_v51  ;;  %v1906_v47 = vld [vmem:[%s17964_s2 + $0x1f8] sm:$0xff]  ;;  %v10412_v51 = vpack.c.bf16 %v1895_v21, %v1891_v18  ;;  %v9263_v18 = vld [vmem:[%s17961_s3 + $0x2b0] sm:$0xff] }
 0x74d   :  { %10399 = vmatprep.subr.bf16.mxu0 %v10398_v63  ;;  %10431 = vmatprep.subr.bf16.mxu1 %v10430_v6  ;;  %v10414_v63 = vpack.c.bf16 %v1904_v41, %v1900_v38  ;;  %v10446_v6 = vpack.c.bf16 %v1906_v47, %v1902_v44  ;;  %v9272_v38 = vld [vmem:[%s17961_s3 + $0x2f8] sm:$0xff]  ;;  %v9265_v41 = vld [vmem:[%s17961_s3 + $0x2c0] sm:$0xff] }
 0x74e   :  { %v9269_v44 = vld [vmem:[%s17961_s3 + $0x2e0] sm:$0xff]  ;;  %v14858_v47 = vpack.c.bf16 %v9272_v38, %v9268_v31  ;;  %v9291_v31 = vld [vmem:[%s17961_s3 + $0x390] sm:$0xff] }
 0x74f   :  { %v9295_v38 = vld [vmem:[%s17961_s3 + $0x3b0] sm:$0xff] }
 0x750   :  { %10401 = vmatpush1.bf16.msra.mxu0 %v10400_v37  ;;  %10433 = vmatpush1.bf16.msra.mxu1 %v10432_v42  ;;  %v9243_v42 = vld [vmem:[%s17961_s3 + $0x210] sm:$0xff] }
 0x751   :  { %10403 = vmatprep.subr.bf16.mxu0 %v10402_v30  ;;  %10435 = vmatprep.subr.bf16.mxu1 %v10434_v26  ;;  %v14761_v27 = vpack.c.bf16 %v9247_v54, %v9243_v42  ;;  %v9250_v30 = vld [vmem:[%s17961_s3 + $0x248] sm:$0xff] }
 0x752   :  { %v9254_v26 = vld [vmem:[%s17961_s3 + $0x268] sm:$0xff] }
 0x753   :  { %v14775_v53 = vpack.c.bf16 %v9254_v26, %v9250_v30  ;;  %v9286_v42 = vld [vmem:[%s17961_s3 + $0x368] sm:$0xff]  ;;  %v9284_v26 = vld [vmem:[%s17961_s3 + $0x358] sm:$0xff] }
 0x754   :  { %10405 = vmatpush1.bf16.msra.mxu0 %v10404_v58  ;;  %10437 = vmatpush1.bf16.msra.mxu1 %v10436_v39  ;;  %v14788_v58 = vpack.c.bf16 %v9253_v43, %v9249_v56  ;;  %v9251_v39 = vld [vmem:[%s17961_s3 + $0x250] sm:$0xff]  ;;  %v14925_v56 = vpack.c.bf16 %v9288_v35, %v9284_v26  ;;  %v9285_v43 = vld [vmem:[%s17961_s3 + $0x360] sm:$0xff] }
 0x755   :  { %10407 = vmatprep.subr.bf16.mxu0 %v10406_v17  ;;  %10439 = vmatprep.subr.bf16.mxu1 %v10438_v13  ;;  %v14797_v48 = vpack.c.bf16 %v9255_v61, %v9251_v39  ;;  %v9258_v17 = vld [vmem:[%s17961_s3 + $0x288] sm:$0xff]  ;;  %v9283_v39 = vld [vmem:[%s17961_s3 + $0x350] sm:$0xff] }
 0x756   :  { %v9262_v13 = vld [vmem:[%s17961_s3 + $0x2a8] sm:$0xff]  ;;  %v9287_v61 = vld [vmem:[%s17961_s3 + $0x370] sm:$0xff] }
 0x757   :  { %v14811_v22 = vpack.c.bf16 %v9262_v13, %v9258_v17  ;;  %v14937_v17 = vpack.c.bf16 %v9285_v43, %v9281_v20  ;;  %v9290_v13 = vld [vmem:[%s17961_s3 + $0x388] sm:$0xff] }
 0x758   :  { %10409 = vmatpush1.bf16.msra.mxu0 %v10408_v12  ;;  %10441 = vmatpush1.bf16.msra.mxu1 %v10440_v15  ;;  %v14824_v12 = vpack.c.bf16 %v9261_v5, %v9257_v1  ;;  %v9259_v15 = vld [vmem:[%s17961_s3 + $0x290] sm:$0xff]  ;;  %v14950_v1 = vpack.c.bf16 %v9287_v61, %v9283_v39  ;;  %v14952_v5 = vpack.c.bf16 %v9294_v4, %v9290_v13 }
 0x759   :  { %10411 = vmatprep.subr.bf16.mxu0 %v10410_v25  ;;  %10443 = vmatprep.subr.bf16.mxu1 %v10442_v28  ;;  %v14833_v21 = vpack.c.bf16 %v9263_v18, %v9259_v15  ;;  %v9266_v25 = vld [vmem:[%s17961_s3 + $0x2c8] sm:$0xff]  ;;  %v9296_v15 = vld [vmem:[%s17961_s3 + $0x3b8] sm:$0xff]  ;;  %v9289_v18 = vld [vmem:[%s17961_s3 + $0x380] sm:$0xff] }
 0x75a   :  { %v9270_v28 = vld [vmem:[%s17961_s3 + $0x2e8] sm:$0xff] }
 0x75b   :  { %v14847_v34 = vpack.c.bf16 %v9270_v28, %v9266_v25  ;;  %v9293_v25 = vld [vmem:[%s17961_s3 + $0x3a0] sm:$0xff]  ;;  %v14964_v28 = vpack.c.bf16 %v9296_v15, %v9292_v62 }
 0x75c   :  { %10413 = vmatpush1.bf16.msra.mxu0 %v10412_v51  ;;  %10445 = vmatpush1.bf16.msra.mxu1 %v10444_v55  ;;  %v14860_v51 = vpack.c.bf16 %v9269_v44, %v9265_v41  ;;  %v9267_v55 = vld [vmem:[%s17961_s3 + $0x2d0] sm:$0xff]  ;;  %v14973_v41 = vpack.c.bf16 %v9293_v25, %v9289_v18  ;;  %v14977_v44 = vpack.c.bf16 %v9295_v38, %v9291_v31 }
 0x75d   :  { %10415 = vmatprep.subr.bf16.mxu0 %v10414_v63  ;;  %10447 = vmatprep.subr.bf16.mxu1 %v10446_v6  ;;  %v9274_v63 = vld [vmem:[%s17961_s3 + $0x308] sm:$0xff]  ;;  %v14872_v6 = vpack.c.bf16 %v9271_v59, %v9267_v55 }
 0x75e   :  { %v9298_v55 = vld [vmem:[%s17961_s3 + $0x3c8] sm:$0xff] }
 0x75f   :  { %v9302_v59 = vld [vmem:[%s17961_s3 + $0x3e8] sm:$0xff] }
 0x760   :  { %10417 = vmatpush1.bf16.msra.mxu0 %v10416_v24  ;;  %10449 = vmatpush1.bf16.msra.mxu1 %v10448_v29  ;;  %v14885_v24 = vpack.c.bf16 %v9278_v10, %v9274_v63  ;;  %v14887_v29 = vpack.c.bf16 %v9280_v19, %v9276_v14  ;;  %v9300_v63 = vld [vmem:[%s17961_s3 + $0x3d8] sm:$0xff]  ;;  %v14991_v10 = vpack.c.bf16 %v9302_v59, %v9298_v55  ;;  %v9297_v19 = vld [vmem:[%s17961_s3 + $0x3c0] sm:$0xff] }
 0x761   :  { %v9304_v14 = vld [vmem:[%s17961_s3 + $0x3f8] sm:$0xff] }
 0x763   :  { %2060 = vmatmul.mubr.f32.vlgmr.msra.gmra.mrb[16].mxu0 %v14230_v60  ;;  %2173 = vmatmul.mubr.f32.vlgmr.msra.gmra.mrb[16].mxu1 %v14230_v60  ;;  %v9242_v60 = vld [vmem:[%s17961_s3 + $0x208] sm:$0xff] }
 0x764   :  { %2065 = vmatprep.mubr.f32.mxu0 %v13677_v3  ;;  %2178 = vmatprep.mubr.f32.mxu1 %v13677_v3 }
 0x767   :  { %2066 = vmatmul.mubr.f32.gmra.mrb[18].mxu0 %v14276_v7  ;;  %2179 = vmatmul.mubr.f32.gmra.mrb[18].mxu1 %v14276_v7  ;;  %v9246_v7 = vld [vmem:[%s17961_s3 + $0x228] sm:$0xff] }
 0x768   :  { %2071 = vmatprep.mubr.f32.mxu0 %v13677_v3  ;;  %2184 = vmatprep.mubr.f32.mxu1 %v13677_v3 }
 0x76b   :  { %2072 = vmatmul.mubr.f32.gmra.mrb[20].mxu0 %v14322_v23  ;;  %2185 = vmatmul.mubr.f32.gmra.mrb[20].mxu1 %v14322_v23  ;;  %v9244_v23 = vld [vmem:[%s17961_s3 + $0x218] sm:$0xff] }
 0x76c   :  { %2077 = vmatprep.mubr.f32.mxu0 %v13677_v3  ;;  %2190 = vmatprep.mubr.f32.mxu1 %v13677_v3 }
 0x76f   :  { %2078 = vmatmul.mubr.f32.gmra.mrb[22].mxu0 %v14368_v36  ;;  %2191 = vmatmul.mubr.f32.gmra.mrb[22].mxu1 %v14368_v36  ;;  %v14739_v36 = vpack.c.bf16 %v9246_v7, %v9242_v60  ;;  %v9273_v60 = vld [vmem:[%s17961_s3 + $0x300] sm:$0xff] }
 0x770   :  { %2083 = vmatprep.mubr.f32.mxu0 %v13677_v3  ;;  %2196 = vmatprep.mubr.f32.mxu1 %v13677_v3  ;;  %v9277_v7 = vld [vmem:[%s17961_s3 + $0x320] sm:$0xff] }
 0x771   :  { %10451 = vmatprep.subr.bf16.mxu0 %v14739_v36 }
 0x773   :  { %2084 = vmatmul.mubr.f32.gmra.mrb[24].mxu0 %v14414_v0  ;;  %2197 = vmatmul.mubr.f32.gmra.mrb[24].mxu1 %v14414_v0  ;;  %v9248_v0 = vld [vmem:[%s17961_s3 + $0x238] sm:$0xff] }
 0x774   :  { %2089 = vmatprep.mubr.f32.mxu0 %v13677_v3  ;;  %2202 = vmatprep.mubr.f32.mxu1 %v13677_v3  ;;  %v14750_v33 = vpack.c.bf16 %v9248_v0, %v9244_v23  ;;  %v9275_v23 = vld [vmem:[%s17961_s3 + $0x310] sm:$0xff]  ;;  %v14899_v0 = vpack.c.bf16 %v9277_v7, %v9273_v60  ;;  %v9301_v60 = vld [vmem:[%s17961_s3 + $0x3e0] sm:$0xff]  ;;  %v15002_v7 = vpack.c.bf16 %v9304_v14, %v9300_v63 }
 0x776   :  { %10483 = vmatprep.subr.bf16.mxu1 %v14750_v33 }
 0x777   :  { %2090 = vmatmul.mubr.f32.gmra.mrb[26].mxu0 %v14460_v2  ;;  %2203 = vmatmul.mubr.f32.gmra.mrb[26].mxu1 %v14460_v2  ;;  %v9241_v2 = vld [vmem:[%s17961_s3 + $0x200] sm:$0xff] }
 0x778   :  { %2095 = vmatprep.mubr.f32.mxu0 %v13677_v3  ;;  %2208 = vmatprep.mubr.f32.mxu1 %v13677_v3 }
 0x779   :  { %10485 = vmatpush1.bf16.msra.mxu1 %v14761_v27 }
 0x77a   :  { %10487 = vmatprep.subr.bf16.mxu1 %v14786_v45 }
 0x77b   :  { %2096 = vmatmul.mubr.f32.gmra.mrb[28].mxu0 %v14546_v32  ;;  %2209 = vmatmul.mubr.f32.gmra.mrb[28].mxu1 %v14546_v32  ;;  %v9245_v32 = vld [vmem:[%s17961_s3 + $0x220] sm:$0xff] }
 0x77c   :  { %2101 = vmatprep.mubr.f32.mxu0 %v13677_v3  ;;  %2214 = vmatprep.mubr.f32.mxu1 %v13677_v3  ;;  %v14752_v37 = vpack.c.bf16 %v9245_v32, %v9241_v2  ;;  %v9279_v2 = vld [vmem:[%s17961_s3 + $0x330] sm:$0xff]  ;;  %v9282_v32 = vld [vmem:[%s17961_s3 + $0x348] sm:$0xff] }
 0x77d   :  { %10489 = vmatpush1.bf16.msra.mxu1 %v14797_v48  ;;  %v14912_v54 = vpack.c.bf16 %v9279_v2, %v9275_v23  ;;  %v14914_v30 = vpack.c.bf16 %v9286_v42, %v9282_v32  ;;  %v15004_v23 = vpack.c.bf16 %v9301_v60, %v9297_v19  ;;  %v9299_v2 = vld [vmem:[%s17961_s3 + $0x3d0] sm:$0xff] }
 0x77e   :  { %10453 = vmatpush1.bf16.msra.mxu0 %v14752_v37  ;;  %10491 = vmatprep.subr.bf16.mxu1 %v14822_v8  ;;  %v9303_v32 = vld [vmem:[%s17961_s3 + $0x3f0] sm:$0xff] }
 0x77f   :  { %10455 = vmatprep.subr.bf16.mxu0 %v14775_v53  ;;  %v15013_v42 = vpack.c.bf16 %v9303_v32, %v9299_v2 }
 0x781   :  { %10493 = vmatpush1.bf16.msra.mxu1 %v14833_v21 }
 0x782   :  { %10457 = vmatpush1.bf16.msra.mxu0 %v14788_v58  ;;  %10495 = vmatprep.subr.bf16.mxu1 %v14858_v47 }
 0x783   :  { %10459 = vmatprep.subr.bf16.mxu0 %v14811_v22 }
 0x785   :  { %10497 = vmatpush1.bf16.msra.mxu1 %v14872_v6 }
 0x786   :  { %10461 = vmatpush1.bf16.msra.mxu0 %v14824_v12  ;;  %10499 = vmatprep.subr.bf16.mxu1 %v14887_v29 }
 0x787   :  { %10463 = vmatprep.subr.bf16.mxu0 %v14847_v34 }
 0x789   :  { %10501 = vmatpush1.bf16.msra.mxu1 %v14912_v54 }
 0x78a   :  { %10465 = vmatpush1.bf16.msra.mxu0 %v14860_v51  ;;  %10503 = vmatprep.subr.bf16.mxu1 %v14925_v56 }
 0x78b   :  { %10467 = vmatprep.subr.bf16.mxu0 %v14885_v24 }
 0x78d   :  { %10505 = vmatpush1.bf16.msra.mxu1 %v14950_v1 }
 0x78e   :  { %10469 = vmatpush1.bf16.msra.mxu0 %v14899_v0  ;;  %10507 = vmatprep.subr.bf16.mxu1 %v14964_v28 }
 0x78f   :  { %10471 = vmatprep.subr.bf16.mxu0 %v14914_v30 }
 0x791   :  { %10509 = vmatpush1.bf16.msra.mxu1 %v14977_v44 }
 0x792   :  { %10473 = vmatpush1.bf16.msra.mxu0 %v14937_v17  ;;  %10511 = vmatprep.subr.bf16.mxu1 %v15002_v7 }
 0x793   :  { %10475 = vmatprep.subr.bf16.mxu0 %v14952_v5 }
 0x795   :  { %10513 = vmatpush1.bf16.msra.mxu1 %v15013_v42 }
 0x796   :  { %10477 = vmatpush1.bf16.msra.mxu0 %v14973_v41  ;;  %10547 = vmatprep.subr.bf16.mxu1 %v14750_v33 }
 0x797   :  { %10479 = vmatprep.subr.bf16.mxu0 %v14991_v10 }
 0x79a   :  { %10481 = vmatpush1.bf16.msra.mxu0 %v15004_v23 }
 0x79b   :  { %10515 = vmatprep.subr.bf16.mxu0 %v14739_v36 }
 0x816   :  { %v1730_v26 = vpop.f32.mrb[14].mxu0  ;;  %v1801_v35 = vpop.f32.mrb[14].mxu1 }
 0x817   :  { %v12728_v20 = vadd.f32 %v1730_v26, %v14208_v50  ;;  %v1732_v43 = vpop.f32.mrb[15].mxu0  ;;  %v1803_v39 = vpop.f32.mrb[15].mxu1  ;;  %v12744_v18 = vadd.f32 %v1801_v35, %v14224_v16 }
 0x818   :  { %v12729_v61 = vadd.f32 %v1732_v43, %v14211_v52  ;;  %v12745_v62 = vadd.f32 %v1803_v39, %v14218_v9 }
 0x819   :  { %v9238_v13 = vmul.f32 -1.442695, %v12728_v20 }
 0x81a   :  { %v9239_v4 = vmul.f32 -1.442695, %v12729_v61  ;;  %v9240_v15 = vmul.f32 -1.442695, %v12745_v62 }
 0x81b   :  { %13149 = vpow2.f32 %v9238_v13 }
 0x81c   :  { %13151 = vpow2.f32 %v9239_v4 }
 0x81d   :  { %13153 = vpow2.f32 %v9240_v15 }
 0x81e   :  { %13155 = vtanh.f32 %v12744_v18 }
 0x825   :  { %v13150_v25 = vpop.eup %13149 }
 0x826   :  { %v13152_v31 = vpop.eup %13151  ;;  %v1813_v38 = vadd.f32 1.0, %v13150_v25 }
 0x827   :  { %v1819_v55 = vadd.f32 1.0, %v13152_v31  ;;  %v13154_v50 = vpop.eup %13153 }
 0x828   :  { %13157 = vrcp.f32 %v1813_v38  ;;  %v13156_v59 = vpop.eup %13155  ;;  %v1826_v19 = vadd.f32 1.0, %v13154_v50 }
 0x829   :  { %13159 = vrcp.f32 %v1819_v55 }
 0x82a   :  { %13161 = vrcp.f32 %v1826_v19 }
 0x832   :  { %v13158_v52 = vpop.eup %13157 }
 0x833   :  { %v13160_v63 = vpop.eup %13159  ;;  %v1830_v14 = vmul.f32 %v13158_v52, %v13156_v59 }
 0x834   :  { %v1829_v60 = vmul.f32 %v13160_v63, %v14513_v40  ;;  %v13162_v16 = vpop.eup %13161  ;;  %v9305_v40 = vld [vmem:[%s17963_s4 + $0x4] sm:$0xf] }
 0x835   :  { %v15067_v26 = vrot.slane %v9305_v40, %v14200_v46  ;;  %v15070_v35 = vrot.slane %v9305_v40, %v14205_v49  ;;  %v15075_v18 = vrot.slane %v9305_v40, %v14213_v57  ;;  %v15079_v31 = vrot.slane %v9305_v40, %v14220_v11 }
 0x836   :  { %v1831_v9 = vadd.f32 %v1830_v14, %v1829_v60 }
 0x838   :  { %13163 = vtanh.f32 %v1831_v9 }
 0x842   :  { %v13164_v2 = vpop.eup %13163 }
 0x843   :  { %v1833_v32 = vmul.f32 %v13164_v2, %v13162_v16 }
 0x845   :  { %2102 = vmatmul.mubr.f32.gmra.mrb[30].mxu0 %v1833_v32  ;;  %2215 = vmatmul.mubr.f32.gmra.mrb[30].mxu1 %v1833_v32 }
 0x846   :  { %2321 = vmatprep.mubr.f32.mxu0 %v13677_v3  ;;  %2392 = vmatprep.mubr.f32.mxu1 %v13677_v3 }
 0x849   :  { %2322 = vmatmul.mubr.f32.vlgmr.msra.gmra.mrb[16].mxu0 %v13677_v3  ;;  %2393 = vmatmul.mubr.f32.vlgmr.msra.gmra.mrb[16].mxu1 %v13677_v3 }
 0x84a   :  { %10517 = vmatpush1.bf16.msra.mxu0 %v14752_v37  ;;  %10549 = vmatpush1.bf16.msra.mxu1 %v14761_v27 }
 0x84b   :  { %10519 = vmatprep.subr.bf16.mxu0 %v14775_v53  ;;  %10551 = vmatprep.subr.bf16.mxu1 %v14786_v45 }
 0x84c   :  { %2496 = vmatprep.mubr.f32.mxu0 %v13677_v3  ;;  %2567 = vmatprep.mubr.f32.mxu1 %v13677_v3 }
 0x84e   :  { %10521 = vmatpush1.bf16.msra.mxu0 %v14788_v58  ;;  %10553 = vmatpush1.bf16.msra.mxu1 %v14797_v48 }
 0x84f   :  { %10523 = vmatprep.subr.bf16.mxu0 %v14811_v22  ;;  %10555 = vmatprep.subr.bf16.mxu1 %v14822_v8 }
 0x852   :  { %10525 = vmatpush1.bf16.msra.mxu0 %v14824_v12  ;;  %10557 = vmatpush1.bf16.msra.mxu1 %v14833_v21 }
 0x853   :  { %10527 = vmatprep.subr.bf16.mxu0 %v14847_v34  ;;  %10559 = vmatprep.subr.bf16.mxu1 %v14858_v47 }
 0x856   :  { %10529 = vmatpush1.bf16.msra.mxu0 %v14860_v51  ;;  %10561 = vmatpush1.bf16.msra.mxu1 %v14872_v6 }
 0x857   :  { %10531 = vmatprep.subr.bf16.mxu0 %v14885_v24  ;;  %10563 = vmatprep.subr.bf16.mxu1 %v14887_v29 }
 0x85a   :  { %10533 = vmatpush1.bf16.msra.mxu0 %v14899_v0  ;;  %10565 = vmatpush1.bf16.msra.mxu1 %v14912_v54 }
 0x85b   :  { %10535 = vmatprep.subr.bf16.mxu0 %v14914_v30  ;;  %10567 = vmatprep.subr.bf16.mxu1 %v14925_v56 }
 0x85e   :  { %10537 = vmatpush1.bf16.msra.mxu0 %v14937_v17  ;;  %10569 = vmatpush1.bf16.msra.mxu1 %v14950_v1 }
 0x85f   :  { %10539 = vmatprep.subr.bf16.mxu0 %v14952_v5  ;;  %10571 = vmatprep.subr.bf16.mxu1 %v14964_v28 }
 0x862   :  { %10541 = vmatpush1.bf16.msra.mxu0 %v14973_v41  ;;  %10573 = vmatpush1.bf16.msra.mxu1 %v14977_v44 }
 0x863   :  { %10543 = vmatprep.subr.bf16.mxu0 %v14991_v10  ;;  %10575 = vmatprep.subr.bf16.mxu1 %v15002_v7 }
 0x866   :  { %10545 = vmatpush1.bf16.msra.mxu0 %v15004_v23  ;;  %10577 = vmatpush1.bf16.msra.mxu1 %v15013_v42 }
 0x867   :  { %10579 = vmatprep.subr.bf16.mxu0 %v14739_v36  ;;  %10611 = vmatprep.subr.bf16.mxu1 %v14750_v33 }
 0x91c   :  { %v2323_v20 = vpop.f32.mrb[16].mxu0  ;;  %v2394_v43 = vpop.f32.mrb[16].mxu1 }
 0x91d   :  { %v12746_v39 = vadd.f32 %v2323_v20, %v15067_v26  ;;  %v2325_v61 = vpop.f32.mrb[17].mxu0  ;;  %v2396_v13 = vpop.f32.mrb[17].mxu1  ;;  %v12762_v55 = vadd.f32 %v2394_v43, %v15079_v31 }
 0x91e   :  { %v12747_v4 = vadd.f32 %v2325_v61, %v15070_v35  ;;  %v12763_v25 = vadd.f32 %v2396_v13, %v15075_v18 }
 0x91f   :  { %v9306_v62 = vmul.f32 -1.442695, %v12746_v39 }
 0x920   :  { %v9307_v15 = vmul.f32 -1.442695, %v12747_v4  ;;  %v9308_v38 = vmul.f32 -1.442695, %v12763_v25 }
 0x921   :  { %13165 = vpow2.f32 %v9306_v62 }
 0x922   :  { %13167 = vpow2.f32 %v9307_v15 }
 0x923   :  { %13169 = vpow2.f32 %v9308_v38 }
 0x924   :  { %13171 = vtanh.f32 %v12762_v55 }
 0x92b   :  { %v13166_v50 = vpop.eup %13165 }
 0x92c   :  { %v13168_v59 = vpop.eup %13167  ;;  %v2406_v52 = vadd.f32 1.0, %v13166_v50 }
 0x92d   :  { %v2412_v63 = vadd.f32 1.0, %v13168_v59  ;;  %v13170_v14 = vpop.eup %13169 }
 0x92e   :  { %13173 = vrcp.f32 %v2406_v52  ;;  %v13172_v19 = vpop.eup %13171  ;;  %v2419_v2 = vadd.f32 1.0, %v13170_v14 }
 0x92f   :  { %13175 = vrcp.f32 %v2412_v63 }
 0x930   :  { %13177 = vrcp.f32 %v2419_v2 }
 0x938   :  { %v13174_v60 = vpop.eup %13173 }
 0x939   :  { %v13176_v9 = vpop.eup %13175  ;;  %v2423_v16 = vmul.f32 %v13174_v60, %v13172_v19 }
 0x93a   :  { %v2422_v32 = vmul.f32 0.0, %v13176_v9  ;;  %v13178_v20 = vpop.eup %13177 }
 0x93c   :  { %v15082_v40 = vadd.f32 %v2423_v16, %v2422_v32 }
 0x93e   :  { %13179 = vtanh.f32 %v15082_v40 }
 0x948   :  { %v13180_v43 = vpop.eup %13179 }
 0x949   :  { %v15085_v39 = vmul.f32 %v13180_v43, %v13178_v20 }
 0x94b   :  { %2497 = vmatmul.mubr.f32.vlgmr.msra.gmra.mrb[18].mxu0 %v15085_v39  ;;  %2568 = vmatmul.mubr.f32.vlgmr.msra.gmra.mrb[18].mxu1 %v15085_v39 }
 0x94c   :  { %10581 = vmatpush1.bf16.msra.mxu0 %v14752_v37  ;;  %10613 = vmatpush1.bf16.msra.mxu1 %v14761_v27 }
 0x94d   :  { %10583 = vmatprep.subr.bf16.mxu0 %v14775_v53  ;;  %10615 = vmatprep.subr.bf16.mxu1 %v14786_v45 }
 0x94e   :  { %2671 = vmatprep.mubr.f32.mxu0 %v13677_v3  ;;  %2742 = vmatprep.mubr.f32.mxu1 %v13677_v3 }
 0x950   :  { %10585 = vmatpush1.bf16.msra.mxu0 %v14788_v58  ;;  %10617 = vmatpush1.bf16.msra.mxu1 %v14797_v48 }
 0x951   :  { %10587 = vmatprep.subr.bf16.mxu0 %v14811_v22  ;;  %10619 = vmatprep.subr.bf16.mxu1 %v14822_v8 }
 0x954   :  { %10589 = vmatpush1.bf16.msra.mxu0 %v14824_v12  ;;  %10621 = vmatpush1.bf16.msra.mxu1 %v14833_v21 }
 0x955   :  { %10591 = vmatprep.subr.bf16.mxu0 %v14847_v34  ;;  %10623 = vmatprep.subr.bf16.mxu1 %v14858_v47 }
 0x958   :  { %10593 = vmatpush1.bf16.msra.mxu0 %v14860_v51  ;;  %10625 = vmatpush1.bf16.msra.mxu1 %v14872_v6 }
 0x959   :  { %10595 = vmatprep.subr.bf16.mxu0 %v14885_v24  ;;  %10627 = vmatprep.subr.bf16.mxu1 %v14887_v29 }
 0x95c   :  { %10597 = vmatpush1.bf16.msra.mxu0 %v14899_v0  ;;  %10629 = vmatpush1.bf16.msra.mxu1 %v14912_v54 }
 0x95d   :  { %10599 = vmatprep.subr.bf16.mxu0 %v14914_v30  ;;  %10631 = vmatprep.subr.bf16.mxu1 %v14925_v56 }
 0x960   :  { %10601 = vmatpush1.bf16.msra.mxu0 %v14937_v17  ;;  %10633 = vmatpush1.bf16.msra.mxu1 %v14950_v1 }
 0x961   :  { %10603 = vmatprep.subr.bf16.mxu0 %v14952_v5  ;;  %10635 = vmatprep.subr.bf16.mxu1 %v14964_v28 }
 0x964   :  { %10605 = vmatpush1.bf16.msra.mxu0 %v14973_v41  ;;  %10637 = vmatpush1.bf16.msra.mxu1 %v14977_v44 }
 0x965   :  { %10607 = vmatprep.subr.bf16.mxu0 %v14991_v10  ;;  %10639 = vmatprep.subr.bf16.mxu1 %v15002_v7 }
 0x968   :  { %10609 = vmatpush1.bf16.msra.mxu0 %v15004_v23  ;;  %10641 = vmatpush1.bf16.msra.mxu1 %v15013_v42 }
 0x969   :  { %10643 = vmatprep.subr.bf16.mxu0 %v14739_v36  ;;  %10675 = vmatprep.subr.bf16.mxu1 %v14750_v33 }
 0xa1e   :  { %v2498_v61 = vpop.f32.mrb[18].mxu0  ;;  %v2569_v13 = vpop.f32.mrb[18].mxu1 }
 0xa1f   :  { %v12748_v4 = vadd.f32 %v2498_v61, %v15067_v26  ;;  %v2500_v62 = vpop.f32.mrb[19].mxu0  ;;  %v2571_v15 = vpop.f32.mrb[19].mxu1  ;;  %v12764_v52 = vadd.f32 %v2569_v13, %v15079_v31 }
 0xa20   :  { %v12749_v25 = vadd.f32 %v2500_v62, %v15070_v35  ;;  %v12765_v50 = vadd.f32 %v2571_v15, %v15075_v18 }
 0xa21   :  { %v9309_v38 = vmul.f32 -1.442695, %v12748_v4 }
 0xa22   :  { %v9310_v55 = vmul.f32 -1.442695, %v12749_v25  ;;  %v9311_v59 = vmul.f32 -1.442695, %v12765_v50 }
 0xa23   :  { %13181 = vpow2.f32 %v9309_v38 }
 0xa24   :  { %13183 = vpow2.f32 %v9310_v55 }
 0xa25   :  { %13185 = vpow2.f32 %v9311_v59 }
 0xa26   :  { %13187 = vtanh.f32 %v12764_v52 }
 0xa2d   :  { %v13182_v63 = vpop.eup %13181 }
 0xa2e   :  { %v13184_v14 = vpop.eup %13183  ;;  %v2581_v19 = vadd.f32 1.0, %v13182_v63 }
 0xa2f   :  { %v2587_v60 = vadd.f32 1.0, %v13184_v14  ;;  %v13186_v9 = vpop.eup %13185 }
 0xa30   :  { %13189 = vrcp.f32 %v2581_v19  ;;  %v13188_v16 = vpop.eup %13187  ;;  %v2594_v43 = vadd.f32 1.0, %v13186_v9 }
 0xa31   :  { %13191 = vrcp.f32 %v2587_v60 }
 0xa32   :  { %13193 = vrcp.f32 %v2594_v43 }
 0xa3a   :  { %v13190_v2 = vpop.eup %13189 }
 0xa3b   :  { %v13192_v32 = vpop.eup %13191  ;;  %v2598_v20 = vmul.f32 %v13190_v2, %v13188_v16 }
 0xa3c   :  { %v2597_v61 = vmul.f32 %v13192_v32, %v15082_v40  ;;  %v13194_v13 = vpop.eup %13193 }
 0xa3e   :  { %v15128_v4 = vadd.f32 %v2598_v20, %v2597_v61 }
 0xa40   :  { %13195 = vtanh.f32 %v15128_v4 }
 0xa4a   :  { %v13196_v62 = vpop.eup %13195 }
 0xa4b   :  { %v15131_v15 = vmul.f32 %v13196_v62, %v13194_v13 }
 0xa4d   :  { %2672 = vmatmul.mubr.f32.vlgmr.msra.gmra.mrb[20].mxu0 %v15131_v15  ;;  %2743 = vmatmul.mubr.f32.vlgmr.msra.gmra.mrb[20].mxu1 %v15131_v15 }
 0xa4e   :  { %10645 = vmatpush1.bf16.msra.mxu0 %v14752_v37  ;;  %10677 = vmatpush1.bf16.msra.mxu1 %v14761_v27 }
 0xa4f   :  { %10647 = vmatprep.subr.bf16.mxu0 %v14775_v53  ;;  %10679 = vmatprep.subr.bf16.mxu1 %v14786_v45 }
 0xa50   :  { %2846 = vmatprep.mubr.f32.mxu0 %v13677_v3  ;;  %2917 = vmatprep.mubr.f32.mxu1 %v13677_v3 }
 0xa52   :  { %10649 = vmatpush1.bf16.msra.mxu0 %v14788_v58  ;;  %10681 = vmatpush1.bf16.msra.mxu1 %v14797_v48 }
 0xa53   :  { %10651 = vmatprep.subr.bf16.mxu0 %v14811_v22  ;;  %10683 = vmatprep.subr.bf16.mxu1 %v14822_v8 }
 0xa56   :  { %10653 = vmatpush1.bf16.msra.mxu0 %v14824_v12  ;;  %10685 = vmatpush1.bf16.msra.mxu1 %v14833_v21 }
 0xa57   :  { %10655 = vmatprep.subr.bf16.mxu0 %v14847_v34  ;;  %10687 = vmatprep.subr.bf16.mxu1 %v14858_v47 }
 0xa5a   :  { %10657 = vmatpush1.bf16.msra.mxu0 %v14860_v51  ;;  %10689 = vmatpush1.bf16.msra.mxu1 %v14872_v6 }
 0xa5b   :  { %10659 = vmatprep.subr.bf16.mxu0 %v14885_v24  ;;  %10691 = vmatprep.subr.bf16.mxu1 %v14887_v29 }
 0xa5e   :  { %10661 = vmatpush1.bf16.msra.mxu0 %v14899_v0  ;;  %10693 = vmatpush1.bf16.msra.mxu1 %v14912_v54 }
 0xa5f   :  { %10663 = vmatprep.subr.bf16.mxu0 %v14914_v30  ;;  %10695 = vmatprep.subr.bf16.mxu1 %v14925_v56 }
 0xa62   :  { %10665 = vmatpush1.bf16.msra.mxu0 %v14937_v17  ;;  %10697 = vmatpush1.bf16.msra.mxu1 %v14950_v1 }
 0xa63   :  { %10667 = vmatprep.subr.bf16.mxu0 %v14952_v5  ;;  %10699 = vmatprep.subr.bf16.mxu1 %v14964_v28 }
 0xa66   :  { %10669 = vmatpush1.bf16.msra.mxu0 %v14973_v41  ;;  %10701 = vmatpush1.bf16.msra.mxu1 %v14977_v44 }
 0xa67   :  { %10671 = vmatprep.subr.bf16.mxu0 %v14991_v10  ;;  %10703 = vmatprep.subr.bf16.mxu1 %v15002_v7 }
 0xa6a   :  { %10673 = vmatpush1.bf16.msra.mxu0 %v15004_v23  ;;  %10705 = vmatpush1.bf16.msra.mxu1 %v15013_v42 }
 0xa6b   :  { %10707 = vmatprep.subr.bf16.mxu0 %v14739_v36  ;;  %10739 = vmatprep.subr.bf16.mxu1 %v14750_v33 }
 0xb20   :  { %v2673_v40 = vpop.f32.mrb[20].mxu0  ;;  %v2744_v25 = vpop.f32.mrb[20].mxu1 }
 0xb21   :  { %v12750_v38 = vadd.f32 %v2673_v40, %v15067_v26  ;;  %v2675_v55 = vpop.f32.mrb[21].mxu0  ;;  %v2746_v50 = vpop.f32.mrb[21].mxu1  ;;  %v12766_v60 = vadd.f32 %v2744_v25, %v15079_v31 }
 0xb22   :  { %v12751_v59 = vadd.f32 %v2675_v55, %v15070_v35  ;;  %v12767_v14 = vadd.f32 %v2746_v50, %v15075_v18 }
 0xb23   :  { %v9312_v52 = vmul.f32 -1.442695, %v12750_v38 }
 0xb24   :  { %v9313_v63 = vmul.f32 -1.442695, %v12751_v59  ;;  %v9314_v19 = vmul.f32 -1.442695, %v12767_v14 }
 0xb25   :  { %13197 = vpow2.f32 %v9312_v52 }
 0xb26   :  { %13199 = vpow2.f32 %v9313_v63 }
 0xb27   :  { %13201 = vpow2.f32 %v9314_v19 }
 0xb28   :  { %13203 = vtanh.f32 %v12766_v60 }
 0xb2f   :  { %v13198_v9 = vpop.eup %13197 }
 0xb30   :  { %v13200_v16 = vpop.eup %13199  ;;  %v2756_v2 = vadd.f32 1.0, %v13198_v9 }
 0xb31   :  { %v2762_v32 = vadd.f32 1.0, %v13200_v16  ;;  %v13202_v20 = vpop.eup %13201 }
 0xb32   :  { %13205 = vrcp.f32 %v2756_v2  ;;  %v13204_v43 = vpop.eup %13203  ;;  %v2769_v40 = vadd.f32 1.0, %v13202_v20 }
 0xb33   :  { %13207 = vrcp.f32 %v2762_v32 }
 0xb34   :  { %13209 = vrcp.f32 %v2769_v40 }
 0xb3c   :  { %v13206_v61 = vpop.eup %13205 }
 0xb3d   :  { %v13208_v13 = vpop.eup %13207  ;;  %v2773_v62 = vmul.f32 %v13206_v61, %v13204_v43 }
 0xb3e   :  { %v2772_v38 = vmul.f32 %v13208_v13, %v15128_v4  ;;  %v13210_v25 = vpop.eup %13209 }
 0xb40   :  { %v15174_v55 = vadd.f32 %v2773_v62, %v2772_v38 }
 0xb42   :  { %13211 = vtanh.f32 %v15174_v55 }
 0xb4c   :  { %v13212_v50 = vpop.eup %13211 }
 0xb4d   :  { %v15177_v59 = vmul.f32 %v13212_v50, %v13210_v25 }
 0xb4f   :  { %2847 = vmatmul.mubr.f32.vlgmr.msra.gmra.mrb[22].mxu0 %v15177_v59  ;;  %2918 = vmatmul.mubr.f32.vlgmr.msra.gmra.mrb[22].mxu1 %v15177_v59 }
 0xb50   :  { %10709 = vmatpush1.bf16.msra.mxu0 %v14752_v37  ;;  %10741 = vmatpush1.bf16.msra.mxu1 %v14761_v27 }
 0xb51   :  { %10711 = vmatprep.subr.bf16.mxu0 %v14775_v53  ;;  %10743 = vmatprep.subr.bf16.mxu1 %v14786_v45 }
 0xb52   :  { %3021 = vmatprep.mubr.f32.mxu0 %v13677_v3  ;;  %3092 = vmatprep.mubr.f32.mxu1 %v13677_v3 }
 0xb54   :  { %10713 = vmatpush1.bf16.msra.mxu0 %v14788_v58  ;;  %10745 = vmatpush1.bf16.msra.mxu1 %v14797_v48 }
 0xb55   :  { %10715 = vmatprep.subr.bf16.mxu0 %v14811_v22  ;;  %10747 = vmatprep.subr.bf16.mxu1 %v14822_v8 }
 0xb58   :  { %10717 = vmatpush1.bf16.msra.mxu0 %v14824_v12  ;;  %10749 = vmatpush1.bf16.msra.mxu1 %v14833_v21 }
 0xb59   :  { %10719 = vmatprep.subr.bf16.mxu0 %v14847_v34  ;;  %10751 = vmatprep.subr.bf16.mxu1 %v14858_v47 }
 0xb5c   :  { %10721 = vmatpush1.bf16.msra.mxu0 %v14860_v51  ;;  %10753 = vmatpush1.bf16.msra.mxu1 %v14872_v6 }
 0xb5d   :  { %10723 = vmatprep.subr.bf16.mxu0 %v14885_v24  ;;  %10755 = vmatprep.subr.bf16.mxu1 %v14887_v29 }
 0xb60   :  { %10725 = vmatpush1.bf16.msra.mxu0 %v14899_v0  ;;  %10757 = vmatpush1.bf16.msra.mxu1 %v14912_v54 }
 0xb61   :  { %10727 = vmatprep.subr.bf16.mxu0 %v14914_v30  ;;  %10759 = vmatprep.subr.bf16.mxu1 %v14925_v56 }
 0xb64   :  { %10729 = vmatpush1.bf16.msra.mxu0 %v14937_v17  ;;  %10761 = vmatpush1.bf16.msra.mxu1 %v14950_v1 }
 0xb65   :  { %10731 = vmatprep.subr.bf16.mxu0 %v14952_v5  ;;  %10763 = vmatprep.subr.bf16.mxu1 %v14964_v28 }
 0xb68   :  { %10733 = vmatpush1.bf16.msra.mxu0 %v14973_v41  ;;  %10765 = vmatpush1.bf16.msra.mxu1 %v14977_v44 }
 0xb69   :  { %10735 = vmatprep.subr.bf16.mxu0 %v14991_v10  ;;  %10767 = vmatprep.subr.bf16.mxu1 %v15002_v7 }
 0xb6c   :  { %10737 = vmatpush1.bf16.msra.mxu0 %v15004_v23  ;;  %10769 = vmatpush1.bf16.msra.mxu1 %v15013_v42 }
 0xb6d   :  { %10771 = vmatprep.subr.bf16.mxu0 %v14739_v36  ;;  %10803 = vmatprep.subr.bf16.mxu1 %v14750_v33 }
 0xc22   :  { %v2848_v4 = vpop.f32.mrb[22].mxu0  ;;  %v2919_v52 = vpop.f32.mrb[22].mxu1 }
 0xc23   :  { %v12752_v63 = vadd.f32 %v2848_v4, %v15067_v26  ;;  %v2850_v14 = vpop.f32.mrb[23].mxu0  ;;  %v2921_v19 = vpop.f32.mrb[23].mxu1  ;;  %v12768_v20 = vadd.f32 %v2919_v52, %v15079_v31 }
 0xc24   :  { %v12753_v60 = vadd.f32 %v2850_v14, %v15070_v35  ;;  %v12769_v2 = vadd.f32 %v2921_v19, %v15075_v18 }
 0xc25   :  { %v9315_v9 = vmul.f32 -1.442695, %v12752_v63 }
 0xc26   :  { %v9316_v16 = vmul.f32 -1.442695, %v12753_v60  ;;  %v9317_v32 = vmul.f32 -1.442695, %v12769_v2 }
 0xc27   :  { %13213 = vpow2.f32 %v9315_v9 }
 0xc28   :  { %13215 = vpow2.f32 %v9316_v16 }
 0xc29   :  { %13217 = vpow2.f32 %v9317_v32 }
 0xc2a   :  { %13219 = vtanh.f32 %v12768_v20 }
 0xc31   :  { %v13214_v43 = vpop.eup %13213 }
 0xc32   :  { %v13216_v61 = vpop.eup %13215  ;;  %v2931_v13 = vadd.f32 1.0, %v13214_v43 }
 0xc33   :  { %v2937_v62 = vadd.f32 1.0, %v13216_v61  ;;  %v13218_v40 = vpop.eup %13217 }
 0xc34   :  { %13221 = vrcp.f32 %v2931_v13  ;;  %v13220_v38 = vpop.eup %13219  ;;  %v2944_v63 = vadd.f32 1.0, %v13218_v40 }
 0xc35   :  { %13223 = vrcp.f32 %v2937_v62 }
 0xc36   :  { %13225 = vrcp.f32 %v2944_v63 }
 0xc3e   :  { %v13222_v25 = vpop.eup %13221 }
 0xc3f   :  { %v13224_v50 = vpop.eup %13223  ;;  %v2948_v4 = vmul.f32 %v13222_v25, %v13220_v38 }
 0xc40   :  { %v2947_v14 = vmul.f32 %v13224_v50, %v15174_v55  ;;  %v13226_v52 = vpop.eup %13225 }
 0xc42   :  { %v15220_v19 = vadd.f32 %v2948_v4, %v2947_v14 }
 0xc44   :  { %13227 = vtanh.f32 %v15220_v19 }
 0xc4e   :  { %v13228_v60 = vpop.eup %13227 }
 0xc4f   :  { %v15223_v9 = vmul.f32 %v13228_v60, %v13226_v52 }
 0xc51   :  { %3022 = vmatmul.mubr.f32.vlgmr.msra.gmra.mrb[24].mxu0 %v15223_v9  ;;  %3093 = vmatmul.mubr.f32.vlgmr.msra.gmra.mrb[24].mxu1 %v15223_v9 }
 0xc52   :  { %10773 = vmatpush1.bf16.msra.mxu0 %v14752_v37  ;;  %10805 = vmatpush1.bf16.msra.mxu1 %v14761_v27 }
 0xc53   :  { %10775 = vmatprep.subr.bf16.mxu0 %v14775_v53  ;;  %10807 = vmatprep.subr.bf16.mxu1 %v14786_v45 }
 0xc54   :  { %3196 = vmatprep.mubr.f32.mxu0 %v13677_v3  ;;  %3267 = vmatprep.mubr.f32.mxu1 %v13677_v3 }
 0xc56   :  { %10777 = vmatpush1.bf16.msra.mxu0 %v14788_v58  ;;  %10809 = vmatpush1.bf16.msra.mxu1 %v14797_v48 }
 0xc57   :  { %10779 = vmatprep.subr.bf16.mxu0 %v14811_v22  ;;  %10811 = vmatprep.subr.bf16.mxu1 %v14822_v8 }
 0xc5a   :  { %10781 = vmatpush1.bf16.msra.mxu0 %v14824_v12  ;;  %10813 = vmatpush1.bf16.msra.mxu1 %v14833_v21 }
 0xc5b   :  { %10783 = vmatprep.subr.bf16.mxu0 %v14847_v34  ;;  %10815 = vmatprep.subr.bf16.mxu1 %v14858_v47 }
 0xc5e   :  { %10785 = vmatpush1.bf16.msra.mxu0 %v14860_v51  ;;  %10817 = vmatpush1.bf16.msra.mxu1 %v14872_v6 }
 0xc5f   :  { %10787 = vmatprep.subr.bf16.mxu0 %v14885_v24  ;;  %10819 = vmatprep.subr.bf16.mxu1 %v14887_v29 }
 0xc62   :  { %10789 = vmatpush1.bf16.msra.mxu0 %v14899_v0  ;;  %10821 = vmatpush1.bf16.msra.mxu1 %v14912_v54 }
 0xc63   :  { %10791 = vmatprep.subr.bf16.mxu0 %v14914_v30  ;;  %10823 = vmatprep.subr.bf16.mxu1 %v14925_v56 }
 0xc66   :  { %10793 = vmatpush1.bf16.msra.mxu0 %v14937_v17  ;;  %10825 = vmatpush1.bf16.msra.mxu1 %v14950_v1 }
 0xc67   :  { %10795 = vmatprep.subr.bf16.mxu0 %v14952_v5  ;;  %10827 = vmatprep.subr.bf16.mxu1 %v14964_v28 }
 0xc6a   :  { %10797 = vmatpush1.bf16.msra.mxu0 %v14973_v41  ;;  %10829 = vmatpush1.bf16.msra.mxu1 %v14977_v44 }
 0xc6b   :  { %10799 = vmatprep.subr.bf16.mxu0 %v14991_v10  ;;  %10831 = vmatprep.subr.bf16.mxu1 %v15002_v7 }
 0xc6e   :  { %10801 = vmatpush1.bf16.msra.mxu0 %v15004_v23  ;;  %10833 = vmatpush1.bf16.msra.mxu1 %v15013_v42 }
 0xc6f   :  { %10835 = vmatprep.subr.bf16.mxu0 %v14739_v36  ;;  %10867 = vmatprep.subr.bf16.mxu1 %v14750_v33 }
 0xd24   :  { %v3023_v55 = vpop.f32.mrb[24].mxu0  ;;  %v3094_v16 = vpop.f32.mrb[24].mxu1 }
 0xd25   :  { %v12754_v2 = vadd.f32 %v3023_v55, %v15067_v26  ;;  %v3025_v32 = vpop.f32.mrb[25].mxu0  ;;  %v3096_v20 = vpop.f32.mrb[25].mxu1  ;;  %v12770_v38 = vadd.f32 %v3094_v16, %v15079_v31 }
 0xd26   :  { %v12755_v43 = vadd.f32 %v3025_v32, %v15070_v35  ;;  %v12771_v62 = vadd.f32 %v3096_v20, %v15075_v18 }
 0xd27   :  { %v9318_v61 = vmul.f32 -1.442695, %v12754_v2 }
 0xd28   :  { %v9319_v13 = vmul.f32 -1.442695, %v12755_v43  ;;  %v9320_v40 = vmul.f32 -1.442695, %v12771_v62 }
 0xd29   :  { %13229 = vpow2.f32 %v9318_v61 }
 0xd2a   :  { %13231 = vpow2.f32 %v9319_v13 }
 0xd2b   :  { %13233 = vpow2.f32 %v9320_v40 }
 0xd2c   :  { %13235 = vtanh.f32 %v12770_v38 }
 0xd33   :  { %v13230_v25 = vpop.eup %13229 }
 0xd34   :  { %v13232_v50 = vpop.eup %13231  ;;  %v3106_v4 = vadd.f32 1.0, %v13230_v25 }
 0xd35   :  { %v3112_v63 = vadd.f32 1.0, %v13232_v50  ;;  %v13234_v14 = vpop.eup %13233 }
 0xd36   :  { %13237 = vrcp.f32 %v3106_v4  ;;  %v13236_v52 = vpop.eup %13235  ;;  %v3119_v32 = vadd.f32 1.0, %v13234_v14 }
 0xd37   :  { %13239 = vrcp.f32 %v3112_v63 }
 0xd38   :  { %13241 = vrcp.f32 %v3119_v32 }
 0xd40   :  { %v13238_v60 = vpop.eup %13237 }
 0xd41   :  { %v13240_v55 = vpop.eup %13239  ;;  %v3123_v2 = vmul.f32 %v13238_v60, %v13236_v52 }
 0xd42   :  { %v3122_v43 = vmul.f32 %v13240_v55, %v15220_v19  ;;  %v13242_v16 = vpop.eup %13241 }
 0xd44   :  { %v15266_v20 = vadd.f32 %v3123_v2, %v3122_v43 }
 0xd46   :  { %13243 = vtanh.f32 %v15266_v20 }
 0xd50   :  { %v13244_v61 = vpop.eup %13243 }
 0xd51   :  { %v15269_v13 = vmul.f32 %v13244_v61, %v13242_v16 }
 0xd53   :  { %3197 = vmatmul.mubr.f32.vlgmr.msra.gmra.mrb[26].mxu0 %v15269_v13  ;;  %3268 = vmatmul.mubr.f32.vlgmr.msra.gmra.mrb[26].mxu1 %v15269_v13 }
 0xd54   :  { %10837 = vmatpush1.bf16.msra.mxu0 %v14752_v37  ;;  %10869 = vmatpush1.bf16.msra.mxu1 %v14761_v27 }
 0xd55   :  { %10839 = vmatprep.subr.bf16.mxu0 %v14775_v53  ;;  %10871 = vmatprep.subr.bf16.mxu1 %v14786_v45 }
 0xd56   :  { %3371 = vmatprep.mubr.f32.mxu0 %v13677_v3  ;;  %3442 = vmatprep.mubr.f32.mxu1 %v13677_v3 }
 0xd58   :  { %10841 = vmatpush1.bf16.msra.mxu0 %v14788_v58  ;;  %10873 = vmatpush1.bf16.msra.mxu1 %v14797_v48 }
 0xd59   :  { %10843 = vmatprep.subr.bf16.mxu0 %v14811_v22  ;;  %10875 = vmatprep.subr.bf16.mxu1 %v14822_v8 }
 0xd5c   :  { %10845 = vmatpush1.bf16.msra.mxu0 %v14824_v12  ;;  %10877 = vmatpush1.bf16.msra.mxu1 %v14833_v21 }
 0xd5d   :  { %10847 = vmatprep.subr.bf16.mxu0 %v14847_v34  ;;  %10879 = vmatprep.subr.bf16.mxu1 %v14858_v47 }
 0xd60   :  { %10849 = vmatpush1.bf16.msra.mxu0 %v14860_v51  ;;  %10881 = vmatpush1.bf16.msra.mxu1 %v14872_v6 }
 0xd61   :  { %10851 = vmatprep.subr.bf16.mxu0 %v14885_v24  ;;  %10883 = vmatprep.subr.bf16.mxu1 %v14887_v29 }
 0xd64   :  { %10853 = vmatpush1.bf16.msra.mxu0 %v14899_v0  ;;  %10885 = vmatpush1.bf16.msra.mxu1 %v14912_v54 }
 0xd65   :  { %10855 = vmatprep.subr.bf16.mxu0 %v14914_v30  ;;  %10887 = vmatprep.subr.bf16.mxu1 %v14925_v56 }
 0xd68   :  { %10857 = vmatpush1.bf16.msra.mxu0 %v14937_v17  ;;  %10889 = vmatpush1.bf16.msra.mxu1 %v14950_v1 }
 0xd69   :  { %10859 = vmatprep.subr.bf16.mxu0 %v14952_v5  ;;  %10891 = vmatprep.subr.bf16.mxu1 %v14964_v28 }
 0xd6c   :  { %10861 = vmatpush1.bf16.msra.mxu0 %v14973_v41  ;;  %10893 = vmatpush1.bf16.msra.mxu1 %v14977_v44 }
 0xd6d   :  { %10863 = vmatprep.subr.bf16.mxu0 %v14991_v10  ;;  %10895 = vmatprep.subr.bf16.mxu1 %v15002_v7 }
 0xd70   :  { %10865 = vmatpush1.bf16.msra.mxu0 %v15004_v23  ;;  %10897 = vmatpush1.bf16.msra.mxu1 %v15013_v42 }
 0xd71   :  { %10899 = vmatprep.subr.bf16.mxu0 %v14739_v36  ;;  %10931 = vmatprep.subr.bf16.mxu1 %v14750_v33 }
 0xe26   :  { %v3198_v19 = vpop.f32.mrb[26].mxu0  ;;  %v3269_v62 = vpop.f32.mrb[26].mxu1 }
 0xe27   :  { %v12756_v40 = vadd.f32 %v3198_v19, %v15067_v26  ;;  %v3200_v38 = vpop.f32.mrb[27].mxu0  ;;  %v3271_v25 = vpop.f32.mrb[27].mxu1  ;;  %v12772_v60 = vadd.f32 %v3269_v62, %v15079_v31 }
 0xe28   :  { %v12757_v50 = vadd.f32 %v3200_v38, %v15070_v35  ;;  %v12773_v14 = vadd.f32 %v3271_v25, %v15075_v18 }
 0xe29   :  { %v9321_v4 = vmul.f32 -1.442695, %v12756_v40 }
 0xe2a   :  { %v9322_v63 = vmul.f32 -1.442695, %v12757_v50  ;;  %v9323_v52 = vmul.f32 -1.442695, %v12773_v14  ;;  %v9336_v14 = vld [vmem:[%s17964_s2 + $0x230] sm:$0xff] }
 0xe2b   :  { %13245 = vpow2.f32 %v9321_v4 }
 0xe2c   :  { %13247 = vpow2.f32 %v9322_v63  ;;  %v9332_v63 = vld [vmem:[%s17964_s2 + $0x210] sm:$0xff] }
 0xe2d   :  { %13249 = vpow2.f32 %v9323_v52  ;;  %v9339_v52 = vld [vmem:[%s17964_s2 + $0x248] sm:$0xff] }
 0xe2e   :  { %13251 = vtanh.f32 %v12772_v60  ;;  %v9343_v60 = vld [vmem:[%s17964_s2 + $0x268] sm:$0xff] }
 0xe35   :  { %v13246_v36 = vpop.eup %13245 }
 0xe36   :  { %v13248_v55 = vpop.eup %13247  ;;  %v3281_v33 = vadd.f32 1.0, %v13246_v36  ;;  %v9341_v36 = vld [vmem:[%s17964_s2 + $0x258] sm:$0xff] }
 0xe37   :  { %v3287_v2 = vadd.f32 1.0, %v13248_v55  ;;  %v13250_v32 = vpop.eup %13249  ;;  %v9345_v55 = vld [vmem:[%s17964_s2 + $0x278] sm:$0xff] }
 0xe38   :  { %13253 = vrcp.f32 %v3281_v33  ;;  %v13252_v43 = vpop.eup %13251  ;;  %v3294_v40 = vadd.f32 1.0, %v13250_v32 }
 0xe39   :  { %13255 = vrcp.f32 %v3287_v2 }
 0xe3a   :  { %13257 = vrcp.f32 %v3294_v40  ;;  %v10966_v40 = vpack.c.bf16 %v9343_v60, %v9339_v52  ;;  %v9364_v60 = vld [vmem:[%s17964_s2 + $0x310] sm:$0xff] }
 0xe42   :  { %v13254_v16 = vpop.eup %13253 }
 0xe43   :  { %v13256_v61 = vpop.eup %13255  ;;  %v3298_v19 = vmul.f32 %v13254_v16, %v13252_v43  ;;  %v10996_v43 = vpack.c.bf16 %v9336_v14, %v9332_v63  ;;  %v9338_v16 = vld [vmem:[%s17964_s2 + $0x240] sm:$0xff] }
 0xe44   :  { %v3297_v38 = vmul.f32 %v13256_v61, %v15266_v20  ;;  %v13258_v62 = vpop.eup %13257  ;;  %v9334_v20 = vld [vmem:[%s17964_s2 + $0x220] sm:$0xff] }
 0xe45   :  { %v9342_v61 = vld [vmem:[%s17964_s2 + $0x260] sm:$0xff] }
 0xe46   :  { %v15312_v25 = vadd.f32 %v3298_v19, %v3297_v38  ;;  %v10998_v38 = vpack.c.bf16 %v9345_v55, %v9341_v36  ;;  %v9366_v63 = vld [vmem:[%s17964_s2 + $0x320] sm:$0xff]  ;;  %v9368_v36 = vld [vmem:[%s17964_s2 + $0x330] sm:$0xff]  ;;  %v9371_v55 = vld [vmem:[%s17964_s2 + $0x348] sm:$0xff] }
 0xe48   :  { %13259 = vtanh.f32 %v15312_v25 }
 0xe52   :  { %v13260_v50 = vpop.eup %13259 }
 0xe53   :  { %v15315_v4 = vmul.f32 %v13260_v50, %v13258_v62  ;;  %v9344_v62 = vld [vmem:[%s17964_s2 + $0x270] sm:$0xff]  ;;  %v9347_v50 = vld [vmem:[%s17964_s2 + $0x288] sm:$0xff] }
 0xe55   :  { %3372 = vmatmul.mubr.f32.vlgmr.msra.gmra.mrb[28].mxu0 %v15315_v4  ;;  %3443 = vmatmul.mubr.f32.vlgmr.msra.gmra.mrb[28].mxu1 %v15315_v4 }
 0xe56   :  { %10901 = vmatpush1.bf16.msra.mxu0 %v14752_v37  ;;  %10933 = vmatpush1.bf16.msra.mxu1 %v14761_v27  ;;  %v9331_v37 = vld [vmem:[%s17964_s2 + $0x208] sm:$0xff] }
 0xe57   :  { %10903 = vmatprep.subr.bf16.mxu0 %v14775_v53  ;;  %10935 = vmatprep.subr.bf16.mxu1 %v14786_v45  ;;  %v9335_v27 = vld [vmem:[%s17964_s2 + $0x228] sm:$0xff]  ;;  %v9333_v53 = vld [vmem:[%s17964_s2 + $0x218] sm:$0xff] }
 0xe58   :  { %3546 = vmatprep.mubr.f32.mxu0 %v13677_v3  ;;  %3617 = vmatprep.mubr.f32.mxu1 %v13677_v3  ;;  %v10962_v45 = vpack.c.bf16 %v9335_v27, %v9331_v37  ;;  %v9351_v37 = vld [vmem:[%s17964_s2 + $0x2a8] sm:$0xff]  ;;  %v9349_v27 = vld [vmem:[%s17964_s2 + $0x298] sm:$0xff] }
 0xe5a   :  { %10905 = vmatpush1.bf16.msra.mxu0 %v14788_v58  ;;  %10937 = vmatpush1.bf16.msra.mxu1 %v14797_v48  ;;  %v9337_v58 = vld [vmem:[%s17964_s2 + $0x238] sm:$0xff] }
 0xe5b   :  { %10907 = vmatprep.subr.bf16.mxu0 %v14811_v22  ;;  %10939 = vmatprep.subr.bf16.mxu1 %v14822_v8  ;;  %v10994_v48 = vpack.c.bf16 %v9337_v58, %v9333_v53  ;;  %v9353_v53 = vld [vmem:[%s17964_s2 + $0x2b8] sm:$0xff] }
 0xe5e   :  { %10909 = vmatpush1.bf16.msra.mxu0 %v14824_v12  ;;  %10941 = vmatpush1.bf16.msra.mxu1 %v14833_v21 }
 0xe5f   :  { %10911 = vmatprep.subr.bf16.mxu0 %v14847_v34  ;;  %10943 = vmatprep.subr.bf16.mxu1 %v14858_v47 }
 0xe62   :  { %10913 = vmatpush1.bf16.msra.mxu0 %v14860_v51  ;;  %10945 = vmatpush1.bf16.msra.mxu1 %v14872_v6 }
 0xe63   :  { %10915 = vmatprep.subr.bf16.mxu0 %v14885_v24  ;;  %10947 = vmatprep.subr.bf16.mxu1 %v14887_v29 }
 0xe66   :  { %10917 = vmatpush1.bf16.msra.mxu0 %v14899_v0  ;;  %10949 = vmatpush1.bf16.msra.mxu1 %v14912_v54 }
 0xe67   :  { %10919 = vmatprep.subr.bf16.mxu0 %v14914_v30  ;;  %10951 = vmatprep.subr.bf16.mxu1 %v14925_v56 }
 0xe6a   :  { %10921 = vmatpush1.bf16.msra.mxu0 %v14937_v17  ;;  %10953 = vmatpush1.bf16.msra.mxu1 %v14950_v1 }
 0xe6b   :  { %10923 = vmatprep.subr.bf16.mxu0 %v14952_v5  ;;  %10955 = vmatprep.subr.bf16.mxu1 %v14964_v28 }
 0xe6e   :  { %10925 = vmatpush1.bf16.msra.mxu0 %v14973_v41  ;;  %10957 = vmatpush1.bf16.msra.mxu1 %v14977_v44 }
 0xe6f   :  { %10927 = vmatprep.subr.bf16.mxu0 %v14991_v10  ;;  %10959 = vmatprep.subr.bf16.mxu1 %v15002_v7 }
 0xe72   :  { %10929 = vmatpush1.bf16.msra.mxu0 %v15004_v23  ;;  %10961 = vmatpush1.bf16.msra.mxu1 %v15013_v42  ;;  %v9330_v42 = vld [vmem:[%s17964_s2 + $0x200] sm:$0xff] }
 0xe73   :  { %10963 = vmatprep.subr.bf16.mxu0 %v10962_v45  ;;  %10995 = vmatprep.subr.bf16.mxu1 %v10994_v48  ;;  %v10964_v32 = vpack.c.bf16 %v9334_v20, %v9330_v42  ;;  %v10968_v45 = vpack.c.bf16 %v9342_v61, %v9338_v16  ;;  %v9346_v48 = vld [vmem:[%s17964_s2 + $0x280] sm:$0xff]  ;;  %v11012_v16 = vpack.c.bf16 %v9368_v36, %v9364_v60  ;;  %v9405_v60 = vld [vmem:[%s17961_s3 + $0x458] sm:$0xff] }
 0xe74   :  { %v9362_v20 = vld [vmem:[%s17964_s2 + $0x300] sm:$0xff] }
 0xe75   :  { %v9370_v61 = vld [vmem:[%s17964_s2 + $0x340] sm:$0xff] }
 0xf28   :  { %v3373_v22 = vpop.f32.mrb[28].mxu0  ;;  %v3444_v8 = vpop.f32.mrb[28].mxu1 }
 0xf29   :  { %v12758_v12 = vadd.f32 %v3373_v22, %v15067_v26  ;;  %v3375_v21 = vpop.f32.mrb[29].mxu0  ;;  %v3446_v34 = vpop.f32.mrb[29].mxu1  ;;  %v12774_v0 = vadd.f32 %v3444_v8, %v15079_v31  ;;  %v9350_v22 = vld [vmem:[%s17964_s2 + $0x2a0] sm:$0xff]  ;;  %v10970_v8 = vpack.c.bf16 %v9351_v37, %v9347_v50  ;;  %v9376_v50 = vld [vmem:[%s17964_s2 + $0x370] sm:$0xff]  ;;  %v9379_v37 = vld [vmem:[%s17964_s2 + $0x388] sm:$0xff] }
 0xf2a   :  { %v12759_v47 = vadd.f32 %v3375_v21, %v15070_v35  ;;  %v12775_v24 = vadd.f32 %v3446_v34, %v15075_v18  ;;  %v9348_v21 = vld [vmem:[%s17964_s2 + $0x290] sm:$0xff] }
 0xf2b   :  { %v9324_v51 = vmul.f32 -1.442695, %v12758_v12  ;;  %v11002_v12 = vpack.c.bf16 %v9353_v53, %v9349_v27  ;;  %v9352_v34 = vld [vmem:[%s17964_s2 + $0x2b0] sm:$0xff]  ;;  %v9383_v27 = vld [vmem:[%s17964_s2 + $0x3a8] sm:$0xff]  ;;  %v9381_v53 = vld [vmem:[%s17964_s2 + $0x398] sm:$0xff] }
 0xf2c   :  { %v9325_v6 = vmul.f32 -1.442695, %v12759_v47  ;;  %v9326_v29 = vmul.f32 -1.442695, %v12775_v24  ;;  %v9355_v47 = vld [vmem:[%s17964_s2 + $0x2c8] sm:$0xff]  ;;  %v9361_v24 = vld [vmem:[%s17964_s2 + $0x2f8] sm:$0xff] }
 0xf2d   :  { %13261 = vpow2.f32 %v9324_v51  ;;  %v9359_v51 = vld [vmem:[%s17964_s2 + $0x2e8] sm:$0xff] }
 0xf2e   :  { %13263 = vpow2.f32 %v9325_v6  ;;  %v9357_v6 = vld [vmem:[%s17964_s2 + $0x2d8] sm:$0xff] }
 0xf2f   :  { %13265 = vpow2.f32 %v9326_v29  ;;  %v10972_v29 = vpack.c.bf16 %v9350_v22, %v9346_v48  ;;  %v9378_v22 = vld [vmem:[%s17964_s2 + $0x380] sm:$0xff] }
 0xf30   :  { %13267 = vtanh.f32 %v12774_v0  ;;  %v11004_v0 = vpack.c.bf16 %v9352_v34, %v9348_v21  ;;  %v9380_v34 = vld [vmem:[%s17964_s2 + $0x390] sm:$0xff] }
 0xf37   :  { %v13262_v54 = vpop.eup %13261 }
 0xf38   :  { %v13264_v30 = vpop.eup %13263  ;;  %v3456_v56 = vadd.f32 1.0, %v13262_v54  ;;  %v9354_v54 = vld [vmem:[%s17964_s2 + $0x2c0] sm:$0xff] }
 0xf39   :  { %v3462_v17 = vadd.f32 1.0, %v13264_v30  ;;  %v13266_v1 = vpop.eup %13265  ;;  %v9358_v30 = vld [vmem:[%s17964_s2 + $0x2e0] sm:$0xff] }
 0xf3a   :  { %13269 = vrcp.f32 %v3456_v56  ;;  %v13268_v5 = vpop.eup %13267  ;;  %v3469_v10 = vadd.f32 1.0, %v13266_v1  ;;  %v10974_v56 = vpack.c.bf16 %v9359_v51, %v9355_v47  ;;  %v9356_v1 = vld [vmem:[%s17964_s2 + $0x2d0] sm:$0xff]  ;;  %v9387_v51 = vld [vmem:[%s17964_s2 + $0x3c8] sm:$0xff] }
 0xf3b   :  { %13271 = vrcp.f32 %v3462_v17  ;;  %v11006_v17 = vpack.c.bf16 %v9361_v24, %v9357_v6  ;;  %v9384_v47 = vld [vmem:[%s17964_s2 + $0x3b0] sm:$0xff]  ;;  %v9391_v6 = vld [vmem:[%s17964_s2 + $0x3e8] sm:$0xff]  ;;  %v9389_v24 = vld [vmem:[%s17964_s2 + $0x3d8] sm:$0xff] }
 0xf3c   :  { %13273 = vrcp.f32 %v3469_v10  ;;  %v9369_v10 = vld [vmem:[%s17964_s2 + $0x338] sm:$0xff] }
 0xf44   :  { %v13270_v28 = vpop.eup %13269 }
 0xf45   :  { %v13272_v41 = vpop.eup %13271  ;;  %v3473_v44 = vmul.f32 %v13270_v28, %v13268_v5  ;;  %v9360_v5 = vld [vmem:[%s17964_s2 + $0x2f0] sm:$0xff]  ;;  %v9363_v28 = vld [vmem:[%s17964_s2 + $0x308] sm:$0xff] }
 0xf46   :  { %v3472_v7 = vmul.f32 %v13272_v41, %v15312_v25  ;;  %v13274_v33 = vpop.eup %13273  ;;  %v9340_v25 = vld [vmem:[%s17964_s2 + $0x250] sm:$0xff]  ;;  %v9367_v41 = vld [vmem:[%s17964_s2 + $0x328] sm:$0xff]  ;;  %v11008_v42 = vpack.c.bf16 %v9360_v5, %v9356_v1  ;;  %v9390_v1 = vld [vmem:[%s17964_s2 + $0x3e0] sm:$0xff] }
 0xf47   :  { %v11000_v58 = vpack.c.bf16 %v9344_v62, %v9340_v25  ;;  %v10978_v14 = vpack.c.bf16 %v9367_v41, %v9363_v28  ;;  %v9372_v62 = vld [vmem:[%s17964_s2 + $0x350] sm:$0xff] }
 0xf48   :  { %v15368_v23 = vadd.f32 %v3473_v44, %v3472_v7  ;;  %v9365_v44 = vld [vmem:[%s17964_s2 + $0x318] sm:$0xff]  ;;  %v10976_v7 = vpack.c.bf16 %v9358_v30, %v9354_v54  ;;  %v11016_v48 = vpack.c.bf16 %v9376_v50, %v9372_v62  ;;  %v11020_v54 = vpack.c.bf16 %v9384_v47, %v9380_v34  ;;  %v9386_v30 = vld [vmem:[%s17964_s2 + $0x3c0] sm:$0xff]  ;;  %v9388_v5 = vld [vmem:[%s17964_s2 + $0x3d0] sm:$0xff] }
 0xf49   :  { %v11010_v52 = vpack.c.bf16 %v9369_v10, %v9365_v44  ;;  %v9392_v28 = vld [vmem:[%s17964_s2 + $0x3f0] sm:$0xff]  ;;  %v10992_v41 = vpack.c.bf16 %v9390_v1, %v9386_v30  ;;  %v9413_v62 = vld [vmem:[%s17961_s3 + $0x498] sm:$0xff]  ;;  %v9431_v1 = vld [vmem:[%s17961_s3 + $0x528] sm:$0xff] }
 0xf4a   :  { %13275 = vtanh.f32 %v15368_v23  ;;  %v11024_v44 = vpack.c.bf16 %v9392_v28, %v9388_v5  ;;  %v9421_v34 = vld [vmem:[%s17961_s3 + $0x4d8] sm:$0xff]  ;;  %v9424_v30 = vld [vmem:[%s17961_s3 + $0x4f0] sm:$0xff] }
 0xf4b   :  { %v9429_v5 = vld [vmem:[%s17961_s3 + $0x518] sm:$0xff] }
 0xf4c   :  { %v9433_v28 = vld [vmem:[%s17961_s3 + $0x538] sm:$0xff] }
 0xf54   :  { %v13276_v2 = vpop.eup %13275 }
 0xf55   :  { %v15401_v19 = vmul.f32 %v13276_v2, %v13274_v33  ;;  %v9375_v33 = vld [vmem:[%s17964_s2 + $0x368] sm:$0xff]  ;;  %v9373_v2 = vld [vmem:[%s17964_s2 + $0x358] sm:$0xff] }
 0xf57   :  { %3547 = vmatmul.mubr.f32.vlgmr.msra.gmra.mrb[30].mxu0 %v15401_v19  ;;  %3618 = vmatmul.mubr.f32.vlgmr.msra.gmra.mrb[30].mxu1 %v15401_v19 }
 0xf58   :  { %10965 = vmatpush1.bf16.msra.mxu0 %v10964_v32  ;;  %10997 = vmatpush1.bf16.msra.mxu1 %v10996_v43  ;;  %v9377_v32 = vld [vmem:[%s17964_s2 + $0x378] sm:$0xff]  ;;  %v10980_v43 = vpack.c.bf16 %v9366_v63, %v9362_v20  ;;  %v9400_v20 = vld [vmem:[%s17961_s3 + $0x430] sm:$0xff] }
 0xf59   :  { %10967 = vmatprep.subr.bf16.mxu0 %v10966_v40  ;;  %10999 = vmatprep.subr.bf16.mxu1 %v10998_v38  ;;  %v9374_v40 = vld [vmem:[%s17964_s2 + $0x360] sm:$0xff]  ;;  %v10982_v38 = vpack.c.bf16 %v9375_v33, %v9371_v55  ;;  %v11014_v25 = vpack.c.bf16 %v9377_v32, %v9373_v2  ;;  %v9409_v55 = vld [vmem:[%s17961_s3 + $0x478] sm:$0xff] }
 0xf5a   :  { %3878 = vmatprep.mubr.f32.mxu0 %v13677_v3  ;;  %3991 = vmatprep.mubr.f32.mxu1 %v13677_v3  ;;  %v9402_v33 = vld [vmem:[%s17961_s3 + $0x440] sm:$0xff]  ;;  %v15641_v32 = vpack.c.bf16 %v9409_v55, %v9405_v60  ;;  %v9441_v60 = vld [vmem:[%s17961_s3 + $0x578] sm:$0xff] }
 0xf5b   :  { %v9406_v2 = vld [vmem:[%s17961_s3 + $0x460] sm:$0xff] }
 0xf5c   :  { %10969 = vmatpush1.bf16.msra.mxu0 %v10968_v45  ;;  %11001 = vmatpush1.bf16.msra.mxu1 %v11000_v58  ;;  %v9385_v45 = vld [vmem:[%s17964_s2 + $0x3b8] sm:$0xff]  ;;  %v10984_v58 = vpack.c.bf16 %v9374_v40, %v9370_v61  ;;  %v9408_v61 = vld [vmem:[%s17961_s3 + $0x470] sm:$0xff]  ;;  %v9434_v55 = vld [vmem:[%s17961_s3 + $0x540] sm:$0xff] }
 0xf5d   :  { %10971 = vmatprep.subr.bf16.mxu0 %v10970_v8  ;;  %11003 = vmatprep.subr.bf16.mxu1 %v11002_v12  ;;  %v9382_v8 = vld [vmem:[%s17964_s2 + $0x3a0] sm:$0xff]  ;;  %v10986_v12 = vpack.c.bf16 %v9383_v27, %v9379_v37  ;;  %v11018_v21 = vpack.c.bf16 %v9385_v45, %v9381_v53  ;;  %v9417_v37 = vld [vmem:[%s17961_s3 + $0x4b8] sm:$0xff] }
 0xf5e   :  { %v9410_v27 = vld [vmem:[%s17961_s3 + $0x480] sm:$0xff]  ;;  %v15677_v45 = vpack.c.bf16 %v9417_v37, %v9413_v62  ;;  %v9447_v62 = vld [vmem:[%s17961_s3 + $0x5a8] sm:$0xff]  ;;  %v9445_v37 = vld [vmem:[%s17961_s3 + $0x598] sm:$0xff] }
 0xf5f   :  { %v9414_v53 = vld [vmem:[%s17961_s3 + $0x4a0] sm:$0xff] }
 0xf60   :  { %10973 = vmatpush1.bf16.msra.mxu0 %v10972_v29  ;;  %11005 = vmatpush1.bf16.msra.mxu1 %v11004_v0  ;;  %v9393_v29 = vld [vmem:[%s17964_s2 + $0x3f8] sm:$0xff]  ;;  %v10988_v0 = vpack.c.bf16 %v9382_v8, %v9378_v22  ;;  %v9416_v22 = vld [vmem:[%s17961_s3 + $0x4b0] sm:$0xff] }
 0xf61   :  { %10975 = vmatprep.subr.bf16.mxu0 %v10974_v56  ;;  %11007 = vmatprep.subr.bf16.mxu1 %v11006_v17  ;;  %v10990_v56 = vpack.c.bf16 %v9391_v6, %v9387_v51  ;;  %v11022_v17 = vpack.c.bf16 %v9393_v29, %v9389_v24  ;;  %v9425_v51 = vld [vmem:[%s17961_s3 + $0x4f8] sm:$0xff]  ;;  %v9418_v6 = vld [vmem:[%s17961_s3 + $0x4c0] sm:$0xff] }
 0xf62   :  { %v9422_v24 = vld [vmem:[%s17961_s3 + $0x4e0] sm:$0xff]  ;;  %v15713_v29 = vpack.c.bf16 %v9425_v51, %v9421_v34  ;;  %v9444_v34 = vld [vmem:[%s17961_s3 + $0x590] sm:$0xff] }
 0xf63   :  { %v9448_v51 = vld [vmem:[%s17961_s3 + $0x5b0] sm:$0xff] }
 0xf64   :  { %10977 = vmatpush1.bf16.msra.mxu0 %v10976_v7  ;;  %11009 = vmatpush1.bf16.msra.mxu1 %v11008_v42  ;;  %v9396_v42 = vld [vmem:[%s17961_s3 + $0x410] sm:$0xff] }
 0xf65   :  { %10979 = vmatprep.subr.bf16.mxu0 %v10978_v14  ;;  %11011 = vmatprep.subr.bf16.mxu1 %v11010_v52  ;;  %v15616_v63 = vpack.c.bf16 %v9400_v20, %v9396_v42  ;;  %v9403_v14 = vld [vmem:[%s17961_s3 + $0x448] sm:$0xff] }
 0xf66   :  { %v9407_v52 = vld [vmem:[%s17961_s3 + $0x468] sm:$0xff] }
 0xf67   :  { %v15630_v36 = vpack.c.bf16 %v9407_v52, %v9403_v14  ;;  %v9439_v42 = vld [vmem:[%s17961_s3 + $0x568] sm:$0xff]  ;;  %v9437_v52 = vld [vmem:[%s17961_s3 + $0x558] sm:$0xff] }
 0xf68   :  { %10981 = vmatpush1.bf16.msra.mxu0 %v10980_v43  ;;  %11013 = vmatpush1.bf16.msra.mxu1 %v11012_v16  ;;  %v15643_v43 = vpack.c.bf16 %v9406_v2, %v9402_v33  ;;  %v9404_v16 = vld [vmem:[%s17961_s3 + $0x450] sm:$0xff]  ;;  %v15780_v33 = vpack.c.bf16 %v9441_v60, %v9437_v52  ;;  %v9438_v2 = vld [vmem:[%s17961_s3 + $0x560] sm:$0xff] }
 0xf69   :  { %10983 = vmatprep.subr.bf16.mxu0 %v10982_v38  ;;  %11015 = vmatprep.subr.bf16.mxu1 %v11014_v25  ;;  %v15652_v40 = vpack.c.bf16 %v9408_v61, %v9404_v16  ;;  %v9411_v38 = vld [vmem:[%s17961_s3 + $0x488] sm:$0xff]  ;;  %v9436_v16 = vld [vmem:[%s17961_s3 + $0x550] sm:$0xff] }
 0xf6a   :  { %v9415_v25 = vld [vmem:[%s17961_s3 + $0x4a8] sm:$0xff]  ;;  %v9440_v61 = vld [vmem:[%s17961_s3 + $0x570] sm:$0xff] }
 0xf6b   :  { %v15666_v50 = vpack.c.bf16 %v9415_v25, %v9411_v38  ;;  %v15792_v38 = vpack.c.bf16 %v9438_v2, %v9434_v55  ;;  %v9443_v25 = vld [vmem:[%s17961_s3 + $0x588] sm:$0xff] }
 0xf6c   :  { %10985 = vmatpush1.bf16.msra.mxu0 %v10984_v58  ;;  %11017 = vmatpush1.bf16.msra.mxu1 %v11016_v48  ;;  %v15679_v58 = vpack.c.bf16 %v9414_v53, %v9410_v27  ;;  %v9412_v48 = vld [vmem:[%s17961_s3 + $0x490] sm:$0xff]  ;;  %v15805_v27 = vpack.c.bf16 %v9440_v61, %v9436_v16  ;;  %v15807_v53 = vpack.c.bf16 %v9447_v62, %v9443_v25 }
 0xf6d   :  { %10987 = vmatprep.subr.bf16.mxu0 %v10986_v12  ;;  %11019 = vmatprep.subr.bf16.mxu1 %v11018_v21  ;;  %v15688_v8 = vpack.c.bf16 %v9416_v22, %v9412_v48  ;;  %v9419_v12 = vld [vmem:[%s17961_s3 + $0x4c8] sm:$0xff]  ;;  %v9449_v48 = vld [vmem:[%s17961_s3 + $0x5b8] sm:$0xff]  ;;  %v9442_v22 = vld [vmem:[%s17961_s3 + $0x580] sm:$0xff] }
 0xf6e   :  { %v9423_v21 = vld [vmem:[%s17961_s3 + $0x4e8] sm:$0xff] }
 0xf6f   :  { %v15702_v47 = vpack.c.bf16 %v9423_v21, %v9419_v12  ;;  %v9446_v12 = vld [vmem:[%s17961_s3 + $0x5a0] sm:$0xff]  ;;  %v15819_v21 = vpack.c.bf16 %v9449_v48, %v9445_v37 }
 0xf70   :  { %10989 = vmatpush1.bf16.msra.mxu0 %v10988_v0  ;;  %11021 = vmatpush1.bf16.msra.mxu1 %v11020_v54  ;;  %v15715_v0 = vpack.c.bf16 %v9422_v24, %v9418_v6  ;;  %v9420_v54 = vld [vmem:[%s17961_s3 + $0x4d0] sm:$0xff]  ;;  %v15828_v6 = vpack.c.bf16 %v9446_v12, %v9442_v22  ;;  %v15832_v24 = vpack.c.bf16 %v9448_v51, %v9444_v34 }
 0xf71   :  { %10991 = vmatprep.subr.bf16.mxu0 %v10990_v56  ;;  %11023 = vmatprep.subr.bf16.mxu1 %v11022_v17  ;;  %v9427_v56 = vld [vmem:[%s17961_s3 + $0x508] sm:$0xff]  ;;  %v15727_v17 = vpack.c.bf16 %v9424_v30, %v9420_v54 }
 0xf72   :  { %v9451_v54 = vld [vmem:[%s17961_s3 + $0x5c8] sm:$0xff] }
 0xf73   :  { %v9455_v30 = vld [vmem:[%s17961_s3 + $0x5e8] sm:$0xff] }
 0xf74   :  { %10993 = vmatpush1.bf16.msra.mxu0 %v10992_v41  ;;  %11025 = vmatpush1.bf16.msra.mxu1 %v11024_v44  ;;  %v15740_v41 = vpack.c.bf16 %v9431_v1, %v9427_v56  ;;  %v15742_v44 = vpack.c.bf16 %v9433_v28, %v9429_v5  ;;  %v9453_v56 = vld [vmem:[%s17961_s3 + $0x5d8] sm:$0xff]  ;;  %v15846_v1 = vpack.c.bf16 %v9455_v30, %v9451_v54  ;;  %v9450_v28 = vld [vmem:[%s17961_s3 + $0x5c0] sm:$0xff] }
 0xf75   :  { %v9457_v5 = vld [vmem:[%s17961_s3 + $0x5f8] sm:$0xff] }
 0xf77   :  { %3879 = vmatmul.mubr.f32.vlgmr.msra.gmra.mrb[32].mxu0 %v15085_v39  ;;  %3992 = vmatmul.mubr.f32.vlgmr.msra.gmra.mrb[32].mxu1 %v15085_v39  ;;  %v9395_v39 = vld [vmem:[%s17961_s3 + $0x408] sm:$0xff] }
 0xf78   :  { %3884 = vmatprep.mubr.f32.mxu0 %v13677_v3  ;;  %3997 = vmatprep.mubr.f32.mxu1 %v13677_v3 }
 0xf7b   :  { %3885 = vmatmul.mubr.f32.gmra.mrb[34].mxu0 %v15131_v15  ;;  %3998 = vmatmul.mubr.f32.gmra.mrb[34].mxu1 %v15131_v15  ;;  %v9399_v15 = vld [vmem:[%s17961_s3 + $0x428] sm:$0xff] }
 0xf7c   :  { %3890 = vmatprep.mubr.f32.mxu0 %v13677_v3  ;;  %4003 = vmatprep.mubr.f32.mxu1 %v13677_v3 }
 0xf7f   :  { %3891 = vmatmul.mubr.f32.gmra.mrb[36].mxu0 %v15177_v59  ;;  %4004 = vmatmul.mubr.f32.gmra.mrb[36].mxu1 %v15177_v59  ;;  %v9397_v59 = vld [vmem:[%s17961_s3 + $0x418] sm:$0xff] }
 0xf80   :  { %3896 = vmatprep.mubr.f32.mxu0 %v13677_v3  ;;  %4009 = vmatprep.mubr.f32.mxu1 %v13677_v3 }
 0xf83   :  { %3897 = vmatmul.mubr.f32.gmra.mrb[38].mxu0 %v15223_v9  ;;  %4010 = vmatmul.mubr.f32.gmra.mrb[38].mxu1 %v15223_v9  ;;  %v15594_v9 = vpack.c.bf16 %v9399_v15, %v9395_v39  ;;  %v9426_v39 = vld [vmem:[%s17961_s3 + $0x500] sm:$0xff] }
 0xf84   :  { %3902 = vmatprep.mubr.f32.mxu0 %v13677_v3  ;;  %4015 = vmatprep.mubr.f32.mxu1 %v13677_v3  ;;  %v9430_v15 = vld [vmem:[%s17961_s3 + $0x520] sm:$0xff] }
 0xf85   :  { %11027 = vmatprep.subr.bf16.mxu0 %v15594_v9 }
 0xf87   :  { %3903 = vmatmul.mubr.f32.gmra.mrb[40].mxu0 %v15269_v13  ;;  %4016 = vmatmul.mubr.f32.gmra.mrb[40].mxu1 %v15269_v13  ;;  %v9401_v13 = vld [vmem:[%s17961_s3 + $0x438] sm:$0xff] }
 0xf88   :  { %3908 = vmatprep.mubr.f32.mxu0 %v13677_v3  ;;  %4021 = vmatprep.mubr.f32.mxu1 %v13677_v3  ;;  %v15605_v10 = vpack.c.bf16 %v9401_v13, %v9397_v59  ;;  %v9428_v59 = vld [vmem:[%s17961_s3 + $0x510] sm:$0xff]  ;;  %v15754_v13 = vpack.c.bf16 %v9430_v15, %v9426_v39  ;;  %v9454_v39 = vld [vmem:[%s17961_s3 + $0x5e0] sm:$0xff]  ;;  %v15857_v15 = vpack.c.bf16 %v9457_v5, %v9453_v56 }
 0xf8a   :  { %11059 = vmatprep.subr.bf16.mxu1 %v15605_v10 }
 0xf8b   :  { %3909 = vmatmul.mubr.f32.gmra.mrb[42].mxu0 %v15315_v4  ;;  %4022 = vmatmul.mubr.f32.gmra.mrb[42].mxu1 %v15315_v4  ;;  %v9394_v4 = vld [vmem:[%s17961_s3 + $0x400] sm:$0xff] }
 0xf8c   :  { %3914 = vmatprep.mubr.f32.mxu0 %v13677_v3  ;;  %4027 = vmatprep.mubr.f32.mxu1 %v13677_v3 }
 0xf8d   :  { %11061 = vmatpush1.bf16.msra.mxu1 %v15616_v63 }
 0xf8e   :  { %11063 = vmatprep.subr.bf16.mxu1 %v15641_v32 }
 0xf8f   :  { %3915 = vmatmul.mubr.f32.gmra.mrb[44].mxu0 %v15401_v19  ;;  %4028 = vmatmul.mubr.f32.gmra.mrb[44].mxu1 %v15401_v19  ;;  %v9398_v19 = vld [vmem:[%s17961_s3 + $0x420] sm:$0xff] }
 0xf90   :  { %3920 = vmatprep.mubr.f32.mxu0 %v13677_v3  ;;  %4033 = vmatprep.mubr.f32.mxu1 %v13677_v3  ;;  %v15607_v7 = vpack.c.bf16 %v9398_v19, %v9394_v4  ;;  %v9432_v4 = vld [vmem:[%s17961_s3 + $0x530] sm:$0xff]  ;;  %v9435_v19 = vld [vmem:[%s17961_s3 + $0x548] sm:$0xff] }
 0xf91   :  { %11065 = vmatpush1.bf16.msra.mxu1 %v15652_v40  ;;  %v15767_v20 = vpack.c.bf16 %v9432_v4, %v9428_v59  ;;  %v15769_v14 = vpack.c.bf16 %v9439_v42, %v9435_v19  ;;  %v15859_v59 = vpack.c.bf16 %v9454_v39, %v9450_v28  ;;  %v9452_v4 = vld [vmem:[%s17961_s3 + $0x5d0] sm:$0xff] }
 0xf92   :  { %11029 = vmatpush1.bf16.msra.mxu0 %v15607_v7  ;;  %11067 = vmatprep.subr.bf16.mxu1 %v15677_v45  ;;  %v9456_v19 = vld [vmem:[%s17961_s3 + $0x5f0] sm:$0xff] }
 0xf93   :  { %11031 = vmatprep.subr.bf16.mxu0 %v15630_v36  ;;  %v15868_v42 = vpack.c.bf16 %v9456_v19, %v9452_v4 }
 0xf95   :  { %11069 = vmatpush1.bf16.msra.mxu1 %v15688_v8 }
 0xf96   :  { %11033 = vmatpush1.bf16.msra.mxu0 %v15643_v43  ;;  %11071 = vmatprep.subr.bf16.mxu1 %v15713_v29 }
 0xf97   :  { %11035 = vmatprep.subr.bf16.mxu0 %v15666_v50 }
 0xf99   :  { %11073 = vmatpush1.bf16.msra.mxu1 %v15727_v17 }
 0xf9a   :  { %11037 = vmatpush1.bf16.msra.mxu0 %v15679_v58  ;;  %11075 = vmatprep.subr.bf16.mxu1 %v15742_v44 }
 0xf9b   :  { %11039 = vmatprep.subr.bf16.mxu0 %v15702_v47 }
 0xf9d   :  { %11077 = vmatpush1.bf16.msra.mxu1 %v15767_v20 }
 0xf9e   :  { %11041 = vmatpush1.bf16.msra.mxu0 %v15715_v0  ;;  %11079 = vmatprep.subr.bf16.mxu1 %v15780_v33 }
 0xf9f   :  { %11043 = vmatprep.subr.bf16.mxu0 %v15740_v41 }
 0xfa1   :  { %11081 = vmatpush1.bf16.msra.mxu1 %v15805_v27 }
 0xfa2   :  { %11045 = vmatpush1.bf16.msra.mxu0 %v15754_v13  ;;  %11083 = vmatprep.subr.bf16.mxu1 %v15819_v21 }
 0xfa3   :  { %11047 = vmatprep.subr.bf16.mxu0 %v15769_v14 }
 0xfa5   :  { %11085 = vmatpush1.bf16.msra.mxu1 %v15832_v24 }
 0xfa6   :  { %11049 = vmatpush1.bf16.msra.mxu0 %v15792_v38  ;;  %11087 = vmatprep.subr.bf16.mxu1 %v15857_v15 }
 0xfa7   :  { %11051 = vmatprep.subr.bf16.mxu0 %v15807_v53 }
 0xfa9   :  { %11089 = vmatpush1.bf16.msra.mxu1 %v15868_v42 }
 0xfaa   :  { %11053 = vmatpush1.bf16.msra.mxu0 %v15828_v6  ;;  %11123 = vmatprep.subr.bf16.mxu1 %v15605_v10 }
 0xfab   :  { %11055 = vmatprep.subr.bf16.mxu0 %v15846_v1 }
 0xfae   :  { %11057 = vmatpush1.bf16.msra.mxu0 %v15859_v59 }
 0xfaf   :  { %11091 = vmatprep.subr.bf16.mxu0 %v15594_v9 }
0x102a   :  { %v3548_v52 = vpop.f32.mrb[30].mxu0  ;;  %v3619_v60 = vpop.f32.mrb[30].mxu1 }
0x102b   :  { %v12760_v55 = vadd.f32 %v3548_v52, %v15067_v26  ;;  %v3550_v2 = vpop.f32.mrb[31].mxu0  ;;  %v3621_v16 = vpop.f32.mrb[31].mxu1  ;;  %v12776_v22 = vadd.f32 %v3619_v60, %v15079_v31 }
0x102c   :  { %v12761_v61 = vadd.f32 %v3550_v2, %v15070_v35  ;;  %v12777_v37 = vadd.f32 %v3621_v16, %v15075_v18 }
0x102d   :  { %v9327_v25 = vmul.f32 -1.442695, %v12760_v55 }
0x102e   :  { %v9328_v62 = vmul.f32 -1.442695, %v12761_v61  ;;  %v9329_v48 = vmul.f32 -1.442695, %v12777_v37 }
0x102f   :  { %13277 = vpow2.f32 %v9327_v25 }
0x1030   :  { %13279 = vpow2.f32 %v9328_v62 }
0x1031   :  { %13281 = vpow2.f32 %v9329_v48 }
0x1032   :  { %13283 = vtanh.f32 %v12776_v22 }
0x1039   :  { %v13278_v12 = vpop.eup %13277 }
0x103a   :  { %v13280_v34 = vpop.eup %13279  ;;  %v3631_v51 = vadd.f32 1.0, %v13278_v12 }
0x103b   :  { %v3637_v54 = vadd.f32 1.0, %v13280_v34  ;;  %v13282_v26 = vpop.eup %13281 }
0x103c   :  { %13285 = vrcp.f32 %v3631_v51  ;;  %v13284_v30 = vpop.eup %13283  ;;  %v3644_v28 = vadd.f32 1.0, %v13282_v26 }
0x103d   :  { %13287 = vrcp.f32 %v3637_v54 }
0x103e   :  { %13289 = vrcp.f32 %v3644_v28 }
0x1046   :  { %v13286_v35 = vpop.eup %13285 }
0x1047   :  { %v13288_v56 = vpop.eup %13287  ;;  %v3648_v5 = vmul.f32 %v13286_v35, %v13284_v30 }
0x1048   :  { %v3647_v39 = vmul.f32 %v13288_v56, %v15368_v23  ;;  %v13290_v31 = vpop.eup %13289  ;;  %v9458_v23 = vld [vmem:[%s17963_s4 + $0x8] sm:$0xf] }
0x1049   :  { %v15922_v52 = vrot.slane %v9458_v23, %v14200_v46  ;;  %v15925_v60 = vrot.slane %v9458_v23, %v14205_v49  ;;  %v15930_v22 = vrot.slane %v9458_v23, %v14213_v57  ;;  %v15934_v34 = vrot.slane %v9458_v23, %v14220_v11 }
0x104a   :  { %v3649_v18 = vadd.f32 %v3648_v5, %v3647_v39 }
0x104c   :  { %13291 = vtanh.f32 %v3649_v18 }
0x1056   :  { %v13292_v4 = vpop.eup %13291 }
0x1057   :  { %v3651_v19 = vmul.f32 %v13292_v4, %v13290_v31 }
0x1059   :  { %3921 = vmatmul.mubr.f32.gmra.mrb[46].mxu0 %v3651_v19  ;;  %4034 = vmatmul.mubr.f32.gmra.mrb[46].mxu1 %v3651_v19 }
0x105a   :  { %4140 = vmatprep.mubr.f32.mxu0 %v13677_v3  ;;  %4211 = vmatprep.mubr.f32.mxu1 %v13677_v3 }
0x105d   :  { %4141 = vmatmul.mubr.f32.vlgmr.msra.gmra.mrb[32].mxu0 %v13677_v3  ;;  %4212 = vmatmul.mubr.f32.vlgmr.msra.gmra.mrb[32].mxu1 %v13677_v3 }
0x105e   :  { %11093 = vmatpush1.bf16.msra.mxu0 %v15607_v7  ;;  %11125 = vmatpush1.bf16.msra.mxu1 %v15616_v63 }
0x105f   :  { %11095 = vmatprep.subr.bf16.mxu0 %v15630_v36  ;;  %11127 = vmatprep.subr.bf16.mxu1 %v15641_v32 }
0x1060   :  { %4315 = vmatprep.mubr.f32.mxu0 %v13677_v3  ;;  %4386 = vmatprep.mubr.f32.mxu1 %v13677_v3 }
0x1062   :  { %11097 = vmatpush1.bf16.msra.mxu0 %v15643_v43  ;;  %11129 = vmatpush1.bf16.msra.mxu1 %v15652_v40 }
0x1063   :  { %11099 = vmatprep.subr.bf16.mxu0 %v15666_v50  ;;  %11131 = vmatprep.subr.bf16.mxu1 %v15677_v45 }
0x1066   :  { %11101 = vmatpush1.bf16.msra.mxu0 %v15679_v58  ;;  %11133 = vmatpush1.bf16.msra.mxu1 %v15688_v8 }
0x1067   :  { %11103 = vmatprep.subr.bf16.mxu0 %v15702_v47  ;;  %11135 = vmatprep.subr.bf16.mxu1 %v15713_v29 }
0x106a   :  { %11105 = vmatpush1.bf16.msra.mxu0 %v15715_v0  ;;  %11137 = vmatpush1.bf16.msra.mxu1 %v15727_v17 }
0x106b   :  { %11107 = vmatprep.subr.bf16.mxu0 %v15740_v41  ;;  %11139 = vmatprep.subr.bf16.mxu1 %v15742_v44 }
0x106e   :  { %11109 = vmatpush1.bf16.msra.mxu0 %v15754_v13  ;;  %11141 = vmatpush1.bf16.msra.mxu1 %v15767_v20 }
0x106f   :  { %11111 = vmatprep.subr.bf16.mxu0 %v15769_v14  ;;  %11143 = vmatprep.subr.bf16.mxu1 %v15780_v33 }
0x1072   :  { %11113 = vmatpush1.bf16.msra.mxu0 %v15792_v38  ;;  %11145 = vmatpush1.bf16.msra.mxu1 %v15805_v27 }
0x1073   :  { %11115 = vmatprep.subr.bf16.mxu0 %v15807_v53  ;;  %11147 = vmatprep.subr.bf16.mxu1 %v15819_v21 }
0x1076   :  { %11117 = vmatpush1.bf16.msra.mxu0 %v15828_v6  ;;  %11149 = vmatpush1.bf16.msra.mxu1 %v15832_v24 }
0x1077   :  { %11119 = vmatprep.subr.bf16.mxu0 %v15846_v1  ;;  %11151 = vmatprep.subr.bf16.mxu1 %v15857_v15 }
0x107a   :  { %11121 = vmatpush1.bf16.msra.mxu0 %v15859_v59  ;;  %11153 = vmatpush1.bf16.msra.mxu1 %v15868_v42 }
0x107b   :  { %11155 = vmatprep.subr.bf16.mxu0 %v15594_v9  ;;  %11187 = vmatprep.subr.bf16.mxu1 %v15605_v10 }
0x1130   :  { %v4142_v55 = vpop.f32.mrb[32].mxu0  ;;  %v4213_v2 = vpop.f32.mrb[32].mxu1 }
0x1131   :  { %v12778_v16 = vadd.f32 %v4142_v55, %v15922_v52  ;;  %v4144_v61 = vpop.f32.mrb[33].mxu0  ;;  %v4215_v25 = vpop.f32.mrb[33].mxu1  ;;  %v12794_v54 = vadd.f32 %v4213_v2, %v15934_v34 }
0x1132   :  { %v12779_v62 = vadd.f32 %v4144_v61, %v15925_v60  ;;  %v12795_v12 = vadd.f32 %v4215_v25, %v15930_v22 }
0x1133   :  { %v9459_v37 = vmul.f32 -1.442695, %v12778_v16 }
0x1134   :  { %v9460_v48 = vmul.f32 -1.442695, %v12779_v62  ;;  %v9461_v51 = vmul.f32 -1.442695, %v12795_v12 }
0x1135   :  { %13293 = vpow2.f32 %v9459_v37 }
0x1136   :  { %13295 = vpow2.f32 %v9460_v48 }
0x1137   :  { %13297 = vpow2.f32 %v9461_v51 }
0x1138   :  { %13299 = vtanh.f32 %v12794_v54 }
0x113f   :  { %v13294_v26 = vpop.eup %13293 }
0x1140   :  { %v13296_v30 = vpop.eup %13295  ;;  %v4225_v35 = vadd.f32 1.0, %v13294_v26 }
0x1141   :  { %v4231_v56 = vadd.f32 1.0, %v13296_v30  ;;  %v13298_v5 = vpop.eup %13297 }
0x1142   :  { %13301 = vrcp.f32 %v4225_v35  ;;  %v13300_v28 = vpop.eup %13299  ;;  %v4238_v4 = vadd.f32 1.0, %v13298_v5 }
0x1143   :  { %13303 = vrcp.f32 %v4231_v56 }
0x1144   :  { %13305 = vrcp.f32 %v4238_v4 }
0x114c   :  { %v13302_v39 = vpop.eup %13301 }
0x114d   :  { %v13304_v18 = vpop.eup %13303  ;;  %v4242_v31 = vmul.f32 %v13302_v39, %v13300_v28 }
0x114e   :  { %v4241_v19 = vmul.f32 0.0, %v13304_v18  ;;  %v13306_v55 = vpop.eup %13305 }
0x1150   :  { %v15937_v23 = vadd.f32 %v4242_v31, %v4241_v19 }
0x1152   :  { %13307 = vtanh.f32 %v15937_v23 }
0x115c   :  { %v13308_v2 = vpop.eup %13307 }
0x115d   :  { %v15940_v16 = vmul.f32 %v13308_v2, %v13306_v55 }
0x115f   :  { %4316 = vmatmul.mubr.f32.vlgmr.msra.gmra.mrb[34].mxu0 %v15940_v16  ;;  %4387 = vmatmul.mubr.f32.vlgmr.msra.gmra.mrb[34].mxu1 %v15940_v16 }
0x1160   :  { %11157 = vmatpush1.bf16.msra.mxu0 %v15607_v7  ;;  %11189 = vmatpush1.bf16.msra.mxu1 %v15616_v63 }
0x1161   :  { %11159 = vmatprep.subr.bf16.mxu0 %v15630_v36  ;;  %11191 = vmatprep.subr.bf16.mxu1 %v15641_v32 }
0x1162   :  { %4490 = vmatprep.mubr.f32.mxu0 %v13677_v3  ;;  %4561 = vmatprep.mubr.f32.mxu1 %v13677_v3 }
0x1164   :  { %11161 = vmatpush1.bf16.msra.mxu0 %v15643_v43  ;;  %11193 = vmatpush1.bf16.msra.mxu1 %v15652_v40 }
0x1165   :  { %11163 = vmatprep.subr.bf16.mxu0 %v15666_v50  ;;  %11195 = vmatprep.subr.bf16.mxu1 %v15677_v45 }
0x1168   :  { %11165 = vmatpush1.bf16.msra.mxu0 %v15679_v58  ;;  %11197 = vmatpush1.bf16.msra.mxu1 %v15688_v8 }
0x1169   :  { %11167 = vmatprep.subr.bf16.mxu0 %v15702_v47  ;;  %11199 = vmatprep.subr.bf16.mxu1 %v15713_v29 }
0x116c   :  { %11169 = vmatpush1.bf16.msra.mxu0 %v15715_v0  ;;  %11201 = vmatpush1.bf16.msra.mxu1 %v15727_v17 }
0x116d   :  { %11171 = vmatprep.subr.bf16.mxu0 %v15740_v41  ;;  %11203 = vmatprep.subr.bf16.mxu1 %v15742_v44 }
0x1170   :  { %11173 = vmatpush1.bf16.msra.mxu0 %v15754_v13  ;;  %11205 = vmatpush1.bf16.msra.mxu1 %v15767_v20 }
0x1171   :  { %11175 = vmatprep.subr.bf16.mxu0 %v15769_v14  ;;  %11207 = vmatprep.subr.bf16.mxu1 %v15780_v33 }
0x1174   :  { %11177 = vmatpush1.bf16.msra.mxu0 %v15792_v38  ;;  %11209 = vmatpush1.bf16.msra.mxu1 %v15805_v27 }
0x1175   :  { %11179 = vmatprep.subr.bf16.mxu0 %v15807_v53  ;;  %11211 = vmatprep.subr.bf16.mxu1 %v15819_v21 }
0x1178   :  { %11181 = vmatpush1.bf16.msra.mxu0 %v15828_v6  ;;  %11213 = vmatpush1.bf16.msra.mxu1 %v15832_v24 }
0x1179   :  { %11183 = vmatprep.subr.bf16.mxu0 %v15846_v1  ;;  %11215 = vmatprep.subr.bf16.mxu1 %v15857_v15 }
0x117c   :  { %11185 = vmatpush1.bf16.msra.mxu0 %v15859_v59  ;;  %11217 = vmatpush1.bf16.msra.mxu1 %v15868_v42 }
0x117d   :  { %11219 = vmatprep.subr.bf16.mxu0 %v15594_v9  ;;  %11251 = vmatprep.subr.bf16.mxu1 %v15605_v10 }
0x1232   :  { %v4317_v61 = vpop.f32.mrb[34].mxu0  ;;  %v4388_v25 = vpop.f32.mrb[34].mxu1 }
0x1233   :  { %v12780_v62 = vadd.f32 %v4317_v61, %v15922_v52  ;;  %v4319_v37 = vpop.f32.mrb[35].mxu0  ;;  %v4390_v48 = vpop.f32.mrb[35].mxu1  ;;  %v12796_v35 = vadd.f32 %v4388_v25, %v15934_v34 }
0x1234   :  { %v12781_v12 = vadd.f32 %v4319_v37, %v15925_v60  ;;  %v12797_v26 = vadd.f32 %v4390_v48, %v15930_v22 }
0x1235   :  { %v9462_v51 = vmul.f32 -1.442695, %v12780_v62 }
0x1236   :  { %v9463_v54 = vmul.f32 -1.442695, %v12781_v12  ;;  %v9464_v30 = vmul.f32 -1.442695, %v12797_v26 }
0x1237   :  { %13309 = vpow2.f32 %v9462_v51 }
0x1238   :  { %13311 = vpow2.f32 %v9463_v54 }
0x1239   :  { %13313 = vpow2.f32 %v9464_v30 }
0x123a   :  { %13315 = vtanh.f32 %v12796_v35 }
0x1241   :  { %v13310_v56 = vpop.eup %13309 }
0x1242   :  { %v13312_v5 = vpop.eup %13311  ;;  %v4400_v28 = vadd.f32 1.0, %v13310_v56 }
0x1243   :  { %v4406_v39 = vadd.f32 1.0, %v13312_v5  ;;  %v13314_v18 = vpop.eup %13313 }
0x1244   :  { %13317 = vrcp.f32 %v4400_v28  ;;  %v13316_v31 = vpop.eup %13315  ;;  %v4413_v2 = vadd.f32 1.0, %v13314_v18 }
0x1245   :  { %13319 = vrcp.f32 %v4406_v39 }
0x1246   :  { %13321 = vrcp.f32 %v4413_v2 }
0x124e   :  { %v13318_v4 = vpop.eup %13317 }
0x124f   :  { %v13320_v19 = vpop.eup %13319  ;;  %v4417_v55 = vmul.f32 %v13318_v4, %v13316_v31 }
0x1250   :  { %v4416_v61 = vmul.f32 %v13320_v19, %v15937_v23  ;;  %v13322_v25 = vpop.eup %13321 }
0x1252   :  { %v15983_v62 = vadd.f32 %v4417_v55, %v4416_v61 }
0x1254   :  { %13323 = vtanh.f32 %v15983_v62 }
0x125e   :  { %v13324_v37 = vpop.eup %13323 }
0x125f   :  { %v15986_v48 = vmul.f32 %v13324_v37, %v13322_v25 }
0x1261   :  { %4491 = vmatmul.mubr.f32.vlgmr.msra.gmra.mrb[36].mxu0 %v15986_v48  ;;  %4562 = vmatmul.mubr.f32.vlgmr.msra.gmra.mrb[36].mxu1 %v15986_v48 }
0x1262   :  { %11221 = vmatpush1.bf16.msra.mxu0 %v15607_v7  ;;  %11253 = vmatpush1.bf16.msra.mxu1 %v15616_v63 }
0x1263   :  { %11223 = vmatprep.subr.bf16.mxu0 %v15630_v36  ;;  %11255 = vmatprep.subr.bf16.mxu1 %v15641_v32 }
0x1264   :  { %4665 = vmatprep.mubr.f32.mxu0 %v13677_v3  ;;  %4736 = vmatprep.mubr.f32.mxu1 %v13677_v3 }
0x1266   :  { %11225 = vmatpush1.bf16.msra.mxu0 %v15643_v43  ;;  %11257 = vmatpush1.bf16.msra.mxu1 %v15652_v40 }
0x1267   :  { %11227 = vmatprep.subr.bf16.mxu0 %v15666_v50  ;;  %11259 = vmatprep.subr.bf16.mxu1 %v15677_v45 }
0x126a   :  { %11229 = vmatpush1.bf16.msra.mxu0 %v15679_v58  ;;  %11261 = vmatpush1.bf16.msra.mxu1 %v15688_v8 }
0x126b   :  { %11231 = vmatprep.subr.bf16.mxu0 %v15702_v47  ;;  %11263 = vmatprep.subr.bf16.mxu1 %v15713_v29 }
0x126e   :  { %11233 = vmatpush1.bf16.msra.mxu0 %v15715_v0  ;;  %11265 = vmatpush1.bf16.msra.mxu1 %v15727_v17 }
0x126f   :  { %11235 = vmatprep.subr.bf16.mxu0 %v15740_v41  ;;  %11267 = vmatprep.subr.bf16.mxu1 %v15742_v44 }
0x1272   :  { %11237 = vmatpush1.bf16.msra.mxu0 %v15754_v13  ;;  %11269 = vmatpush1.bf16.msra.mxu1 %v15767_v20 }
0x1273   :  { %11239 = vmatprep.subr.bf16.mxu0 %v15769_v14  ;;  %11271 = vmatprep.subr.bf16.mxu1 %v15780_v33 }
0x1276   :  { %11241 = vmatpush1.bf16.msra.mxu0 %v15792_v38  ;;  %11273 = vmatpush1.bf16.msra.mxu1 %v15805_v27 }
0x1277   :  { %11243 = vmatprep.subr.bf16.mxu0 %v15807_v53  ;;  %11275 = vmatprep.subr.bf16.mxu1 %v15819_v21 }
0x127a   :  { %11245 = vmatpush1.bf16.msra.mxu0 %v15828_v6  ;;  %11277 = vmatpush1.bf16.msra.mxu1 %v15832_v24 }
0x127b   :  { %11247 = vmatprep.subr.bf16.mxu0 %v15846_v1  ;;  %11279 = vmatprep.subr.bf16.mxu1 %v15857_v15 }
0x127e   :  { %11249 = vmatpush1.bf16.msra.mxu0 %v15859_v59  ;;  %11281 = vmatpush1.bf16.msra.mxu1 %v15868_v42 }
0x127f   :  { %11283 = vmatprep.subr.bf16.mxu0 %v15594_v9  ;;  %11315 = vmatprep.subr.bf16.mxu1 %v15605_v10 }
0x1334   :  { %v4492_v23 = vpop.f32.mrb[36].mxu0  ;;  %v4563_v12 = vpop.f32.mrb[36].mxu1 }
0x1335   :  { %v12782_v51 = vadd.f32 %v4492_v23, %v15922_v52  ;;  %v4494_v54 = vpop.f32.mrb[37].mxu0  ;;  %v4565_v26 = vpop.f32.mrb[37].mxu1  ;;  %v12798_v39 = vadd.f32 %v4563_v12, %v15934_v34 }
0x1336   :  { %v12783_v30 = vadd.f32 %v4494_v54, %v15925_v60  ;;  %v12799_v5 = vadd.f32 %v4565_v26, %v15930_v22 }
0x1337   :  { %v9465_v35 = vmul.f32 -1.442695, %v12782_v51 }
0x1338   :  { %v9466_v56 = vmul.f32 -1.442695, %v12783_v30  ;;  %v9467_v28 = vmul.f32 -1.442695, %v12799_v5 }
0x1339   :  { %13325 = vpow2.f32 %v9465_v35 }
0x133a   :  { %13327 = vpow2.f32 %v9466_v56 }
0x133b   :  { %13329 = vpow2.f32 %v9467_v28 }
0x133c   :  { %13331 = vtanh.f32 %v12798_v39 }
0x1343   :  { %v13326_v18 = vpop.eup %13325 }
0x1344   :  { %v13328_v31 = vpop.eup %13327  ;;  %v4575_v4 = vadd.f32 1.0, %v13326_v18 }
0x1345   :  { %v4581_v19 = vadd.f32 1.0, %v13328_v31  ;;  %v13330_v55 = vpop.eup %13329 }
0x1346   :  { %13333 = vrcp.f32 %v4575_v4  ;;  %v13332_v2 = vpop.eup %13331  ;;  %v4588_v23 = vadd.f32 1.0, %v13330_v55 }
0x1347   :  { %13335 = vrcp.f32 %v4581_v19 }
0x1348   :  { %13337 = vrcp.f32 %v4588_v23 }
0x1350   :  { %v13334_v61 = vpop.eup %13333 }
0x1351   :  { %v13336_v25 = vpop.eup %13335  ;;  %v4592_v37 = vmul.f32 %v13334_v61, %v13332_v2 }
0x1352   :  { %v4591_v51 = vmul.f32 %v13336_v25, %v15983_v62  ;;  %v13338_v12 = vpop.eup %13337 }
0x1354   :  { %v16029_v54 = vadd.f32 %v4592_v37, %v4591_v51 }
0x1356   :  { %13339 = vtanh.f32 %v16029_v54 }
0x1360   :  { %v13340_v26 = vpop.eup %13339 }
0x1361   :  { %v16032_v30 = vmul.f32 %v13340_v26, %v13338_v12 }
0x1363   :  { %4666 = vmatmul.mubr.f32.vlgmr.msra.gmra.mrb[38].mxu0 %v16032_v30  ;;  %4737 = vmatmul.mubr.f32.vlgmr.msra.gmra.mrb[38].mxu1 %v16032_v30 }
0x1364   :  { %11285 = vmatpush1.bf16.msra.mxu0 %v15607_v7  ;;  %11317 = vmatpush1.bf16.msra.mxu1 %v15616_v63 }
0x1365   :  { %11287 = vmatprep.subr.bf16.mxu0 %v15630_v36  ;;  %11319 = vmatprep.subr.bf16.mxu1 %v15641_v32 }
0x1366   :  { %4840 = vmatprep.mubr.f32.mxu0 %v13677_v3  ;;  %4911 = vmatprep.mubr.f32.mxu1 %v13677_v3 }
0x1368   :  { %11289 = vmatpush1.bf16.msra.mxu0 %v15643_v43  ;;  %11321 = vmatpush1.bf16.msra.mxu1 %v15652_v40 }
0x1369   :  { %11291 = vmatprep.subr.bf16.mxu0 %v15666_v50  ;;  %11323 = vmatprep.subr.bf16.mxu1 %v15677_v45 }
0x136c   :  { %11293 = vmatpush1.bf16.msra.mxu0 %v15679_v58  ;;  %11325 = vmatpush1.bf16.msra.mxu1 %v15688_v8 }
0x136d   :  { %11295 = vmatprep.subr.bf16.mxu0 %v15702_v47  ;;  %11327 = vmatprep.subr.bf16.mxu1 %v15713_v29 }
0x1370   :  { %11297 = vmatpush1.bf16.msra.mxu0 %v15715_v0  ;;  %11329 = vmatpush1.bf16.msra.mxu1 %v15727_v17 }
0x1371   :  { %11299 = vmatprep.subr.bf16.mxu0 %v15740_v41  ;;  %11331 = vmatprep.subr.bf16.mxu1 %v15742_v44 }
0x1374   :  { %11301 = vmatpush1.bf16.msra.mxu0 %v15754_v13  ;;  %11333 = vmatpush1.bf16.msra.mxu1 %v15767_v20 }
0x1375   :  { %11303 = vmatprep.subr.bf16.mxu0 %v15769_v14  ;;  %11335 = vmatprep.subr.bf16.mxu1 %v15780_v33 }
0x1378   :  { %11305 = vmatpush1.bf16.msra.mxu0 %v15792_v38  ;;  %11337 = vmatpush1.bf16.msra.mxu1 %v15805_v27 }
0x1379   :  { %11307 = vmatprep.subr.bf16.mxu0 %v15807_v53  ;;  %11339 = vmatprep.subr.bf16.mxu1 %v15819_v21 }
0x137c   :  { %11309 = vmatpush1.bf16.msra.mxu0 %v15828_v6  ;;  %11341 = vmatpush1.bf16.msra.mxu1 %v15832_v24 }
0x137d   :  { %11311 = vmatprep.subr.bf16.mxu0 %v15846_v1  ;;  %11343 = vmatprep.subr.bf16.mxu1 %v15857_v15 }
0x1380   :  { %11313 = vmatpush1.bf16.msra.mxu0 %v15859_v59  ;;  %11345 = vmatpush1.bf16.msra.mxu1 %v15868_v42 }
0x1381   :  { %11347 = vmatprep.subr.bf16.mxu0 %v15594_v9  ;;  %11379 = vmatprep.subr.bf16.mxu1 %v15605_v10 }
0x1436   :  { %v4667_v62 = vpop.f32.mrb[38].mxu0  ;;  %v4738_v35 = vpop.f32.mrb[38].mxu1 }
0x1437   :  { %v12784_v56 = vadd.f32 %v4667_v62, %v15922_v52  ;;  %v4669_v5 = vpop.f32.mrb[39].mxu0  ;;  %v4740_v28 = vpop.f32.mrb[39].mxu1  ;;  %v12800_v55 = vadd.f32 %v4738_v35, %v15934_v34 }
0x1438   :  { %v12785_v39 = vadd.f32 %v4669_v5, %v15925_v60  ;;  %v12801_v4 = vadd.f32 %v4740_v28, %v15930_v22 }
0x1439   :  { %v9468_v18 = vmul.f32 -1.442695, %v12784_v56 }
0x143a   :  { %v9469_v31 = vmul.f32 -1.442695, %v12785_v39  ;;  %v9470_v19 = vmul.f32 -1.442695, %v12801_v4 }
0x143b   :  { %13341 = vpow2.f32 %v9468_v18 }
0x143c   :  { %13343 = vpow2.f32 %v9469_v31 }
0x143d   :  { %13345 = vpow2.f32 %v9470_v19 }
0x143e   :  { %13347 = vtanh.f32 %v12800_v55 }
0x1445   :  { %v13342_v2 = vpop.eup %13341 }
0x1446   :  { %v13344_v61 = vpop.eup %13343  ;;  %v4750_v25 = vadd.f32 1.0, %v13342_v2 }
0x1447   :  { %v4756_v37 = vadd.f32 1.0, %v13344_v61  ;;  %v13346_v23 = vpop.eup %13345 }
0x1448   :  { %13349 = vrcp.f32 %v4750_v25  ;;  %v13348_v51 = vpop.eup %13347  ;;  %v4763_v56 = vadd.f32 1.0, %v13346_v23 }
0x1449   :  { %13351 = vrcp.f32 %v4756_v37 }
0x144a   :  { %13353 = vrcp.f32 %v4763_v56 }
0x1452   :  { %v13350_v12 = vpop.eup %13349 }
0x1453   :  { %v13352_v26 = vpop.eup %13351  ;;  %v4767_v62 = vmul.f32 %v13350_v12, %v13348_v51 }
0x1454   :  { %v4766_v5 = vmul.f32 %v13352_v26, %v16029_v54  ;;  %v13354_v35 = vpop.eup %13353 }
0x1456   :  { %v16075_v28 = vadd.f32 %v4767_v62, %v4766_v5 }
0x1458   :  { %13355 = vtanh.f32 %v16075_v28 }
0x1462   :  { %v13356_v39 = vpop.eup %13355 }
0x1463   :  { %v16078_v18 = vmul.f32 %v13356_v39, %v13354_v35 }
0x1465   :  { %4841 = vmatmul.mubr.f32.vlgmr.msra.gmra.mrb[40].mxu0 %v16078_v18  ;;  %4912 = vmatmul.mubr.f32.vlgmr.msra.gmra.mrb[40].mxu1 %v16078_v18 }
0x1466   :  { %11349 = vmatpush1.bf16.msra.mxu0 %v15607_v7  ;;  %11381 = vmatpush1.bf16.msra.mxu1 %v15616_v63 }
0x1467   :  { %11351 = vmatprep.subr.bf16.mxu0 %v15630_v36  ;;  %11383 = vmatprep.subr.bf16.mxu1 %v15641_v32 }
0x1468   :  { %5015 = vmatprep.mubr.f32.mxu0 %v13677_v3  ;;  %5086 = vmatprep.mubr.f32.mxu1 %v13677_v3 }
0x146a   :  { %11353 = vmatpush1.bf16.msra.mxu0 %v15643_v43  ;;  %11385 = vmatpush1.bf16.msra.mxu1 %v15652_v40 }
0x146b   :  { %11355 = vmatprep.subr.bf16.mxu0 %v15666_v50  ;;  %11387 = vmatprep.subr.bf16.mxu1 %v15677_v45 }
0x146e   :  { %11357 = vmatpush1.bf16.msra.mxu0 %v15679_v58  ;;  %11389 = vmatpush1.bf16.msra.mxu1 %v15688_v8 }
0x146f   :  { %11359 = vmatprep.subr.bf16.mxu0 %v15702_v47  ;;  %11391 = vmatprep.subr.bf16.mxu1 %v15713_v29 }
0x1472   :  { %11361 = vmatpush1.bf16.msra.mxu0 %v15715_v0  ;;  %11393 = vmatpush1.bf16.msra.mxu1 %v15727_v17 }
0x1473   :  { %11363 = vmatprep.subr.bf16.mxu0 %v15740_v41  ;;  %11395 = vmatprep.subr.bf16.mxu1 %v15742_v44 }
0x1476   :  { %11365 = vmatpush1.bf16.msra.mxu0 %v15754_v13  ;;  %11397 = vmatpush1.bf16.msra.mxu1 %v15767_v20 }
0x1477   :  { %11367 = vmatprep.subr.bf16.mxu0 %v15769_v14  ;;  %11399 = vmatprep.subr.bf16.mxu1 %v15780_v33 }
0x147a   :  { %11369 = vmatpush1.bf16.msra.mxu0 %v15792_v38  ;;  %11401 = vmatpush1.bf16.msra.mxu1 %v15805_v27 }
0x147b   :  { %11371 = vmatprep.subr.bf16.mxu0 %v15807_v53  ;;  %11403 = vmatprep.subr.bf16.mxu1 %v15819_v21 }
0x147e   :  { %11373 = vmatpush1.bf16.msra.mxu0 %v15828_v6  ;;  %11405 = vmatpush1.bf16.msra.mxu1 %v15832_v24 }
0x147f   :  { %11375 = vmatprep.subr.bf16.mxu0 %v15846_v1  ;;  %11407 = vmatprep.subr.bf16.mxu1 %v15857_v15 }
0x1482   :  { %11377 = vmatpush1.bf16.msra.mxu0 %v15859_v59  ;;  %11409 = vmatpush1.bf16.msra.mxu1 %v15868_v42 }
0x1483   :  { %11411 = vmatprep.subr.bf16.mxu0 %v15594_v9  ;;  %11443 = vmatprep.subr.bf16.mxu1 %v15605_v10 }
0x1538   :  { %v4842_v54 = vpop.f32.mrb[40].mxu0  ;;  %v4913_v31 = vpop.f32.mrb[40].mxu1 }
0x1539   :  { %v12786_v4 = vadd.f32 %v4842_v54, %v15922_v52  ;;  %v4844_v19 = vpop.f32.mrb[41].mxu0  ;;  %v4915_v55 = vpop.f32.mrb[41].mxu1  ;;  %v12802_v51 = vadd.f32 %v4913_v31, %v15934_v34 }
0x153a   :  { %v12787_v2 = vadd.f32 %v4844_v19, %v15925_v60  ;;  %v12803_v37 = vadd.f32 %v4915_v55, %v15930_v22 }
0x153b   :  { %v9471_v61 = vmul.f32 -1.442695, %v12786_v4 }
0x153c   :  { %v9472_v25 = vmul.f32 -1.442695, %v12787_v2  ;;  %v9473_v23 = vmul.f32 -1.442695, %v12803_v37 }
0x153d   :  { %13357 = vpow2.f32 %v9471_v61 }
0x153e   :  { %13359 = vpow2.f32 %v9472_v25 }
0x153f   :  { %13361 = vpow2.f32 %v9473_v23 }
0x1540   :  { %13363 = vtanh.f32 %v12802_v51 }
0x1547   :  { %v13358_v12 = vpop.eup %13357 }
0x1548   :  { %v13360_v26 = vpop.eup %13359  ;;  %v4925_v62 = vadd.f32 1.0, %v13358_v12 }
0x1549   :  { %v4931_v56 = vadd.f32 1.0, %v13360_v26  ;;  %v13362_v5 = vpop.eup %13361 }
0x154a   :  { %13365 = vrcp.f32 %v4925_v62  ;;  %v13364_v35 = vpop.eup %13363  ;;  %v4938_v19 = vadd.f32 1.0, %v13362_v5 }
0x154b   :  { %13367 = vrcp.f32 %v4931_v56 }
0x154c   :  { %13369 = vrcp.f32 %v4938_v19 }
0x1554   :  { %v13366_v39 = vpop.eup %13365 }
0x1555   :  { %v13368_v54 = vpop.eup %13367  ;;  %v4942_v4 = vmul.f32 %v13366_v39, %v13364_v35 }
0x1556   :  { %v4941_v2 = vmul.f32 %v13368_v54, %v16075_v28  ;;  %v13370_v31 = vpop.eup %13369 }
0x1558   :  { %v16121_v55 = vadd.f32 %v4942_v4, %v4941_v2 }
0x155a   :  { %13371 = vtanh.f32 %v16121_v55 }
0x1564   :  { %v13372_v61 = vpop.eup %13371 }
0x1565   :  { %v16124_v25 = vmul.f32 %v13372_v61, %v13370_v31 }
0x1567   :  { %5016 = vmatmul.mubr.f32.vlgmr.msra.gmra.mrb[42].mxu0 %v16124_v25  ;;  %5087 = vmatmul.mubr.f32.vlgmr.msra.gmra.mrb[42].mxu1 %v16124_v25 }
0x1568   :  { %11413 = vmatpush1.bf16.msra.mxu0 %v15607_v7  ;;  %11445 = vmatpush1.bf16.msra.mxu1 %v15616_v63 }
0x1569   :  { %11415 = vmatprep.subr.bf16.mxu0 %v15630_v36  ;;  %11447 = vmatprep.subr.bf16.mxu1 %v15641_v32 }
0x156a   :  { %5190 = vmatprep.mubr.f32.mxu0 %v13677_v3  ;;  %5261 = vmatprep.mubr.f32.mxu1 %v13677_v3 }
0x156c   :  { %11417 = vmatpush1.bf16.msra.mxu0 %v15643_v43  ;;  %11449 = vmatpush1.bf16.msra.mxu1 %v15652_v40 }
0x156d   :  { %11419 = vmatprep.subr.bf16.mxu0 %v15666_v50  ;;  %11451 = vmatprep.subr.bf16.mxu1 %v15677_v45 }
0x1570   :  { %11421 = vmatpush1.bf16.msra.mxu0 %v15679_v58  ;;  %11453 = vmatpush1.bf16.msra.mxu1 %v15688_v8 }
0x1571   :  { %11423 = vmatprep.subr.bf16.mxu0 %v15702_v47  ;;  %11455 = vmatprep.subr.bf16.mxu1 %v15713_v29 }
0x1574   :  { %11425 = vmatpush1.bf16.msra.mxu0 %v15715_v0  ;;  %11457 = vmatpush1.bf16.msra.mxu1 %v15727_v17 }
0x1575   :  { %11427 = vmatprep.subr.bf16.mxu0 %v15740_v41  ;;  %11459 = vmatprep.subr.bf16.mxu1 %v15742_v44 }
0x1578   :  { %11429 = vmatpush1.bf16.msra.mxu0 %v15754_v13  ;;  %11461 = vmatpush1.bf16.msra.mxu1 %v15767_v20 }
0x1579   :  { %11431 = vmatprep.subr.bf16.mxu0 %v15769_v14  ;;  %11463 = vmatprep.subr.bf16.mxu1 %v15780_v33 }
0x157c   :  { %11433 = vmatpush1.bf16.msra.mxu0 %v15792_v38  ;;  %11465 = vmatpush1.bf16.msra.mxu1 %v15805_v27 }
0x157d   :  { %11435 = vmatprep.subr.bf16.mxu0 %v15807_v53  ;;  %11467 = vmatprep.subr.bf16.mxu1 %v15819_v21 }
0x1580   :  { %11437 = vmatpush1.bf16.msra.mxu0 %v15828_v6  ;;  %11469 = vmatpush1.bf16.msra.mxu1 %v15832_v24 }
0x1581   :  { %11439 = vmatprep.subr.bf16.mxu0 %v15846_v1  ;;  %11471 = vmatprep.subr.bf16.mxu1 %v15857_v15 }
0x1584   :  { %11441 = vmatpush1.bf16.msra.mxu0 %v15859_v59  ;;  %11473 = vmatpush1.bf16.msra.mxu1 %v15868_v42 }
0x1585   :  { %11475 = vmatprep.subr.bf16.mxu0 %v15594_v9  ;;  %11507 = vmatprep.subr.bf16.mxu1 %v15605_v10 }
0x163a   :  { %v5017_v28 = vpop.f32.mrb[42].mxu0  ;;  %v5088_v37 = vpop.f32.mrb[42].mxu1 }
0x163b   :  { %v12788_v23 = vadd.f32 %v5017_v28, %v15922_v52  ;;  %v5019_v51 = vpop.f32.mrb[43].mxu0  ;;  %v5090_v12 = vpop.f32.mrb[43].mxu1  ;;  %v12804_v39 = vadd.f32 %v5088_v37, %v15934_v34 }
0x163c   :  { %v12789_v26 = vadd.f32 %v5019_v51, %v15925_v60  ;;  %v12805_v5 = vadd.f32 %v5090_v12, %v15930_v22 }
0x163d   :  { %v9474_v62 = vmul.f32 -1.442695, %v12788_v23 }
0x163e   :  { %v9475_v56 = vmul.f32 -1.442695, %v12789_v26  ;;  %v9476_v35 = vmul.f32 -1.442695, %v12805_v5  ;;  %v9489_v5 = vld [vmem:[%s17964_s2 + $0x430] sm:$0xff] }
0x163f   :  { %13373 = vpow2.f32 %v9474_v62 }
0x1640   :  { %13375 = vpow2.f32 %v9475_v56  ;;  %v9485_v56 = vld [vmem:[%s17964_s2 + $0x410] sm:$0xff] }
0x1641   :  { %13377 = vpow2.f32 %v9476_v35  ;;  %v9492_v35 = vld [vmem:[%s17964_s2 + $0x448] sm:$0xff] }
0x1642   :  { %13379 = vtanh.f32 %v12804_v39  ;;  %v9496_v39 = vld [vmem:[%s17964_s2 + $0x468] sm:$0xff] }
0x1649   :  { %v13374_v9 = vpop.eup %13373 }
0x164a   :  { %v13376_v54 = vpop.eup %13375  ;;  %v5100_v10 = vadd.f32 1.0, %v13374_v9  ;;  %v9494_v9 = vld [vmem:[%s17964_s2 + $0x458] sm:$0xff] }
0x164b   :  { %v5106_v4 = vadd.f32 1.0, %v13376_v54  ;;  %v13378_v19 = vpop.eup %13377  ;;  %v9498_v54 = vld [vmem:[%s17964_s2 + $0x478] sm:$0xff] }
0x164c   :  { %13381 = vrcp.f32 %v5100_v10  ;;  %v13380_v2 = vpop.eup %13379  ;;  %v5113_v23 = vadd.f32 1.0, %v13378_v19 }
0x164d   :  { %13383 = vrcp.f32 %v5106_v4 }
0x164e   :  { %13385 = vrcp.f32 %v5113_v23  ;;  %v11542_v23 = vpack.c.bf16 %v9496_v39, %v9492_v35  ;;  %v9517_v39 = vld [vmem:[%s17964_s2 + $0x510] sm:$0xff] }
0x1656   :  { %v13382_v31 = vpop.eup %13381 }
0x1657   :  { %v13384_v61 = vpop.eup %13383  ;;  %v5117_v28 = vmul.f32 %v13382_v31, %v13380_v2  ;;  %v11572_v2 = vpack.c.bf16 %v9489_v5, %v9485_v56  ;;  %v9491_v31 = vld [vmem:[%s17964_s2 + $0x440] sm:$0xff] }
0x1658   :  { %v5116_v51 = vmul.f32 %v13384_v61, %v16121_v55  ;;  %v13386_v37 = vpop.eup %13385  ;;  %v9487_v55 = vld [vmem:[%s17964_s2 + $0x420] sm:$0xff] }
0x1659   :  { %v9495_v61 = vld [vmem:[%s17964_s2 + $0x460] sm:$0xff] }
0x165a   :  { %v16167_v12 = vadd.f32 %v5117_v28, %v5116_v51  ;;  %v11574_v51 = vpack.c.bf16 %v9498_v54, %v9494_v9  ;;  %v9519_v56 = vld [vmem:[%s17964_s2 + $0x520] sm:$0xff]  ;;  %v9521_v9 = vld [vmem:[%s17964_s2 + $0x530] sm:$0xff]  ;;  %v9524_v54 = vld [vmem:[%s17964_s2 + $0x548] sm:$0xff] }
0x165c   :  { %13387 = vtanh.f32 %v16167_v12 }
0x1666   :  { %v13388_v26 = vpop.eup %13387 }
0x1667   :  { %v16170_v62 = vmul.f32 %v13388_v26, %v13386_v37  ;;  %v9497_v37 = vld [vmem:[%s17964_s2 + $0x470] sm:$0xff]  ;;  %v9500_v26 = vld [vmem:[%s17964_s2 + $0x488] sm:$0xff] }
0x1669   :  { %5191 = vmatmul.mubr.f32.vlgmr.msra.gmra.mrb[44].mxu0 %v16170_v62  ;;  %5262 = vmatmul.mubr.f32.vlgmr.msra.gmra.mrb[44].mxu1 %v16170_v62 }
0x166a   :  { %11477 = vmatpush1.bf16.msra.mxu0 %v15607_v7  ;;  %11509 = vmatpush1.bf16.msra.mxu1 %v15616_v63  ;;  %v9484_v7 = vld [vmem:[%s17964_s2 + $0x408] sm:$0xff] }
0x166b   :  { %11479 = vmatprep.subr.bf16.mxu0 %v15630_v36  ;;  %11511 = vmatprep.subr.bf16.mxu1 %v15641_v32  ;;  %v9488_v63 = vld [vmem:[%s17964_s2 + $0x428] sm:$0xff]  ;;  %v9486_v36 = vld [vmem:[%s17964_s2 + $0x418] sm:$0xff] }
0x166c   :  { %5365 = vmatprep.mubr.f32.mxu0 %v13677_v3  ;;  %5436 = vmatprep.mubr.f32.mxu1 %v13677_v3  ;;  %v11538_v32 = vpack.c.bf16 %v9488_v63, %v9484_v7  ;;  %v9504_v7 = vld [vmem:[%s17964_s2 + $0x4a8] sm:$0xff]  ;;  %v9502_v63 = vld [vmem:[%s17964_s2 + $0x498] sm:$0xff] }
0x166e   :  { %11481 = vmatpush1.bf16.msra.mxu0 %v15643_v43  ;;  %11513 = vmatpush1.bf16.msra.mxu1 %v15652_v40  ;;  %v9490_v43 = vld [vmem:[%s17964_s2 + $0x438] sm:$0xff] }
0x166f   :  { %11483 = vmatprep.subr.bf16.mxu0 %v15666_v50  ;;  %11515 = vmatprep.subr.bf16.mxu1 %v15677_v45  ;;  %v11570_v40 = vpack.c.bf16 %v9490_v43, %v9486_v36  ;;  %v9506_v36 = vld [vmem:[%s17964_s2 + $0x4b8] sm:$0xff] }
0x1672   :  { %11485 = vmatpush1.bf16.msra.mxu0 %v15679_v58  ;;  %11517 = vmatpush1.bf16.msra.mxu1 %v15688_v8 }
0x1673   :  { %11487 = vmatprep.subr.bf16.mxu0 %v15702_v47  ;;  %11519 = vmatprep.subr.bf16.mxu1 %v15713_v29 }
0x1676   :  { %11489 = vmatpush1.bf16.msra.mxu0 %v15715_v0  ;;  %11521 = vmatpush1.bf16.msra.mxu1 %v15727_v17 }
0x1677   :  { %11491 = vmatprep.subr.bf16.mxu0 %v15740_v41  ;;  %11523 = vmatprep.subr.bf16.mxu1 %v15742_v44 }
0x167a   :  { %11493 = vmatpush1.bf16.msra.mxu0 %v15754_v13  ;;  %11525 = vmatpush1.bf16.msra.mxu1 %v15767_v20 }
0x167b   :  { %11495 = vmatprep.subr.bf16.mxu0 %v15769_v14  ;;  %11527 = vmatprep.subr.bf16.mxu1 %v15780_v33 }
0x167e   :  { %11497 = vmatpush1.bf16.msra.mxu0 %v15792_v38  ;;  %11529 = vmatpush1.bf16.msra.mxu1 %v15805_v27 }
0x167f   :  { %11499 = vmatprep.subr.bf16.mxu0 %v15807_v53  ;;  %11531 = vmatprep.subr.bf16.mxu1 %v15819_v21 }
0x1682   :  { %11501 = vmatpush1.bf16.msra.mxu0 %v15828_v6  ;;  %11533 = vmatpush1.bf16.msra.mxu1 %v15832_v24 }
0x1683   :  { %11503 = vmatprep.subr.bf16.mxu0 %v15846_v1  ;;  %11535 = vmatprep.subr.bf16.mxu1 %v15857_v15 }
0x1686   :  { %11505 = vmatpush1.bf16.msra.mxu0 %v15859_v59  ;;  %11537 = vmatpush1.bf16.msra.mxu1 %v15868_v42  ;;  %v9483_v42 = vld [vmem:[%s17964_s2 + $0x400] sm:$0xff] }
0x1687   :  { %11539 = vmatprep.subr.bf16.mxu0 %v11538_v32  ;;  %11571 = vmatprep.subr.bf16.mxu1 %v11570_v40  ;;  %v11540_v19 = vpack.c.bf16 %v9487_v55, %v9483_v42  ;;  %v11544_v32 = vpack.c.bf16 %v9495_v61, %v9491_v31  ;;  %v9499_v40 = vld [vmem:[%s17964_s2 + $0x480] sm:$0xff]  ;;  %v11588_v31 = vpack.c.bf16 %v9521_v9, %v9517_v39  ;;  %v9558_v39 = vld [vmem:[%s17961_s3 + $0x658] sm:$0xff] }
0x1688   :  { %v9515_v55 = vld [vmem:[%s17964_s2 + $0x500] sm:$0xff] }
0x1689   :  { %v9523_v61 = vld [vmem:[%s17964_s2 + $0x540] sm:$0xff] }
0x173c   :  { %v5192_v50 = vpop.f32.mrb[44].mxu0  ;;  %v5263_v45 = vpop.f32.mrb[44].mxu1 }
0x173d   :  { %v12790_v58 = vadd.f32 %v5192_v50, %v15922_v52  ;;  %v5194_v8 = vpop.f32.mrb[45].mxu0  ;;  %v5265_v47 = vpop.f32.mrb[45].mxu1  ;;  %v12806_v13 = vadd.f32 %v5263_v45, %v15934_v34  ;;  %v9503_v50 = vld [vmem:[%s17964_s2 + $0x4a0] sm:$0xff]  ;;  %v11546_v45 = vpack.c.bf16 %v9504_v7, %v9500_v26  ;;  %v9529_v26 = vld [vmem:[%s17964_s2 + $0x570] sm:$0xff]  ;;  %v9532_v7 = vld [vmem:[%s17964_s2 + $0x588] sm:$0xff] }
0x173e   :  { %v12791_v29 = vadd.f32 %v5194_v8, %v15925_v60  ;;  %v12807_v41 = vadd.f32 %v5265_v47, %v15930_v22  ;;  %v9501_v8 = vld [vmem:[%s17964_s2 + $0x490] sm:$0xff] }
0x173f   :  { %v9477_v0 = vmul.f32 -1.442695, %v12790_v58  ;;  %v11578_v58 = vpack.c.bf16 %v9506_v36, %v9502_v63  ;;  %v9505_v47 = vld [vmem:[%s17964_s2 + $0x4b0] sm:$0xff]  ;;  %v9536_v63 = vld [vmem:[%s17964_s2 + $0x5a8] sm:$0xff]  ;;  %v9534_v36 = vld [vmem:[%s17964_s2 + $0x598] sm:$0xff] }
0x1740   :  { %v9478_v17 = vmul.f32 -1.442695, %v12791_v29  ;;  %v9479_v44 = vmul.f32 -1.442695, %v12807_v41  ;;  %v9508_v29 = vld [vmem:[%s17964_s2 + $0x4c8] sm:$0xff]  ;;  %v9514_v41 = vld [vmem:[%s17964_s2 + $0x4f8] sm:$0xff] }
0x1741   :  { %13389 = vpow2.f32 %v9477_v0  ;;  %v9512_v0 = vld [vmem:[%s17964_s2 + $0x4e8] sm:$0xff] }
0x1742   :  { %13391 = vpow2.f32 %v9478_v17  ;;  %v9510_v17 = vld [vmem:[%s17964_s2 + $0x4d8] sm:$0xff] }
0x1743   :  { %13393 = vpow2.f32 %v9479_v44  ;;  %v11548_v44 = vpack.c.bf16 %v9503_v50, %v9499_v40  ;;  %v9531_v50 = vld [vmem:[%s17964_s2 + $0x580] sm:$0xff] }
0x1744   :  { %13395 = vtanh.f32 %v12806_v13  ;;  %v11580_v13 = vpack.c.bf16 %v9505_v47, %v9501_v8  ;;  %v9533_v47 = vld [vmem:[%s17964_s2 + $0x590] sm:$0xff] }
0x174b   :  { %v13390_v20 = vpop.eup %13389 }
0x174c   :  { %v13392_v14 = vpop.eup %13391  ;;  %v5275_v33 = vadd.f32 1.0, %v13390_v20  ;;  %v9507_v20 = vld [vmem:[%s17964_s2 + $0x4c0] sm:$0xff] }
0x174d   :  { %v5281_v38 = vadd.f32 1.0, %v13392_v14  ;;  %v13394_v27 = vpop.eup %13393  ;;  %v9511_v14 = vld [vmem:[%s17964_s2 + $0x4e0] sm:$0xff] }
0x174e   :  { %13397 = vrcp.f32 %v5275_v33  ;;  %v13396_v53 = vpop.eup %13395  ;;  %v5288_v1 = vadd.f32 1.0, %v13394_v27  ;;  %v11550_v33 = vpack.c.bf16 %v9512_v0, %v9508_v29  ;;  %v9509_v27 = vld [vmem:[%s17964_s2 + $0x4d0] sm:$0xff]  ;;  %v9540_v0 = vld [vmem:[%s17964_s2 + $0x5c8] sm:$0xff] }
0x174f   :  { %13399 = vrcp.f32 %v5281_v38  ;;  %v11582_v38 = vpack.c.bf16 %v9514_v41, %v9510_v17  ;;  %v9537_v29 = vld [vmem:[%s17964_s2 + $0x5b0] sm:$0xff]  ;;  %v9544_v17 = vld [vmem:[%s17964_s2 + $0x5e8] sm:$0xff]  ;;  %v9542_v41 = vld [vmem:[%s17964_s2 + $0x5d8] sm:$0xff] }
0x1750   :  { %13401 = vrcp.f32 %v5288_v1  ;;  %v9522_v1 = vld [vmem:[%s17964_s2 + $0x538] sm:$0xff] }
0x1758   :  { %v13398_v21 = vpop.eup %13397 }
0x1759   :  { %v13400_v6 = vpop.eup %13399  ;;  %v5292_v24 = vmul.f32 %v13398_v21, %v13396_v53  ;;  %v9513_v53 = vld [vmem:[%s17964_s2 + $0x4f0] sm:$0xff]  ;;  %v9516_v21 = vld [vmem:[%s17964_s2 + $0x508] sm:$0xff] }
0x175a   :  { %v5291_v15 = vmul.f32 %v13400_v6, %v16167_v12  ;;  %v13402_v10 = vpop.eup %13401  ;;  %v9493_v12 = vld [vmem:[%s17964_s2 + $0x450] sm:$0xff]  ;;  %v9520_v6 = vld [vmem:[%s17964_s2 + $0x528] sm:$0xff]  ;;  %v11584_v42 = vpack.c.bf16 %v9513_v53, %v9509_v27  ;;  %v9543_v27 = vld [vmem:[%s17964_s2 + $0x5e0] sm:$0xff] }
0x175b   :  { %v11576_v43 = vpack.c.bf16 %v9497_v37, %v9493_v12  ;;  %v11554_v5 = vpack.c.bf16 %v9520_v6, %v9516_v21  ;;  %v9525_v37 = vld [vmem:[%s17964_s2 + $0x550] sm:$0xff] }
0x175c   :  { %v16223_v59 = vadd.f32 %v5292_v24, %v5291_v15  ;;  %v9518_v24 = vld [vmem:[%s17964_s2 + $0x518] sm:$0xff]  ;;  %v11552_v15 = vpack.c.bf16 %v9511_v14, %v9507_v20  ;;  %v11592_v40 = vpack.c.bf16 %v9529_v26, %v9525_v37  ;;  %v11596_v20 = vpack.c.bf16 %v9537_v29, %v9533_v47  ;;  %v9539_v14 = vld [vmem:[%s17964_s2 + $0x5c0] sm:$0xff]  ;;  %v9541_v53 = vld [vmem:[%s17964_s2 + $0x5d0] sm:$0xff] }
0x175d   :  { %v11586_v35 = vpack.c.bf16 %v9522_v1, %v9518_v24  ;;  %v9545_v21 = vld [vmem:[%s17964_s2 + $0x5f0] sm:$0xff]  ;;  %v11568_v6 = vpack.c.bf16 %v9543_v27, %v9539_v14  ;;  %v9566_v37 = vld [vmem:[%s17961_s3 + $0x698] sm:$0xff]  ;;  %v9584_v27 = vld [vmem:[%s17961_s3 + $0x728] sm:$0xff] }
0x175e   :  { %13403 = vtanh.f32 %v16223_v59  ;;  %v11600_v24 = vpack.c.bf16 %v9545_v21, %v9541_v53  ;;  %v9574_v47 = vld [vmem:[%s17961_s3 + $0x6d8] sm:$0xff]  ;;  %v9577_v14 = vld [vmem:[%s17961_s3 + $0x6f0] sm:$0xff] }
0x175f   :  { %v9582_v53 = vld [vmem:[%s17961_s3 + $0x718] sm:$0xff] }
0x1760   :  { %v9586_v21 = vld [vmem:[%s17961_s3 + $0x738] sm:$0xff] }
0x1768   :  { %v13404_v4 = vpop.eup %13403 }
0x1769   :  { %v16256_v28 = vmul.f32 %v13404_v4, %v13402_v10  ;;  %v9528_v10 = vld [vmem:[%s17964_s2 + $0x568] sm:$0xff]  ;;  %v9526_v4 = vld [vmem:[%s17964_s2 + $0x558] sm:$0xff] }
0x176b   :  { %5366 = vmatmul.mubr.f32.vlgmr.msra.gmra.mrb[46].mxu0 %v16256_v28  ;;  %5437 = vmatmul.mubr.f32.vlgmr.msra.gmra.mrb[46].mxu1 %v16256_v28 }
0x176c   :  { %11541 = vmatpush1.bf16.msra.mxu0 %v11540_v19  ;;  %11573 = vmatpush1.bf16.msra.mxu1 %v11572_v2  ;;  %v9530_v19 = vld [vmem:[%s17964_s2 + $0x578] sm:$0xff]  ;;  %v11556_v2 = vpack.c.bf16 %v9519_v56, %v9515_v55  ;;  %v9553_v55 = vld [vmem:[%s17961_s3 + $0x630] sm:$0xff] }
0x176d   :  { %11543 = vmatprep.subr.bf16.mxu0 %v11542_v23  ;;  %11575 = vmatprep.subr.bf16.mxu1 %v11574_v51  ;;  %v9527_v23 = vld [vmem:[%s17964_s2 + $0x560] sm:$0xff]  ;;  %v11558_v51 = vpack.c.bf16 %v9528_v10, %v9524_v54  ;;  %v11590_v12 = vpack.c.bf16 %v9530_v19, %v9526_v4  ;;  %v9562_v54 = vld [vmem:[%s17961_s3 + $0x678] sm:$0xff] }
0x176e   :  { %5697 = vmatprep.mubr.f32.mxu0 %v13677_v3  ;;  %5810 = vmatprep.mubr.f32.mxu1 %v13677_v3  ;;  %v9555_v10 = vld [vmem:[%s17961_s3 + $0x640] sm:$0xff]  ;;  %v16496_v19 = vpack.c.bf16 %v9562_v54, %v9558_v39  ;;  %v9594_v39 = vld [vmem:[%s17961_s3 + $0x778] sm:$0xff] }
0x176f   :  { %v9559_v4 = vld [vmem:[%s17961_s3 + $0x660] sm:$0xff] }
0x1770   :  { %11545 = vmatpush1.bf16.msra.mxu0 %v11544_v32  ;;  %11577 = vmatpush1.bf16.msra.mxu1 %v11576_v43  ;;  %v9538_v32 = vld [vmem:[%s17964_s2 + $0x5b8] sm:$0xff]  ;;  %v11560_v43 = vpack.c.bf16 %v9527_v23, %v9523_v61  ;;  %v9561_v61 = vld [vmem:[%s17961_s3 + $0x670] sm:$0xff]  ;;  %v9587_v54 = vld [vmem:[%s17961_s3 + $0x740] sm:$0xff] }
0x1771   :  { %11547 = vmatprep.subr.bf16.mxu0 %v11546_v45  ;;  %11579 = vmatprep.subr.bf16.mxu1 %v11578_v58  ;;  %v9535_v45 = vld [vmem:[%s17964_s2 + $0x5a0] sm:$0xff]  ;;  %v11562_v58 = vpack.c.bf16 %v9536_v63, %v9532_v7  ;;  %v11594_v8 = vpack.c.bf16 %v9538_v32, %v9534_v36  ;;  %v9570_v7 = vld [vmem:[%s17961_s3 + $0x6b8] sm:$0xff] }
0x1772   :  { %v9563_v63 = vld [vmem:[%s17961_s3 + $0x680] sm:$0xff]  ;;  %v16532_v32 = vpack.c.bf16 %v9570_v7, %v9566_v37  ;;  %v9600_v37 = vld [vmem:[%s17961_s3 + $0x7a8] sm:$0xff]  ;;  %v9598_v7 = vld [vmem:[%s17961_s3 + $0x798] sm:$0xff] }
0x1773   :  { %v9567_v36 = vld [vmem:[%s17961_s3 + $0x6a0] sm:$0xff] }
0x1774   :  { %11549 = vmatpush1.bf16.msra.mxu0 %v11548_v44  ;;  %11581 = vmatpush1.bf16.msra.mxu1 %v11580_v13  ;;  %v9546_v44 = vld [vmem:[%s17964_s2 + $0x5f8] sm:$0xff]  ;;  %v11564_v13 = vpack.c.bf16 %v9535_v45, %v9531_v50  ;;  %v9569_v50 = vld [vmem:[%s17961_s3 + $0x6b0] sm:$0xff] }
0x1775   :  { %11551 = vmatprep.subr.bf16.mxu0 %v11550_v33  ;;  %11583 = vmatprep.subr.bf16.mxu1 %v11582_v38  ;;  %v11566_v33 = vpack.c.bf16 %v9544_v17, %v9540_v0  ;;  %v11598_v38 = vpack.c.bf16 %v9546_v44, %v9542_v41  ;;  %v9578_v0 = vld [vmem:[%s17961_s3 + $0x6f8] sm:$0xff]  ;;  %v9571_v17 = vld [vmem:[%s17961_s3 + $0x6c0] sm:$0xff] }
0x1776   :  { %v9575_v41 = vld [vmem:[%s17961_s3 + $0x6e0] sm:$0xff]  ;;  %v16568_v44 = vpack.c.bf16 %v9578_v0, %v9574_v47  ;;  %v9597_v47 = vld [vmem:[%s17961_s3 + $0x790] sm:$0xff] }
0x1777   :  { %v9601_v0 = vld [vmem:[%s17961_s3 + $0x7b0] sm:$0xff] }
0x1778   :  { %11553 = vmatpush1.bf16.msra.mxu0 %v11552_v15  ;;  %11585 = vmatpush1.bf16.msra.mxu1 %v11584_v42  ;;  %v9549_v42 = vld [vmem:[%s17961_s3 + $0x610] sm:$0xff] }
0x1779   :  { %11555 = vmatprep.subr.bf16.mxu0 %v11554_v5  ;;  %11587 = vmatprep.subr.bf16.mxu1 %v11586_v35  ;;  %v16471_v56 = vpack.c.bf16 %v9553_v55, %v9549_v42  ;;  %v9556_v5 = vld [vmem:[%s17961_s3 + $0x648] sm:$0xff] }
0x177a   :  { %v9560_v35 = vld [vmem:[%s17961_s3 + $0x668] sm:$0xff] }
0x177b   :  { %v16485_v9 = vpack.c.bf16 %v9560_v35, %v9556_v5  ;;  %v9592_v42 = vld [vmem:[%s17961_s3 + $0x768] sm:$0xff]  ;;  %v9590_v35 = vld [vmem:[%s17961_s3 + $0x758] sm:$0xff] }
0x177c   :  { %11557 = vmatpush1.bf16.msra.mxu0 %v11556_v2  ;;  %11589 = vmatpush1.bf16.msra.mxu1 %v11588_v31  ;;  %v16498_v2 = vpack.c.bf16 %v9559_v4, %v9555_v10  ;;  %v9557_v31 = vld [vmem:[%s17961_s3 + $0x650] sm:$0xff]  ;;  %v16635_v10 = vpack.c.bf16 %v9594_v39, %v9590_v35  ;;  %v9591_v4 = vld [vmem:[%s17961_s3 + $0x760] sm:$0xff] }
0x177d   :  { %11559 = vmatprep.subr.bf16.mxu0 %v11558_v51  ;;  %11591 = vmatprep.subr.bf16.mxu1 %v11590_v12  ;;  %v16507_v23 = vpack.c.bf16 %v9561_v61, %v9557_v31  ;;  %v9564_v51 = vld [vmem:[%s17961_s3 + $0x688] sm:$0xff]  ;;  %v9589_v31 = vld [vmem:[%s17961_s3 + $0x750] sm:$0xff] }
0x177e   :  { %v9568_v12 = vld [vmem:[%s17961_s3 + $0x6a8] sm:$0xff]  ;;  %v9593_v61 = vld [vmem:[%s17961_s3 + $0x770] sm:$0xff] }
0x177f   :  { %v16521_v26 = vpack.c.bf16 %v9568_v12, %v9564_v51  ;;  %v16647_v51 = vpack.c.bf16 %v9591_v4, %v9587_v54  ;;  %v9596_v12 = vld [vmem:[%s17961_s3 + $0x788] sm:$0xff] }
0x1780   :  { %11561 = vmatpush1.bf16.msra.mxu0 %v11560_v43  ;;  %11593 = vmatpush1.bf16.msra.mxu1 %v11592_v40  ;;  %v16534_v43 = vpack.c.bf16 %v9567_v36, %v9563_v63  ;;  %v9565_v40 = vld [vmem:[%s17961_s3 + $0x690] sm:$0xff]  ;;  %v16660_v63 = vpack.c.bf16 %v9593_v61, %v9589_v31  ;;  %v16662_v36 = vpack.c.bf16 %v9600_v37, %v9596_v12 }
0x1781   :  { %11563 = vmatprep.subr.bf16.mxu0 %v11562_v58  ;;  %11595 = vmatprep.subr.bf16.mxu1 %v11594_v8  ;;  %v16543_v45 = vpack.c.bf16 %v9569_v50, %v9565_v40  ;;  %v9572_v58 = vld [vmem:[%s17961_s3 + $0x6c8] sm:$0xff]  ;;  %v9602_v40 = vld [vmem:[%s17961_s3 + $0x7b8] sm:$0xff]  ;;  %v9595_v50 = vld [vmem:[%s17961_s3 + $0x780] sm:$0xff] }
0x1782   :  { %v9576_v8 = vld [vmem:[%s17961_s3 + $0x6e8] sm:$0xff] }
0x1783   :  { %v16557_v29 = vpack.c.bf16 %v9576_v8, %v9572_v58  ;;  %v9599_v58 = vld [vmem:[%s17961_s3 + $0x7a0] sm:$0xff]  ;;  %v16674_v8 = vpack.c.bf16 %v9602_v40, %v9598_v7 }
0x1784   :  { %11565 = vmatpush1.bf16.msra.mxu0 %v11564_v13  ;;  %11597 = vmatpush1.bf16.msra.mxu1 %v11596_v20  ;;  %v16570_v13 = vpack.c.bf16 %v9575_v41, %v9571_v17  ;;  %v9573_v20 = vld [vmem:[%s17961_s3 + $0x6d0] sm:$0xff]  ;;  %v16683_v17 = vpack.c.bf16 %v9599_v58, %v9595_v50  ;;  %v16687_v41 = vpack.c.bf16 %v9601_v0, %v9597_v47 }
0x1785   :  { %11567 = vmatprep.subr.bf16.mxu0 %v11566_v33  ;;  %11599 = vmatprep.subr.bf16.mxu1 %v11598_v38  ;;  %v9580_v33 = vld [vmem:[%s17961_s3 + $0x708] sm:$0xff]  ;;  %v16582_v38 = vpack.c.bf16 %v9577_v14, %v9573_v20 }
0x1786   :  { %v9604_v20 = vld [vmem:[%s17961_s3 + $0x7c8] sm:$0xff] }
0x1787   :  { %v9608_v14 = vld [vmem:[%s17961_s3 + $0x7e8] sm:$0xff] }
0x1788   :  { %11569 = vmatpush1.bf16.msra.mxu0 %v11568_v6  ;;  %11601 = vmatpush1.bf16.msra.mxu1 %v11600_v24  ;;  %v16595_v6 = vpack.c.bf16 %v9584_v27, %v9580_v33  ;;  %v16597_v24 = vpack.c.bf16 %v9586_v21, %v9582_v53  ;;  %v9606_v33 = vld [vmem:[%s17961_s3 + $0x7d8] sm:$0xff]  ;;  %v16701_v27 = vpack.c.bf16 %v9608_v14, %v9604_v20  ;;  %v9603_v21 = vld [vmem:[%s17961_s3 + $0x7c0] sm:$0xff] }
0x1789   :  { %v9610_v53 = vld [vmem:[%s17961_s3 + $0x7f8] sm:$0xff] }
0x178b   :  { %5698 = vmatmul.mubr.f32.vlgmr.msra.gmra.mrb[48].mxu0 %v15940_v16  ;;  %5811 = vmatmul.mubr.f32.vlgmr.msra.gmra.mrb[48].mxu1 %v15940_v16  ;;  %v9548_v16 = vld [vmem:[%s17961_s3 + $0x608] sm:$0xff] }
0x178c   :  { %5703 = vmatprep.mubr.f32.mxu0 %v13677_v3  ;;  %5816 = vmatprep.mubr.f32.mxu1 %v13677_v3 }
0x178f   :  { %5704 = vmatmul.mubr.f32.gmra.mrb[50].mxu0 %v15986_v48  ;;  %5817 = vmatmul.mubr.f32.gmra.mrb[50].mxu1 %v15986_v48  ;;  %v9552_v48 = vld [vmem:[%s17961_s3 + $0x628] sm:$0xff] }
0x1790   :  { %5709 = vmatprep.mubr.f32.mxu0 %v13677_v3  ;;  %5822 = vmatprep.mubr.f32.mxu1 %v13677_v3 }
0x1793   :  { %5710 = vmatmul.mubr.f32.gmra.mrb[52].mxu0 %v16032_v30  ;;  %5823 = vmatmul.mubr.f32.gmra.mrb[52].mxu1 %v16032_v30  ;;  %v9550_v30 = vld [vmem:[%s17961_s3 + $0x618] sm:$0xff] }
0x1794   :  { %5715 = vmatprep.mubr.f32.mxu0 %v13677_v3  ;;  %5828 = vmatprep.mubr.f32.mxu1 %v13677_v3 }
0x1797   :  { %5716 = vmatmul.mubr.f32.gmra.mrb[54].mxu0 %v16078_v18  ;;  %5829 = vmatmul.mubr.f32.gmra.mrb[54].mxu1 %v16078_v18  ;;  %v16449_v18 = vpack.c.bf16 %v9552_v48, %v9548_v16  ;;  %v9579_v16 = vld [vmem:[%s17961_s3 + $0x700] sm:$0xff] }
0x1798   :  { %5721 = vmatprep.mubr.f32.mxu0 %v13677_v3  ;;  %5834 = vmatprep.mubr.f32.mxu1 %v13677_v3  ;;  %v9583_v48 = vld [vmem:[%s17961_s3 + $0x720] sm:$0xff] }
0x1799   :  { %11603 = vmatprep.subr.bf16.mxu0 %v16449_v18 }
0x179b   :  { %5722 = vmatmul.mubr.f32.gmra.mrb[56].mxu0 %v16124_v25  ;;  %5835 = vmatmul.mubr.f32.gmra.mrb[56].mxu1 %v16124_v25  ;;  %v9554_v25 = vld [vmem:[%s17961_s3 + $0x638] sm:$0xff] }
0x179c   :  { %5727 = vmatprep.mubr.f32.mxu0 %v13677_v3  ;;  %5840 = vmatprep.mubr.f32.mxu1 %v13677_v3  ;;  %v16460_v1 = vpack.c.bf16 %v9554_v25, %v9550_v30  ;;  %v9581_v30 = vld [vmem:[%s17961_s3 + $0x710] sm:$0xff]  ;;  %v16609_v25 = vpack.c.bf16 %v9583_v48, %v9579_v16  ;;  %v9607_v16 = vld [vmem:[%s17961_s3 + $0x7e0] sm:$0xff]  ;;  %v16712_v48 = vpack.c.bf16 %v9610_v53, %v9606_v33 }
0x179e   :  { %11635 = vmatprep.subr.bf16.mxu1 %v16460_v1 }
0x179f   :  { %5728 = vmatmul.mubr.f32.gmra.mrb[58].mxu0 %v16170_v62  ;;  %5841 = vmatmul.mubr.f32.gmra.mrb[58].mxu1 %v16170_v62  ;;  %v9547_v62 = vld [vmem:[%s17961_s3 + $0x600] sm:$0xff] }
0x17a0   :  { %5733 = vmatprep.mubr.f32.mxu0 %v13677_v3  ;;  %5846 = vmatprep.mubr.f32.mxu1 %v13677_v3 }
0x17a1   :  { %11637 = vmatpush1.bf16.msra.mxu1 %v16471_v56 }
0x17a2   :  { %11639 = vmatprep.subr.bf16.mxu1 %v16496_v19 }
0x17a3   :  { %5734 = vmatmul.mubr.f32.gmra.mrb[60].mxu0 %v16256_v28  ;;  %5847 = vmatmul.mubr.f32.gmra.mrb[60].mxu1 %v16256_v28  ;;  %v9551_v28 = vld [vmem:[%s17961_s3 + $0x620] sm:$0xff] }
0x17a4   :  { %5739 = vmatprep.mubr.f32.mxu0 %v13677_v3  ;;  %5852 = vmatprep.mubr.f32.mxu1 %v13677_v3  ;;  %v16462_v15 = vpack.c.bf16 %v9551_v28, %v9547_v62  ;;  %v9585_v62 = vld [vmem:[%s17961_s3 + $0x730] sm:$0xff]  ;;  %v9588_v28 = vld [vmem:[%s17961_s3 + $0x748] sm:$0xff] }
0x17a5   :  { %11641 = vmatpush1.bf16.msra.mxu1 %v16507_v23  ;;  %v16622_v55 = vpack.c.bf16 %v9585_v62, %v9581_v30  ;;  %v16624_v5 = vpack.c.bf16 %v9592_v42, %v9588_v28  ;;  %v16714_v30 = vpack.c.bf16 %v9607_v16, %v9603_v21  ;;  %v9605_v62 = vld [vmem:[%s17961_s3 + $0x7d0] sm:$0xff] }
0x17a6   :  { %11605 = vmatpush1.bf16.msra.mxu0 %v16462_v15  ;;  %11643 = vmatprep.subr.bf16.mxu1 %v16532_v32  ;;  %v9609_v28 = vld [vmem:[%s17961_s3 + $0x7f0] sm:$0xff] }
0x17a7   :  { %11607 = vmatprep.subr.bf16.mxu0 %v16485_v9  ;;  %v16723_v42 = vpack.c.bf16 %v9609_v28, %v9605_v62 }
0x17a9   :  { %11645 = vmatpush1.bf16.msra.mxu1 %v16543_v45 }
0x17aa   :  { %11609 = vmatpush1.bf16.msra.mxu0 %v16498_v2  ;;  %11647 = vmatprep.subr.bf16.mxu1 %v16568_v44 }
0x17ab   :  { %11611 = vmatprep.subr.bf16.mxu0 %v16521_v26 }
0x17ad   :  { %11649 = vmatpush1.bf16.msra.mxu1 %v16582_v38 }
0x17ae   :  { %11613 = vmatpush1.bf16.msra.mxu0 %v16534_v43  ;;  %11651 = vmatprep.subr.bf16.mxu1 %v16597_v24 }
0x17af   :  { %11615 = vmatprep.subr.bf16.mxu0 %v16557_v29 }
0x17b1   :  { %11653 = vmatpush1.bf16.msra.mxu1 %v16622_v55 }
0x17b2   :  { %11617 = vmatpush1.bf16.msra.mxu0 %v16570_v13  ;;  %11655 = vmatprep.subr.bf16.mxu1 %v16635_v10 }
0x17b3   :  { %11619 = vmatprep.subr.bf16.mxu0 %v16595_v6 }
0x17b5   :  { %11657 = vmatpush1.bf16.msra.mxu1 %v16660_v63 }
0x17b6   :  { %11621 = vmatpush1.bf16.msra.mxu0 %v16609_v25  ;;  %11659 = vmatprep.subr.bf16.mxu1 %v16674_v8 }
0x17b7   :  { %11623 = vmatprep.subr.bf16.mxu0 %v16624_v5 }
0x17b9   :  { %11661 = vmatpush1.bf16.msra.mxu1 %v16687_v41 }
0x17ba   :  { %11625 = vmatpush1.bf16.msra.mxu0 %v16647_v51  ;;  %11663 = vmatprep.subr.bf16.mxu1 %v16712_v48 }
0x17bb   :  { %11627 = vmatprep.subr.bf16.mxu0 %v16662_v36 }
0x17bd   :  { %11665 = vmatpush1.bf16.msra.mxu1 %v16723_v42 }
0x17be   :  { %11629 = vmatpush1.bf16.msra.mxu0 %v16683_v17  ;;  %11699 = vmatprep.subr.bf16.mxu1 %v16460_v1 }
0x17bf   :  { %11631 = vmatprep.subr.bf16.mxu0 %v16701_v27 }
0x17c2   :  { %11633 = vmatpush1.bf16.msra.mxu0 %v16714_v30 }
0x17c3   :  { %11667 = vmatprep.subr.bf16.mxu0 %v16449_v18 }
0x183e   :  { %v5367_v35 = vpop.f32.mrb[46].mxu0  ;;  %v5438_v39 = vpop.f32.mrb[46].mxu1 }
0x183f   :  { %v12792_v54 = vadd.f32 %v5367_v35, %v15922_v52  ;;  %v5369_v4 = vpop.f32.mrb[47].mxu0  ;;  %v5440_v31 = vpop.f32.mrb[47].mxu1  ;;  %v12808_v50 = vadd.f32 %v5438_v39, %v15934_v34 }
0x1840   :  { %v12793_v61 = vadd.f32 %v5369_v4, %v15925_v60  ;;  %v12809_v7 = vadd.f32 %v5440_v31, %v15930_v22 }
0x1841   :  { %v9480_v12 = vmul.f32 -1.442695, %v12792_v54 }
0x1842   :  { %v9481_v37 = vmul.f32 -1.442695, %v12793_v61  ;;  %v9482_v40 = vmul.f32 -1.442695, %v12809_v7 }
0x1843   :  { %13405 = vpow2.f32 %v9480_v12 }
0x1844   :  { %13407 = vpow2.f32 %v9481_v37 }
0x1845   :  { %13409 = vpow2.f32 %v9482_v40 }
0x1846   :  { %13411 = vtanh.f32 %v12808_v50 }
0x184d   :  { %v13406_v58 = vpop.eup %13405 }
0x184e   :  { %v13408_v47 = vpop.eup %13407  ;;  %v5450_v0 = vadd.f32 1.0, %v13406_v58 }
0x184f   :  { %v5456_v20 = vadd.f32 1.0, %v13408_v47  ;;  %v13410_v52 = vpop.eup %13409 }
0x1850   :  { %13413 = vrcp.f32 %v5450_v0  ;;  %v13412_v14 = vpop.eup %13411  ;;  %v5463_v21 = vadd.f32 1.0, %v13410_v52 }
0x1851   :  { %13415 = vrcp.f32 %v5456_v20 }
0x1852   :  { %13417 = vrcp.f32 %v5463_v21 }
0x185a   :  { %v13414_v60 = vpop.eup %13413 }
0x185b   :  { %v13416_v33 = vpop.eup %13415  ;;  %v5467_v53 = vmul.f32 %v13414_v60, %v13412_v14 }
0x185c   :  { %v5466_v16 = vmul.f32 %v13416_v33, %v16223_v59  ;;  %v13418_v34 = vpop.eup %13417  ;;  %v9611_v59 = vld [vmem:[%s17963_s4 + $0xc] sm:$0xf] }
0x185d   :  { %v16777_v35 = vrot.slane %v9611_v59, %v14200_v46  ;;  %v16780_v39 = vrot.slane %v9611_v59, %v14205_v49  ;;  %v16785_v50 = vrot.slane %v9611_v59, %v14213_v57  ;;  %v16789_v47 = vrot.slane %v9611_v59, %v14220_v11 }
0x185e   :  { %v5468_v22 = vadd.f32 %v5467_v53, %v5466_v16 }
0x1860   :  { %13419 = vtanh.f32 %v5468_v22 }
0x186a   :  { %v13420_v62 = vpop.eup %13419 }
0x186b   :  { %v5470_v28 = vmul.f32 %v13420_v62, %v13418_v34 }
0x186d   :  { %5740 = vmatmul.mubr.f32.gmra.mrb[62].mxu0 %v5470_v28  ;;  %5853 = vmatmul.mubr.f32.gmra.mrb[62].mxu1 %v5470_v28 }
0x186e   :  { %5959 = vmatprep.mubr.f32.mxu0 %v13677_v3  ;;  %6030 = vmatprep.mubr.f32.mxu1 %v13677_v3 }
0x1871   :  { %5960 = vmatmul.mubr.f32.vlgmr.msra.gmra.mrb[48].mxu0 %v13677_v3  ;;  %6031 = vmatmul.mubr.f32.vlgmr.msra.gmra.mrb[48].mxu1 %v13677_v3 }
0x1872   :  { %11669 = vmatpush1.bf16.msra.mxu0 %v16462_v15  ;;  %11701 = vmatpush1.bf16.msra.mxu1 %v16471_v56 }
0x1873   :  { %11671 = vmatprep.subr.bf16.mxu0 %v16485_v9  ;;  %11703 = vmatprep.subr.bf16.mxu1 %v16496_v19 }
0x1874   :  { %6134 = vmatprep.mubr.f32.mxu0 %v13677_v3  ;;  %6205 = vmatprep.mubr.f32.mxu1 %v13677_v3 }
0x1876   :  { %11673 = vmatpush1.bf16.msra.mxu0 %v16498_v2  ;;  %11705 = vmatpush1.bf16.msra.mxu1 %v16507_v23 }
0x1877   :  { %11675 = vmatprep.subr.bf16.mxu0 %v16521_v26  ;;  %11707 = vmatprep.subr.bf16.mxu1 %v16532_v32 }
0x187a   :  { %11677 = vmatpush1.bf16.msra.mxu0 %v16534_v43  ;;  %11709 = vmatpush1.bf16.msra.mxu1 %v16543_v45 }
0x187b   :  { %11679 = vmatprep.subr.bf16.mxu0 %v16557_v29  ;;  %11711 = vmatprep.subr.bf16.mxu1 %v16568_v44 }
0x187e   :  { %11681 = vmatpush1.bf16.msra.mxu0 %v16570_v13  ;;  %11713 = vmatpush1.bf16.msra.mxu1 %v16582_v38 }
0x187f   :  { %11683 = vmatprep.subr.bf16.mxu0 %v16595_v6  ;;  %11715 = vmatprep.subr.bf16.mxu1 %v16597_v24 }
0x1882   :  { %11685 = vmatpush1.bf16.msra.mxu0 %v16609_v25  ;;  %11717 = vmatpush1.bf16.msra.mxu1 %v16622_v55 }
0x1883   :  { %11687 = vmatprep.subr.bf16.mxu0 %v16624_v5  ;;  %11719 = vmatprep.subr.bf16.mxu1 %v16635_v10 }
0x1886   :  { %11689 = vmatpush1.bf16.msra.mxu0 %v16647_v51  ;;  %11721 = vmatpush1.bf16.msra.mxu1 %v16660_v63 }
0x1887   :  { %11691 = vmatprep.subr.bf16.mxu0 %v16662_v36  ;;  %11723 = vmatprep.subr.bf16.mxu1 %v16674_v8 }
0x188a   :  { %11693 = vmatpush1.bf16.msra.mxu0 %v16683_v17  ;;  %11725 = vmatpush1.bf16.msra.mxu1 %v16687_v41 }
0x188b   :  { %11695 = vmatprep.subr.bf16.mxu0 %v16701_v27  ;;  %11727 = vmatprep.subr.bf16.mxu1 %v16712_v48 }
0x188e   :  { %11697 = vmatpush1.bf16.msra.mxu0 %v16714_v30  ;;  %11729 = vmatpush1.bf16.msra.mxu1 %v16723_v42 }
0x188f   :  { %11731 = vmatprep.subr.bf16.mxu0 %v16449_v18  ;;  %11763 = vmatprep.subr.bf16.mxu1 %v16460_v1 }
0x1944   :  { %v5961_v54 = vpop.f32.mrb[48].mxu0  ;;  %v6032_v4 = vpop.f32.mrb[48].mxu1 }
0x1945   :  { %v12810_v31 = vadd.f32 %v5961_v54, %v16777_v35  ;;  %v5963_v61 = vpop.f32.mrb[49].mxu0  ;;  %v6034_v12 = vpop.f32.mrb[49].mxu1  ;;  %v12826_v20 = vadd.f32 %v6032_v4, %v16789_v47 }
0x1946   :  { %v12811_v37 = vadd.f32 %v5963_v61, %v16780_v39  ;;  %v12827_v58 = vadd.f32 %v6034_v12, %v16785_v50 }
0x1947   :  { %v9612_v7 = vmul.f32 -1.442695, %v12810_v31 }
0x1948   :  { %v9613_v40 = vmul.f32 -1.442695, %v12811_v37  ;;  %v9614_v0 = vmul.f32 -1.442695, %v12827_v58 }
0x1949   :  { %13421 = vpow2.f32 %v9612_v7 }
0x194a   :  { %13423 = vpow2.f32 %v9613_v40 }
0x194b   :  { %13425 = vpow2.f32 %v9614_v0 }
0x194c   :  { %13427 = vtanh.f32 %v12826_v20 }
0x1953   :  { %v13422_v52 = vpop.eup %13421 }
0x1954   :  { %v13424_v14 = vpop.eup %13423  ;;  %v6044_v60 = vadd.f32 1.0, %v13422_v52 }
0x1955   :  { %v6050_v33 = vadd.f32 1.0, %v13424_v14  ;;  %v13426_v53 = vpop.eup %13425 }
0x1956   :  { %13429 = vrcp.f32 %v6044_v60  ;;  %v13428_v21 = vpop.eup %13427  ;;  %v6057_v62 = vadd.f32 1.0, %v13426_v53 }
0x1957   :  { %13431 = vrcp.f32 %v6050_v33 }
0x1958   :  { %13433 = vrcp.f32 %v6057_v62 }
0x1960   :  { %v13430_v16 = vpop.eup %13429 }
0x1961   :  { %v13432_v22 = vpop.eup %13431  ;;  %v6061_v34 = vmul.f32 %v13430_v16, %v13428_v21 }
0x1962   :  { %v6060_v28 = vmul.f32 0.0, %v13432_v22  ;;  %v13434_v54 = vpop.eup %13433 }
0x1964   :  { %v16792_v59 = vadd.f32 %v6061_v34, %v6060_v28 }
0x1966   :  { %13435 = vtanh.f32 %v16792_v59 }
0x1970   :  { %v13436_v4 = vpop.eup %13435 }
0x1971   :  { %v16795_v31 = vmul.f32 %v13436_v4, %v13434_v54 }
0x1973   :  { %6135 = vmatmul.mubr.f32.vlgmr.msra.gmra.mrb[50].mxu0 %v16795_v31  ;;  %6206 = vmatmul.mubr.f32.vlgmr.msra.gmra.mrb[50].mxu1 %v16795_v31 }
0x1974   :  { %11733 = vmatpush1.bf16.msra.mxu0 %v16462_v15  ;;  %11765 = vmatpush1.bf16.msra.mxu1 %v16471_v56 }
0x1975   :  { %11735 = vmatprep.subr.bf16.mxu0 %v16485_v9  ;;  %11767 = vmatprep.subr.bf16.mxu1 %v16496_v19 }
0x1976   :  { %6309 = vmatprep.mubr.f32.mxu0 %v13677_v3  ;;  %6380 = vmatprep.mubr.f32.mxu1 %v13677_v3 }
0x1978   :  { %11737 = vmatpush1.bf16.msra.mxu0 %v16498_v2  ;;  %11769 = vmatpush1.bf16.msra.mxu1 %v16507_v23 }
0x1979   :  { %11739 = vmatprep.subr.bf16.mxu0 %v16521_v26  ;;  %11771 = vmatprep.subr.bf16.mxu1 %v16532_v32 }
0x197c   :  { %11741 = vmatpush1.bf16.msra.mxu0 %v16534_v43  ;;  %11773 = vmatpush1.bf16.msra.mxu1 %v16543_v45 }
0x197d   :  { %11743 = vmatprep.subr.bf16.mxu0 %v16557_v29  ;;  %11775 = vmatprep.subr.bf16.mxu1 %v16568_v44 }
0x1980   :  { %11745 = vmatpush1.bf16.msra.mxu0 %v16570_v13  ;;  %11777 = vmatpush1.bf16.msra.mxu1 %v16582_v38 }
0x1981   :  { %11747 = vmatprep.subr.bf16.mxu0 %v16595_v6  ;;  %11779 = vmatprep.subr.bf16.mxu1 %v16597_v24 }
0x1984   :  { %11749 = vmatpush1.bf16.msra.mxu0 %v16609_v25  ;;  %11781 = vmatpush1.bf16.msra.mxu1 %v16622_v55 }
0x1985   :  { %11751 = vmatprep.subr.bf16.mxu0 %v16624_v5  ;;  %11783 = vmatprep.subr.bf16.mxu1 %v16635_v10 }
0x1988   :  { %11753 = vmatpush1.bf16.msra.mxu0 %v16647_v51  ;;  %11785 = vmatpush1.bf16.msra.mxu1 %v16660_v63 }
0x1989   :  { %11755 = vmatprep.subr.bf16.mxu0 %v16662_v36  ;;  %11787 = vmatprep.subr.bf16.mxu1 %v16674_v8 }
0x198c   :  { %11757 = vmatpush1.bf16.msra.mxu0 %v16683_v17  ;;  %11789 = vmatpush1.bf16.msra.mxu1 %v16687_v41 }
0x198d   :  { %11759 = vmatprep.subr.bf16.mxu0 %v16701_v27  ;;  %11791 = vmatprep.subr.bf16.mxu1 %v16712_v48 }
0x1990   :  { %11761 = vmatpush1.bf16.msra.mxu0 %v16714_v30  ;;  %11793 = vmatpush1.bf16.msra.mxu1 %v16723_v42 }
0x1991   :  { %11795 = vmatprep.subr.bf16.mxu0 %v16449_v18  ;;  %11827 = vmatprep.subr.bf16.mxu1 %v16460_v1 }
0x1a46   :  { %v6136_v61 = vpop.f32.mrb[50].mxu0  ;;  %v6207_v12 = vpop.f32.mrb[50].mxu1 }
0x1a47   :  { %v12812_v37 = vadd.f32 %v6136_v61, %v16777_v35  ;;  %v6138_v7 = vpop.f32.mrb[51].mxu0  ;;  %v6209_v40 = vpop.f32.mrb[51].mxu1  ;;  %v12828_v60 = vadd.f32 %v6207_v12, %v16789_v47 }
0x1a48   :  { %v12813_v58 = vadd.f32 %v6138_v7, %v16780_v39  ;;  %v12829_v52 = vadd.f32 %v6209_v40, %v16785_v50 }
0x1a49   :  { %v9615_v0 = vmul.f32 -1.442695, %v12812_v37 }
0x1a4a   :  { %v9616_v20 = vmul.f32 -1.442695, %v12813_v58  ;;  %v9617_v14 = vmul.f32 -1.442695, %v12829_v52 }
0x1a4b   :  { %13437 = vpow2.f32 %v9615_v0 }
0x1a4c   :  { %13439 = vpow2.f32 %v9616_v20 }
0x1a4d   :  { %13441 = vpow2.f32 %v9617_v14 }
0x1a4e   :  { %13443 = vtanh.f32 %v12828_v60 }
0x1a55   :  { %v13438_v33 = vpop.eup %13437 }
0x1a56   :  { %v13440_v53 = vpop.eup %13439  ;;  %v6219_v21 = vadd.f32 1.0, %v13438_v33 }
0x1a57   :  { %v6225_v16 = vadd.f32 1.0, %v13440_v53  ;;  %v13442_v22 = vpop.eup %13441 }
0x1a58   :  { %13445 = vrcp.f32 %v6219_v21  ;;  %v13444_v34 = vpop.eup %13443  ;;  %v6232_v4 = vadd.f32 1.0, %v13442_v22 }
0x1a59   :  { %13447 = vrcp.f32 %v6225_v16 }
0x1a5a   :  { %13449 = vrcp.f32 %v6232_v4 }
0x1a62   :  { %v13446_v62 = vpop.eup %13445 }
0x1a63   :  { %v13448_v28 = vpop.eup %13447  ;;  %v6236_v54 = vmul.f32 %v13446_v62, %v13444_v34 }
0x1a64   :  { %v6235_v61 = vmul.f32 %v13448_v28, %v16792_v59  ;;  %v13450_v12 = vpop.eup %13449 }
0x1a66   :  { %v16838_v37 = vadd.f32 %v6236_v54, %v6235_v61 }
0x1a68   :  { %13451 = vtanh.f32 %v16838_v37 }
0x1a72   :  { %v13452_v7 = vpop.eup %13451 }
0x1a73   :  { %v16841_v40 = vmul.f32 %v13452_v7, %v13450_v12 }
0x1a75   :  { %6310 = vmatmul.mubr.f32.vlgmr.msra.gmra.mrb[52].mxu0 %v16841_v40  ;;  %6381 = vmatmul.mubr.f32.vlgmr.msra.gmra.mrb[52].mxu1 %v16841_v40 }
0x1a76   :  { %11797 = vmatpush1.bf16.msra.mxu0 %v16462_v15  ;;  %11829 = vmatpush1.bf16.msra.mxu1 %v16471_v56 }
0x1a77   :  { %11799 = vmatprep.subr.bf16.mxu0 %v16485_v9  ;;  %11831 = vmatprep.subr.bf16.mxu1 %v16496_v19 }
0x1a78   :  { %6484 = vmatprep.mubr.f32.mxu0 %v13677_v3  ;;  %6555 = vmatprep.mubr.f32.mxu1 %v13677_v3 }
0x1a7a   :  { %11801 = vmatpush1.bf16.msra.mxu0 %v16498_v2  ;;  %11833 = vmatpush1.bf16.msra.mxu1 %v16507_v23 }
0x1a7b   :  { %11803 = vmatprep.subr.bf16.mxu0 %v16521_v26  ;;  %11835 = vmatprep.subr.bf16.mxu1 %v16532_v32 }
0x1a7e   :  { %11805 = vmatpush1.bf16.msra.mxu0 %v16534_v43  ;;  %11837 = vmatpush1.bf16.msra.mxu1 %v16543_v45 }
0x1a7f   :  { %11807 = vmatprep.subr.bf16.mxu0 %v16557_v29  ;;  %11839 = vmatprep.subr.bf16.mxu1 %v16568_v44 }
0x1a82   :  { %11809 = vmatpush1.bf16.msra.mxu0 %v16570_v13  ;;  %11841 = vmatpush1.bf16.msra.mxu1 %v16582_v38 }
0x1a83   :  { %11811 = vmatprep.subr.bf16.mxu0 %v16595_v6  ;;  %11843 = vmatprep.subr.bf16.mxu1 %v16597_v24 }
0x1a86   :  { %11813 = vmatpush1.bf16.msra.mxu0 %v16609_v25  ;;  %11845 = vmatpush1.bf16.msra.mxu1 %v16622_v55 }
0x1a87   :  { %11815 = vmatprep.subr.bf16.mxu0 %v16624_v5  ;;  %11847 = vmatprep.subr.bf16.mxu1 %v16635_v10 }
0x1a8a   :  { %11817 = vmatpush1.bf16.msra.mxu0 %v16647_v51  ;;  %11849 = vmatpush1.bf16.msra.mxu1 %v16660_v63 }
0x1a8b   :  { %11819 = vmatprep.subr.bf16.mxu0 %v16662_v36  ;;  %11851 = vmatprep.subr.bf16.mxu1 %v16674_v8 }
0x1a8e   :  { %11821 = vmatpush1.bf16.msra.mxu0 %v16683_v17  ;;  %11853 = vmatpush1.bf16.msra.mxu1 %v16687_v41 }
0x1a8f   :  { %11823 = vmatprep.subr.bf16.mxu0 %v16701_v27  ;;  %11855 = vmatprep.subr.bf16.mxu1 %v16712_v48 }
0x1a92   :  { %11825 = vmatpush1.bf16.msra.mxu0 %v16714_v30  ;;  %11857 = vmatpush1.bf16.msra.mxu1 %v16723_v42 }
0x1a93   :  { %11859 = vmatprep.subr.bf16.mxu0 %v16449_v18  ;;  %11891 = vmatprep.subr.bf16.mxu1 %v16460_v1 }
0x1b48   :  { %v6311_v59 = vpop.f32.mrb[52].mxu0  ;;  %v6382_v58 = vpop.f32.mrb[52].mxu1 }
0x1b49   :  { %v12814_v0 = vadd.f32 %v6311_v59, %v16777_v35  ;;  %v6313_v20 = vpop.f32.mrb[53].mxu0  ;;  %v6384_v52 = vpop.f32.mrb[53].mxu1  ;;  %v12830_v16 = vadd.f32 %v6382_v58, %v16789_v47 }
0x1b4a   :  { %v12815_v14 = vadd.f32 %v6313_v20, %v16780_v39  ;;  %v12831_v53 = vadd.f32 %v6384_v52, %v16785_v50 }
0x1b4b   :  { %v9618_v60 = vmul.f32 -1.442695, %v12814_v0 }
0x1b4c   :  { %v9619_v33 = vmul.f32 -1.442695, %v12815_v14  ;;  %v9620_v21 = vmul.f32 -1.442695, %v12831_v53 }
0x1b4d   :  { %13453 = vpow2.f32 %v9618_v60 }
0x1b4e   :  { %13455 = vpow2.f32 %v9619_v33 }
0x1b4f   :  { %13457 = vpow2.f32 %v9620_v21 }
0x1b50   :  { %13459 = vtanh.f32 %v12830_v16 }
0x1b57   :  { %v13454_v22 = vpop.eup %13453 }
0x1b58   :  { %v13456_v34 = vpop.eup %13455  ;;  %v6394_v62 = vadd.f32 1.0, %v13454_v22 }
0x1b59   :  { %v6400_v28 = vadd.f32 1.0, %v13456_v34  ;;  %v13458_v54 = vpop.eup %13457 }
0x1b5a   :  { %13461 = vrcp.f32 %v6394_v62  ;;  %v13460_v4 = vpop.eup %13459  ;;  %v6407_v59 = vadd.f32 1.0, %v13458_v54 }
0x1b5b   :  { %13463 = vrcp.f32 %v6400_v28 }
0x1b5c   :  { %13465 = vrcp.f32 %v6407_v59 }
0x1b64   :  { %v13462_v61 = vpop.eup %13461 }
0x1b65   :  { %v13464_v12 = vpop.eup %13463  ;;  %v6411_v7 = vmul.f32 %v13462_v61, %v13460_v4 }
0x1b66   :  { %v6410_v0 = vmul.f32 %v13464_v12, %v16838_v37  ;;  %v13466_v58 = vpop.eup %13465 }
0x1b68   :  { %v16884_v20 = vadd.f32 %v6411_v7, %v6410_v0 }
0x1b6a   :  { %13467 = vtanh.f32 %v16884_v20 }
0x1b74   :  { %v13468_v52 = vpop.eup %13467 }
0x1b75   :  { %v16887_v14 = vmul.f32 %v13468_v52, %v13466_v58 }
0x1b77   :  { %6485 = vmatmul.mubr.f32.vlgmr.msra.gmra.mrb[54].mxu0 %v16887_v14  ;;  %6556 = vmatmul.mubr.f32.vlgmr.msra.gmra.mrb[54].mxu1 %v16887_v14 }
0x1b78   :  { %11861 = vmatpush1.bf16.msra.mxu0 %v16462_v15  ;;  %11893 = vmatpush1.bf16.msra.mxu1 %v16471_v56 }
0x1b79   :  { %11863 = vmatprep.subr.bf16.mxu0 %v16485_v9  ;;  %11895 = vmatprep.subr.bf16.mxu1 %v16496_v19 }
0x1b7a   :  { %6659 = vmatprep.mubr.f32.mxu0 %v13677_v3  ;;  %6730 = vmatprep.mubr.f32.mxu1 %v13677_v3 }
0x1b7c   :  { %11865 = vmatpush1.bf16.msra.mxu0 %v16498_v2  ;;  %11897 = vmatpush1.bf16.msra.mxu1 %v16507_v23 }
0x1b7d   :  { %11867 = vmatprep.subr.bf16.mxu0 %v16521_v26  ;;  %11899 = vmatprep.subr.bf16.mxu1 %v16532_v32 }
0x1b80   :  { %11869 = vmatpush1.bf16.msra.mxu0 %v16534_v43  ;;  %11901 = vmatpush1.bf16.msra.mxu1 %v16543_v45 }
0x1b81   :  { %11871 = vmatprep.subr.bf16.mxu0 %v16557_v29  ;;  %11903 = vmatprep.subr.bf16.mxu1 %v16568_v44 }
0x1b84   :  { %11873 = vmatpush1.bf16.msra.mxu0 %v16570_v13  ;;  %11905 = vmatpush1.bf16.msra.mxu1 %v16582_v38 }
0x1b85   :  { %11875 = vmatprep.subr.bf16.mxu0 %v16595_v6  ;;  %11907 = vmatprep.subr.bf16.mxu1 %v16597_v24 }
0x1b88   :  { %11877 = vmatpush1.bf16.msra.mxu0 %v16609_v25  ;;  %11909 = vmatpush1.bf16.msra.mxu1 %v16622_v55 }
0x1b89   :  { %11879 = vmatprep.subr.bf16.mxu0 %v16624_v5  ;;  %11911 = vmatprep.subr.bf16.mxu1 %v16635_v10 }
0x1b8c   :  { %11881 = vmatpush1.bf16.msra.mxu0 %v16647_v51  ;;  %11913 = vmatpush1.bf16.msra.mxu1 %v16660_v63 }
0x1b8d   :  { %11883 = vmatprep.subr.bf16.mxu0 %v16662_v36  ;;  %11915 = vmatprep.subr.bf16.mxu1 %v16674_v8 }
0x1b90   :  { %11885 = vmatpush1.bf16.msra.mxu0 %v16683_v17  ;;  %11917 = vmatpush1.bf16.msra.mxu1 %v16687_v41 }
0x1b91   :  { %11887 = vmatprep.subr.bf16.mxu0 %v16701_v27  ;;  %11919 = vmatprep.subr.bf16.mxu1 %v16712_v48 }
0x1b94   :  { %11889 = vmatpush1.bf16.msra.mxu0 %v16714_v30  ;;  %11921 = vmatpush1.bf16.msra.mxu1 %v16723_v42 }
0x1b95   :  { %11923 = vmatprep.subr.bf16.mxu0 %v16449_v18  ;;  %11955 = vmatprep.subr.bf16.mxu1 %v16460_v1 }
0x1c4a   :  { %v6486_v37 = vpop.f32.mrb[54].mxu0  ;;  %v6557_v60 = vpop.f32.mrb[54].mxu1 }
0x1c4b   :  { %v12816_v33 = vadd.f32 %v6486_v37, %v16777_v35  ;;  %v6488_v53 = vpop.f32.mrb[55].mxu0  ;;  %v6559_v21 = vpop.f32.mrb[55].mxu1  ;;  %v12832_v54 = vadd.f32 %v6557_v60, %v16789_v47 }
0x1c4c   :  { %v12817_v16 = vadd.f32 %v6488_v53, %v16780_v39  ;;  %v12833_v62 = vadd.f32 %v6559_v21, %v16785_v50 }
0x1c4d   :  { %v9621_v22 = vmul.f32 -1.442695, %v12816_v33 }
0x1c4e   :  { %v9622_v34 = vmul.f32 -1.442695, %v12817_v16  ;;  %v9623_v28 = vmul.f32 -1.442695, %v12833_v62 }
0x1c4f   :  { %13469 = vpow2.f32 %v9621_v22 }
0x1c50   :  { %13471 = vpow2.f32 %v9622_v34 }
0x1c51   :  { %13473 = vpow2.f32 %v9623_v28 }
0x1c52   :  { %13475 = vtanh.f32 %v12832_v54 }
0x1c59   :  { %v13470_v4 = vpop.eup %13469 }
0x1c5a   :  { %v13472_v61 = vpop.eup %13471  ;;  %v6569_v12 = vadd.f32 1.0, %v13470_v4 }
0x1c5b   :  { %v6575_v7 = vadd.f32 1.0, %v13472_v61  ;;  %v13474_v59 = vpop.eup %13473 }
0x1c5c   :  { %13477 = vrcp.f32 %v6569_v12  ;;  %v13476_v0 = vpop.eup %13475  ;;  %v6582_v33 = vadd.f32 1.0, %v13474_v59 }
0x1c5d   :  { %13479 = vrcp.f32 %v6575_v7 }
0x1c5e   :  { %13481 = vrcp.f32 %v6582_v33 }
0x1c66   :  { %v13478_v58 = vpop.eup %13477 }
0x1c67   :  { %v13480_v52 = vpop.eup %13479  ;;  %v6586_v37 = vmul.f32 %v13478_v58, %v13476_v0 }
0x1c68   :  { %v6585_v53 = vmul.f32 %v13480_v52, %v16884_v20  ;;  %v13482_v60 = vpop.eup %13481 }
0x1c6a   :  { %v16930_v21 = vadd.f32 %v6586_v37, %v6585_v53 }
0x1c6c   :  { %13483 = vtanh.f32 %v16930_v21 }
0x1c76   :  { %v13484_v16 = vpop.eup %13483 }
0x1c77   :  { %v16933_v22 = vmul.f32 %v13484_v16, %v13482_v60 }
0x1c79   :  { %6660 = vmatmul.mubr.f32.vlgmr.msra.gmra.mrb[56].mxu0 %v16933_v22  ;;  %6731 = vmatmul.mubr.f32.vlgmr.msra.gmra.mrb[56].mxu1 %v16933_v22 }
0x1c7a   :  { %11925 = vmatpush1.bf16.msra.mxu0 %v16462_v15  ;;  %11957 = vmatpush1.bf16.msra.mxu1 %v16471_v56 }
0x1c7b   :  { %11927 = vmatprep.subr.bf16.mxu0 %v16485_v9  ;;  %11959 = vmatprep.subr.bf16.mxu1 %v16496_v19 }
0x1c7c   :  { %6834 = vmatprep.mubr.f32.mxu0 %v13677_v3  ;;  %6905 = vmatprep.mubr.f32.mxu1 %v13677_v3 }
0x1c7e   :  { %11929 = vmatpush1.bf16.msra.mxu0 %v16498_v2  ;;  %11961 = vmatpush1.bf16.msra.mxu1 %v16507_v23 }
0x1c7f   :  { %11931 = vmatprep.subr.bf16.mxu0 %v16521_v26  ;;  %11963 = vmatprep.subr.bf16.mxu1 %v16532_v32 }
0x1c82   :  { %11933 = vmatpush1.bf16.msra.mxu0 %v16534_v43  ;;  %11965 = vmatpush1.bf16.msra.mxu1 %v16543_v45 }
0x1c83   :  { %11935 = vmatprep.subr.bf16.mxu0 %v16557_v29  ;;  %11967 = vmatprep.subr.bf16.mxu1 %v16568_v44 }
0x1c86   :  { %11937 = vmatpush1.bf16.msra.mxu0 %v16570_v13  ;;  %11969 = vmatpush1.bf16.msra.mxu1 %v16582_v38 }
0x1c87   :  { %11939 = vmatprep.subr.bf16.mxu0 %v16595_v6  ;;  %11971 = vmatprep.subr.bf16.mxu1 %v16597_v24 }
0x1c8a   :  { %11941 = vmatpush1.bf16.msra.mxu0 %v16609_v25  ;;  %11973 = vmatpush1.bf16.msra.mxu1 %v16622_v55 }
0x1c8b   :  { %11943 = vmatprep.subr.bf16.mxu0 %v16624_v5  ;;  %11975 = vmatprep.subr.bf16.mxu1 %v16635_v10 }
0x1c8e   :  { %11945 = vmatpush1.bf16.msra.mxu0 %v16647_v51  ;;  %11977 = vmatpush1.bf16.msra.mxu1 %v16660_v63 }
0x1c8f   :  { %11947 = vmatprep.subr.bf16.mxu0 %v16662_v36  ;;  %11979 = vmatprep.subr.bf16.mxu1 %v16674_v8 }
0x1c92   :  { %11949 = vmatpush1.bf16.msra.mxu0 %v16683_v17  ;;  %11981 = vmatpush1.bf16.msra.mxu1 %v16687_v41 }
0x1c93   :  { %11951 = vmatprep.subr.bf16.mxu0 %v16701_v27  ;;  %11983 = vmatprep.subr.bf16.mxu1 %v16712_v48 }
0x1c96   :  { %11953 = vmatpush1.bf16.msra.mxu0 %v16714_v30  ;;  %11985 = vmatpush1.bf16.msra.mxu1 %v16723_v42 }
0x1c97   :  { %11987 = vmatprep.subr.bf16.mxu0 %v16449_v18  ;;  %12019 = vmatprep.subr.bf16.mxu1 %v16460_v1 }
0x1d4c   :  { %v6661_v20 = vpop.f32.mrb[56].mxu0  ;;  %v6732_v34 = vpop.f32.mrb[56].mxu1 }
0x1d4d   :  { %v12818_v62 = vadd.f32 %v6661_v20, %v16777_v35  ;;  %v6663_v28 = vpop.f32.mrb[57].mxu0  ;;  %v6734_v54 = vpop.f32.mrb[57].mxu1  ;;  %v12834_v0 = vadd.f32 %v6732_v34, %v16789_v47 }
0x1d4e   :  { %v12819_v4 = vadd.f32 %v6663_v28, %v16780_v39  ;;  %v12835_v7 = vadd.f32 %v6734_v54, %v16785_v50 }
0x1d4f   :  { %v9624_v61 = vmul.f32 -1.442695, %v12818_v62 }
0x1d50   :  { %v9625_v12 = vmul.f32 -1.442695, %v12819_v4  ;;  %v9626_v59 = vmul.f32 -1.442695, %v12835_v7 }
0x1d51   :  { %13485 = vpow2.f32 %v9624_v61 }
0x1d52   :  { %13487 = vpow2.f32 %v9625_v12 }
0x1d53   :  { %13489 = vpow2.f32 %v9626_v59 }
0x1d54   :  { %13491 = vtanh.f32 %v12834_v0 }
0x1d5b   :  { %v13486_v58 = vpop.eup %13485 }
0x1d5c   :  { %v13488_v52 = vpop.eup %13487  ;;  %v6744_v37 = vadd.f32 1.0, %v13486_v58 }
0x1d5d   :  { %v6750_v33 = vadd.f32 1.0, %v13488_v52  ;;  %v13490_v53 = vpop.eup %13489 }
0x1d5e   :  { %13493 = vrcp.f32 %v6744_v37  ;;  %v13492_v60 = vpop.eup %13491  ;;  %v6757_v28 = vadd.f32 1.0, %v13490_v53 }
0x1d5f   :  { %13495 = vrcp.f32 %v6750_v33 }
0x1d60   :  { %13497 = vrcp.f32 %v6757_v28 }
0x1d68   :  { %v13494_v16 = vpop.eup %13493 }
0x1d69   :  { %v13496_v20 = vpop.eup %13495  ;;  %v6761_v62 = vmul.f32 %v13494_v16, %v13492_v60 }
0x1d6a   :  { %v6760_v4 = vmul.f32 %v13496_v20, %v16930_v21  ;;  %v13498_v34 = vpop.eup %13497 }
0x1d6c   :  { %v16976_v54 = vadd.f32 %v6761_v62, %v6760_v4 }
0x1d6e   :  { %13499 = vtanh.f32 %v16976_v54 }
0x1d78   :  { %v13500_v61 = vpop.eup %13499 }
0x1d79   :  { %v16979_v12 = vmul.f32 %v13500_v61, %v13498_v34 }
0x1d7b   :  { %6835 = vmatmul.mubr.f32.vlgmr.msra.gmra.mrb[58].mxu0 %v16979_v12  ;;  %6906 = vmatmul.mubr.f32.vlgmr.msra.gmra.mrb[58].mxu1 %v16979_v12 }
0x1d7c   :  { %11989 = vmatpush1.bf16.msra.mxu0 %v16462_v15  ;;  %12021 = vmatpush1.bf16.msra.mxu1 %v16471_v56 }
0x1d7d   :  { %11991 = vmatprep.subr.bf16.mxu0 %v16485_v9  ;;  %12023 = vmatprep.subr.bf16.mxu1 %v16496_v19 }
0x1d7e   :  { %7009 = vmatprep.mubr.f32.mxu0 %v13677_v3  ;;  %7080 = vmatprep.mubr.f32.mxu1 %v13677_v3 }
0x1d80   :  { %11993 = vmatpush1.bf16.msra.mxu0 %v16498_v2  ;;  %12025 = vmatpush1.bf16.msra.mxu1 %v16507_v23 }
0x1d81   :  { %11995 = vmatprep.subr.bf16.mxu0 %v16521_v26  ;;  %12027 = vmatprep.subr.bf16.mxu1 %v16532_v32 }
0x1d84   :  { %11997 = vmatpush1.bf16.msra.mxu0 %v16534_v43  ;;  %12029 = vmatpush1.bf16.msra.mxu1 %v16543_v45 }
0x1d85   :  { %11999 = vmatprep.subr.bf16.mxu0 %v16557_v29  ;;  %12031 = vmatprep.subr.bf16.mxu1 %v16568_v44 }
0x1d88   :  { %12001 = vmatpush1.bf16.msra.mxu0 %v16570_v13  ;;  %12033 = vmatpush1.bf16.msra.mxu1 %v16582_v38 }
0x1d89   :  { %12003 = vmatprep.subr.bf16.mxu0 %v16595_v6  ;;  %12035 = vmatprep.subr.bf16.mxu1 %v16597_v24 }
0x1d8c   :  { %12005 = vmatpush1.bf16.msra.mxu0 %v16609_v25  ;;  %12037 = vmatpush1.bf16.msra.mxu1 %v16622_v55 }
0x1d8d   :  { %12007 = vmatprep.subr.bf16.mxu0 %v16624_v5  ;;  %12039 = vmatprep.subr.bf16.mxu1 %v16635_v10 }
0x1d90   :  { %12009 = vmatpush1.bf16.msra.mxu0 %v16647_v51  ;;  %12041 = vmatpush1.bf16.msra.mxu1 %v16660_v63 }
0x1d91   :  { %12011 = vmatprep.subr.bf16.mxu0 %v16662_v36  ;;  %12043 = vmatprep.subr.bf16.mxu1 %v16674_v8 }
0x1d94   :  { %12013 = vmatpush1.bf16.msra.mxu0 %v16683_v17  ;;  %12045 = vmatpush1.bf16.msra.mxu1 %v16687_v41 }
0x1d95   :  { %12015 = vmatprep.subr.bf16.mxu0 %v16701_v27  ;;  %12047 = vmatprep.subr.bf16.mxu1 %v16712_v48 }
0x1d98   :  { %12017 = vmatpush1.bf16.msra.mxu0 %v16714_v30  ;;  %12049 = vmatpush1.bf16.msra.mxu1 %v16723_v42 }
0x1d99   :  { %12051 = vmatprep.subr.bf16.mxu0 %v16449_v18  ;;  %12083 = vmatprep.subr.bf16.mxu1 %v16460_v1 }
0x1e4e   :  { %v6836_v21 = vpop.f32.mrb[58].mxu0  ;;  %v6907_v7 = vpop.f32.mrb[58].mxu1 }
0x1e4f   :  { %v12820_v59 = vadd.f32 %v6836_v21, %v16777_v35  ;;  %v6838_v0 = vpop.f32.mrb[59].mxu0  ;;  %v6909_v58 = vpop.f32.mrb[59].mxu1  ;;  %v12836_v16 = vadd.f32 %v6907_v7, %v16789_v47 }
0x1e50   :  { %v12821_v52 = vadd.f32 %v6838_v0, %v16780_v39  ;;  %v12837_v53 = vadd.f32 %v6909_v58, %v16785_v50 }
0x1e51   :  { %v9627_v37 = vmul.f32 -1.442695, %v12820_v59 }
0x1e52   :  { %v9628_v33 = vmul.f32 -1.442695, %v12821_v52  ;;  %v9629_v60 = vmul.f32 -1.442695, %v12837_v53  ;;  %v9642_v53 = vld [vmem:[%s17964_s2 + $0x630] sm:$0xff] }
0x1e53   :  { %13501 = vpow2.f32 %v9627_v37 }
0x1e54   :  { %13503 = vpow2.f32 %v9628_v33  ;;  %v9638_v33 = vld [vmem:[%s17964_s2 + $0x610] sm:$0xff] }
0x1e55   :  { %13505 = vpow2.f32 %v9629_v60  ;;  %v9645_v60 = vld [vmem:[%s17964_s2 + $0x648] sm:$0xff] }
0x1e56   :  { %13507 = vtanh.f32 %v12836_v16  ;;  %v9649_v16 = vld [vmem:[%s17964_s2 + $0x668] sm:$0xff] }
0x1e5d   :  { %v13502_v18 = vpop.eup %13501 }
0x1e5e   :  { %v13504_v20 = vpop.eup %13503  ;;  %v6919_v1 = vadd.f32 1.0, %v13502_v18  ;;  %v9647_v18 = vld [vmem:[%s17964_s2 + $0x658] sm:$0xff] }
0x1e5f   :  { %v6925_v62 = vadd.f32 1.0, %v13504_v20  ;;  %v13506_v28 = vpop.eup %13505  ;;  %v9651_v20 = vld [vmem:[%s17964_s2 + $0x678] sm:$0xff] }
0x1e60   :  { %13509 = vrcp.f32 %v6919_v1  ;;  %v13508_v4 = vpop.eup %13507  ;;  %v6932_v59 = vadd.f32 1.0, %v13506_v28 }
0x1e61   :  { %13511 = vrcp.f32 %v6925_v62 }
0x1e62   :  { %13513 = vrcp.f32 %v6932_v59  ;;  %v12118_v59 = vpack.c.bf16 %v9649_v16, %v9645_v60  ;;  %v9670_v16 = vld [vmem:[%s17964_s2 + $0x710] sm:$0xff] }
0x1e6a   :  { %v13510_v34 = vpop.eup %13509 }
0x1e6b   :  { %v13512_v61 = vpop.eup %13511  ;;  %v6936_v21 = vmul.f32 %v13510_v34, %v13508_v4  ;;  %v12148_v4 = vpack.c.bf16 %v9642_v53, %v9638_v33  ;;  %v9644_v34 = vld [vmem:[%s17964_s2 + $0x640] sm:$0xff] }
0x1e6c   :  { %v6935_v0 = vmul.f32 %v13512_v61, %v16976_v54  ;;  %v13514_v7 = vpop.eup %13513  ;;  %v9640_v54 = vld [vmem:[%s17964_s2 + $0x620] sm:$0xff] }
0x1e6d   :  { %v9648_v61 = vld [vmem:[%s17964_s2 + $0x660] sm:$0xff] }
0x1e6e   :  { %v17022_v58 = vadd.f32 %v6936_v21, %v6935_v0  ;;  %v12150_v0 = vpack.c.bf16 %v9651_v20, %v9647_v18  ;;  %v9672_v33 = vld [vmem:[%s17964_s2 + $0x720] sm:$0xff]  ;;  %v9674_v18 = vld [vmem:[%s17964_s2 + $0x730] sm:$0xff]  ;;  %v9677_v20 = vld [vmem:[%s17964_s2 + $0x748] sm:$0xff] }
0x1e70   :  { %13515 = vtanh.f32 %v17022_v58 }
0x1e7a   :  { %v13516_v52 = vpop.eup %13515 }
0x1e7b   :  { %v17025_v37 = vmul.f32 %v13516_v52, %v13514_v7  ;;  %v9650_v7 = vld [vmem:[%s17964_s2 + $0x670] sm:$0xff]  ;;  %v9653_v52 = vld [vmem:[%s17964_s2 + $0x688] sm:$0xff] }
0x1e7d   :  { %7010 = vmatmul.mubr.f32.vlgmr.msra.gmra.mrb[60].mxu0 %v17025_v37  ;;  %7081 = vmatmul.mubr.f32.vlgmr.msra.gmra.mrb[60].mxu1 %v17025_v37 }
0x1e7e   :  { %12053 = vmatpush1.bf16.msra.mxu0 %v16462_v15  ;;  %12085 = vmatpush1.bf16.msra.mxu1 %v16471_v56  ;;  %v9637_v15 = vld [vmem:[%s17964_s2 + $0x608] sm:$0xff] }
0x1e7f   :  { %12055 = vmatprep.subr.bf16.mxu0 %v16485_v9  ;;  %12087 = vmatprep.subr.bf16.mxu1 %v16496_v19  ;;  %v9641_v56 = vld [vmem:[%s17964_s2 + $0x628] sm:$0xff]  ;;  %v9639_v9 = vld [vmem:[%s17964_s2 + $0x618] sm:$0xff] }
0x1e80   :  { %7184 = vmatprep.mubr.f32.mxu0 %v13677_v3  ;;  %7255 = vmatprep.mubr.f32.mxu1 %v13677_v3  ;;  %v12114_v19 = vpack.c.bf16 %v9641_v56, %v9637_v15  ;;  %v9657_v15 = vld [vmem:[%s17964_s2 + $0x6a8] sm:$0xff]  ;;  %v9655_v56 = vld [vmem:[%s17964_s2 + $0x698] sm:$0xff] }
0x1e82   :  { %12057 = vmatpush1.bf16.msra.mxu0 %v16498_v2  ;;  %12089 = vmatpush1.bf16.msra.mxu1 %v16507_v23  ;;  %v9643_v2 = vld [vmem:[%s17964_s2 + $0x638] sm:$0xff] }
0x1e83   :  { %12059 = vmatprep.subr.bf16.mxu0 %v16521_v26  ;;  %12091 = vmatprep.subr.bf16.mxu1 %v16532_v32  ;;  %v12146_v23 = vpack.c.bf16 %v9643_v2, %v9639_v9  ;;  %v9659_v9 = vld [vmem:[%s17964_s2 + $0x6b8] sm:$0xff] }
0x1e86   :  { %12061 = vmatpush1.bf16.msra.mxu0 %v16534_v43  ;;  %12093 = vmatpush1.bf16.msra.mxu1 %v16543_v45 }
0x1e87   :  { %12063 = vmatprep.subr.bf16.mxu0 %v16557_v29  ;;  %12095 = vmatprep.subr.bf16.mxu1 %v16568_v44 }
0x1e8a   :  { %12065 = vmatpush1.bf16.msra.mxu0 %v16570_v13  ;;  %12097 = vmatpush1.bf16.msra.mxu1 %v16582_v38 }
0x1e8b   :  { %12067 = vmatprep.subr.bf16.mxu0 %v16595_v6  ;;  %12099 = vmatprep.subr.bf16.mxu1 %v16597_v24 }
0x1e8e   :  { %12069 = vmatpush1.bf16.msra.mxu0 %v16609_v25  ;;  %12101 = vmatpush1.bf16.msra.mxu1 %v16622_v55 }
0x1e8f   :  { %12071 = vmatprep.subr.bf16.mxu0 %v16624_v5  ;;  %12103 = vmatprep.subr.bf16.mxu1 %v16635_v10 }
0x1e92   :  { %12073 = vmatpush1.bf16.msra.mxu0 %v16647_v51  ;;  %12105 = vmatpush1.bf16.msra.mxu1 %v16660_v63 }
0x1e93   :  { %12075 = vmatprep.subr.bf16.mxu0 %v16662_v36  ;;  %12107 = vmatprep.subr.bf16.mxu1 %v16674_v8 }
0x1e96   :  { %12077 = vmatpush1.bf16.msra.mxu0 %v16683_v17  ;;  %12109 = vmatpush1.bf16.msra.mxu1 %v16687_v41 }
0x1e97   :  { %12079 = vmatprep.subr.bf16.mxu0 %v16701_v27  ;;  %12111 = vmatprep.subr.bf16.mxu1 %v16712_v48 }
0x1e9a   :  { %12081 = vmatpush1.bf16.msra.mxu0 %v16714_v30  ;;  %12113 = vmatpush1.bf16.msra.mxu1 %v16723_v42  ;;  %v9636_v42 = vld [vmem:[%s17964_s2 + $0x600] sm:$0xff] }
0x1e9b   :  { %12115 = vmatprep.subr.bf16.mxu0 %v12114_v19  ;;  %12147 = vmatprep.subr.bf16.mxu1 %v12146_v23  ;;  %v12116_v28 = vpack.c.bf16 %v9640_v54, %v9636_v42  ;;  %v12120_v19 = vpack.c.bf16 %v9648_v61, %v9644_v34  ;;  %v9652_v23 = vld [vmem:[%s17964_s2 + $0x680] sm:$0xff]  ;;  %v12164_v34 = vpack.c.bf16 %v9674_v18, %v9670_v16  ;;  %v9711_v16 = vld [vmem:[%s17961_s3 + $0x858] sm:$0xff] }
0x1e9c   :  { %v9668_v54 = vld [vmem:[%s17964_s2 + $0x700] sm:$0xff] }
0x1e9d   :  { %v9676_v61 = vld [vmem:[%s17964_s2 + $0x740] sm:$0xff] }
0x1f50   :  { %v7011_v26 = vpop.f32.mrb[60].mxu0  ;;  %v7082_v32 = vpop.f32.mrb[60].mxu1 }
0x1f51   :  { %v12822_v43 = vadd.f32 %v7011_v26, %v16777_v35  ;;  %v7013_v45 = vpop.f32.mrb[61].mxu0  ;;  %v7084_v29 = vpop.f32.mrb[61].mxu1  ;;  %v12838_v25 = vadd.f32 %v7082_v32, %v16789_v47  ;;  %v9656_v26 = vld [vmem:[%s17964_s2 + $0x6a0] sm:$0xff]  ;;  %v12122_v32 = vpack.c.bf16 %v9657_v15, %v9653_v52  ;;  %v9682_v52 = vld [vmem:[%s17964_s2 + $0x770] sm:$0xff]  ;;  %v9685_v15 = vld [vmem:[%s17964_s2 + $0x788] sm:$0xff] }
0x1f52   :  { %v12823_v44 = vadd.f32 %v7013_v45, %v16780_v39  ;;  %v12839_v6 = vadd.f32 %v7084_v29, %v16785_v50  ;;  %v9654_v45 = vld [vmem:[%s17964_s2 + $0x690] sm:$0xff] }
0x1f53   :  { %v9630_v13 = vmul.f32 -1.442695, %v12822_v43  ;;  %v12154_v43 = vpack.c.bf16 %v9659_v9, %v9655_v56  ;;  %v9658_v29 = vld [vmem:[%s17964_s2 + $0x6b0] sm:$0xff]  ;;  %v9689_v56 = vld [vmem:[%s17964_s2 + $0x7a8] sm:$0xff]  ;;  %v9687_v9 = vld [vmem:[%s17964_s2 + $0x798] sm:$0xff] }
0x1f54   :  { %v9631_v38 = vmul.f32 -1.442695, %v12823_v44  ;;  %v9632_v24 = vmul.f32 -1.442695, %v12839_v6  ;;  %v9661_v44 = vld [vmem:[%s17964_s2 + $0x6c8] sm:$0xff]  ;;  %v9667_v6 = vld [vmem:[%s17964_s2 + $0x6f8] sm:$0xff] }
0x1f55   :  { %13517 = vpow2.f32 %v9630_v13  ;;  %v9665_v13 = vld [vmem:[%s17964_s2 + $0x6e8] sm:$0xff] }
0x1f56   :  { %13519 = vpow2.f32 %v9631_v38  ;;  %v9663_v38 = vld [vmem:[%s17964_s2 + $0x6d8] sm:$0xff] }
0x1f57   :  { %13521 = vpow2.f32 %v9632_v24  ;;  %v12124_v24 = vpack.c.bf16 %v9656_v26, %v9652_v23  ;;  %v9684_v26 = vld [vmem:[%s17964_s2 + $0x780] sm:$0xff] }
0x1f58   :  { %13523 = vtanh.f32 %v12838_v25  ;;  %v12156_v25 = vpack.c.bf16 %v9658_v29, %v9654_v45  ;;  %v9686_v29 = vld [vmem:[%s17964_s2 + $0x790] sm:$0xff] }
0x1f5f   :  { %v13518_v55 = vpop.eup %13517 }
0x1f60   :  { %v13520_v5 = vpop.eup %13519  ;;  %v7094_v10 = vadd.f32 1.0, %v13518_v55  ;;  %v9660_v55 = vld [vmem:[%s17964_s2 + $0x6c0] sm:$0xff] }
0x1f61   :  { %v7100_v51 = vadd.f32 1.0, %v13520_v5  ;;  %v13522_v63 = vpop.eup %13521  ;;  %v9664_v5 = vld [vmem:[%s17964_s2 + $0x6e0] sm:$0xff] }
0x1f62   :  { %13525 = vrcp.f32 %v7094_v10  ;;  %v13524_v36 = vpop.eup %13523  ;;  %v7107_v27 = vadd.f32 1.0, %v13522_v63  ;;  %v12126_v10 = vpack.c.bf16 %v9665_v13, %v9661_v44  ;;  %v9662_v63 = vld [vmem:[%s17964_s2 + $0x6d0] sm:$0xff]  ;;  %v9693_v13 = vld [vmem:[%s17964_s2 + $0x7c8] sm:$0xff] }
0x1f63   :  { %13527 = vrcp.f32 %v7100_v51  ;;  %v12158_v51 = vpack.c.bf16 %v9667_v6, %v9663_v38  ;;  %v9690_v44 = vld [vmem:[%s17964_s2 + $0x7b0] sm:$0xff]  ;;  %v9697_v38 = vld [vmem:[%s17964_s2 + $0x7e8] sm:$0xff]  ;;  %v9695_v6 = vld [vmem:[%s17964_s2 + $0x7d8] sm:$0xff] }
0x1f64   :  { %13529 = vrcp.f32 %v7107_v27  ;;  %v9675_v27 = vld [vmem:[%s17964_s2 + $0x738] sm:$0xff] }
0x1f6c   :  { %v13526_v8 = vpop.eup %13525 }
0x1f6d   :  { %v13528_v17 = vpop.eup %13527  ;;  %v7111_v41 = vmul.f32 %v13526_v8, %v13524_v36  ;;  %v9666_v36 = vld [vmem:[%s17964_s2 + $0x6f0] sm:$0xff]  ;;  %v9669_v8 = vld [vmem:[%s17964_s2 + $0x708] sm:$0xff] }
0x1f6e   :  { %v7110_v48 = vmul.f32 %v13528_v17, %v17022_v58  ;;  %v13530_v1 = vpop.eup %13529  ;;  %v9646_v58 = vld [vmem:[%s17964_s2 + $0x650] sm:$0xff]  ;;  %v9673_v17 = vld [vmem:[%s17964_s2 + $0x728] sm:$0xff]  ;;  %v12160_v42 = vpack.c.bf16 %v9666_v36, %v9662_v63  ;;  %v9696_v63 = vld [vmem:[%s17964_s2 + $0x7e0] sm:$0xff] }
0x1f6f   :  { %v12152_v2 = vpack.c.bf16 %v9650_v7, %v9646_v58  ;;  %v12130_v53 = vpack.c.bf16 %v9673_v17, %v9669_v8  ;;  %v9678_v7 = vld [vmem:[%s17964_s2 + $0x750] sm:$0xff] }
0x1f70   :  { %v17078_v30 = vadd.f32 %v7111_v41, %v7110_v48  ;;  %v9671_v41 = vld [vmem:[%s17964_s2 + $0x718] sm:$0xff]  ;;  %v12128_v48 = vpack.c.bf16 %v9664_v5, %v9660_v55  ;;  %v12168_v23 = vpack.c.bf16 %v9682_v52, %v9678_v7  ;;  %v12172_v55 = vpack.c.bf16 %v9690_v44, %v9686_v29  ;;  %v9692_v5 = vld [vmem:[%s17964_s2 + $0x7c0] sm:$0xff]  ;;  %v9694_v36 = vld [vmem:[%s17964_s2 + $0x7d0] sm:$0xff] }
0x1f71   :  { %v12162_v60 = vpack.c.bf16 %v9675_v27, %v9671_v41  ;;  %v9698_v8 = vld [vmem:[%s17964_s2 + $0x7f0] sm:$0xff]  ;;  %v12144_v17 = vpack.c.bf16 %v9696_v63, %v9692_v5  ;;  %v9719_v7 = vld [vmem:[%s17961_s3 + $0x898] sm:$0xff]  ;;  %v9737_v63 = vld [vmem:[%s17961_s3 + $0x928] sm:$0xff] }
0x1f72   :  { %13531 = vtanh.f32 %v17078_v30  ;;  %v12176_v41 = vpack.c.bf16 %v9698_v8, %v9694_v36  ;;  %v9727_v29 = vld [vmem:[%s17961_s3 + $0x8d8] sm:$0xff]  ;;  %v9730_v5 = vld [vmem:[%s17961_s3 + $0x8f0] sm:$0xff] }
0x1f73   :  { %v9735_v36 = vld [vmem:[%s17961_s3 + $0x918] sm:$0xff] }
0x1f74   :  { %v9739_v8 = vld [vmem:[%s17961_s3 + $0x938] sm:$0xff] }
0x1f7c   :  { %v13532_v62 = vpop.eup %13531 }
0x1f7d   :  { %v17111_v21 = vmul.f32 %v13532_v62, %v13530_v1  ;;  %v9681_v1 = vld [vmem:[%s17964_s2 + $0x768] sm:$0xff]  ;;  %v9679_v62 = vld [vmem:[%s17964_s2 + $0x758] sm:$0xff] }
0x1f7f   :  { %7185 = vmatmul.mubr.f32.vlgmr.msra.gmra.mrb[62].mxu0 %v17111_v21  ;;  %7256 = vmatmul.mubr.f32.vlgmr.msra.gmra.mrb[62].mxu1 %v17111_v21 }
0x1f80   :  { %12117 = vmatpush1.bf16.msra.mxu0 %v12116_v28  ;;  %12149 = vmatpush1.bf16.msra.mxu1 %v12148_v4  ;;  %v9683_v28 = vld [vmem:[%s17964_s2 + $0x778] sm:$0xff]  ;;  %v12132_v4 = vpack.c.bf16 %v9672_v33, %v9668_v54  ;;  %v9706_v54 = vld [vmem:[%s17961_s3 + $0x830] sm:$0xff] }
0x1f81   :  { %12119 = vmatprep.subr.bf16.mxu0 %v12118_v59  ;;  %12151 = vmatprep.subr.bf16.mxu1 %v12150_v0  ;;  %v9680_v59 = vld [vmem:[%s17964_s2 + $0x760] sm:$0xff]  ;;  %v12134_v0 = vpack.c.bf16 %v9681_v1, %v9677_v20  ;;  %v12166_v58 = vpack.c.bf16 %v9683_v28, %v9679_v62  ;;  %v9715_v20 = vld [vmem:[%s17961_s3 + $0x878] sm:$0xff] }
0x1f82   :  { %7516 = vmatprep.mubr.f32.mxu0 %v13677_v3  ;;  %7629 = vmatprep.mubr.f32.mxu1 %v13677_v3  ;;  %v9708_v1 = vld [vmem:[%s17961_s3 + $0x840] sm:$0xff]  ;;  %v17351_v28 = vpack.c.bf16 %v9715_v20, %v9711_v16  ;;  %v9747_v16 = vld [vmem:[%s17961_s3 + $0x978] sm:$0xff] }
0x1f83   :  { %v9712_v62 = vld [vmem:[%s17961_s3 + $0x860] sm:$0xff] }
0x1f84   :  { %12121 = vmatpush1.bf16.msra.mxu0 %v12120_v19  ;;  %12153 = vmatpush1.bf16.msra.mxu1 %v12152_v2  ;;  %v9691_v19 = vld [vmem:[%s17964_s2 + $0x7b8] sm:$0xff]  ;;  %v12136_v2 = vpack.c.bf16 %v9680_v59, %v9676_v61  ;;  %v9714_v61 = vld [vmem:[%s17961_s3 + $0x870] sm:$0xff]  ;;  %v9740_v20 = vld [vmem:[%s17961_s3 + $0x940] sm:$0xff] }
0x1f85   :  { %12123 = vmatprep.subr.bf16.mxu0 %v12122_v32  ;;  %12155 = vmatprep.subr.bf16.mxu1 %v12154_v43  ;;  %v9688_v32 = vld [vmem:[%s17964_s2 + $0x7a0] sm:$0xff]  ;;  %v12138_v43 = vpack.c.bf16 %v9689_v56, %v9685_v15  ;;  %v12170_v45 = vpack.c.bf16 %v9691_v19, %v9687_v9  ;;  %v9723_v15 = vld [vmem:[%s17961_s3 + $0x8b8] sm:$0xff] }
0x1f86   :  { %v9716_v56 = vld [vmem:[%s17961_s3 + $0x880] sm:$0xff]  ;;  %v17387_v19 = vpack.c.bf16 %v9723_v15, %v9719_v7  ;;  %v9753_v7 = vld [vmem:[%s17961_s3 + $0x9a8] sm:$0xff]  ;;  %v9751_v15 = vld [vmem:[%s17961_s3 + $0x998] sm:$0xff] }
0x1f87   :  { %v9720_v9 = vld [vmem:[%s17961_s3 + $0x8a0] sm:$0xff] }
0x1f88   :  { %12125 = vmatpush1.bf16.msra.mxu0 %v12124_v24  ;;  %12157 = vmatpush1.bf16.msra.mxu1 %v12156_v25  ;;  %v9699_v24 = vld [vmem:[%s17964_s2 + $0x7f8] sm:$0xff]  ;;  %v12140_v25 = vpack.c.bf16 %v9688_v32, %v9684_v26  ;;  %v9722_v26 = vld [vmem:[%s17961_s3 + $0x8b0] sm:$0xff] }
0x1f89   :  { %12127 = vmatprep.subr.bf16.mxu0 %v12126_v10  ;;  %12159 = vmatprep.subr.bf16.mxu1 %v12158_v51  ;;  %v12142_v10 = vpack.c.bf16 %v9697_v38, %v9693_v13  ;;  %v12174_v51 = vpack.c.bf16 %v9699_v24, %v9695_v6  ;;  %v9731_v13 = vld [vmem:[%s17961_s3 + $0x8f8] sm:$0xff]  ;;  %v9724_v38 = vld [vmem:[%s17961_s3 + $0x8c0] sm:$0xff] }
0x1f8a   :  { %v9728_v6 = vld [vmem:[%s17961_s3 + $0x8e0] sm:$0xff]  ;;  %v17423_v24 = vpack.c.bf16 %v9731_v13, %v9727_v29  ;;  %v9750_v29 = vld [vmem:[%s17961_s3 + $0x990] sm:$0xff] }
0x1f8b   :  { %v9754_v13 = vld [vmem:[%s17961_s3 + $0x9b0] sm:$0xff] }
0x1f8c   :  { %12129 = vmatpush1.bf16.msra.mxu0 %v12128_v48  ;;  %12161 = vmatpush1.bf16.msra.mxu1 %v12160_v42  ;;  %v9702_v42 = vld [vmem:[%s17961_s3 + $0x810] sm:$0xff] }
0x1f8d   :  { %12131 = vmatprep.subr.bf16.mxu0 %v12130_v53  ;;  %12163 = vmatprep.subr.bf16.mxu1 %v12162_v60  ;;  %v17326_v33 = vpack.c.bf16 %v9706_v54, %v9702_v42  ;;  %v9709_v53 = vld [vmem:[%s17961_s3 + $0x848] sm:$0xff] }
0x1f8e   :  { %v9713_v60 = vld [vmem:[%s17961_s3 + $0x868] sm:$0xff] }
0x1f8f   :  { %v17340_v18 = vpack.c.bf16 %v9713_v60, %v9709_v53  ;;  %v9745_v42 = vld [vmem:[%s17961_s3 + $0x968] sm:$0xff]  ;;  %v9743_v60 = vld [vmem:[%s17961_s3 + $0x958] sm:$0xff] }
0x1f90   :  { %12133 = vmatpush1.bf16.msra.mxu0 %v12132_v4  ;;  %12165 = vmatpush1.bf16.msra.mxu1 %v12164_v34  ;;  %v17353_v4 = vpack.c.bf16 %v9712_v62, %v9708_v1  ;;  %v9710_v34 = vld [vmem:[%s17961_s3 + $0x850] sm:$0xff]  ;;  %v17490_v1 = vpack.c.bf16 %v9747_v16, %v9743_v60  ;;  %v9744_v62 = vld [vmem:[%s17961_s3 + $0x960] sm:$0xff] }
0x1f91   :  { %12135 = vmatprep.subr.bf16.mxu0 %v12134_v0  ;;  %12167 = vmatprep.subr.bf16.mxu1 %v12166_v58  ;;  %v17362_v59 = vpack.c.bf16 %v9714_v61, %v9710_v34  ;;  %v9717_v0 = vld [vmem:[%s17961_s3 + $0x888] sm:$0xff]  ;;  %v9742_v34 = vld [vmem:[%s17961_s3 + $0x950] sm:$0xff] }
0x1f92   :  { %v9721_v58 = vld [vmem:[%s17961_s3 + $0x8a8] sm:$0xff]  ;;  %v9746_v61 = vld [vmem:[%s17961_s3 + $0x970] sm:$0xff] }
0x1f93   :  { %v17376_v52 = vpack.c.bf16 %v9721_v58, %v9717_v0  ;;  %v17502_v0 = vpack.c.bf16 %v9744_v62, %v9740_v20  ;;  %v9749_v58 = vld [vmem:[%s17961_s3 + $0x988] sm:$0xff] }
0x1f94   :  { %12137 = vmatpush1.bf16.msra.mxu0 %v12136_v2  ;;  %12169 = vmatpush1.bf16.msra.mxu1 %v12168_v23  ;;  %v17389_v2 = vpack.c.bf16 %v9720_v9, %v9716_v56  ;;  %v9718_v23 = vld [vmem:[%s17961_s3 + $0x890] sm:$0xff]  ;;  %v17515_v56 = vpack.c.bf16 %v9746_v61, %v9742_v34  ;;  %v17517_v9 = vpack.c.bf16 %v9753_v7, %v9749_v58 }
0x1f95   :  { %12139 = vmatprep.subr.bf16.mxu0 %v12138_v43  ;;  %12171 = vmatprep.subr.bf16.mxu1 %v12170_v45  ;;  %v17398_v32 = vpack.c.bf16 %v9722_v26, %v9718_v23  ;;  %v9725_v43 = vld [vmem:[%s17961_s3 + $0x8c8] sm:$0xff]  ;;  %v9755_v23 = vld [vmem:[%s17961_s3 + $0x9b8] sm:$0xff]  ;;  %v9748_v26 = vld [vmem:[%s17961_s3 + $0x980] sm:$0xff] }
0x1f96   :  { %v9729_v45 = vld [vmem:[%s17961_s3 + $0x8e8] sm:$0xff] }
0x1f97   :  { %v17412_v44 = vpack.c.bf16 %v9729_v45, %v9725_v43  ;;  %v9752_v43 = vld [vmem:[%s17961_s3 + $0x9a0] sm:$0xff]  ;;  %v17529_v45 = vpack.c.bf16 %v9755_v23, %v9751_v15 }
0x1f98   :  { %12141 = vmatpush1.bf16.msra.mxu0 %v12140_v25  ;;  %12173 = vmatpush1.bf16.msra.mxu1 %v12172_v55  ;;  %v17425_v25 = vpack.c.bf16 %v9728_v6, %v9724_v38  ;;  %v9726_v55 = vld [vmem:[%s17961_s3 + $0x8d0] sm:$0xff]  ;;  %v17538_v38 = vpack.c.bf16 %v9752_v43, %v9748_v26  ;;  %v17542_v6 = vpack.c.bf16 %v9754_v13, %v9750_v29 }
0x1f99   :  { %12143 = vmatprep.subr.bf16.mxu0 %v12142_v10  ;;  %12175 = vmatprep.subr.bf16.mxu1 %v12174_v51  ;;  %v9733_v10 = vld [vmem:[%s17961_s3 + $0x908] sm:$0xff]  ;;  %v17437_v51 = vpack.c.bf16 %v9730_v5, %v9726_v55 }
0x1f9a   :  { %v9757_v55 = vld [vmem:[%s17961_s3 + $0x9c8] sm:$0xff] }
0x1f9b   :  { %v9761_v5 = vld [vmem:[%s17961_s3 + $0x9e8] sm:$0xff] }
0x1f9c   :  { %12145 = vmatpush1.bf16.msra.mxu0 %v12144_v17  ;;  %12177 = vmatpush1.bf16.msra.mxu1 %v12176_v41  ;;  %v17450_v17 = vpack.c.bf16 %v9737_v63, %v9733_v10  ;;  %v17452_v41 = vpack.c.bf16 %v9739_v8, %v9735_v36  ;;  %v9759_v10 = vld [vmem:[%s17961_s3 + $0x9d8] sm:$0xff]  ;;  %v17556_v63 = vpack.c.bf16 %v9761_v5, %v9757_v55  ;;  %v9756_v8 = vld [vmem:[%s17961_s3 + $0x9c0] sm:$0xff] }
0x1f9d   :  { %v9763_v36 = vld [vmem:[%s17961_s3 + $0x9f8] sm:$0xff] }
0x1f9f   :  { %7517 = vmatmul.mubr.f32.vlgmr.msra.gmra.mrb[64].mxu0 %v16795_v31  ;;  %7630 = vmatmul.mubr.f32.vlgmr.msra.gmra.mrb[64].mxu1 %v16795_v31  ;;  %v9701_v31 = vld [vmem:[%s17961_s3 + $0x808] sm:$0xff] }
0x1fa0   :  { %7522 = vmatprep.mubr.f32.mxu0 %v13677_v3  ;;  %7635 = vmatprep.mubr.f32.mxu1 %v13677_v3 }
0x1fa3   :  { %7523 = vmatmul.mubr.f32.gmra.mrb[66].mxu0 %v16841_v40  ;;  %7636 = vmatmul.mubr.f32.gmra.mrb[66].mxu1 %v16841_v40  ;;  %v9705_v40 = vld [vmem:[%s17961_s3 + $0x828] sm:$0xff] }
0x1fa4   :  { %7528 = vmatprep.mubr.f32.mxu0 %v13677_v3  ;;  %7641 = vmatprep.mubr.f32.mxu1 %v13677_v3 }
0x1fa7   :  { %7529 = vmatmul.mubr.f32.gmra.mrb[68].mxu0 %v16887_v14  ;;  %7642 = vmatmul.mubr.f32.gmra.mrb[68].mxu1 %v16887_v14  ;;  %v9703_v14 = vld [vmem:[%s17961_s3 + $0x818] sm:$0xff] }
0x1fa8   :  { %7534 = vmatprep.mubr.f32.mxu0 %v13677_v3  ;;  %7647 = vmatprep.mubr.f32.mxu1 %v13677_v3 }
0x1fab   :  { %7535 = vmatmul.mubr.f32.gmra.mrb[70].mxu0 %v16933_v22  ;;  %7648 = vmatmul.mubr.f32.gmra.mrb[70].mxu1 %v16933_v22  ;;  %v17304_v22 = vpack.c.bf16 %v9705_v40, %v9701_v31  ;;  %v9732_v31 = vld [vmem:[%s17961_s3 + $0x900] sm:$0xff] }
0x1fac   :  { %7540 = vmatprep.mubr.f32.mxu0 %v13677_v3  ;;  %7653 = vmatprep.mubr.f32.mxu1 %v13677_v3  ;;  %v9736_v40 = vld [vmem:[%s17961_s3 + $0x920] sm:$0xff] }
0x1fad   :  { %12179 = vmatprep.subr.bf16.mxu0 %v17304_v22 }
0x1faf   :  { %7541 = vmatmul.mubr.f32.gmra.mrb[72].mxu0 %v16979_v12  ;;  %7654 = vmatmul.mubr.f32.gmra.mrb[72].mxu1 %v16979_v12  ;;  %v9707_v12 = vld [vmem:[%s17961_s3 + $0x838] sm:$0xff] }
0x1fb0   :  { %7546 = vmatprep.mubr.f32.mxu0 %v13677_v3  ;;  %7659 = vmatprep.mubr.f32.mxu1 %v13677_v3  ;;  %v17315_v27 = vpack.c.bf16 %v9707_v12, %v9703_v14  ;;  %v9734_v14 = vld [vmem:[%s17961_s3 + $0x910] sm:$0xff]  ;;  %v17464_v12 = vpack.c.bf16 %v9736_v40, %v9732_v31  ;;  %v9760_v31 = vld [vmem:[%s17961_s3 + $0x9e0] sm:$0xff]  ;;  %v17567_v40 = vpack.c.bf16 %v9763_v36, %v9759_v10 }
0x1fb2   :  { %12211 = vmatprep.subr.bf16.mxu1 %v17315_v27 }
0x1fb3   :  { %7547 = vmatmul.mubr.f32.gmra.mrb[74].mxu0 %v17025_v37  ;;  %7660 = vmatmul.mubr.f32.gmra.mrb[74].mxu1 %v17025_v37  ;;  %v9700_v37 = vld [vmem:[%s17961_s3 + $0x800] sm:$0xff] }
0x1fb4   :  { %7552 = vmatprep.mubr.f32.mxu0 %v13677_v3  ;;  %7665 = vmatprep.mubr.f32.mxu1 %v13677_v3 }
0x1fb5   :  { %12213 = vmatpush1.bf16.msra.mxu1 %v17326_v33 }
0x1fb6   :  { %12215 = vmatprep.subr.bf16.mxu1 %v17351_v28 }
0x1fb7   :  { %7553 = vmatmul.mubr.f32.gmra.mrb[76].mxu0 %v17111_v21  ;;  %7666 = vmatmul.mubr.f32.gmra.mrb[76].mxu1 %v17111_v21  ;;  %v9704_v21 = vld [vmem:[%s17961_s3 + $0x820] sm:$0xff] }
0x1fb8   :  { %7558 = vmatprep.mubr.f32.mxu0 %v13677_v3  ;;  %7671 = vmatprep.mubr.f32.mxu1 %v13677_v3  ;;  %v17317_v48 = vpack.c.bf16 %v9704_v21, %v9700_v37  ;;  %v9738_v37 = vld [vmem:[%s17961_s3 + $0x930] sm:$0xff]  ;;  %v9741_v21 = vld [vmem:[%s17961_s3 + $0x948] sm:$0xff] }
0x1fb9   :  { %12217 = vmatpush1.bf16.msra.mxu1 %v17362_v59  ;;  %v17477_v54 = vpack.c.bf16 %v9738_v37, %v9734_v14  ;;  %v17479_v53 = vpack.c.bf16 %v9745_v42, %v9741_v21  ;;  %v17569_v14 = vpack.c.bf16 %v9760_v31, %v9756_v8  ;;  %v9758_v37 = vld [vmem:[%s17961_s3 + $0x9d0] sm:$0xff] }
0x1fba   :  { %12181 = vmatpush1.bf16.msra.mxu0 %v17317_v48  ;;  %12219 = vmatprep.subr.bf16.mxu1 %v17387_v19  ;;  %v9762_v21 = vld [vmem:[%s17961_s3 + $0x9f0] sm:$0xff] }
0x1fbb   :  { %12183 = vmatprep.subr.bf16.mxu0 %v17340_v18  ;;  %v17578_v42 = vpack.c.bf16 %v9762_v21, %v9758_v37 }
0x1fbd   :  { %12221 = vmatpush1.bf16.msra.mxu1 %v17398_v32 }
0x1fbe   :  { %12185 = vmatpush1.bf16.msra.mxu0 %v17353_v4  ;;  %12223 = vmatprep.subr.bf16.mxu1 %v17423_v24 }
0x1fbf   :  { %12187 = vmatprep.subr.bf16.mxu0 %v17376_v52 }
0x1fc1   :  { %12225 = vmatpush1.bf16.msra.mxu1 %v17437_v51 }
0x1fc2   :  { %12189 = vmatpush1.bf16.msra.mxu0 %v17389_v2  ;;  %12227 = vmatprep.subr.bf16.mxu1 %v17452_v41 }
0x1fc3   :  { %12191 = vmatprep.subr.bf16.mxu0 %v17412_v44 }
0x1fc5   :  { %12229 = vmatpush1.bf16.msra.mxu1 %v17477_v54 }
0x1fc6   :  { %12193 = vmatpush1.bf16.msra.mxu0 %v17425_v25  ;;  %12231 = vmatprep.subr.bf16.mxu1 %v17490_v1 }
0x1fc7   :  { %12195 = vmatprep.subr.bf16.mxu0 %v17450_v17 }
0x1fc9   :  { %12233 = vmatpush1.bf16.msra.mxu1 %v17515_v56 }
0x1fca   :  { %12197 = vmatpush1.bf16.msra.mxu0 %v17464_v12  ;;  %12235 = vmatprep.subr.bf16.mxu1 %v17529_v45 }
0x1fcb   :  { %12199 = vmatprep.subr.bf16.mxu0 %v17479_v53 }
0x1fcd   :  { %12237 = vmatpush1.bf16.msra.mxu1 %v17542_v6 }
0x1fce   :  { %12201 = vmatpush1.bf16.msra.mxu0 %v17502_v0  ;;  %12239 = vmatprep.subr.bf16.mxu1 %v17567_v40 }
0x1fcf   :  { %12203 = vmatprep.subr.bf16.mxu0 %v17517_v9 }
0x1fd1   :  { %12241 = vmatpush1.bf16.msra.mxu1 %v17578_v42 }
0x1fd2   :  { %12205 = vmatpush1.bf16.msra.mxu0 %v17538_v38  ;;  %12275 = vmatprep.subr.bf16.mxu1 %v17315_v27 }
0x1fd3   :  { %12207 = vmatprep.subr.bf16.mxu0 %v17556_v63 }
0x1fd6   :  { %12209 = vmatpush1.bf16.msra.mxu0 %v17569_v14 }
0x1fd7   :  { %12243 = vmatprep.subr.bf16.mxu0 %v17304_v22 }
0x2052   :  { %v7186_v60 = vpop.f32.mrb[62].mxu0  ;;  %v7257_v16 = vpop.f32.mrb[62].mxu1 }
0x2053   :  { %v12824_v20 = vadd.f32 %v7186_v60, %v16777_v35  ;;  %v7188_v62 = vpop.f32.mrb[63].mxu0  ;;  %v7259_v34 = vpop.f32.mrb[63].mxu1  ;;  %v12840_v26 = vadd.f32 %v7257_v16, %v16789_v47 }
0x2054   :  { %v12825_v61 = vadd.f32 %v7188_v62, %v16780_v39  ;;  %v12841_v15 = vadd.f32 %v7259_v34, %v16785_v50 }
0x2055   :  { %v9633_v58 = vmul.f32 -1.442695, %v12824_v20 }
0x2056   :  { %v9634_v7 = vmul.f32 -1.442695, %v12825_v61  ;;  %v9635_v23 = vmul.f32 -1.442695, %v12841_v15 }
0x2057   :  { %13533 = vpow2.f32 %v9633_v58 }
0x2058   :  { %13535 = vpow2.f32 %v9634_v7 }
0x2059   :  { %13537 = vpow2.f32 %v9635_v23 }
0x205a   :  { %13539 = vtanh.f32 %v12840_v26 }
0x2061   :  { %v13534_v43 = vpop.eup %13533 }
0x2062   :  { %v13536_v29 = vpop.eup %13535  ;;  %v7269_v13 = vadd.f32 1.0, %v13534_v43 }
0x2063   :  { %v7275_v55 = vadd.f32 1.0, %v13536_v29  ;;  %v13538_v35 = vpop.eup %13537 }
0x2064   :  { %13541 = vrcp.f32 %v7269_v13  ;;  %v13540_v5 = vpop.eup %13539  ;;  %v7282_v8 = vadd.f32 1.0, %v13538_v35 }
0x2065   :  { %13543 = vrcp.f32 %v7275_v55 }
0x2066   :  { %13545 = vrcp.f32 %v7282_v8 }
0x206e   :  { %v13542_v39 = vpop.eup %13541 }
0x206f   :  { %v13544_v10 = vpop.eup %13543  ;;  %v7286_v36 = vmul.f32 %v13542_v39, %v13540_v5 }
0x2070   :  { %v7285_v31 = vmul.f32 %v13544_v10, %v17078_v30  ;;  %v13546_v47 = vpop.eup %13545  ;;  %v9764_v30 = vld [vmem:[%s17963_s4 + $0x10] sm:$0xf] }
0x2071   :  { %v17632_v60 = vrot.slane %v9764_v30, %v14200_v46  ;;  %v17635_v16 = vrot.slane %v9764_v30, %v14205_v49  ;;  %v17640_v26 = vrot.slane %v9764_v30, %v14213_v57  ;;  %v17644_v49 = vrot.slane %v9764_v30, %v14220_v11 }
0x2072   :  { %v7287_v50 = vadd.f32 %v7286_v36, %v7285_v31 }
0x2074   :  { %13547 = vtanh.f32 %v7287_v50 }
0x207e   :  { %v13548_v37 = vpop.eup %13547 }
0x207f   :  { %v7289_v21 = vmul.f32 %v13548_v37, %v13546_v47 }
0x2081   :  { %7559 = vmatmul.mubr.f32.gmra.mrb[78].mxu0 %v7289_v21  ;;  %7672 = vmatmul.mubr.f32.gmra.mrb[78].mxu1 %v7289_v21 }
0x2082   :  { %7778 = vmatprep.mubr.f32.mxu0 %v13677_v3  ;;  %7849 = vmatprep.mubr.f32.mxu1 %v13677_v3 }
0x2085   :  { %7779 = vmatmul.mubr.f32.vlgmr.msra.gmra.mrb[64].mxu0 %v13677_v3  ;;  %7850 = vmatmul.mubr.f32.vlgmr.msra.gmra.mrb[64].mxu1 %v13677_v3 }
0x2086   :  { %12245 = vmatpush1.bf16.msra.mxu0 %v17317_v48  ;;  %12277 = vmatpush1.bf16.msra.mxu1 %v17326_v33 }
0x2087   :  { %12247 = vmatprep.subr.bf16.mxu0 %v17340_v18  ;;  %12279 = vmatprep.subr.bf16.mxu1 %v17351_v28 }
0x2088   :  { %7952 = vmatprep.mubr.f32.mxu0 %v13677_v3  ;;  %8023 = vmatprep.mubr.f32.mxu1 %v13677_v3 }
0x208a   :  { %12249 = vmatpush1.bf16.msra.mxu0 %v17353_v4  ;;  %12281 = vmatpush1.bf16.msra.mxu1 %v17362_v59 }
0x208b   :  { %12251 = vmatprep.subr.bf16.mxu0 %v17376_v52  ;;  %12283 = vmatprep.subr.bf16.mxu1 %v17387_v19 }
0x208e   :  { %12253 = vmatpush1.bf16.msra.mxu0 %v17389_v2  ;;  %12285 = vmatpush1.bf16.msra.mxu1 %v17398_v32 }
0x208f   :  { %12255 = vmatprep.subr.bf16.mxu0 %v17412_v44  ;;  %12287 = vmatprep.subr.bf16.mxu1 %v17423_v24 }
0x2092   :  { %12257 = vmatpush1.bf16.msra.mxu0 %v17425_v25  ;;  %12289 = vmatpush1.bf16.msra.mxu1 %v17437_v51 }
0x2093   :  { %12259 = vmatprep.subr.bf16.mxu0 %v17450_v17  ;;  %12291 = vmatprep.subr.bf16.mxu1 %v17452_v41 }
0x2096   :  { %12261 = vmatpush1.bf16.msra.mxu0 %v17464_v12  ;;  %12293 = vmatpush1.bf16.msra.mxu1 %v17477_v54 }
0x2097   :  { %12263 = vmatprep.subr.bf16.mxu0 %v17479_v53  ;;  %12295 = vmatprep.subr.bf16.mxu1 %v17490_v1 }
0x209a   :  { %12265 = vmatpush1.bf16.msra.mxu0 %v17502_v0  ;;  %12297 = vmatpush1.bf16.msra.mxu1 %v17515_v56 }
0x209b   :  { %12267 = vmatprep.subr.bf16.mxu0 %v17517_v9  ;;  %12299 = vmatprep.subr.bf16.mxu1 %v17529_v45 }
0x209e   :  { %12269 = vmatpush1.bf16.msra.mxu0 %v17538_v38  ;;  %12301 = vmatpush1.bf16.msra.mxu1 %v17542_v6 }
0x209f   :  { %12271 = vmatprep.subr.bf16.mxu0 %v17556_v63  ;;  %12303 = vmatprep.subr.bf16.mxu1 %v17567_v40 }
0x20a2   :  { %12273 = vmatpush1.bf16.msra.mxu0 %v17569_v14  ;;  %12305 = vmatpush1.bf16.msra.mxu1 %v17578_v42 }
0x20a3   :  { %12307 = vmatprep.subr.bf16.mxu0 %v17304_v22  ;;  %12339 = vmatprep.subr.bf16.mxu1 %v17315_v27 }
0x2158   :  { %v7780_v20 = vpop.f32.mrb[64].mxu0  ;;  %v7851_v62 = vpop.f32.mrb[64].mxu1 }
0x2159   :  { %v12842_v34 = vadd.f32 %v7780_v20, %v17632_v60  ;;  %v7782_v61 = vpop.f32.mrb[65].mxu0  ;;  %v7853_v58 = vpop.f32.mrb[65].mxu1  ;;  %v12858_v29 = vadd.f32 %v7851_v62, %v17644_v49 }
0x215a   :  { %v12843_v7 = vadd.f32 %v7782_v61, %v17635_v16  ;;  %v12859_v46 = vadd.f32 %v7853_v58, %v17640_v26 }
0x215b   :  { %v9765_v15 = vmul.f32 -1.442695, %v12842_v34 }
0x215c   :  { %v9766_v23 = vmul.f32 -1.442695, %v12843_v7  ;;  %v9767_v43 = vmul.f32 -1.442695, %v12859_v46 }
0x215d   :  { %13549 = vpow2.f32 %v9765_v15 }
0x215e   :  { %13551 = vpow2.f32 %v9766_v23 }
0x215f   :  { %13553 = vpow2.f32 %v9767_v43 }
0x2160   :  { %13555 = vtanh.f32 %v12858_v29 }
0x2167   :  { %v13550_v13 = vpop.eup %13549 }
0x2168   :  { %v13552_v55 = vpop.eup %13551  ;;  %v7863_v35 = vadd.f32 1.0, %v13550_v13 }
0x2169   :  { %v7869_v5 = vadd.f32 1.0, %v13552_v55  ;;  %v13554_v57 = vpop.eup %13553 }
0x216a   :  { %13557 = vrcp.f32 %v7863_v35  ;;  %v13556_v39 = vpop.eup %13555  ;;  %v7876_v31 = vadd.f32 1.0, %v13554_v57 }
0x216b   :  { %13559 = vrcp.f32 %v7869_v5 }
0x216c   :  { %13561 = vrcp.f32 %v7876_v31 }
0x2174   :  { %v13558_v10 = vpop.eup %13557 }
0x2175   :  { %v13560_v36 = vpop.eup %13559  ;;  %v7880_v8 = vmul.f32 %v13558_v10, %v13556_v39 }
0x2176   :  { %v7879_v50 = vmul.f32 0.0, %v13560_v36  ;;  %v13562_v47 = vpop.eup %13561 }
0x2178   :  { %v17647_v11 = vadd.f32 %v7880_v8, %v7879_v50 }
0x217a   :  { %13563 = vtanh.f32 %v17647_v11 }
0x2184   :  { %v13564_v37 = vpop.eup %13563 }
0x2185   :  { %v7883_v21 = vmul.f32 %v13564_v37, %v13562_v47 }
0x2187   :  { %7953 = vmatmul.mubr.f32.vlgmr.msra.gmra.mrb[66].mxu0 %v7883_v21  ;;  %8024 = vmatmul.mubr.f32.vlgmr.msra.gmra.mrb[66].mxu1 %v7883_v21 }
0x2188   :  { %12309 = vmatpush1.bf16.msra.mxu0 %v17317_v48  ;;  %12341 = vmatpush1.bf16.msra.mxu1 %v17326_v33 }
0x2189   :  { %12311 = vmatprep.subr.bf16.mxu0 %v17340_v18  ;;  %12343 = vmatprep.subr.bf16.mxu1 %v17351_v28 }
0x218a   :  { %8126 = vmatprep.mubr.f32.mxu0 %v13677_v3  ;;  %8197 = vmatprep.mubr.f32.mxu1 %v13677_v3 }
0x218c   :  { %12313 = vmatpush1.bf16.msra.mxu0 %v17353_v4  ;;  %12345 = vmatpush1.bf16.msra.mxu1 %v17362_v59 }
0x218d   :  { %12315 = vmatprep.subr.bf16.mxu0 %v17376_v52  ;;  %12347 = vmatprep.subr.bf16.mxu1 %v17387_v19 }
0x2190   :  { %12317 = vmatpush1.bf16.msra.mxu0 %v17389_v2  ;;  %12349 = vmatpush1.bf16.msra.mxu1 %v17398_v32 }
0x2191   :  { %12319 = vmatprep.subr.bf16.mxu0 %v17412_v44  ;;  %12351 = vmatprep.subr.bf16.mxu1 %v17423_v24 }
0x2194   :  { %12321 = vmatpush1.bf16.msra.mxu0 %v17425_v25  ;;  %12353 = vmatpush1.bf16.msra.mxu1 %v17437_v51 }
0x2195   :  { %12323 = vmatprep.subr.bf16.mxu0 %v17450_v17  ;;  %12355 = vmatprep.subr.bf16.mxu1 %v17452_v41 }
0x2198   :  { %12325 = vmatpush1.bf16.msra.mxu0 %v17464_v12  ;;  %12357 = vmatpush1.bf16.msra.mxu1 %v17477_v54 }
0x2199   :  { %12327 = vmatprep.subr.bf16.mxu0 %v17479_v53  ;;  %12359 = vmatprep.subr.bf16.mxu1 %v17490_v1 }
0x219c   :  { %12329 = vmatpush1.bf16.msra.mxu0 %v17502_v0  ;;  %12361 = vmatpush1.bf16.msra.mxu1 %v17515_v56 }
0x219d   :  { %12331 = vmatprep.subr.bf16.mxu0 %v17517_v9  ;;  %12363 = vmatprep.subr.bf16.mxu1 %v17529_v45 }
0x21a0   :  { %12333 = vmatpush1.bf16.msra.mxu0 %v17538_v38  ;;  %12365 = vmatpush1.bf16.msra.mxu1 %v17542_v6 }
0x21a1   :  { %12335 = vmatprep.subr.bf16.mxu0 %v17556_v63  ;;  %12367 = vmatprep.subr.bf16.mxu1 %v17567_v40 }
0x21a4   :  { %12337 = vmatpush1.bf16.msra.mxu0 %v17569_v14  ;;  %12369 = vmatpush1.bf16.msra.mxu1 %v17578_v42 }
0x21a5   :  { %12371 = vmatprep.subr.bf16.mxu0 %v17304_v22  ;;  %12403 = vmatprep.subr.bf16.mxu1 %v17315_v27 }
0x225a   :  { %v7954_v30 = vpop.f32.mrb[66].mxu0  ;;  %v8025_v20 = vpop.f32.mrb[66].mxu1 }
0x225b   :  { %v12844_v62 = vadd.f32 %v7954_v30, %v17632_v60  ;;  %v7956_v34 = vpop.f32.mrb[67].mxu0  ;;  %v8027_v61 = vpop.f32.mrb[67].mxu1  ;;  %v12860_v43 = vadd.f32 %v8025_v20, %v17644_v49 }
0x225c   :  { %v12845_v58 = vadd.f32 %v7956_v34, %v17635_v16  ;;  %v12861_v23 = vadd.f32 %v8027_v61, %v17640_v26 }
0x225d   :  { %v9768_v7 = vmul.f32 -1.442695, %v12844_v62 }
0x225e   :  { %v9769_v15 = vmul.f32 -1.442695, %v12845_v58  ;;  %v9770_v46 = vmul.f32 -1.442695, %v12861_v23 }
0x225f   :  { %13565 = vpow2.f32 %v9768_v7 }
0x2260   :  { %13567 = vpow2.f32 %v9769_v15 }
0x2261   :  { %13569 = vpow2.f32 %v9770_v46 }
0x2262   :  { %13571 = vtanh.f32 %v12860_v43 }
0x2269   :  { %v13566_v29 = vpop.eup %13565 }
0x226a   :  { %v13568_v13 = vpop.eup %13567  ;;  %v8037_v55 = vadd.f32 1.0, %v13566_v29 }
0x226b   :  { %v8043_v35 = vadd.f32 1.0, %v13568_v13  ;;  %v13570_v5 = vpop.eup %13569 }
0x226c   :  { %13573 = vrcp.f32 %v8037_v55  ;;  %v13572_v57 = vpop.eup %13571  ;;  %v8050_v8 = vadd.f32 1.0, %v13570_v5 }
0x226d   :  { %13575 = vrcp.f32 %v8043_v35 }
0x226e   :  { %13577 = vrcp.f32 %v8050_v8 }
0x2276   :  { %v13574_v39 = vpop.eup %13573 }
0x2277   :  { %v13576_v10 = vpop.eup %13575  ;;  %v8054_v36 = vmul.f32 %v13574_v39, %v13572_v57 }
0x2278   :  { %v8053_v31 = vmul.f32 %v13576_v10, %v17647_v11  ;;  %v13578_v47 = vpop.eup %13577 }
0x227a   :  { %v17689_v50 = vadd.f32 %v8054_v36, %v8053_v31 }
0x227c   :  { %13579 = vtanh.f32 %v17689_v50 }
0x2286   :  { %v13580_v37 = vpop.eup %13579 }
0x2287   :  { %v8057_v21 = vmul.f32 %v13580_v37, %v13578_v47 }
0x2289   :  { %8127 = vmatmul.mubr.f32.vlgmr.msra.gmra.mrb[68].mxu0 %v8057_v21  ;;  %8198 = vmatmul.mubr.f32.vlgmr.msra.gmra.mrb[68].mxu1 %v8057_v21 }
0x228a   :  { %12373 = vmatpush1.bf16.msra.mxu0 %v17317_v48  ;;  %12405 = vmatpush1.bf16.msra.mxu1 %v17326_v33 }
0x228b   :  { %12375 = vmatprep.subr.bf16.mxu0 %v17340_v18  ;;  %12407 = vmatprep.subr.bf16.mxu1 %v17351_v28 }
0x228c   :  { %8300 = vmatprep.mubr.f32.mxu0 %v13677_v3  ;;  %8371 = vmatprep.mubr.f32.mxu1 %v13677_v3 }
0x228e   :  { %12377 = vmatpush1.bf16.msra.mxu0 %v17353_v4  ;;  %12409 = vmatpush1.bf16.msra.mxu1 %v17362_v59 }
0x228f   :  { %12379 = vmatprep.subr.bf16.mxu0 %v17376_v52  ;;  %12411 = vmatprep.subr.bf16.mxu1 %v17387_v19 }
0x2292   :  { %12381 = vmatpush1.bf16.msra.mxu0 %v17389_v2  ;;  %12413 = vmatpush1.bf16.msra.mxu1 %v17398_v32 }
0x2293   :  { %12383 = vmatprep.subr.bf16.mxu0 %v17412_v44  ;;  %12415 = vmatprep.subr.bf16.mxu1 %v17423_v24 }
0x2296   :  { %12385 = vmatpush1.bf16.msra.mxu0 %v17425_v25  ;;  %12417 = vmatpush1.bf16.msra.mxu1 %v17437_v51 }
0x2297   :  { %12387 = vmatprep.subr.bf16.mxu0 %v17450_v17  ;;  %12419 = vmatprep.subr.bf16.mxu1 %v17452_v41 }
0x229a   :  { %12389 = vmatpush1.bf16.msra.mxu0 %v17464_v12  ;;  %12421 = vmatpush1.bf16.msra.mxu1 %v17477_v54 }
0x229b   :  { %12391 = vmatprep.subr.bf16.mxu0 %v17479_v53  ;;  %12423 = vmatprep.subr.bf16.mxu1 %v17490_v1 }
0x229e   :  { %12393 = vmatpush1.bf16.msra.mxu0 %v17502_v0  ;;  %12425 = vmatpush1.bf16.msra.mxu1 %v17515_v56 }
0x229f   :  { %12395 = vmatprep.subr.bf16.mxu0 %v17517_v9  ;;  %12427 = vmatprep.subr.bf16.mxu1 %v17529_v45 }
0x22a2   :  { %12397 = vmatpush1.bf16.msra.mxu0 %v17538_v38  ;;  %12429 = vmatpush1.bf16.msra.mxu1 %v17542_v6 }
0x22a3   :  { %12399 = vmatprep.subr.bf16.mxu0 %v17556_v63  ;;  %12431 = vmatprep.subr.bf16.mxu1 %v17567_v40 }
0x22a6   :  { %12401 = vmatpush1.bf16.msra.mxu0 %v17569_v14  ;;  %12433 = vmatpush1.bf16.msra.mxu1 %v17578_v42 }
0x22a7   :  { %12435 = vmatprep.subr.bf16.mxu0 %v17304_v22  ;;  %12467 = vmatprep.subr.bf16.mxu1 %v17315_v27 }
0x235c   :  { %v8128_v11 = vpop.f32.mrb[68].mxu0  ;;  %v8199_v30 = vpop.f32.mrb[68].mxu1 }
0x235d   :  { %v12846_v20 = vadd.f32 %v8128_v11, %v17632_v60  ;;  %v8130_v62 = vpop.f32.mrb[69].mxu0  ;;  %v8201_v34 = vpop.f32.mrb[69].mxu1  ;;  %v12862_v46 = vadd.f32 %v8199_v30, %v17644_v49 }
0x235e   :  { %v12847_v61 = vadd.f32 %v8130_v62, %v17635_v16  ;;  %v12863_v15 = vadd.f32 %v8201_v34, %v17640_v26 }
0x235f   :  { %v9771_v58 = vmul.f32 -1.442695, %v12846_v20 }
0x2360   :  { %v9772_v7 = vmul.f32 -1.442695, %v12847_v61  ;;  %v9773_v23 = vmul.f32 -1.442695, %v12863_v15 }
0x2361   :  { %13581 = vpow2.f32 %v9771_v58 }
0x2362   :  { %13583 = vpow2.f32 %v9772_v7 }
0x2363   :  { %13585 = vpow2.f32 %v9773_v23 }
0x2364   :  { %13587 = vtanh.f32 %v12862_v46 }
0x236b   :  { %v13582_v43 = vpop.eup %13581 }
0x236c   :  { %v13584_v29 = vpop.eup %13583  ;;  %v8211_v13 = vadd.f32 1.0, %v13582_v43 }
0x236d   :  { %v8217_v55 = vadd.f32 1.0, %v13584_v29  ;;  %v13586_v35 = vpop.eup %13585 }
0x236e   :  { %13589 = vrcp.f32 %v8211_v13  ;;  %v13588_v5 = vpop.eup %13587  ;;  %v8224_v36 = vadd.f32 1.0, %v13586_v35 }
0x236f   :  { %13591 = vrcp.f32 %v8217_v55 }
0x2370   :  { %13593 = vrcp.f32 %v8224_v36 }
0x2378   :  { %v13590_v57 = vpop.eup %13589 }
0x2379   :  { %v13592_v39 = vpop.eup %13591  ;;  %v8228_v10 = vmul.f32 %v13590_v57, %v13588_v5 }
0x237a   :  { %v8227_v8 = vmul.f32 %v13592_v39, %v17689_v50  ;;  %v13594_v47 = vpop.eup %13593 }
0x237c   :  { %v17731_v31 = vadd.f32 %v8228_v10, %v8227_v8 }
0x237e   :  { %13595 = vtanh.f32 %v17731_v31 }
0x2388   :  { %v13596_v37 = vpop.eup %13595 }
0x2389   :  { %v8231_v21 = vmul.f32 %v13596_v37, %v13594_v47 }
0x238b   :  { %8301 = vmatmul.mubr.f32.vlgmr.msra.gmra.mrb[70].mxu0 %v8231_v21  ;;  %8372 = vmatmul.mubr.f32.vlgmr.msra.gmra.mrb[70].mxu1 %v8231_v21 }
0x238c   :  { %12437 = vmatpush1.bf16.msra.mxu0 %v17317_v48  ;;  %12469 = vmatpush1.bf16.msra.mxu1 %v17326_v33 }
0x238d   :  { %12439 = vmatprep.subr.bf16.mxu0 %v17340_v18  ;;  %12471 = vmatprep.subr.bf16.mxu1 %v17351_v28 }
0x238e   :  { %8474 = vmatprep.mubr.f32.mxu0 %v13677_v3  ;;  %8545 = vmatprep.mubr.f32.mxu1 %v13677_v3 }
0x2390   :  { %12441 = vmatpush1.bf16.msra.mxu0 %v17353_v4  ;;  %12473 = vmatpush1.bf16.msra.mxu1 %v17362_v59 }
0x2391   :  { %12443 = vmatprep.subr.bf16.mxu0 %v17376_v52  ;;  %12475 = vmatprep.subr.bf16.mxu1 %v17387_v19 }
0x2394   :  { %12445 = vmatpush1.bf16.msra.mxu0 %v17389_v2  ;;  %12477 = vmatpush1.bf16.msra.mxu1 %v17398_v32 }
0x2395   :  { %12447 = vmatprep.subr.bf16.mxu0 %v17412_v44  ;;  %12479 = vmatprep.subr.bf16.mxu1 %v17423_v24 }
0x2398   :  { %12449 = vmatpush1.bf16.msra.mxu0 %v17425_v25  ;;  %12481 = vmatpush1.bf16.msra.mxu1 %v17437_v51 }
0x2399   :  { %12451 = vmatprep.subr.bf16.mxu0 %v17450_v17  ;;  %12483 = vmatprep.subr.bf16.mxu1 %v17452_v41 }
0x239c   :  { %12453 = vmatpush1.bf16.msra.mxu0 %v17464_v12  ;;  %12485 = vmatpush1.bf16.msra.mxu1 %v17477_v54 }
0x239d   :  { %12455 = vmatprep.subr.bf16.mxu0 %v17479_v53  ;;  %12487 = vmatprep.subr.bf16.mxu1 %v17490_v1 }
0x23a0   :  { %12457 = vmatpush1.bf16.msra.mxu0 %v17502_v0  ;;  %12489 = vmatpush1.bf16.msra.mxu1 %v17515_v56 }
0x23a1   :  { %12459 = vmatprep.subr.bf16.mxu0 %v17517_v9  ;;  %12491 = vmatprep.subr.bf16.mxu1 %v17529_v45 }
0x23a4   :  { %12461 = vmatpush1.bf16.msra.mxu0 %v17538_v38  ;;  %12493 = vmatpush1.bf16.msra.mxu1 %v17542_v6 }
0x23a5   :  { %12463 = vmatprep.subr.bf16.mxu0 %v17556_v63  ;;  %12495 = vmatprep.subr.bf16.mxu1 %v17567_v40 }
0x23a8   :  { %12465 = vmatpush1.bf16.msra.mxu0 %v17569_v14  ;;  %12497 = vmatpush1.bf16.msra.mxu1 %v17578_v42 }
0x23a9   :  { %12499 = vmatprep.subr.bf16.mxu0 %v17304_v22  ;;  %12531 = vmatprep.subr.bf16.mxu1 %v17315_v27 }
0x245e   :  { %v8302_v50 = vpop.f32.mrb[70].mxu0  ;;  %v8373_v11 = vpop.f32.mrb[70].mxu1 }
0x245f   :  { %v12848_v30 = vadd.f32 %v8302_v50, %v17632_v60  ;;  %v8304_v20 = vpop.f32.mrb[71].mxu0  ;;  %v8375_v62 = vpop.f32.mrb[71].mxu1  ;;  %v12864_v23 = vadd.f32 %v8373_v11, %v17644_v49 }
0x2460   :  { %v12849_v34 = vadd.f32 %v8304_v20, %v17635_v16  ;;  %v12865_v7 = vadd.f32 %v8375_v62, %v17640_v26 }
0x2461   :  { %v9774_v61 = vmul.f32 -1.442695, %v12848_v30 }
0x2462   :  { %v9775_v58 = vmul.f32 -1.442695, %v12849_v34  ;;  %v9776_v15 = vmul.f32 -1.442695, %v12865_v7 }
0x2463   :  { %13597 = vpow2.f32 %v9774_v61 }
0x2464   :  { %13599 = vpow2.f32 %v9775_v58 }
0x2465   :  { %13601 = vpow2.f32 %v9776_v15 }
0x2466   :  { %13603 = vtanh.f32 %v12864_v23 }
0x246d   :  { %v13598_v46 = vpop.eup %13597 }
0x246e   :  { %v13600_v43 = vpop.eup %13599  ;;  %v8385_v29 = vadd.f32 1.0, %v13598_v46 }
0x246f   :  { %v8391_v13 = vadd.f32 1.0, %v13600_v43  ;;  %v13602_v55 = vpop.eup %13601 }
0x2470   :  { %13605 = vrcp.f32 %v8385_v29  ;;  %v13604_v35 = vpop.eup %13603  ;;  %v8398_v10 = vadd.f32 1.0, %v13602_v55 }
0x2471   :  { %13607 = vrcp.f32 %v8391_v13 }
0x2472   :  { %13609 = vrcp.f32 %v8398_v10 }
0x247a   :  { %v13606_v5 = vpop.eup %13605 }
0x247b   :  { %v13608_v57 = vpop.eup %13607  ;;  %v8402_v39 = vmul.f32 %v13606_v5, %v13604_v35 }
0x247c   :  { %v8401_v36 = vmul.f32 %v13608_v57, %v17731_v31  ;;  %v13610_v47 = vpop.eup %13609 }
0x247e   :  { %v17773_v8 = vadd.f32 %v8402_v39, %v8401_v36 }
0x2480   :  { %13611 = vtanh.f32 %v17773_v8 }
0x248a   :  { %v13612_v37 = vpop.eup %13611 }
0x248b   :  { %v8405_v21 = vmul.f32 %v13612_v37, %v13610_v47 }
0x248d   :  { %8475 = vmatmul.mubr.f32.vlgmr.msra.gmra.mrb[72].mxu0 %v8405_v21  ;;  %8546 = vmatmul.mubr.f32.vlgmr.msra.gmra.mrb[72].mxu1 %v8405_v21 }
0x248e   :  { %12501 = vmatpush1.bf16.msra.mxu0 %v17317_v48  ;;  %12533 = vmatpush1.bf16.msra.mxu1 %v17326_v33 }
0x248f   :  { %12503 = vmatprep.subr.bf16.mxu0 %v17340_v18  ;;  %12535 = vmatprep.subr.bf16.mxu1 %v17351_v28 }
0x2490   :  { %8648 = vmatprep.mubr.f32.mxu0 %v13677_v3  ;;  %8719 = vmatprep.mubr.f32.mxu1 %v13677_v3 }
0x2492   :  { %12505 = vmatpush1.bf16.msra.mxu0 %v17353_v4  ;;  %12537 = vmatpush1.bf16.msra.mxu1 %v17362_v59 }
0x2493   :  { %12507 = vmatprep.subr.bf16.mxu0 %v17376_v52  ;;  %12539 = vmatprep.subr.bf16.mxu1 %v17387_v19 }
0x2496   :  { %12509 = vmatpush1.bf16.msra.mxu0 %v17389_v2  ;;  %12541 = vmatpush1.bf16.msra.mxu1 %v17398_v32 }
0x2497   :  { %12511 = vmatprep.subr.bf16.mxu0 %v17412_v44  ;;  %12543 = vmatprep.subr.bf16.mxu1 %v17423_v24 }
0x249a   :  { %12513 = vmatpush1.bf16.msra.mxu0 %v17425_v25  ;;  %12545 = vmatpush1.bf16.msra.mxu1 %v17437_v51 }
0x249b   :  { %12515 = vmatprep.subr.bf16.mxu0 %v17450_v17  ;;  %12547 = vmatprep.subr.bf16.mxu1 %v17452_v41 }
0x249e   :  { %12517 = vmatpush1.bf16.msra.mxu0 %v17464_v12  ;;  %12549 = vmatpush1.bf16.msra.mxu1 %v17477_v54 }
0x249f   :  { %12519 = vmatprep.subr.bf16.mxu0 %v17479_v53  ;;  %12551 = vmatprep.subr.bf16.mxu1 %v17490_v1 }
0x24a2   :  { %12521 = vmatpush1.bf16.msra.mxu0 %v17502_v0  ;;  %12553 = vmatpush1.bf16.msra.mxu1 %v17515_v56 }
0x24a3   :  { %12523 = vmatprep.subr.bf16.mxu0 %v17517_v9  ;;  %12555 = vmatprep.subr.bf16.mxu1 %v17529_v45 }
0x24a6   :  { %12525 = vmatpush1.bf16.msra.mxu0 %v17538_v38  ;;  %12557 = vmatpush1.bf16.msra.mxu1 %v17542_v6 }
0x24a7   :  { %12527 = vmatprep.subr.bf16.mxu0 %v17556_v63  ;;  %12559 = vmatprep.subr.bf16.mxu1 %v17567_v40 }
0x24aa   :  { %12529 = vmatpush1.bf16.msra.mxu0 %v17569_v14  ;;  %12561 = vmatpush1.bf16.msra.mxu1 %v17578_v42 }
0x24ab   :  { %12563 = vmatprep.subr.bf16.mxu0 %v17304_v22  ;;  %12595 = vmatprep.subr.bf16.mxu1 %v17315_v27 }
0x2560   :  { %v8476_v31 = vpop.f32.mrb[72].mxu0  ;;  %v8547_v50 = vpop.f32.mrb[72].mxu1 }
0x2561   :  { %v12850_v11 = vadd.f32 %v8476_v31, %v17632_v60  ;;  %v8478_v30 = vpop.f32.mrb[73].mxu0  ;;  %v8549_v20 = vpop.f32.mrb[73].mxu1  ;;  %v12866_v15 = vadd.f32 %v8547_v50, %v17644_v49 }
0x2562   :  { %v12851_v62 = vadd.f32 %v8478_v30, %v17635_v16  ;;  %v12867_v58 = vadd.f32 %v8549_v20, %v17640_v26 }
0x2563   :  { %v9777_v34 = vmul.f32 -1.442695, %v12850_v11 }
0x2564   :  { %v9778_v61 = vmul.f32 -1.442695, %v12851_v62  ;;  %v9779_v7 = vmul.f32 -1.442695, %v12867_v58 }
0x2565   :  { %13613 = vpow2.f32 %v9777_v34 }
0x2566   :  { %13615 = vpow2.f32 %v9778_v61 }
0x2567   :  { %13617 = vpow2.f32 %v9779_v7 }
0x2568   :  { %13619 = vtanh.f32 %v12866_v15 }
0x256f   :  { %v13614_v23 = vpop.eup %13613 }
0x2570   :  { %v13616_v46 = vpop.eup %13615  ;;  %v8559_v43 = vadd.f32 1.0, %v13614_v23 }
0x2571   :  { %v8565_v29 = vadd.f32 1.0, %v13616_v46  ;;  %v13618_v13 = vpop.eup %13617 }
0x2572   :  { %13621 = vrcp.f32 %v8559_v43  ;;  %v13620_v55 = vpop.eup %13619  ;;  %v8572_v39 = vadd.f32 1.0, %v13618_v13 }
0x2573   :  { %13623 = vrcp.f32 %v8565_v29 }
0x2574   :  { %13625 = vrcp.f32 %v8572_v39 }
0x257c   :  { %v13622_v35 = vpop.eup %13621 }
0x257d   :  { %v13624_v5 = vpop.eup %13623  ;;  %v8576_v57 = vmul.f32 %v13622_v35, %v13620_v55 }
0x257e   :  { %v8575_v10 = vmul.f32 %v13624_v5, %v17773_v8  ;;  %v13626_v47 = vpop.eup %13625 }
0x2580   :  { %v17815_v36 = vadd.f32 %v8576_v57, %v8575_v10 }
0x2582   :  { %13627 = vtanh.f32 %v17815_v36 }
0x258c   :  { %v13628_v37 = vpop.eup %13627 }
0x258d   :  { %v8579_v21 = vmul.f32 %v13628_v37, %v13626_v47  ;;  %v9105_v37 = vld [vmem:[%s17965_s5 + $0x18] sm:$0xff] }
0x258f   :  { %8649 = vmatmul.mubr.f32.vlgmr.msra.gmra.mrb[74].mxu0 %v8579_v21  ;;  %8720 = vmatmul.mubr.f32.vlgmr.msra.gmra.mrb[74].mxu1 %v8579_v21 }
0x2590   :  { %12565 = vmatpush1.bf16.msra.mxu0 %v17317_v48  ;;  %12597 = vmatpush1.bf16.msra.mxu1 %v17326_v33 }
0x2591   :  { %12567 = vmatprep.subr.bf16.mxu0 %v17340_v18  ;;  %12599 = vmatprep.subr.bf16.mxu1 %v17351_v28 }
0x2592   :  { %8822 = vmatprep.mubr.f32.mxu0 %v13677_v3  ;;  %8893 = vmatprep.mubr.f32.mxu1 %v13677_v3 }
0x2594   :  { %12569 = vmatpush1.bf16.msra.mxu0 %v17353_v4  ;;  %12601 = vmatpush1.bf16.msra.mxu1 %v17362_v59 }
0x2595   :  { %12571 = vmatprep.subr.bf16.mxu0 %v17376_v52  ;;  %12603 = vmatprep.subr.bf16.mxu1 %v17387_v19 }
0x2598   :  { %12573 = vmatpush1.bf16.msra.mxu0 %v17389_v2  ;;  %12605 = vmatpush1.bf16.msra.mxu1 %v17398_v32 }
0x2599   :  { %12575 = vmatprep.subr.bf16.mxu0 %v17412_v44  ;;  %12607 = vmatprep.subr.bf16.mxu1 %v17423_v24 }
0x259c   :  { %12577 = vmatpush1.bf16.msra.mxu0 %v17425_v25  ;;  %12609 = vmatpush1.bf16.msra.mxu1 %v17437_v51 }
0x259d   :  { %12579 = vmatprep.subr.bf16.mxu0 %v17450_v17  ;;  %12611 = vmatprep.subr.bf16.mxu1 %v17452_v41 }
0x25a0   :  { %12581 = vmatpush1.bf16.msra.mxu0 %v17464_v12  ;;  %12613 = vmatpush1.bf16.msra.mxu1 %v17477_v54 }
0x25a1   :  { %12583 = vmatprep.subr.bf16.mxu0 %v17479_v53  ;;  %12615 = vmatprep.subr.bf16.mxu1 %v17490_v1 }
0x25a4   :  { %12585 = vmatpush1.bf16.msra.mxu0 %v17502_v0  ;;  %12617 = vmatpush1.bf16.msra.mxu1 %v17515_v56 }
0x25a5   :  { %12587 = vmatprep.subr.bf16.mxu0 %v17517_v9  ;;  %12619 = vmatprep.subr.bf16.mxu1 %v17529_v45 }
0x25a8   :  { %12589 = vmatpush1.bf16.msra.mxu0 %v17538_v38  ;;  %12621 = vmatpush1.bf16.msra.mxu1 %v17542_v6 }
0x25a9   :  { %12591 = vmatprep.subr.bf16.mxu0 %v17556_v63  ;;  %12623 = vmatprep.subr.bf16.mxu1 %v17567_v40 }
0x25ac   :  { %12593 = vmatpush1.bf16.msra.mxu0 %v17569_v14  ;;  %12625 = vmatpush1.bf16.msra.mxu1 %v17578_v42 }
0x25ad   :  { %12627 = vmatprep.subr.bf16.mxu0 %v17304_v22  ;;  %12659 = vmatprep.subr.bf16.mxu1 %v17315_v27 }
0x2662   :  { %v8650_v8 = vpop.f32.mrb[74].mxu0  ;;  %v8721_v31 = vpop.f32.mrb[74].mxu1 }
0x2663   :  { %v12852_v50 = vadd.f32 %v8650_v8, %v17632_v60  ;;  %v8652_v11 = vpop.f32.mrb[75].mxu0  ;;  %v8723_v30 = vpop.f32.mrb[75].mxu1  ;;  %v12868_v7 = vadd.f32 %v8721_v31, %v17644_v49  ;;  %v9106_v8 = vld [vmem:[%s17965_s5 + $0x20] sm:$0xff]  ;;  %v9107_v31 = vld [vmem:[%s17965_s5 + $0x28] sm:$0xff] }
0x2664   :  { %v12853_v20 = vadd.f32 %v8652_v11, %v17635_v16  ;;  %v12869_v61 = vadd.f32 %v8723_v30, %v17640_v26  ;;  %v9108_v11 = vld [vmem:[%s17965_s5 + $0x30] sm:$0xff]  ;;  %v9109_v30 = vld [vmem:[%s17965_s5 + $0x38] sm:$0xff] }
0x2665   :  { %v9780_v62 = vmul.f32 -1.442695, %v12852_v50  ;;  %v12697_v50 = vpack.c.bf16 %v9107_v31, %v9106_v8 }
0x2666   :  { %v9781_v34 = vmul.f32 -1.442695, %v12853_v20  ;;  %v9782_v58 = vmul.f32 -1.442695, %v12869_v61  ;;  %v12700_v20 = vpack.c.bf16 %v9109_v30, %v9108_v11 }
0x2667   :  { %13629 = vpow2.f32 %v9780_v62  ;;  %v9110_v62 = vld [vmem:[%s17965_s5 + $0x40] sm:$0xff] }
0x2668   :  { %13631 = vpow2.f32 %v9781_v34  ;;  %v9111_v34 = vld [vmem:[%s17965_s5 + $0x48] sm:$0xff] }
0x2669   :  { %13633 = vpow2.f32 %v9782_v58  ;;  %v12703_v61 = vpack.c.bf16 %v9111_v34, %v9110_v62  ;;  %v9112_v58 = vld [vmem:[%s17965_s5 + $0x50] sm:$0xff] }
0x266a   :  { %13635 = vtanh.f32 %v12868_v7  ;;  %v9113_v7 = vld [vmem:[%s17965_s5 + $0x58] sm:$0xff] }
0x2671   :  { %v13630_v22 = vpop.eup %13629 }
0x2672   :  { %v13632_v15 = vpop.eup %13631  ;;  %v8733_v27 = vadd.f32 1.0, %v13630_v22  ;;  %v9114_v22 = vld [vmem:[%s17965_s5 + $0x60] sm:$0xff] }
0x2673   :  { %v8739_v23 = vadd.f32 1.0, %v13632_v15  ;;  %v13634_v46 = vpop.eup %13633  ;;  %v12706_v15 = vpack.c.bf16 %v9113_v7, %v9112_v58 }
0x2674   :  { %13637 = vrcp.f32 %v8733_v27  ;;  %v13636_v43 = vpop.eup %13635  ;;  %v8746_v35 = vadd.f32 1.0, %v13634_v46  ;;  %v9115_v27 = vld [vmem:[%s17965_s5 + $0x68] sm:$0xff]  ;;  %v9116_v46 = vld [vmem:[%s17965_s5 + $0x70] sm:$0xff] }
0x2675   :  { %13639 = vrcp.f32 %v8739_v23  ;;  %v12709_v23 = vpack.c.bf16 %v9115_v27, %v9114_v22 }
0x2676   :  { %13641 = vrcp.f32 %v8746_v35 }
0x267e   :  { %v13638_v29 = vpop.eup %13637 }
0x267f   :  { %v13640_v13 = vpop.eup %13639  ;;  %v8750_v55 = vmul.f32 %v13638_v29, %v13636_v43  ;;  %v9117_v43 = vld [vmem:[%s17965_s5 + $0x78] sm:$0xff] }
0x2680   :  { %v8749_v5 = vmul.f32 %v13640_v13, %v17815_v36  ;;  %v13642_v39 = vpop.eup %13641  ;;  %v9104_v36 = vld [vmem:[%s17965_s5 + $0x10] sm:$0xff]  ;;  %v12712_v29 = vpack.c.bf16 %v9117_v43, %v9116_v46 }
0x2681   :  { %v12694_v21 = vpack.c.bf16 %v9105_v37, %v9104_v36 }
0x2682   :  { %v17857_v57 = vadd.f32 %v8750_v55, %v8749_v5 }
0x2684   :  { %13643 = vtanh.f32 %v17857_v57 }
0x268e   :  { %v13644_v10 = vpop.eup %13643 }
0x268f   :  { %v8753_v47 = vmul.f32 %v13644_v10, %v13642_v39 }
0x2691   :  { %8823 = vmatmul.mubr.f32.vlgmr.msra.gmra.mrb[76].mxu0 %v8753_v47  ;;  %8894 = vmatmul.mubr.f32.vlgmr.msra.gmra.mrb[76].mxu1 %v8753_v47 }
0x2692   :  { %12629 = vmatpush1.bf16.msra.mxu0 %v17317_v48  ;;  %12661 = vmatpush1.bf16.msra.mxu1 %v17326_v33 }
0x2693   :  { %12631 = vmatprep.subr.bf16.mxu0 %v17340_v18  ;;  %12663 = vmatprep.subr.bf16.mxu1 %v17351_v28 }
0x2694   :  { %8996 = vmatprep.mubr.f32.mxu0 %v13677_v3  ;;  %9067 = vmatprep.mubr.f32.mxu1 %v13677_v3 }
0x2696   :  { %12633 = vmatpush1.bf16.msra.mxu0 %v17353_v4  ;;  %12665 = vmatpush1.bf16.msra.mxu1 %v17362_v59 }
0x2697   :  { %12635 = vmatprep.subr.bf16.mxu0 %v17376_v52  ;;  %12667 = vmatprep.subr.bf16.mxu1 %v17387_v19 }
0x269a   :  { %12637 = vmatpush1.bf16.msra.mxu0 %v17389_v2  ;;  %12669 = vmatpush1.bf16.msra.mxu1 %v17398_v32 }
0x269b   :  { %12639 = vmatprep.subr.bf16.mxu0 %v17412_v44  ;;  %12671 = vmatprep.subr.bf16.mxu1 %v17423_v24 }
0x269e   :  { %12641 = vmatpush1.bf16.msra.mxu0 %v17425_v25  ;;  %12673 = vmatpush1.bf16.msra.mxu1 %v17437_v51 }
0x269f   :  { %12643 = vmatprep.subr.bf16.mxu0 %v17450_v17  ;;  %12675 = vmatprep.subr.bf16.mxu1 %v17452_v41 }
0x26a2   :  { %12645 = vmatpush1.bf16.msra.mxu0 %v17464_v12  ;;  %12677 = vmatpush1.bf16.msra.mxu1 %v17477_v54 }
0x26a3   :  { %12647 = vmatprep.subr.bf16.mxu0 %v17479_v53  ;;  %12679 = vmatprep.subr.bf16.mxu1 %v17490_v1 }
0x26a6   :  { %12649 = vmatpush1.bf16.msra.mxu0 %v17502_v0  ;;  %12681 = vmatpush1.bf16.msra.mxu1 %v17515_v56 }
0x26a7   :  { %12651 = vmatprep.subr.bf16.mxu0 %v17517_v9  ;;  %12683 = vmatprep.subr.bf16.mxu1 %v17529_v45 }
0x26aa   :  { %12653 = vmatpush1.bf16.msra.mxu0 %v17538_v38  ;;  %12685 = vmatpush1.bf16.msra.mxu1 %v17542_v6 }
0x26ab   :  { %12655 = vmatprep.subr.bf16.mxu0 %v17556_v63  ;;  %12687 = vmatprep.subr.bf16.mxu1 %v17567_v40  ;;  %v9102_v63 = vld [vmem:[%s17965_s5] sm:$0xff]  ;;  %v9103_v40 = vld [vmem:[%s17965_s5 + $0x8] sm:$0xff] }
0x26ae   :  { %12657 = vmatpush1.bf16.msra.mxu0 %v17569_v14  ;;  %12689 = vmatpush1.bf16.msra.mxu1 %v17578_v42  ;;  %v12691_v14 = vpack.c.bf16 %v9103_v40, %v9102_v63  ;;  %v13678_v42 = vmov 0.0|0.0  }
0x26af   :  { %12690 = vmatprep.subr.bf16.mxu0 %v13678_v42 }
0x2764   :  { %v8824_v48 = vpop.f32.mrb[76].mxu0  ;;  %v8895_v33 = vpop.f32.mrb[76].mxu1 }
0x2765   :  { %v12854_v18 = vadd.f32 %v8824_v48, %v17632_v60  ;;  %v8826_v28 = vpop.f32.mrb[77].mxu0  ;;  %v8897_v4 = vpop.f32.mrb[77].mxu1  ;;  %v12870_v44 = vadd.f32 %v8895_v33, %v17644_v49 }
0x2766   :  { %v12855_v59 = vadd.f32 %v8826_v28, %v17635_v16  ;;  %v12871_v2 = vadd.f32 %v8897_v4, %v17640_v26 }
0x2767   :  { %v9783_v52 = vmul.f32 -1.442695, %v12854_v18 }
0x2768   :  { %v9784_v19 = vmul.f32 -1.442695, %v12855_v59  ;;  %v9785_v32 = vmul.f32 -1.442695, %v12871_v2 }
0x2769   :  { %13645 = vpow2.f32 %v9783_v52 }
0x276a   :  { %13647 = vpow2.f32 %v9784_v19 }
0x276b   :  { %13649 = vpow2.f32 %v9785_v32 }
0x276c   :  { %13651 = vtanh.f32 %v12870_v44 }
0x2773   :  { %v13646_v24 = vpop.eup %13645 }
0x2774   :  { %v13648_v25 = vpop.eup %13647  ;;  %v8907_v51 = vadd.f32 1.0, %v13646_v24 }
0x2775   :  { %v8913_v17 = vadd.f32 1.0, %v13648_v25  ;;  %v13650_v41 = vpop.eup %13649 }
0x2776   :  { %13653 = vrcp.f32 %v8907_v51  ;;  %v13652_v12 = vpop.eup %13651  ;;  %v8920_v0 = vadd.f32 1.0, %v13650_v41  ;;  %v9789_v51 = vld [vmem:[%s17966_s6] ss:$0 sm:$0xff] }
0x2777   :  { %13655 = vrcp.f32 %v8913_v17 }
0x2778   :  { %13657 = vrcp.f32 %v8920_v0 }
0x2780   :  { %v13654_v54 = vpop.eup %13653 }
0x2781   :  { %v13656_v53 = vpop.eup %13655  ;;  %v8924_v1 = vmul.f32 %v13654_v54, %v13652_v12 }
0x2782   :  { %v8923_v56 = vmul.f32 %v13656_v53, %v17857_v57  ;;  %v13658_v45 = vpop.eup %13657 }
0x2784   :  { %v17897_v9 = vadd.f32 %v8924_v1, %v8923_v56 }
0x2786   :  { %13659 = vtanh.f32 %v17897_v9 }
0x2790   :  { %v13660_v38 = vpop.eup %13659 }
0x2791   :  { %v8927_v6 = vmul.f32 %v13660_v38, %v13658_v45 }
0x2793   :  { %8997 = vmatmul.mubr.f32.vlgmr.msra.gmra.mrb[78].mxu0 %v8927_v6  ;;  %9068 = vmatmul.mubr.f32.vlgmr.msra.gmra.mrb[78].mxu1 %v8927_v6 }
0x2794   :  { %12692 = vmatpush3.bf16.msra.mxu0 %v12691_v14  ;;  %9839 = vmatprep.mubr.msk.f32.mxu0 %vm13679_vm1, %v13677_v3 }
0x2795   :  { %12693 = vmatprep.subr.bf16.mxu0 %v13678_v42 }
0x2798   :  { %12695 = vmatpush3.bf16.msra.mxu0 %v12694_v21 }
0x2799   :  { %12696 = vmatprep.subr.bf16.mxu0 %v13678_v42 }
0x279c   :  { %12698 = vmatpush3.bf16.msra.mxu0 %v12697_v50 }
0x279d   :  { %12699 = vmatprep.subr.bf16.mxu0 %v13678_v42 }
0x27a0   :  { %12701 = vmatpush3.bf16.msra.mxu0 %v12700_v20 }
0x27a1   :  { %12702 = vmatprep.subr.bf16.mxu0 %v13678_v42 }
0x27a4   :  { %12704 = vmatpush3.bf16.msra.mxu0 %v12703_v61 }
0x27a5   :  { %12705 = vmatprep.subr.bf16.mxu0 %v13678_v42 }
0x27a8   :  { %12707 = vmatpush3.bf16.msra.mxu0 %v12706_v15 }
0x27a9   :  { %12708 = vmatprep.subr.bf16.mxu0 %v13678_v42 }
0x27ac   :  { %12710 = vmatpush3.bf16.msra.mxu0 %v12709_v23 }
0x27ad   :  { %12711 = vmatprep.subr.bf16.mxu0 %v13678_v42 }
0x27b0   :  { %12713 = vmatpush3.bf16.msra.mxu0 %v12712_v29 }
0x2866   :  { %v8998_v13 = vpop.f32.mrb[78].mxu0  ;;  %v9069_v55 = vpop.f32.mrb[78].mxu1 }
0x2867   :  { %v12856_v35 = vadd.f32 %v8998_v13, %v17632_v60  ;;  %v9000_v3 = vpop.f32.mrb[79].mxu0  ;;  %v9071_v5 = vpop.f32.mrb[79].mxu1  ;;  %v12872_v33 = vadd.f32 %v9069_v55, %v17644_v49 }
0x2868   :  { %v12857_v57 = vadd.f32 %v9000_v3, %v17635_v16  ;;  %v12873_v47 = vadd.f32 %v9071_v5, %v17640_v26 }
0x2869   :  { %v9786_v39 = vmul.f32 -1.442695, %v12856_v35 }
0x286a   :  { %v9787_v10 = vmul.f32 -1.442695, %v12857_v57  ;;  %v9788_v48 = vmul.f32 -1.442695, %v12873_v47 }
0x286b   :  { %13661 = vpow2.f32 %v9786_v39 }
0x286c   :  { %13663 = vpow2.f32 %v9787_v10 }
0x286d   :  { %13665 = vpow2.f32 %v9788_v48 }
0x286e   :  { %13667 = vtanh.f32 %v12872_v33 }
0x2875   :  { %v13662_v18 = vpop.eup %13661 }
0x2876   :  { %v13664_v28 = vpop.eup %13663  ;;  %v9081_v4 = vadd.f32 1.0, %v13662_v18 }
0x2877   :  { %v9087_v59 = vadd.f32 1.0, %v13664_v28  ;;  %v13666_v60 = vpop.eup %13665 }
0x2878   :  { %13669 = vrcp.f32 %v9081_v4  ;;  %v13668_v52 = vpop.eup %13667  ;;  %v9094_v32 = vadd.f32 1.0, %v13666_v60 }
0x2879   :  { %13671 = vrcp.f32 %v9087_v59 }
0x287a   :  { %13673 = vrcp.f32 %v9094_v32 }
0x2882   :  { %v13670_v16 = vpop.eup %13669 }
0x2883   :  { %v13672_v19 = vpop.eup %13671  ;;  %v9098_v2 = vmul.f32 %v13670_v16, %v13668_v52 }
0x2884   :  { %v9097_v44 = vmul.f32 %v13672_v19, %v17897_v9  ;;  %v13674_v49 = vpop.eup %13673 }
0x2886   :  { %v9099_v26 = vadd.f32 %v9098_v2, %v9097_v44 }
0x2888   :  { %13675 = vtanh.f32 %v9099_v26 }
0x2892   :  { %v13676_v24 = vpop.eup %13675 }
0x2893   :  { %v9101_v25 = vmul.f32 %v13676_v24, %v13674_v49 }
0x2895   :  { %9840 = vmatmul.mubr.f32.vlgmr.msra.gmra.mrb[80].mxu0 %v9101_v25 }
0x2968   :  { %v9191_v17 = vpop.f32.mrb[80].mxu0 }
0x2969   :  { %v9192_v41 = vadd.f32 %v9789_v51, %v9191_v17  ;;  %v9841_v12 = vpop.f32.mrb[81].mxu0 }
0x296b   :  { %9196 = vst.msk [vmem:[%s17967_s7] sm:$0xff] %vm9195_vm2, %v9192_v41 }

</bundles_post_ra>
